<compile_context>
chip_gen: v6e
topology: v6e:2x2x1
jax: 0.10.0
libtpu: 0.0.40
codegen_flags: <defaults>
</compile_context>

<pallas_src>
import jax
import jax.numpy as jnp
from jax import lax
from jax.experimental import pallas as pl
from jax.experimental.pallas import tpu as pltpu

EPS = 1e-5
HI = lax.Precision.HIGHEST   # used only by the pure-JAX reference


def _rup(x, m):
    return ((x + m - 1) // m) * m


def _cparams():
    # Grid is over the batch -> independent steps; sharded across TensorCores.
    return pltpu.CompilerParams(dimension_semantics=("parallel",))


# ---------------------------------------------------------------------------
# Pass 1: conv1 (+ fused shortcut conv) + BN partial stats
# ---------------------------------------------------------------------------
def _make_conv1_kernel(stride, Ho, Wo, Cin, with_sc):
    M = Ho * Wo
    s = stride

    def kernel(*refs):
        if with_sc:
            (xph_ref, w1_ref, wsc_ref, h1_ref, sm1_ref, sq1_ref,
             hsc_ref, smsc_ref, sqsc_ref, slab_ref) = refs
        else:
            xph_ref, w1_ref, h1_ref, sm1_ref, sq1_ref, slab_ref = refs
        P = w1_ref.shape[1]

        # Build the (M, 9*Cin) im2col slab in VMEM from the phase-split image.
        center = None
        for dy in range(3):
            for dx in range(3):
                k = dy * 3 + dx
                ph = (dy % s) * s + (dx % s)
                r0, c0 = dy // s, dx // s
                tap = xph_ref[ph, r0:r0 + Ho, c0:c0 + Wo, :].reshape(M, Cin)
                slab_ref[:, k * Cin:(k + 1) * Cin] = tap
                if k == 4:                       # center tap == stride-s 1x1 input
                    center = tap

        acc = jnp.dot(slab_ref[...], w1_ref[...],
                      preferred_element_type=jnp.float32)          # (M, P) f32
        h1_ref[...] = acc.reshape(1, Ho, Wo, P).astype(h1_ref.dtype)
        sm1_ref[...] = jnp.sum(acc, axis=0).reshape(1, 1, P)
        sq1_ref[...] = jnp.sum(acc * acc, axis=0).reshape(1, 1, P)

        if with_sc:
            acs = jnp.dot(center, wsc_ref[...],
                          preferred_element_type=jnp.float32)      # (M, P)
            hsc_ref[...] = acs.reshape(1, Ho, Wo, P).astype(hsc_ref.dtype)
            smsc_ref[...] = jnp.sum(acs, axis=0).reshape(1, 1, P)
            sqsc_ref[...] = jnp.sum(acs * acs, axis=0).reshape(1, 1, P)

    return kernel


def _conv1_bn_stats(xph, w1, wsc, stride, Ho, Wo, N):
    ss, Hh, Wh, Cin = xph.shape[0] // N, xph.shape[1], xph.shape[2], xph.shape[3]
    P = w1.shape[1]
    M = Ho * Wo
    with_sc = wsc is not None
    kern = _make_conv1_kernel(stride, Ho, Wo, Cin, with_sc)

    x_spec = pl.BlockSpec((ss, Hh, Wh, Cin), lambda n: (n, 0, 0, 0))
    h_spec = pl.BlockSpec((1, Ho, Wo, P), lambda n: (n, 0, 0, 0))
    st_spec = pl.BlockSpec((1, 1, P), lambda n: (n, 0, 0))
    h_shape = jax.ShapeDtypeStruct((N, Ho, Wo, P), jnp.bfloat16)
    st_shape = jax.ShapeDtypeStruct((N, 1, P), jnp.float32)

    in_specs = [x_spec, pl.BlockSpec((9 * Cin, P), lambda n: (0, 0))]
    out_specs = [h_spec, st_spec, st_spec]
    out_shape = [h_shape, st_shape, st_shape]
    args = [xph, w1]
    if with_sc:
        in_specs.append(pl.BlockSpec((Cin, P), lambda n: (0, 0)))
        out_specs += [h_spec, st_spec, st_spec]
        out_shape += [h_shape, st_shape, st_shape]
        args.append(wsc)

    return pl.pallas_call(
        kern,
        out_shape=tuple(out_shape),
        grid_spec=pltpu.PrefetchScalarGridSpec(
            num_scalar_prefetch=0, grid=(N,),
            in_specs=in_specs, out_specs=out_specs,
            scratch_shapes=[pltpu.VMEM((M, 9 * Cin), jnp.bfloat16)]),
        compiler_params=_cparams(),
    )(*args)


# ---------------------------------------------------------------------------
# Pass 2: BN1-apply + ReLU fused into conv2, + BN2 partial stats
# ---------------------------------------------------------------------------
def _make_conv2_kernel(Ho, Wo):
    M = Ho * Wo

    def kernel(h1_ref, s1_ref, t1_ref, w2_ref, h2_ref, sm_ref, sq_ref,
               ypad_ref, slab_ref):
        P = w2_ref.shape[1]
        # BN1 apply + ReLU in VMEM (no standalone epilogue pass).
        y1 = jnp.maximum(h1_ref[0].astype(jnp.float32) * s1_ref[0] + t1_ref[0], 0.0)
        # Zero-padded conv2 input lives only in VMEM scratch.
        ypad_ref[...] = jnp.zeros_like(ypad_ref)
        ypad_ref[1:Ho + 1, 1:Wo + 1, :] = y1.astype(ypad_ref.dtype)
        for dy in range(3):
            for dx in range(3):
                k = dy * 3 + dx
                slab_ref[:, k * P:(k + 1) * P] = (
                    ypad_ref[dy:dy + Ho, dx:dx + Wo, :].reshape(M, P))
        acc = jnp.dot(slab_ref[...], w2_ref[...],
                      preferred_element_type=jnp.float32)          # (M, P)
        h2_ref[...] = acc.reshape(1, Ho, Wo, P).astype(h2_ref.dtype)
        sm_ref[...] = jnp.sum(acc, axis=0).reshape(1, 1, P)
        sq_ref[...] = jnp.sum(acc * acc, axis=0).reshape(1, 1, P)

    return kernel


def _bn_relu_conv2_stats(h1, s1, t1, w2, Ho, Wo):
    N, P = h1.shape[0], w2.shape[1]
    M = Ho * Wo
    h_spec = pl.BlockSpec((1, Ho, Wo, P), lambda n: (n, 0, 0, 0))
    v_spec = pl.BlockSpec((1, P), lambda n: (0, 0))
    st_spec = pl.BlockSpec((1, 1, P), lambda n: (n, 0, 0))
    return pl.pallas_call(
        _make_conv2_kernel(Ho, Wo),
        out_shape=(jax.ShapeDtypeStruct((N, Ho, Wo, P), jnp.bfloat16),
                   jax.ShapeDtypeStruct((N, 1, P), jnp.float32),
                   jax.ShapeDtypeStruct((N, 1, P), jnp.float32)),
        grid_spec=pltpu.PrefetchScalarGridSpec(
            num_scalar_prefetch=0, grid=(N,),
            in_specs=[h_spec, v_spec, v_spec,
                      pl.BlockSpec((9 * P, P), lambda n: (0, 0))],
            out_specs=[h_spec, st_spec, st_spec],
            scratch_shapes=[pltpu.VMEM((Ho + 2, Wo + 2, P), jnp.bfloat16),
                            pltpu.VMEM((M, 9 * P), jnp.bfloat16)]),
        compiler_params=_cparams(),
    )(h1, s1, t1, w2)


# ---------------------------------------------------------------------------
# Pass 3: BN2-apply + shortcut + ReLU epilogue
# ---------------------------------------------------------------------------
def _bn_add_relu_kernel(h2_ref, s_ref, t_ref, x_ref, o_ref):
    y = (h2_ref[...].astype(jnp.float32) * s_ref[0] + t_ref[0]
         + x_ref[...].astype(jnp.float32))
    o_ref[...] = jnp.maximum(y, 0.0).astype(o_ref.dtype)


def _bn_add_bn_relu_kernel(h2_ref, s2_ref, t2_ref, hsc_ref, ssc_ref, tsc_ref, o_ref):
    y = h2_ref[...].astype(jnp.float32) * s2_ref[0] + t2_ref[0]
    y = y + hsc_ref[...].astype(jnp.float32) * ssc_ref[0] + tsc_ref[0]
    o_ref[...] = jnp.maximum(y, 0.0).astype(o_ref.dtype)


def _bn_add_relu(h2, s2, t2, xres):
    N, Ho, Wo, P = h2.shape
    h_spec = pl.BlockSpec((1, Ho, Wo, P), lambda n: (n, 0, 0, 0))
    v_spec = pl.BlockSpec((1, P), lambda n: (0, 0))
    return pl.pallas_call(
        _bn_add_relu_kernel,
        out_shape=jax.ShapeDtypeStruct((N, Ho, Wo, P), jnp.bfloat16),
        grid_spec=pltpu.PrefetchScalarGridSpec(
            num_scalar_prefetch=0, grid=(N,),
            in_specs=[h_spec, v_spec, v_spec, h_spec], out_specs=h_spec),
        compiler_params=_cparams(),
    )(h2, s2, t2, xres)


def _bn_add_bn_relu(h2, s2, t2, hsc, ssc, tsc):
    N, Ho, Wo, P = h2.shape
    h_spec = pl.BlockSpec((1, Ho, Wo, P), lambda n: (n, 0, 0, 0))
    v_spec = pl.BlockSpec((1, P), lambda n: (0, 0))
    return pl.pallas_call(
        _bn_add_bn_relu_kernel,
        out_shape=jax.ShapeDtypeStruct((N, Ho, Wo, P), jnp.bfloat16),
        grid_spec=pltpu.PrefetchScalarGridSpec(
            num_scalar_prefetch=0, grid=(N,),
            in_specs=[h_spec, v_spec, v_spec, h_spec, v_spec, v_spec],
            out_specs=h_spec),
        compiler_params=_cparams(),
    )(h2, s2, t2, hsc, ssc, tsc)


# ---------------------------------------------------------------------------
# Plain-JAX glue
# ---------------------------------------------------------------------------
def _bn_fold(sm, sq, gamma, beta, count):
    # Global batch stats from per-image partials, folded into y = h*s + t.
    # NOTE: var = E[h^2] - mean^2 in f32; fine here (|mean| ~ std).  Use a
    # shifted/Welford form if reused where |mean| >> std.
    tot = jnp.sum(sm, axis=(0, 1))
    tsq = jnp.sum(sq, axis=(0, 1))
    mean = tot / count
    var = jnp.maximum(tsq / count - mean * mean, 0.0)
    s = gamma.reshape(-1) * lax.rsqrt(var + EPS)
    t = beta.reshape(-1) - mean * s
    return s.reshape(1, -1), t.reshape(1, -1)


def init_params(key, in_planes, planes, stride):
    ks = jax.random.split(key, 9)
    p = {
        "w1": jax.random.normal(ks[0], (3, 3, in_planes, planes), jnp.float32) * 0.1,
        "g1": 1.0 + 0.1 * jax.random.normal(ks[1], (1, planes), jnp.float32),
        "b1": 0.1 * jax.random.normal(ks[2], (1, planes), jnp.float32),
        "w2": jax.random.normal(ks[3], (3, 3, planes, planes), jnp.float32) * 0.1,
        "g2": 1.0 + 0.1 * jax.random.normal(ks[4], (1, planes), jnp.float32),
        "b2": 0.1 * jax.random.normal(ks[5], (1, planes), jnp.float32),
    }
    if stride != 1 or in_planes != planes:
        p["wsc"] = jax.random.normal(ks[6], (1, 1, in_planes, planes), jnp.float32) * 0.1
        p["gsc"] = 1.0 + 0.1 * jax.random.normal(ks[7], (1, planes), jnp.float32)
        p["bsc"] = 0.1 * jax.random.normal(ks[8], (1, planes), jnp.float32)
    return p


def basic_block(x_nchw, params, stride):
    """Pallas BasicBlock forward. Input NCHW (PyTorch convention); output NCHW bf16."""
    # Cast to bf16 BEFORE any padding / layout prep (review item).
    x = jnp.transpose(x_nchw, (0, 2, 3, 1)).astype(jnp.bfloat16)   # NHWC
    N, H, W, Cin = x.shape
    planes = params["w1"].shape[-1]
    s = stride
    Ho = (H - 1) // s + 1
    Wo = (W - 1) // s + 1

    # 1-pixel spatial zero-pad + stride-phase split so every in-kernel tap read
    # is a contiguous slice (no 9x HBM im2col slab).
    Hp, Wp = _rup(H + 2, s), _rup(W + 2, s)
    xp = jnp.pad(x, ((0, 0), (1, Hp - H - 1), (1, Wp - W - 1), (0, 0)))
    xph = jnp.stack([xp[:, pr::s, pc::s, :]
                     for pr in range(s) for pc in range(s)], axis=1)
    xph = xph.reshape(N * s * s, Hp // s, Wp // s, Cin)

    w1 = params["w1"].reshape(9 * Cin, planes).astype(jnp.bfloat16)
    w2 = params["w2"].reshape(9 * planes, planes).astype(jnp.bfloat16)
    wsc = params.get("wsc")
    if wsc is not None:
        wsc = wsc.reshape(Cin, planes).astype(jnp.bfloat16)

    count = N * Ho * Wo

    # Pass 1: conv1 (+ fused projection-shortcut conv) + BN partial stats.
    if wsc is not None:
        h1, sm1, sq1, hsc, smsc, sqsc = _conv1_bn_stats(xph, w1, wsc, s, Ho, Wo, N)
    else:
        h1, sm1, sq1 = _conv1_bn_stats(xph, w1, None, s, Ho, Wo, N)
    s1, t1 = _bn_fold(sm1, sq1, params["g1"], params["b1"], count)

    # Pass 2: BN1-apply + ReLU fused into conv2, + BN2 partial stats.
    h2, sm2, sq2 = _bn_relu_conv2_stats(h1, s1, t1, w2, Ho, Wo)
    s2, t2 = _bn_fold(sm2, sq2, params["g2"], params["b2"], count)

    # Pass 3: BN2-apply + shortcut + ReLU epilogue (bf16 output).
    if wsc is not None:
        ssc, tsc = _bn_fold(smsc, sqsc, params["gsc"], params["bsc"], count)
        out = _bn_add_bn_relu(h2, s2, t2, hsc, ssc, tsc)
    else:
        out = _bn_add_relu(h2, s2, t2, x)   # identity residual, bf16, unpadded

    return jnp.transpose(out, (0, 3, 1, 2))  # NHWC -> NCHW


# ---------------------------------------------------------------------------
# Pure-JAX reference (correctness check only)
# ---------------------------------------------------------------------------
def reference(x_nchw, params, stride):
    x = jnp.transpose(x_nchw, (0, 2, 3, 1)).astype(jnp.float32)
    dn = ("NHWC", "HWIO", "NHWC")

    def bn(h, g, b):
        mean = jnp.mean(h, axis=(0, 1, 2), keepdims=True)
        var = jnp.mean(jnp.square(h - mean), axis=(0, 1, 2), keepdims=True)
        return (h - mean) * lax.rsqrt(var + EPS) * g.reshape(1, 1, 1, -1) + b.reshape(1, 1, 1, -1)

    out = lax.conv_general_dilated(x, params["w1"], (stride, stride), ((1, 1), (1, 1)),
                                   dimension_numbers=dn, precision=HI)
    out = jax.nn.relu(bn(out, params["g1"], params["b1"]))
    out = lax.conv_general_dilated(out, params["w2"], (1, 1), ((1, 1), (1, 1)),
                                   dimension_numbers=dn, precision=HI)
    out = bn(out, params["g2"], params["b2"])
    if "wsc" in params:
        sc = lax.conv_general_dilated(x, params["wsc"], (stride, stride), ((0, 0), (0, 0)),
                                      dimension_numbers=dn, precision=HI)
        sc = bn(sc, params["gsc"], params["bsc"])
    else:
        sc = x
    out = jax.nn.relu(out + sc)
    return jnp.transpose(out, (0, 3, 1, 2))


if __name__ == "__main__":
    key = jax.random.PRNGKey(0)
    kx, kp1, kp2 = jax.random.split(key, 3)

    # Input in PyTorch NCHW convention: (batch=2, channels=4, H=16, W=16).
    x = jax.random.normal(kx, (2, 4, 16, 16), jnp.float32)

    bb = jax.jit(basic_block, static_argnums=2)

    # Case 1: identity shortcut (stride=1, in_planes == planes).
    p1 = init_params(kp1, in_planes=4, planes=4, stride=1)
    y1 = jax.block_until_ready(bb(x, p1, 1))
    r1 = reference(x, p1, stride=1)
    assert y1.shape == (2, 4, 16, 16)
    err1 = float(jnp.max(jnp.abs(y1.astype(jnp.float32) - r1)))
    assert jnp.allclose(y1.astype(jnp.float32), r1, atol=3e-2, rtol=3e-2), err1

    # Case 2: projection shortcut (stride=2, in_planes=4 -> planes=8).
    p2 = init_params(kp2, in_planes=4, planes=8, stride=2)
    y2 = jax.block_until_ready(bb(x, p2, 2))
    r2 = reference(x, p2, stride=2)
    assert y2.shape == (2, 8, 8, 8)
    err2 = float(jnp.max(jnp.abs(y2.astype(jnp.float32) - r2)))
    assert jnp.allclose(y2.astype(jnp.float32), r2, atol=3e-2, rtol=3e-2), err2

    print("KERNEL_OK")
</pallas_src>

<mosaic_0001>
module attributes {stable_mosaic.version = 11 : i64} {
  func.func @kernel(%arg0: i32, %arg1: memref<1x18x18x4xbf16, #tpu.memory_space<vmem>>, %arg2: memref<36x4xbf16, #tpu.memory_space<vmem>>, %arg3: memref<1x16x16x4xbf16, #tpu.memory_space<vmem>>, %arg4: memref<1x1x4xf32, #tpu.memory_space<vmem>>, %arg5: memref<1x1x4xf32, #tpu.memory_space<vmem>>, %arg6: memref<256x36xbf16, #tpu.memory_space<vmem>>) attributes {dimension_semantics = [#tpu.dimension_semantics<parallel>], iteration_bounds = array<i64: 2>, scalar_prefetch = 0 : i64, scratch_operands = 1 : i64, tpu.core_type = #tpu.core_type<tc>, window_params = [{transform_indices = @transform_0, window_bounds = array<i64: 1, 18, 18, 4>}, {pipeline_mode = #tpu.pipeline_mode<synchronous>, transform_indices = @transform_1, window_bounds = array<i64: 36, 4>}, {transform_indices = @transform_2, window_bounds = array<i64: 1, 16, 16, 4>}, {transform_indices = @transform_3, window_bounds = array<i64: 1, 1, 4>}, {transform_indices = @transform_4, window_bounds = array<i64: 1, 1, 4>}]} {
    %c0 = arith.constant 0 : index
    %c0_0 = arith.constant 0 : index
    %c0_1 = arith.constant 0 : index
    %c0_2 = arith.constant 0 : index
    %0 = vector.load %arg1[%c0, %c0_0, %c0_1, %c0_2] : memref<1x18x18x4xbf16, #tpu.memory_space<vmem>>, vector<1x16x16x4xbf16>
    %1 = vector.shape_cast %0 : vector<1x16x16x4xbf16> to vector<16x16x4xbf16>
    %2 = vector.shape_cast %1 : vector<16x16x4xbf16> to vector<256x4xbf16>
    %c0_3 = arith.constant 0 : index
    %c0_4 = arith.constant 0 : index
    %3 = vector.load %arg6[%c0_3, %c0_4] : memref<256x36xbf16, #tpu.memory_space<vmem>>, vector<256x4xbf16>
    tpu.vector_store %arg6[%c0_3, %c0_4], %2 {strides = array<i32>} : memref<256x36xbf16, #tpu.memory_space<vmem>>, vector<256x4xbf16>,
    %c0_5 = arith.constant 0 : index
    %c0_6 = arith.constant 0 : index
    %c1 = arith.constant 1 : index
    %c0_7 = arith.constant 0 : index
    %4 = vector.load %arg1[%c0_5, %c0_6, %c1, %c0_7] : memref<1x18x18x4xbf16, #tpu.memory_space<vmem>>, vector<1x16x16x4xbf16>
    %5 = vector.shape_cast %4 : vector<1x16x16x4xbf16> to vector<16x16x4xbf16>
    %6 = vector.shape_cast %5 : vector<16x16x4xbf16> to vector<256x4xbf16>
    %c0_8 = arith.constant 0 : index
    %c4 = arith.constant 4 : index
    %7 = vector.load %arg6[%c0_8, %c4] : memref<256x36xbf16, #tpu.memory_space<vmem>>, vector<256x4xbf16>
    tpu.vector_store %arg6[%c0_8, %c4], %6 {strides = array<i32>} : memref<256x36xbf16, #tpu.memory_space<vmem>>, vector<256x4xbf16>,
    %c0_9 = arith.constant 0 : index
    %c0_10 = arith.constant 0 : index
    %c2 = arith.constant 2 : index
    %c0_11 = arith.constant 0 : index
    %8 = vector.load %arg1[%c0_9, %c0_10, %c2, %c0_11] : memref<1x18x18x4xbf16, #tpu.memory_space<vmem>>, vector<1x16x16x4xbf16>
    %9 = vector.shape_cast %8 : vector<1x16x16x4xbf16> to vector<16x16x4xbf16>
    %10 = vector.shape_cast %9 : vector<16x16x4xbf16> to vector<256x4xbf16>
    %c0_12 = arith.constant 0 : index
    %c8 = arith.constant 8 : index
    %11 = vector.load %arg6[%c0_12, %c8] : memref<256x36xbf16, #tpu.memory_space<vmem>>, vector<256x4xbf16>
    tpu.vector_store %arg6[%c0_12, %c8], %10 {strides = array<i32>} : memref<256x36xbf16, #tpu.memory_space<vmem>>, vector<256x4xbf16>,
    %c0_13 = arith.constant 0 : index
    %c1_14 = arith.constant 1 : index
    %c0_15 = arith.constant 0 : index
    %c0_16 = arith.constant 0 : index
    %12 = vector.load %arg1[%c0_13, %c1_14, %c0_15, %c0_16] : memref<1x18x18x4xbf16, #tpu.memory_space<vmem>>, vector<1x16x16x4xbf16>
    %13 = vector.shape_cast %12 : vector<1x16x16x4xbf16> to vector<16x16x4xbf16>
    %14 = vector.shape_cast %13 : vector<16x16x4xbf16> to vector<256x4xbf16>
    %c0_17 = arith.constant 0 : index
    %c12 = arith.constant 12 : index
    %15 = vector.load %arg6[%c0_17, %c12] : memref<256x36xbf16, #tpu.memory_space<vmem>>, vector<256x4xbf16>
    tpu.vector_store %arg6[%c0_17, %c12], %14 {strides = array<i32>} : memref<256x36xbf16, #tpu.memory_space<vmem>>, vector<256x4xbf16>,
    %c0_18 = arith.constant 0 : index
    %c1_19 = arith.constant 1 : index
    %c1_20 = arith.constant 1 : index
    %c0_21 = arith.constant 0 : index
    %16 = vector.load %arg1[%c0_18, %c1_19, %c1_20, %c0_21] : memref<1x18x18x4xbf16, #tpu.memory_space<vmem>>, vector<1x16x16x4xbf16>
    %17 = vector.shape_cast %16 : vector<1x16x16x4xbf16> to vector<16x16x4xbf16>
    %18 = vector.shape_cast %17 : vector<16x16x4xbf16> to vector<256x4xbf16>
    %c0_22 = arith.constant 0 : index
    %c16 = arith.constant 16 : index
    %19 = vector.load %arg6[%c0_22, %c16] : memref<256x36xbf16, #tpu.memory_space<vmem>>, vector<256x4xbf16>
    tpu.vector_store %arg6[%c0_22, %c16], %18 {strides = array<i32>} : memref<256x36xbf16, #tpu.memory_space<vmem>>, vector<256x4xbf16>,
    %c0_23 = arith.constant 0 : index
    %c1_24 = arith.constant 1 : index
    %c2_25 = arith.constant 2 : index
    %c0_26 = arith.constant 0 : index
    %20 = vector.load %arg1[%c0_23, %c1_24, %c2_25, %c0_26] : memref<1x18x18x4xbf16, #tpu.memory_space<vmem>>, vector<1x16x16x4xbf16>
    %21 = vector.shape_cast %20 : vector<1x16x16x4xbf16> to vector<16x16x4xbf16>
    %22 = vector.shape_cast %21 : vector<16x16x4xbf16> to vector<256x4xbf16>
    %c0_27 = arith.constant 0 : index
    %c20 = arith.constant 20 : index
    %23 = vector.load %arg6[%c0_27, %c20] : memref<256x36xbf16, #tpu.memory_space<vmem>>, vector<256x4xbf16>
    tpu.vector_store %arg6[%c0_27, %c20], %22 {strides = array<i32>} : memref<256x36xbf16, #tpu.memory_space<vmem>>, vector<256x4xbf16>,
    %c0_28 = arith.constant 0 : index
    %c2_29 = arith.constant 2 : index
    %c0_30 = arith.constant 0 : index
    %c0_31 = arith.constant 0 : index
    %24 = vector.load %arg1[%c0_28, %c2_29, %c0_30, %c0_31] : memref<1x18x18x4xbf16, #tpu.memory_space<vmem>>, vector<1x16x16x4xbf16>
    %25 = vector.shape_cast %24 : vector<1x16x16x4xbf16> to vector<16x16x4xbf16>
    %26 = vector.shape_cast %25 : vector<16x16x4xbf16> to vector<256x4xbf16>
    %c0_32 = arith.constant 0 : index
    %c24 = arith.constant 24 : index
    %27 = vector.load %arg6[%c0_32, %c24] : memref<256x36xbf16, #tpu.memory_space<vmem>>, vector<256x4xbf16>
    tpu.vector_store %arg6[%c0_32, %c24], %26 {strides = array<i32>} : memref<256x36xbf16, #tpu.memory_space<vmem>>, vector<256x4xbf16>,
    %c0_33 = arith.constant 0 : index
    %c2_34 = arith.constant 2 : index
    %c1_35 = arith.constant 1 : index
    %c0_36 = arith.constant 0 : index
    %28 = vector.load %arg1[%c0_33, %c2_34, %c1_35, %c0_36] : memref<1x18x18x4xbf16, #tpu.memory_space<vmem>>, vector<1x16x16x4xbf16>
    %29 = vector.shape_cast %28 : vector<1x16x16x4xbf16> to vector<16x16x4xbf16>
    %30 = vector.shape_cast %29 : vector<16x16x4xbf16> to vector<256x4xbf16>
    %c0_37 = arith.constant 0 : index
    %c28 = arith.constant 28 : index
    %31 = vector.load %arg6[%c0_37, %c28] : memref<256x36xbf16, #tpu.memory_space<vmem>>, vector<256x4xbf16>
    tpu.vector_store %arg6[%c0_37, %c28], %30 {strides = array<i32>} : memref<256x36xbf16, #tpu.memory_space<vmem>>, vector<256x4xbf16>,
    %c0_38 = arith.constant 0 : index
    %c2_39 = arith.constant 2 : index
    %c2_40 = arith.constant 2 : index
    %c0_41 = arith.constant 0 : index
    %32 = vector.load %arg1[%c0_38, %c2_39, %c2_40, %c0_41] : memref<1x18x18x4xbf16, #tpu.memory_space<vmem>>, vector<1x16x16x4xbf16>
    %33 = vector.shape_cast %32 : vector<1x16x16x4xbf16> to vector<16x16x4xbf16>
    %34 = vector.shape_cast %33 : vector<16x16x4xbf16> to vector<256x4xbf16>
    %c0_42 = arith.constant 0 : index
    %c32 = arith.constant 32 : index
    %35 = vector.load %arg6[%c0_42, %c32] : memref<256x36xbf16, #tpu.memory_space<vmem>>, vector<256x4xbf16>
    tpu.vector_store %arg6[%c0_42, %c32], %34 {strides = array<i32>} : memref<256x36xbf16, #tpu.memory_space<vmem>>, vector<256x4xbf16>,
    %c0_43 = arith.constant 0 : index
    %c0_44 = arith.constant 0 : index
    %36 = vector.load %arg6[%c0_43, %c0_44] : memref<256x36xbf16, #tpu.memory_space<vmem>>, vector<256x36xbf16>
    %c0_45 = arith.constant 0 : index
    %c0_46 = arith.constant 0 : index
    %37 = vector.load %arg2[%c0_45, %c0_46] : memref<36x4xbf16, #tpu.memory_space<vmem>>, vector<36x4xbf16>
    %cst = arith.constant dense<0.000000e+00> : vector<256x4xf32>
    %38 = tpu.matmul %36, %37, %cst {dimension_numbers = #tpu.dot_dimension_numbers<[1], [0], [0], [1], [0, 0, 1, 1], [], []>} : vector<256x36xbf16>, vector<36x4xbf16>, vector<256x4xf32> -> vector<256x4xf32>
    %39 = vector.shape_cast %38 : vector<256x4xf32> to vector<1x16x16x4xf32>
    %40 = arith.truncf %39 : vector<1x16x16x4xf32> to vector<1x16x16x4xbf16>
    %c0_47 = arith.constant 0 : index
    %c0_48 = arith.constant 0 : index
    %c0_49 = arith.constant 0 : index
    %c0_50 = arith.constant 0 : index
    %41 = vector.load %arg3[%c0_47, %c0_48, %c0_49, %c0_50] : memref<1x16x16x4xbf16, #tpu.memory_space<vmem>>, vector<1x16x16x4xbf16>
    tpu.vector_store %arg3[%c0_47, %c0_48, %c0_49, %c0_50], %40 {strides = array<i32>} : memref<1x16x16x4xbf16, #tpu.memory_space<vmem>>, vector<1x16x16x4xbf16>,
    %cst_51 = arith.constant dense<0.000000e+00> : vector<4xf32>
    %42 = vector.multi_reduction <add>, %38, %cst_51 [0] : vector<256x4xf32> to vector<4xf32>
    %43 = vector.shape_cast %42 : vector<4xf32> to vector<1x1x4xf32>
    %c0_52 = arith.constant 0 : index
    %c0_53 = arith.constant 0 : index
    %c0_54 = arith.constant 0 : index
    %44 = vector.load %arg4[%c0_52, %c0_53, %c0_54] : memref<1x1x4xf32, #tpu.memory_space<vmem>>, vector<1x1x4xf32>
    tpu.vector_store %arg4[%c0_52, %c0_53, %c0_54], %43 {strides = array<i32>} : memref<1x1x4xf32, #tpu.memory_space<vmem>>, vector<1x1x4xf32>,
    %45 = arith.mulf %38, %38 : vector<256x4xf32>
    %cst_55 = arith.constant dense<0.000000e+00> : vector<4xf32>
    %46 = vector.multi_reduction <add>, %45, %cst_55 [0] : vector<256x4xf32> to vector<4xf32>
    %47 = vector.shape_cast %46 : vector<4xf32> to vector<1x1x4xf32>
    %c0_56 = arith.constant 0 : index
    %c0_57 = arith.constant 0 : index
    %c0_58 = arith.constant 0 : index
    %48 = vector.load %arg5[%c0_56, %c0_57, %c0_58] : memref<1x1x4xf32, #tpu.memory_space<vmem>>, vector<1x1x4xf32>
    tpu.vector_store %arg5[%c0_56, %c0_57, %c0_58], %47 {strides = array<i32>} : memref<1x1x4xf32, #tpu.memory_space<vmem>>, vector<1x1x4xf32>,
    return
  }
  func.func @transform_0(%arg0: i32) -> (i32, i32, i32, i32) {
    %c0_i32 = arith.constant 0 : i32
    %c0_i32_0 = arith.constant 0 : i32
    %c0_i32_1 = arith.constant 0 : i32
    %c0_i32_2 = arith.constant 0 : i32
    return %arg0, %c0_i32, %c0_i32_0, %c0_i32_1 : i32, i32, i32, i32
  }
  func.func @transform_1(%arg0: i32) -> (i32, i32) {
    %c0_i32 = arith.constant 0 : i32
    %c0_i32_0 = arith.constant 0 : i32
    %c0_i32_1 = arith.constant 0 : i32
    return %c0_i32, %c0_i32_0 : i32, i32
  }
  func.func @transform_2(%arg0: i32) -> (i32, i32, i32, i32) {
    %c0_i32 = arith.constant 0 : i32
    %c0_i32_0 = arith.constant 0 : i32
    %c0_i32_1 = arith.constant 0 : i32
    %c0_i32_2 = arith.constant 0 : i32
    return %arg0, %c0_i32, %c0_i32_0, %c0_i32_1 : i32, i32, i32, i32
  }
  func.func @transform_3(%arg0: i32) -> (i32, i32, i32) {
    %c0_i32 = arith.constant 0 : i32
    %c0_i32_0 = arith.constant 0 : i32
    %c0_i32_1 = arith.constant 0 : i32
    return %arg0, %c0_i32, %c0_i32_0 : i32, i32, i32
  }
  func.func @transform_4(%arg0: i32) -> (i32, i32, i32) {
    %c0_i32 = arith.constant 0 : i32
    %c0_i32_0 = arith.constant 0 : i32
    %c0_i32_1 = arith.constant 0 : i32
    return %arg0, %c0_i32, %c0_i32_0 : i32, i32, i32
  }
}

module attributes {stable_mosaic.version = 11 : i64} {
  func.func @_bn_add_relu_kernel(%arg0: i32, %arg1: memref<1x16x16x4xbf16, #tpu.memory_space<vmem>>, %arg2: memref<1x4xf32, #tpu.memory_space<vmem>>, %arg3: memref<1x4xf32, #tpu.memory_space<vmem>>, %arg4: memref<1x16x16x4xbf16, #tpu.memory_space<vmem>>, %arg5: memref<1x16x16x4xbf16, #tpu.memory_space<vmem>>) attributes {dimension_semantics = [#tpu.dimension_semantics<parallel>], iteration_bounds = array<i64: 2>, scalar_prefetch = 0 : i64, scratch_operands = 0 : i64, tpu.core_type = #tpu.core_type<tc>, window_params = [{transform_indices = @transform_0, window_bounds = array<i64: 1, 16, 16, 4>}, {pipeline_mode = #tpu.pipeline_mode<synchronous>, transform_indices = @transform_1, window_bounds = array<i64: 1, 4>}, {pipeline_mode = #tpu.pipeline_mode<synchronous>, transform_indices = @transform_2, window_bounds = array<i64: 1, 4>}, {transform_indices = @transform_3, window_bounds = array<i64: 1, 16, 16, 4>}, {transform_indices = @transform_4, window_bounds = array<i64: 1, 16, 16, 4>}]} {
    %c0 = arith.constant 0 : index
    %c0_0 = arith.constant 0 : index
    %c0_1 = arith.constant 0 : index
    %c0_2 = arith.constant 0 : index
    %0 = vector.load %arg1[%c0, %c0_0, %c0_1, %c0_2] : memref<1x16x16x4xbf16, #tpu.memory_space<vmem>>, vector<1x16x16x4xbf16>
    %1 = arith.extf %0 : vector<1x16x16x4xbf16> to vector<1x16x16x4xf32>
    %c0_3 = arith.constant 0 : index
    %c0_4 = arith.constant 0 : index
    %2 = vector.load %arg2[%c0_3, %c0_4] : memref<1x4xf32, #tpu.memory_space<vmem>>, vector<1x4xf32>
    %3 = vector.shape_cast %2 : vector<1x4xf32> to vector<4xf32>
    %4 = vector.shape_cast %3 : vector<4xf32> to vector<1x1x1x4xf32>
    %5 = vector.broadcast %4 : vector<1x1x1x4xf32> to vector<1x16x16x4xf32>
    %6 = arith.mulf %1, %5 : vector<1x16x16x4xf32>
    %c0_5 = arith.constant 0 : index
    %c0_6 = arith.constant 0 : index
    %7 = vector.load %arg3[%c0_5, %c0_6] : memref<1x4xf32, #tpu.memory_space<vmem>>, vector<1x4xf32>
    %8 = vector.shape_cast %7 : vector<1x4xf32> to vector<4xf32>
    %9 = vector.shape_cast %8 : vector<4xf32> to vector<1x1x1x4xf32>
    %10 = vector.broadcast %9 : vector<1x1x1x4xf32> to vector<1x16x16x4xf32>
    %11 = arith.addf %6, %10 : vector<1x16x16x4xf32>
    %c0_7 = arith.constant 0 : index
    %c0_8 = arith.constant 0 : index
    %c0_9 = arith.constant 0 : index
    %c0_10 = arith.constant 0 : index
    %12 = vector.load %arg4[%c0_7, %c0_8, %c0_9, %c0_10] : memref<1x16x16x4xbf16, #tpu.memory_space<vmem>>, vector<1x16x16x4xbf16>
    %13 = arith.extf %12 : vector<1x16x16x4xbf16> to vector<1x16x16x4xf32>
    %14 = arith.addf %11, %13 : vector<1x16x16x4xf32>
    %cst = arith.constant 0.000000e+00 : f32
    %15 = vector.broadcast %cst : f32 to vector<1x16x16x4xf32>
    %16 = arith.maximumf %14, %15 : vector<1x16x16x4xf32>
    %17 = arith.truncf %16 : vector<1x16x16x4xf32> to vector<1x16x16x4xbf16>
    %c0_11 = arith.constant 0 : index
    %c0_12 = arith.constant 0 : index
    %c0_13 = arith.constant 0 : index
    %c0_14 = arith.constant 0 : index
    %18 = vector.load %arg5[%c0_11, %c0_12, %c0_13, %c0_14] : memref<1x16x16x4xbf16, #tpu.memory_space<vmem>>, vector<1x16x16x4xbf16>
    tpu.vector_store %arg5[%c0_11, %c0_12, %c0_13, %c0_14], %17 {strides = array<i32>} : memref<1x16x16x4xbf16, #tpu.memory_space<vmem>>, vector<1x16x16x4xbf16>,
    return
  }
  func.func @transform_0(%arg0: i32) -> (i32, i32, i32, i32) {
    %c0_i32 = arith.constant 0 : i32
    %c0_i32_0 = arith.constant 0 : i32
    %c0_i32_1 = arith.constant 0 : i32
    %c0_i32_2 = arith.constant 0 : i32
    return %arg0, %c0_i32, %c0_i32_0, %c0_i32_1 : i32, i32, i32, i32
  }
  func.func @transform_1(%arg0: i32) -> (i32, i32) {
    %c0_i32 = arith.constant 0 : i32
    %c0_i32_0 = arith.constant 0 : i32
    %c0_i32_1 = arith.constant 0 : i32
    return %c0_i32, %c0_i32_0 : i32, i32
  }
  func.func @transform_2(%arg0: i32) -> (i32, i32) {
    %c0_i32 = arith.constant 0 : i32
    %c0_i32_0 = arith.constant 0 : i32
    %c0_i32_1 = arith.constant 0 : i32
    return %c0_i32, %c0_i32_0 : i32, i32
  }
  func.func @transform_3(%arg0: i32) -> (i32, i32, i32, i32) {
    %c0_i32 = arith.constant 0 : i32
    %c0_i32_0 = arith.constant 0 : i32
    %c0_i32_1 = arith.constant 0 : i32
    %c0_i32_2 = arith.constant 0 : i32
    return %arg0, %c0_i32, %c0_i32_0, %c0_i32_1 : i32, i32, i32, i32
  }
  func.func @transform_4(%arg0: i32) -> (i32, i32, i32, i32) {
    %c0_i32 = arith.constant 0 : i32
    %c0_i32_0 = arith.constant 0 : i32
    %c0_i32_1 = arith.constant 0 : i32
    %c0_i32_2 = arith.constant 0 : i32
    return %arg0, %c0_i32, %c0_i32_0, %c0_i32_1 : i32, i32, i32, i32
  }
}

module attributes {stable_mosaic.version = 11 : i64} {
  func.func @kernel(%arg0: i32, %arg1: memref<1x16x16x4xbf16, #tpu.memory_space<vmem>>, %arg2: memref<1x4xf32, #tpu.memory_space<vmem>>, %arg3: memref<1x4xf32, #tpu.memory_space<vmem>>, %arg4: memref<36x4xbf16, #tpu.memory_space<vmem>>, %arg5: memref<1x16x16x4xbf16, #tpu.memory_space<vmem>>, %arg6: memref<1x1x4xf32, #tpu.memory_space<vmem>>, %arg7: memref<1x1x4xf32, #tpu.memory_space<vmem>>, %arg8: memref<18x18x4xbf16, #tpu.memory_space<vmem>>, %arg9: memref<256x36xbf16, #tpu.memory_space<vmem>>) attributes {dimension_semantics = [#tpu.dimension_semantics<parallel>], iteration_bounds = array<i64: 2>, scalar_prefetch = 0 : i64, scratch_operands = 2 : i64, tpu.core_type = #tpu.core_type<tc>, window_params = [{transform_indices = @transform_0, window_bounds = array<i64: 1, 16, 16, 4>}, {pipeline_mode = #tpu.pipeline_mode<synchronous>, transform_indices = @transform_1, window_bounds = array<i64: 1, 4>}, {pipeline_mode = #tpu.pipeline_mode<synchronous>, transform_indices = @transform_2, window_bounds = array<i64: 1, 4>}, {pipeline_mode = #tpu.pipeline_mode<synchronous>, transform_indices = @transform_3, window_bounds = array<i64: 36, 4>}, {transform_indices = @transform_4, window_bounds = array<i64: 1, 16, 16, 4>}, {transform_indices = @transform_5, window_bounds = array<i64: 1, 1, 4>}, {transform_indices = @transform_6, window_bounds = array<i64: 1, 1, 4>}]} {
    %c0 = arith.constant 0 : index
    %c0_0 = arith.constant 0 : index
    %c0_1 = arith.constant 0 : index
    %c0_2 = arith.constant 0 : index
    %0 = vector.load %arg1[%c0, %c0_0, %c0_1, %c0_2] : memref<1x16x16x4xbf16, #tpu.memory_space<vmem>>, vector<1x16x16x4xbf16>
    %1 = vector.shape_cast %0 : vector<1x16x16x4xbf16> to vector<16x16x4xbf16>
    %2 = arith.extf %1 : vector<16x16x4xbf16> to vector<16x16x4xf32>
    %c0_3 = arith.constant 0 : index
    %c0_4 = arith.constant 0 : index
    %3 = vector.load %arg2[%c0_3, %c0_4] : memref<1x4xf32, #tpu.memory_space<vmem>>, vector<1x4xf32>
    %4 = vector.shape_cast %3 : vector<1x4xf32> to vector<4xf32>
    %5 = vector.shape_cast %4 : vector<4xf32> to vector<1x1x4xf32>
    %6 = vector.broadcast %5 : vector<1x1x4xf32> to vector<16x16x4xf32>
    %7 = arith.mulf %2, %6 : vector<16x16x4xf32>
    %c0_5 = arith.constant 0 : index
    %c0_6 = arith.constant 0 : index
    %8 = vector.load %arg3[%c0_5, %c0_6] : memref<1x4xf32, #tpu.memory_space<vmem>>, vector<1x4xf32>
    %9 = vector.shape_cast %8 : vector<1x4xf32> to vector<4xf32>
    %10 = vector.shape_cast %9 : vector<4xf32> to vector<1x1x4xf32>
    %11 = vector.broadcast %10 : vector<1x1x4xf32> to vector<16x16x4xf32>
    %12 = arith.addf %7, %11 : vector<16x16x4xf32>
    %cst = arith.constant 0.000000e+00 : f32
    %13 = vector.broadcast %cst : f32 to vector<16x16x4xf32>
    %14 = arith.maximumf %12, %13 : vector<16x16x4xf32>
    %cst_7 = arith.constant 0.000000e+00 : bf16
    %15 = vector.broadcast %cst_7 : bf16 to vector<18x18x4xbf16>
    %c0_8 = arith.constant 0 : index
    %c0_9 = arith.constant 0 : index
    %c0_10 = arith.constant 0 : index
    %16 = vector.load %arg8[%c0_8, %c0_9, %c0_10] : memref<18x18x4xbf16, #tpu.memory_space<vmem>>, vector<18x18x4xbf16>
    tpu.vector_store %arg8[%c0_8, %c0_9, %c0_10], %15 {strides = array<i32>} : memref<18x18x4xbf16, #tpu.memory_space<vmem>>, vector<18x18x4xbf16>,
    %17 = arith.truncf %14 : vector<16x16x4xf32> to vector<16x16x4xbf16>
    %c1 = arith.constant 1 : index
    %c1_11 = arith.constant 1 : index
    %c0_12 = arith.constant 0 : index
    %18 = vector.load %arg8[%c1, %c1_11, %c0_12] : memref<18x18x4xbf16, #tpu.memory_space<vmem>>, vector<16x16x4xbf16>
    tpu.vector_store %arg8[%c1, %c1_11, %c0_12], %17 {strides = array<i32>} : memref<18x18x4xbf16, #tpu.memory_space<vmem>>, vector<16x16x4xbf16>,
    %c0_13 = arith.constant 0 : index
    %c0_14 = arith.constant 0 : index
    %c0_15 = arith.constant 0 : index
    %19 = vector.load %arg8[%c0_13, %c0_14, %c0_15] : memref<18x18x4xbf16, #tpu.memory_space<vmem>>, vector<16x16x4xbf16>
    %20 = vector.shape_cast %19 : vector<16x16x4xbf16> to vector<256x4xbf16>
    %c0_16 = arith.constant 0 : index
    %c0_17 = arith.constant 0 : index
    %21 = vector.load %arg9[%c0_16, %c0_17] : memref<256x36xbf16, #tpu.memory_space<vmem>>, vector<256x4xbf16>
    tpu.vector_store %arg9[%c0_16, %c0_17], %20 {strides = array<i32>} : memref<256x36xbf16, #tpu.memory_space<vmem>>, vector<256x4xbf16>,
    %c0_18 = arith.constant 0 : index
    %c1_19 = arith.constant 1 : index
    %c0_20 = arith.constant 0 : index
    %22 = vector.load %arg8[%c0_18, %c1_19, %c0_20] : memref<18x18x4xbf16, #tpu.memory_space<vmem>>, vector<16x16x4xbf16>
    %23 = vector.shape_cast %22 : vector<16x16x4xbf16> to vector<256x4xbf16>
    %c0_21 = arith.constant 0 : index
    %c4 = arith.constant 4 : index
    %24 = vector.load %arg9[%c0_21, %c4] : memref<256x36xbf16, #tpu.memory_space<vmem>>, vector<256x4xbf16>
    tpu.vector_store %arg9[%c0_21, %c4], %23 {strides = array<i32>} : memref<256x36xbf16, #tpu.memory_space<vmem>>, vector<256x4xbf16>,
    %c0_22 = arith.constant 0 : index
    %c2 = arith.constant 2 : index
    %c0_23 = arith.constant 0 : index
    %25 = vector.load %arg8[%c0_22, %c2, %c0_23] : memref<18x18x4xbf16, #tpu.memory_space<vmem>>, vector<16x16x4xbf16>
    %26 = vector.shape_cast %25 : vector<16x16x4xbf16> to vector<256x4xbf16>
    %c0_24 = arith.constant 0 : index
    %c8 = arith.constant 8 : index
    %27 = vector.load %arg9[%c0_24, %c8] : memref<256x36xbf16, #tpu.memory_space<vmem>>, vector<256x4xbf16>
    tpu.vector_store %arg9[%c0_24, %c8], %26 {strides = array<i32>} : memref<256x36xbf16, #tpu.memory_space<vmem>>, vector<256x4xbf16>,
    %c1_25 = arith.constant 1 : index
    %c0_26 = arith.constant 0 : index
    %c0_27 = arith.constant 0 : index
    %28 = vector.load %arg8[%c1_25, %c0_26, %c0_27] : memref<18x18x4xbf16, #tpu.memory_space<vmem>>, vector<16x16x4xbf16>
    %29 = vector.shape_cast %28 : vector<16x16x4xbf16> to vector<256x4xbf16>
    %c0_28 = arith.constant 0 : index
    %c12 = arith.constant 12 : index
    %30 = vector.load %arg9[%c0_28, %c12] : memref<256x36xbf16, #tpu.memory_space<vmem>>, vector<256x4xbf16>
    tpu.vector_store %arg9[%c0_28, %c12], %29 {strides = array<i32>} : memref<256x36xbf16, #tpu.memory_space<vmem>>, vector<256x4xbf16>,
    %c1_29 = arith.constant 1 : index
    %c1_30 = arith.constant 1 : index
    %c0_31 = arith.constant 0 : index
    %31 = vector.load %arg8[%c1_29, %c1_30, %c0_31] : memref<18x18x4xbf16, #tpu.memory_space<vmem>>, vector<16x16x4xbf16>
    %32 = vector.shape_cast %31 : vector<16x16x4xbf16> to vector<256x4xbf16>
    %c0_32 = arith.constant 0 : index
    %c16 = arith.constant 16 : index
    %33 = vector.load %arg9[%c0_32, %c16] : memref<256x36xbf16, #tpu.memory_space<vmem>>, vector<256x4xbf16>
    tpu.vector_store %arg9[%c0_32, %c16], %32 {strides = array<i32>} : memref<256x36xbf16, #tpu.memory_space<vmem>>, vector<256x4xbf16>,
    %c1_33 = arith.constant 1 : index
    %c2_34 = arith.constant 2 : index
    %c0_35 = arith.constant 0 : index
    %34 = vector.load %arg8[%c1_33, %c2_34, %c0_35] : memref<18x18x4xbf16, #tpu.memory_space<vmem>>, vector<16x16x4xbf16>
    %35 = vector.shape_cast %34 : vector<16x16x4xbf16> to vector<256x4xbf16>
    %c0_36 = arith.constant 0 : index
    %c20 = arith.constant 20 : index
    %36 = vector.load %arg9[%c0_36, %c20] : memref<256x36xbf16, #tpu.memory_space<vmem>>, vector<256x4xbf16>
    tpu.vector_store %arg9[%c0_36, %c20], %35 {strides = array<i32>} : memref<256x36xbf16, #tpu.memory_space<vmem>>, vector<256x4xbf16>,
    %c2_37 = arith.constant 2 : index
    %c0_38 = arith.constant 0 : index
    %c0_39 = arith.constant 0 : index
    %37 = vector.load %arg8[%c2_37, %c0_38, %c0_39] : memref<18x18x4xbf16, #tpu.memory_space<vmem>>, vector<16x16x4xbf16>
    %38 = vector.shape_cast %37 : vector<16x16x4xbf16> to vector<256x4xbf16>
    %c0_40 = arith.constant 0 : index
    %c24 = arith.constant 24 : index
    %39 = vector.load %arg9[%c0_40, %c24] : memref<256x36xbf16, #tpu.memory_space<vmem>>, vector<256x4xbf16>
    tpu.vector_store %arg9[%c0_40, %c24], %38 {strides = array<i32>} : memref<256x36xbf16, #tpu.memory_space<vmem>>, vector<256x4xbf16>,
    %c2_41 = arith.constant 2 : index
    %c1_42 = arith.constant 1 : index
    %c0_43 = arith.constant 0 : index
    %40 = vector.load %arg8[%c2_41, %c1_42, %c0_43] : memref<18x18x4xbf16, #tpu.memory_space<vmem>>, vector<16x16x4xbf16>
    %41 = vector.shape_cast %40 : vector<16x16x4xbf16> to vector<256x4xbf16>
    %c0_44 = arith.constant 0 : index
    %c28 = arith.constant 28 : index
    %42 = vector.load %arg9[%c0_44, %c28] : memref<256x36xbf16, #tpu.memory_space<vmem>>, vector<256x4xbf16>
    tpu.vector_store %arg9[%c0_44, %c28], %41 {strides = array<i32>} : memref<256x36xbf16, #tpu.memory_space<vmem>>, vector<256x4xbf16>,
    %c2_45 = arith.constant 2 : index
    %c2_46 = arith.constant 2 : index
    %c0_47 = arith.constant 0 : index
    %43 = vector.load %arg8[%c2_45, %c2_46, %c0_47] : memref<18x18x4xbf16, #tpu.memory_space<vmem>>, vector<16x16x4xbf16>
    %44 = vector.shape_cast %43 : vector<16x16x4xbf16> to vector<256x4xbf16>
    %c0_48 = arith.constant 0 : index
    %c32 = arith.constant 32 : index
    %45 = vector.load %arg9[%c0_48, %c32] : memref<256x36xbf16, #tpu.memory_space<vmem>>, vector<256x4xbf16>
    tpu.vector_store %arg9[%c0_48, %c32], %44 {strides = array<i32>} : memref<256x36xbf16, #tpu.memory_space<vmem>>, vector<256x4xbf16>,
    %c0_49 = arith.constant 0 : index
    %c0_50 = arith.constant 0 : index
    %46 = vector.load %arg9[%c0_49, %c0_50] : memref<256x36xbf16, #tpu.memory_space<vmem>>, vector<256x36xbf16>
    %c0_51 = arith.constant 0 : index
    %c0_52 = arith.constant 0 : index
    %47 = vector.load %arg4[%c0_51, %c0_52] : memref<36x4xbf16, #tpu.memory_space<vmem>>, vector<36x4xbf16>
    %cst_53 = arith.constant dense<0.000000e+00> : vector<256x4xf32>
    %48 = tpu.matmul %46, %47, %cst_53 {dimension_numbers = #tpu.dot_dimension_numbers<[1], [0], [0], [1], [0, 0, 1, 1], [], []>} : vector<256x36xbf16>, vector<36x4xbf16>, vector<256x4xf32> -> vector<256x4xf32>
    %49 = vector.shape_cast %48 : vector<256x4xf32> to vector<1x16x16x4xf32>
    %50 = arith.truncf %49 : vector<1x16x16x4xf32> to vector<1x16x16x4xbf16>
    %c0_54 = arith.constant 0 : index
    %c0_55 = arith.constant 0 : index
    %c0_56 = arith.constant 0 : index
    %c0_57 = arith.constant 0 : index
    %51 = vector.load %arg5[%c0_54, %c0_55, %c0_56, %c0_57] : memref<1x16x16x4xbf16, #tpu.memory_space<vmem>>, vector<1x16x16x4xbf16>
    tpu.vector_store %arg5[%c0_54, %c0_55, %c0_56, %c0_57], %50 {strides = array<i32>} : memref<1x16x16x4xbf16, #tpu.memory_space<vmem>>, vector<1x16x16x4xbf16>,
    %cst_58 = arith.constant dense<0.000000e+00> : vector<4xf32>
    %52 = vector.multi_reduction <add>, %48, %cst_58 [0] : vector<256x4xf32> to vector<4xf32>
    %53 = vector.shape_cast %52 : vector<4xf32> to vector<1x1x4xf32>
    %c0_59 = arith.constant 0 : index
    %c0_60 = arith.constant 0 : index
    %c0_61 = arith.constant 0 : index
    %54 = vector.load %arg6[%c0_59, %c0_60, %c0_61] : memref<1x1x4xf32, #tpu.memory_space<vmem>>, vector<1x1x4xf32>
    tpu.vector_store %arg6[%c0_59, %c0_60, %c0_61], %53 {strides = array<i32>} : memref<1x1x4xf32, #tpu.memory_space<vmem>>, vector<1x1x4xf32>,
    %55 = arith.mulf %48, %48 : vector<256x4xf32>
    %cst_62 = arith.constant dense<0.000000e+00> : vector<4xf32>
    %56 = vector.multi_reduction <add>, %55, %cst_62 [0] : vector<256x4xf32> to vector<4xf32>
    %57 = vector.shape_cast %56 : vector<4xf32> to vector<1x1x4xf32>
    %c0_63 = arith.constant 0 : index
    %c0_64 = arith.constant 0 : index
    %c0_65 = arith.constant 0 : index
    %58 = vector.load %arg7[%c0_63, %c0_64, %c0_65] : memref<1x1x4xf32, #tpu.memory_space<vmem>>, vector<1x1x4xf32>
    tpu.vector_store %arg7[%c0_63, %c0_64, %c0_65], %57 {strides = array<i32>} : memref<1x1x4xf32, #tpu.memory_space<vmem>>, vector<1x1x4xf32>,
    return
  }
  func.func @transform_0(%arg0: i32) -> (i32, i32, i32, i32) {
    %c0_i32 = arith.constant 0 : i32
    %c0_i32_0 = arith.constant 0 : i32
    %c0_i32_1 = arith.constant 0 : i32
    %c0_i32_2 = arith.constant 0 : i32
    return %arg0, %c0_i32, %c0_i32_0, %c0_i32_1 : i32, i32, i32, i32
  }
  func.func @transform_1(%arg0: i32) -> (i32, i32) {
    %c0_i32 = arith.constant 0 : i32
    %c0_i32_0 = arith.constant 0 : i32
    %c0_i32_1 = arith.constant 0 : i32
    return %c0_i32, %c0_i32_0 : i32, i32
  }
  func.func @transform_2(%arg0: i32) -> (i32, i32) {
    %c0_i32 = arith.constant 0 : i32
    %c0_i32_0 = arith.constant 0 : i32
    %c0_i32_1 = arith.constant 0 : i32
    return %c0_i32, %c0_i32_0 : i32, i32
  }
  func.func @transform_3(%arg0: i32) -> (i32, i32) {
    %c0_i32 = arith.constant 0 : i32
    %c0_i32_0 = arith.constant 0 : i32
    %c0_i32_1 = arith.constant 0 : i32
    return %c0_i32, %c0_i32_0 : i32, i32
  }
  func.func @transform_4(%arg0: i32) -> (i32, i32, i32, i32) {
    %c0_i32 = arith.constant 0 : i32
    %c0_i32_0 = arith.constant 0 : i32
    %c0_i32_1 = arith.constant 0 : i32
    %c0_i32_2 = arith.constant 0 : i32
    return %arg0, %c0_i32, %c0_i32_0, %c0_i32_1 : i32, i32, i32, i32
  }
  func.func @transform_5(%arg0: i32) -> (i32, i32, i32) {
    %c0_i32 = arith.constant 0 : i32
    %c0_i32_0 = arith.constant 0 : i32
    %c0_i32_1 = arith.constant 0 : i32
    return %arg0, %c0_i32, %c0_i32_0 : i32, i32, i32
  }
  func.func @transform_6(%arg0: i32) -> (i32, i32, i32) {
    %c0_i32 = arith.constant 0 : i32
    %c0_i32_0 = arith.constant 0 : i32
    %c0_i32_1 = arith.constant 0 : i32
    return %arg0, %c0_i32, %c0_i32_0 : i32, i32, i32
  }
}

</mosaic_0001>

<bundles_post_ra>
// kernel: basic_block.5
= control target key start
LH: loop header
LB: loop body
LE: loop exit
PB: predicated region body
PF: predicated region fallthrough
CT: control target
= control target key end

     0   :  { %s997_s15 = smov 0   ;;  %s1198_s0 = inlined_call_operand.vmem [shape: bf16[2,16,16,4], index: 0, kind: input, shape index: {}]   ;;  %s1199_s1 = inlined_call_operand.vmem [shape: f32[1,4], index: 1, kind: input, shape index: {}]   ;;  %s1200_s2 = inlined_call_operand.vmem [shape: f32[1,4], index: 2, kind: input, shape index: {}]   ;;  %s1201_s3 = inlined_call_operand.vmem [shape: bf16[2,16,16,4], index: 3, kind: input, shape index: {}]   ;;  %s1202_s4 = inlined_call_operand.vmem [shape: bf16[2,16,16,4], index: 4, kind: output, shape index: {}]  }
   0x1 LB: > { %s716_s16 = sadd.s32 4294967295, %s970_s15   ;;  %p720_p0 = scmp.ge.s32.totalorder %s970_s15, 1  ;;  %s970_s15 = sphi %s997_s15, %s14_s15  }
   0x2   : > { %p172_p1 = scmp.lt.s32.totalorder %s970_s15, 3 }
   0x4   : > { %p173_p2 = pnand %p720_p0, %p172_p1 }
   0x5   : > { %p203_p3 = scmp.lt.s32.totalorder (!%p173_p2), %s716_s16, 1 }
   0x6   : > { %176 = sbr.rel (%p173_p2) target bundleno = 78 (0x4e), region = 36 }
   0xb   : > { %s1204_s16 = smov (!%p203_p3, %s716_s16), 1  ;;  %v1022_v0 = vld [vmem:[%s1199_s1] ss:$0 sm:$0xff]  ;;  %vm616_vm0 = vcmask 27648  }
   0xc   : > { %s1005_s17 = sshll.u32 %s1204_s16, 7  ;;  %v1033_v11 = vld [vmem:[%s1200_s2] ss:$0 sm:$0xff] }
   0xd   : > { %s1011_s20 = scalar_lea.vmem %s1198_s0, %s1005_s17  ;;  %s1017_s23 = scalar_lea.vmem %s1201_s3, %s1005_s17 }
   0xe   : > { %v799_v1 = vld [vmem:[%s1011_s20] sm:$0xff]   ;;  %v926_v3 = vld [vmem:[%s1011_s20 + $0x8] sm:$0xff]   ;;  %v927_v9 = vld [vmem:[%s1011_s20 + $0x10] sm:$0xff]   ;;  %s1055_s30 = scalar_lea.vmem %s1202_s4, %s1005_s17 }
   0xf   : > { %v863_v2 = vld [vmem:[%s1017_s23] sm:$0xff]   ;;  %v800_v4 = vunpack.c.l.bf16 %v799_v1  ;;  %v801_v6 = vunpack.c.h.bf16 %v799_v1  ;;  %v941_v8 = vld [vmem:[%s1017_s23 + $0x8] sm:$0xff]   ;;  %v942_v10 = vld [vmem:[%s1017_s23 + $0x10] sm:$0xff]   ;;  %v804_v12 = vunpack.c.l.bf16 %v926_v3  ;;  %v805_v14 = vunpack.c.h.bf16 %v926_v3 }
  0x10   : > { %v864_v5 = vunpack.c.l.bf16 %v863_v2  ;;  %v865_v7 = vunpack.c.h.bf16 %v863_v2  ;;  %v868_v13 = vunpack.c.l.bf16 %v941_v8  ;;  %v869_v15 = vunpack.c.h.bf16 %v941_v8  ;;  %v928_v16 = vld [vmem:[%s1011_s20 + $0x18] sm:$0xff]   ;;  %v929_v50 = vld [vmem:[%s1011_s20 + $0x20] sm:$0xff]   ;;  %v930_v60 = vld [vmem:[%s1011_s20 + $0x28] sm:$0xff]  }
  0x11   : > { %v289_v17 = vmul.f32 %v800_v4, %v1022_v0  ;;  %v290_v18 = vmul.f32 %v801_v6, %v1022_v0  ;;  %v808_v19 = vunpack.c.l.bf16 %v927_v9  ;;  %v872_v20 = vunpack.c.l.bf16 %v942_v10  ;;  %v943_v21 = vld [vmem:[%s1017_s23 + $0x18] sm:$0xff]   ;;  %v944_v55 = vld [vmem:[%s1017_s23 + $0x20] sm:$0xff]   ;;  %v945_v2 = vld [vmem:[%s1017_s23 + $0x28] sm:$0xff]  }
  0x12   : > { %v291_v22 = vmul.f32 %v804_v12, %v1022_v0  ;;  %v292_v23 = vmul.f32 %v805_v14, %v1022_v0  ;;  %v809_v24 = vunpack.c.h.bf16 %v927_v9  ;;  %v873_v25 = vunpack.c.h.bf16 %v942_v10 }
  0x13   : > { %v328_v26 = vadd.f32 %v1033_v11, %v289_v17  ;;  %v329_v27 = vadd.f32 %v1033_v11, %v290_v18  ;;  %v293_v28 = vmul.f32 %v808_v19, %v1022_v0  ;;  %v812_v29 = vunpack.c.l.bf16 %v928_v16 }
  0x14   : > { %v330_v30 = vadd.f32 %v1033_v11, %v291_v22  ;;  %v331_v31 = vadd.f32 %v1033_v11, %v292_v23  ;;  %v294_v32 = vmul.f32 %v809_v24, %v1022_v0  ;;  %v876_v33 = vunpack.c.l.bf16 %v943_v21 }
  0x15   : > { %v424_v34 = vadd.f32 %v864_v5, %v328_v26  ;;  %v425_v35 = vadd.f32 %v865_v7, %v329_v27  ;;  %v332_v36 = vadd.f32 %v1033_v11, %v293_v28  ;;  %v295_v37 = vmul.f32 %v812_v29, %v1022_v0  ;;  %v931_v7 = vld [vmem:[%s1011_s20 + $0x30] sm:$0xff]   ;;  %v932_v26 = vld [vmem:[%s1011_s20 + $0x38] sm:$0xff]  }
  0x16   : > { %v426_v38 = vadd.f32 %v868_v13, %v330_v30  ;;  %v427_v39 = vadd.f32 %v869_v15, %v331_v31  ;;  %v333_v40 = vadd.f32 %v1033_v11, %v294_v32  ;;  %v813_v41 = vunpack.c.h.bf16 %v928_v16  ;;  %v946_v13 = vld [vmem:[%s1017_s23 + $0x30] sm:$0xff]   ;;  %v947_v31 = vld [vmem:[%s1017_s23 + $0x38] sm:$0xff]  }
  0x17   : > { %v456_v42 = vmax.f32 %v424_v34, 0.0  ;;  %v457_v43 = vmax.f32 %v425_v35, 0.0  ;;  %v428_v44 = vadd.f32 %v872_v20, %v332_v36  ;;  %v334_v45 = vadd.f32 %v1033_v11, %v295_v37 }
  0x18   : > { %v458_v46 = vmax.f32 %v426_v38, 0.0  ;;  %v459_v47 = vmax.f32 %v427_v39, 0.0  ;;  %v429_v48 = vadd.f32 %v873_v25, %v333_v40  ;;  %v296_v49 = vmul.f32 %v813_v41, %v1022_v0 }
  0x19   : > { %v766_v51 = vpack.c.bf16 %v456_v42, %v456_v42  ;;  %v767_v52 = vpack.c.bf16 %v457_v43, %v457_v43  ;;  %v460_v53 = vmax.f32 %v428_v44, 0.0  ;;  %v430_v54 = vadd.f32 %v876_v33, %v334_v45 }
  0x1a   : > { %v768_v56 = vpack.c.bf16 %v458_v46, %v458_v46  ;;  %v769_v57 = vpack.c.bf16 %v459_v47, %v459_v47  ;;  %v461_v58 = vmax.f32 %v429_v48, 0.0  ;;  %v335_v59 = vadd.f32 %v1033_v11, %v296_v49  ;;  %v933_v48 = vld [vmem:[%s1011_s20 + $0x40] sm:$0xff]  }
  0x1b   : > { %617 = vst.msk [vmem:[%s1055_s30] sm:$0xf] %vm616_vm0, %v766_v51  ;;  %618 = vst.msk [vmem:[%s1055_s30 + $0x4] sm:$0xf] %vm616_vm0, %v767_v52  ;;  %v770_v61 = vpack.c.bf16 %v460_v53, %v460_v53  ;;  %v462_v62 = vmax.f32 %v430_v54, 0.0  ;;  %v877_v63 = vunpack.c.h.bf16 %v943_v21  ;;  %v816_v1 = vunpack.c.l.bf16 %v929_v50  ;;  %v948_v53 = vld [vmem:[%s1017_s23 + $0x40] sm:$0xff]  }
  0x1c   : > { %619 = vst.msk [vmem:[%s1055_s30 + $0x8] sm:$0xf] %vm616_vm0, %v768_v56  ;;  %620 = vst.msk [vmem:[%s1055_s30 + $0xc] sm:$0xf] %vm616_vm0, %v769_v57  ;;  %v771_v3 = vpack.c.bf16 %v461_v58, %v461_v58  ;;  %v880_v4 = vunpack.c.l.bf16 %v944_v55  ;;  %v817_v5 = vunpack.c.h.bf16 %v929_v50  ;;  %v881_v6 = vunpack.c.h.bf16 %v944_v55 }
  0x1d   : > { %621 = vst.msk [vmem:[%s1055_s30 + $0x10] sm:$0xf] %vm616_vm0, %v770_v61  ;;  %v772_v8 = vpack.c.bf16 %v462_v62, %v462_v62  ;;  %v431_v9 = vadd.f32 %v877_v63, %v335_v59  ;;  %v297_v10 = vmul.f32 %v816_v1, %v1022_v0  ;;  %v820_v12 = vunpack.c.l.bf16 %v930_v60  ;;  %v934_v62 = vld [vmem:[%s1011_s20 + $0x48] sm:$0xff]  }
  0x1e   : > { %622 = vst.msk [vmem:[%s1055_s30 + $0x14] sm:$0xf] %vm616_vm0, %v771_v3  ;;  %v298_v14 = vmul.f32 %v817_v5, %v1022_v0  ;;  %v884_v15 = vunpack.c.l.bf16 %v945_v2  ;;  %v821_v16 = vunpack.c.h.bf16 %v930_v60  ;;  %v885_v17 = vunpack.c.h.bf16 %v945_v2  ;;  %v949_v63 = vld [vmem:[%s1017_s23 + $0x48] sm:$0xff]  }
  0x1f   : > { %623 = vst.msk [vmem:[%s1055_s30 + $0x18] sm:$0xf] %vm616_vm0, %v772_v8  ;;  %v463_v18 = vmax.f32 %v431_v9, 0.0  ;;  %v336_v19 = vadd.f32 %v1033_v11, %v297_v10  ;;  %v299_v20 = vmul.f32 %v820_v12, %v1022_v0  ;;  %v824_v21 = vunpack.c.l.bf16 %v931_v7  ;;  %v935_v9 = vld [vmem:[%s1011_s20 + $0x50] sm:$0xff]  }
  0x20   : > { %v337_v22 = vadd.f32 %v1033_v11, %v298_v14  ;;  %v300_v23 = vmul.f32 %v821_v16, %v1022_v0  ;;  %v888_v24 = vunpack.c.l.bf16 %v946_v13  ;;  %v825_v25 = vunpack.c.h.bf16 %v931_v7 }
  0x21   : > { %v773_v27 = vpack.c.bf16 %v463_v18, %v463_v18  ;;  %v432_v28 = vadd.f32 %v880_v4, %v336_v19  ;;  %v338_v29 = vadd.f32 %v1033_v11, %v299_v20  ;;  %v301_v30 = vmul.f32 %v824_v21, %v1022_v0 }
  0x22   : > { %v433_v32 = vadd.f32 %v881_v6, %v337_v22  ;;  %v339_v33 = vadd.f32 %v1033_v11, %v300_v23  ;;  %v302_v34 = vmul.f32 %v825_v25, %v1022_v0  ;;  %v889_v35 = vunpack.c.h.bf16 %v946_v13 }
  0x23   : > { %624 = vst.msk [vmem:[%s1055_s30 + $0x1c] sm:$0xf] %vm616_vm0, %v773_v27  ;;  %v464_v36 = vmax.f32 %v432_v28, 0.0  ;;  %v434_v37 = vadd.f32 %v884_v15, %v338_v29  ;;  %v340_v38 = vadd.f32 %v1033_v11, %v301_v30  ;;  %v828_v39 = vunpack.c.l.bf16 %v932_v26  ;;  %v950_v15 = vld [vmem:[%s1017_s23 + $0x50] sm:$0xff]  }
  0x24   : > { %v465_v40 = vmax.f32 %v433_v32, 0.0  ;;  %v435_v41 = vadd.f32 %v885_v17, %v339_v33  ;;  %v341_v42 = vadd.f32 %v1033_v11, %v302_v34  ;;  %v892_v43 = vunpack.c.l.bf16 %v947_v31  ;;  %v936_v32 = vld [vmem:[%s1011_s20 + $0x58] sm:$0xff]  }
  0x25   : > { %v774_v44 = vpack.c.bf16 %v464_v36, %v464_v36  ;;  %v466_v45 = vmax.f32 %v434_v37, 0.0  ;;  %v436_v46 = vadd.f32 %v888_v24, %v340_v38  ;;  %v303_v47 = vmul.f32 %v828_v39, %v1022_v0  ;;  %v951_v33 = vld [vmem:[%s1017_s23 + $0x58] sm:$0xff]  }
  0x26   : > { %v775_v49 = vpack.c.bf16 %v465_v40, %v465_v40  ;;  %v467_v50 = vmax.f32 %v435_v41, 0.0  ;;  %v437_v51 = vadd.f32 %v889_v35, %v341_v42  ;;  %v829_v52 = vunpack.c.h.bf16 %v932_v26 }
  0x27   : > { %625 = vst.msk [vmem:[%s1055_s30 + $0x20] sm:$0xf] %vm616_vm0, %v774_v44  ;;  %v776_v54 = vpack.c.bf16 %v466_v45, %v466_v45  ;;  %v468_v55 = vmax.f32 %v436_v46, 0.0  ;;  %v342_v56 = vadd.f32 %v1033_v11, %v303_v47  ;;  %v893_v57 = vunpack.c.h.bf16 %v947_v31  ;;  %v937_v46 = vld [vmem:[%s1011_s20 + $0x60] sm:$0xff]  }
  0x28   : > { %626 = vst.msk [vmem:[%s1055_s30 + $0x24] sm:$0xf] %vm616_vm0, %v775_v49  ;;  %v777_v58 = vpack.c.bf16 %v467_v50, %v467_v50  ;;  %v469_v59 = vmax.f32 %v437_v51, 0.0  ;;  %v304_v60 = vmul.f32 %v829_v52, %v1022_v0  ;;  %v832_v61 = vunpack.c.l.bf16 %v933_v48  ;;  %v952_v51 = vld [vmem:[%s1017_s23 + $0x60] sm:$0xff]  }
  0x29   : > { %627 = vst.msk [vmem:[%s1055_s30 + $0x28] sm:$0xf] %vm616_vm0, %v776_v54  ;;  %v778_v1 = vpack.c.bf16 %v468_v55, %v468_v55  ;;  %v438_v2 = vadd.f32 %v892_v43, %v342_v56  ;;  %v896_v3 = vunpack.c.l.bf16 %v948_v53  ;;  %v833_v4 = vunpack.c.h.bf16 %v933_v48 }
  0x2a   : > { %628 = vst.msk [vmem:[%s1055_s30 + $0x2c] sm:$0xf] %vm616_vm0, %v777_v58  ;;  %v779_v5 = vpack.c.bf16 %v469_v59, %v469_v59  ;;  %v343_v6 = vadd.f32 %v1033_v11, %v304_v60  ;;  %v305_v7 = vmul.f32 %v832_v61, %v1022_v0  ;;  %v897_v8 = vunpack.c.h.bf16 %v948_v53  ;;  %v938_v60 = vld [vmem:[%s1011_s20 + $0x68] sm:$0xff]  }
  0x2b   : > { %629 = vst.msk [vmem:[%s1055_s30 + $0x30] sm:$0xf] %vm616_vm0, %v778_v1  ;;  %v470_v10 = vmax.f32 %v438_v2, 0.0  ;;  %v306_v12 = vmul.f32 %v833_v4, %v1022_v0  ;;  %v836_v13 = vunpack.c.l.bf16 %v934_v62  ;;  %v900_v14 = vunpack.c.l.bf16 %v949_v63  ;;  %v953_v2 = vld [vmem:[%s1017_s23 + $0x68] sm:$0xff]  }
  0x2c   : > { %630 = vst.msk [vmem:[%s1055_s30 + $0x34] sm:$0xf] %vm616_vm0, %v779_v5  ;;  %v439_v16 = vadd.f32 %v893_v57, %v343_v6  ;;  %v344_v17 = vadd.f32 %v1033_v11, %v305_v7  ;;  %v837_v18 = vunpack.c.h.bf16 %v934_v62  ;;  %v901_v19 = vunpack.c.h.bf16 %v949_v63 }
  0x2d   : > { %v780_v20 = vpack.c.bf16 %v470_v10, %v470_v10  ;;  %v345_v21 = vadd.f32 %v1033_v11, %v306_v12  ;;  %v307_v22 = vmul.f32 %v836_v13, %v1022_v0  ;;  %v840_v23 = vunpack.c.l.bf16 %v935_v9  ;;  %v939_v12 = vld [vmem:[%s1011_s20 + $0x70] sm:$0xff]  }
  0x2e   : > { %v471_v24 = vmax.f32 %v439_v16, 0.0  ;;  %v440_v25 = vadd.f32 %v896_v3, %v344_v17  ;;  %v308_v26 = vmul.f32 %v837_v18, %v1022_v0  ;;  %v904_v27 = vunpack.c.l.bf16 %v950_v15 }
  0x2f   : > { %631 = vst.msk [vmem:[%s1055_s30 + $0x38] sm:$0xf] %vm616_vm0, %v780_v20  ;;  %v441_v28 = vadd.f32 %v897_v8, %v345_v21  ;;  %v346_v29 = vadd.f32 %v1033_v11, %v307_v22  ;;  %v309_v30 = vmul.f32 %v840_v23, %v1022_v0  ;;  %v841_v31 = vunpack.c.h.bf16 %v935_v9  ;;  %v954_v21 = vld [vmem:[%s1017_s23 + $0x70] sm:$0xff]  }
  0x30   : > { %v781_v34 = vpack.c.bf16 %v471_v24, %v471_v24  ;;  %v472_v35 = vmax.f32 %v440_v25, 0.0  ;;  %v347_v36 = vadd.f32 %v1033_v11, %v308_v26  ;;  %v905_v37 = vunpack.c.h.bf16 %v950_v15 }
  0x31   : > { %v473_v38 = vmax.f32 %v441_v28, 0.0  ;;  %v442_v39 = vadd.f32 %v900_v14, %v346_v29  ;;  %v348_v40 = vadd.f32 %v1033_v11, %v309_v30  ;;  %v310_v41 = vmul.f32 %v841_v31, %v1022_v0 }
  0x32   : > { %632 = vst.msk [vmem:[%s1055_s30 + $0x3c] sm:$0xf] %vm616_vm0, %v781_v34  ;;  %v782_v42 = vpack.c.bf16 %v472_v35, %v472_v35  ;;  %v443_v43 = vadd.f32 %v901_v19, %v347_v36  ;;  %v844_v44 = vunpack.c.l.bf16 %v936_v32  ;;  %v908_v45 = vunpack.c.l.bf16 %v951_v33  ;;  %v940_v34 = vld [vmem:[%s1011_s20 + $0x78] sm:$0xff]  }
  0x33   : > { %v783_v47 = vpack.c.bf16 %v473_v38, %v473_v38  ;;  %v474_v48 = vmax.f32 %v442_v39, 0.0  ;;  %v444_v49 = vadd.f32 %v904_v27, %v348_v40  ;;  %v349_v50 = vadd.f32 %v1033_v11, %v310_v41  ;;  %v955_v39 = vld [vmem:[%s1017_s23 + $0x78] sm:$0xff]  }
  0x34   : > { %633 = vst.msk [vmem:[%s1055_s30 + $0x40] sm:$0xf] %vm616_vm0, %v782_v42  ;;  %v475_v52 = vmax.f32 %v443_v43, 0.0  ;;  %v311_v53 = vmul.f32 %v844_v44, %v1022_v0  ;;  %v845_v54 = vunpack.c.h.bf16 %v936_v32  ;;  %v909_v55 = vunpack.c.h.bf16 %v951_v33 }
  0x35   : > { %634 = vst.msk [vmem:[%s1055_s30 + $0x44] sm:$0xf] %vm616_vm0, %v783_v47  ;;  %v784_v56 = vpack.c.bf16 %v474_v48, %v474_v48  ;;  %v476_v57 = vmax.f32 %v444_v49, 0.0  ;;  %v445_v58 = vadd.f32 %v905_v37, %v349_v50  ;;  %v848_v59 = vunpack.c.l.bf16 %v937_v46 }
  0x36   : > { %v785_v61 = vpack.c.bf16 %v475_v52, %v475_v52  ;;  %v350_v62 = vadd.f32 %v1033_v11, %v311_v53  ;;  %v312_v63 = vmul.f32 %v845_v54, %v1022_v0  ;;  %v912_v1 = vunpack.c.l.bf16 %v952_v51 }
  0x37   : > { %635 = vst.msk [vmem:[%s1055_s30 + $0x48] sm:$0xf] %vm616_vm0, %v784_v56  ;;  %v786_v3 = vpack.c.bf16 %v476_v57, %v476_v57  ;;  %v477_v4 = vmax.f32 %v445_v58, 0.0  ;;  %v313_v5 = vmul.f32 %v848_v59, %v1022_v0  ;;  %v849_v6 = vunpack.c.h.bf16 %v937_v46 }
  0x38   : > { %636 = vst.msk [vmem:[%s1055_s30 + $0x4c] sm:$0xf] %vm616_vm0, %v785_v61  ;;  %v446_v7 = vadd.f32 %v908_v45, %v350_v62  ;;  %v351_v8 = vadd.f32 %v1033_v11, %v312_v63  ;;  %v913_v9 = vunpack.c.h.bf16 %v952_v51  ;;  %v852_v10 = vunpack.c.l.bf16 %v938_v60 }
  0x39   : > { %637 = vst.msk [vmem:[%s1055_s30 + $0x50] sm:$0xf] %vm616_vm0, %v786_v3  ;;  %v787_v13 = vpack.c.bf16 %v477_v4, %v477_v4  ;;  %v352_v14 = vadd.f32 %v1033_v11, %v313_v5  ;;  %v314_v15 = vmul.f32 %v849_v6, %v1022_v0  ;;  %v916_v16 = vunpack.c.l.bf16 %v953_v2 }
  0x3a   : > { %v478_v17 = vmax.f32 %v446_v7, 0.0  ;;  %v447_v18 = vadd.f32 %v909_v55, %v351_v8  ;;  %v315_v19 = vmul.f32 %v852_v10, %v1022_v0  ;;  %v853_v20 = vunpack.c.h.bf16 %v938_v60 }
  0x3b   : > { %638 = vst.msk [vmem:[%s1055_s30 + $0x54] sm:$0xf] %vm616_vm0, %v787_v13  ;;  %v448_v22 = vadd.f32 %v912_v1, %v352_v14  ;;  %v353_v23 = vadd.f32 %v1033_v11, %v314_v15  ;;  %v917_v24 = vunpack.c.h.bf16 %v953_v2  ;;  %v856_v25 = vunpack.c.l.bf16 %v939_v12 }
  0x3c   : > { %v788_v26 = vpack.c.bf16 %v478_v17, %v478_v17  ;;  %v479_v27 = vmax.f32 %v447_v18, 0.0  ;;  %v354_v28 = vadd.f32 %v1033_v11, %v315_v19  ;;  %v316_v29 = vmul.f32 %v853_v20, %v1022_v0 }
  0x3d   : > { %v480_v30 = vmax.f32 %v448_v22, 0.0  ;;  %v449_v31 = vadd.f32 %v913_v9, %v353_v23  ;;  %v317_v32 = vmul.f32 %v856_v25, %v1022_v0  ;;  %v920_v33 = vunpack.c.l.bf16 %v954_v21 }
  0x3e   : > { %639 = vst.msk [vmem:[%s1055_s30 + $0x58] sm:$0xf] %vm616_vm0, %v788_v26  ;;  %v789_v35 = vpack.c.bf16 %v479_v27, %v479_v27  ;;  %v450_v36 = vadd.f32 %v916_v16, %v354_v28  ;;  %v355_v37 = vadd.f32 %v1033_v11, %v316_v29  ;;  %v857_v38 = vunpack.c.h.bf16 %v939_v12 }
  0x3f   : > { %v790_v40 = vpack.c.bf16 %v480_v30, %v480_v30  ;;  %v481_v41 = vmax.f32 %v449_v31, 0.0  ;;  %v356_v42 = vadd.f32 %v1033_v11, %v317_v32  ;;  %v921_v43 = vunpack.c.h.bf16 %v954_v21 }
  0x40   : > { %640 = vst.msk [vmem:[%s1055_s30 + $0x5c] sm:$0xf] %vm616_vm0, %v789_v35  ;;  %v482_v44 = vmax.f32 %v450_v36, 0.0  ;;  %v451_v45 = vadd.f32 %v917_v24, %v355_v37  ;;  %v318_v46 = vmul.f32 %v857_v38, %v1022_v0  ;;  %v860_v47 = vunpack.c.l.bf16 %v940_v34 }
  0x41   : > { %641 = vst.msk [vmem:[%s1055_s30 + $0x60] sm:$0xf] %vm616_vm0, %v790_v40  ;;  %v791_v48 = vpack.c.bf16 %v481_v41, %v481_v41  ;;  %v452_v49 = vadd.f32 %v920_v33, %v356_v42  ;;  %v924_v50 = vunpack.c.l.bf16 %v955_v39  ;;  %v861_v51 = vunpack.c.h.bf16 %v940_v34 }
  0x42   : > { %v792_v52 = vpack.c.bf16 %v482_v44, %v482_v44  ;;  %v483_v53 = vmax.f32 %v451_v45, 0.0  ;;  %v357_v54 = vadd.f32 %v1033_v11, %v318_v46  ;;  %v319_v55 = vmul.f32 %v860_v47, %v1022_v0 }
  0x43   : > { %642 = vst.msk [vmem:[%s1055_s30 + $0x64] sm:$0xf] %vm616_vm0, %v791_v48  ;;  %v484_v56 = vmax.f32 %v452_v49, 0.0  ;;  %v320_v57 = vmul.f32 %v861_v51, %v1022_v0  ;;  %v925_v58 = vunpack.c.h.bf16 %v955_v39 }
  0x44   : > { %643 = vst.msk [vmem:[%s1055_s30 + $0x68] sm:$0xf] %vm616_vm0, %v792_v52  ;;  %v793_v59 = vpack.c.bf16 %v483_v53, %v483_v53  ;;  %v453_v60 = vadd.f32 %v921_v43, %v357_v54  ;;  %v358_v61 = vadd.f32 %v1033_v11, %v319_v55 }
  0x45   : > { %v794_v62 = vpack.c.bf16 %v484_v56, %v484_v56  ;;  %v359_v63 = vadd.f32 %v1033_v11, %v320_v57 }
  0x46   : > { %644 = vst.msk [vmem:[%s1055_s30 + $0x6c] sm:$0xf] %vm616_vm0, %v793_v59  ;;  %v485_v1 = vmax.f32 %v453_v60, 0.0  ;;  %v454_v2 = vadd.f32 %v924_v50, %v358_v61 }
  0x47   : > { %645 = vst.msk [vmem:[%s1055_s30 + $0x70] sm:$0xf] %vm616_vm0, %v794_v62  ;;  %v455_v0 = vadd.f32 %v925_v58, %v359_v63 }
  0x48   : > { %v795_v3 = vpack.c.bf16 %v485_v1, %v485_v1  ;;  %v486_v4 = vmax.f32 %v454_v2, 0.0 }
  0x49   : > { %v487_v5 = vmax.f32 %v455_v0, 0.0 }
  0x4a   : > { %646 = vst.msk [vmem:[%s1055_s30 + $0x74] sm:$0xf] %vm616_vm0, %v795_v3  ;;  %v796_v6 = vpack.c.bf16 %v486_v4, %v486_v4 }
  0x4b   : > { %v797_v7 = vpack.c.bf16 %v487_v5, %v487_v5 }
  0x4c   : > { %647 = vst.msk [vmem:[%s1055_s30 + $0x78] sm:$0xf] %vm616_vm0, %v796_v6 }
  0x4d   : > { %648 = vst.msk [vmem:[%s1055_s30 + $0x7c] sm:$0xf] %vm616_vm0, %v797_v7 }
  0x4e PF: > { %s14_s15 = sadd.s32 1, %s970_s15  }
  0x4f   : > { %p11_p4 = scmp.ge.s32.totalorder %s14_s15, 4  }
  0x51   :  { %13 = sbr.rel (!%p11_p4) target bundleno = 1 (0x1), region = 69 }

// kernel: basic_block.3
= control target key start
LH: loop header
LB: loop body
LE: loop exit
PB: predicated region body
PF: predicated region fallthrough
CT: control target
= control target key end

     0   :  { %s4710_s15 = smov 0   ;;  %s6309_s0 = inlined_call_operand.vmem [shape: bf16[2,18,18,4], index: 0, kind: input, shape index: {}]   ;;  %s6310_s1 = inlined_call_operand.vmem [shape: bf16[36,4], index: 1, kind: input, shape index: {}]   ;;  %s6311_s2 = inlined_call_operand.vmem [shape: bf16[2,16,16,4], index: 2, kind: output, shape index: {0}]   ;;  %s6312_s3 = inlined_call_operand.vmem [shape: f32[2,1,4], index: 3, kind: output, shape index: {1}]   ;;  %s6313_s4 = inlined_call_operand.vmem [shape: f32[2,1,4], index: 4, kind: output, shape index: {2}]  }
   0x1 LB: > { %s4154_s16 = sadd.s32 4294967295, %s4675_s15   ;;  %p4158_p0 = scmp.ge.s32.totalorder %s4675_s15, 1  ;;  %s4675_s15 = sphi %s4710_s15, %s15_s15  }
   0x2   : > { %p167_p1 = scmp.lt.s32.totalorder %s4675_s15, 3 }
   0x4   : > { %p168_p2 = pnand %p4158_p0, %p167_p1 }
   0x5   : > { %p199_p3 = scmp.lt.s32.totalorder (!%p168_p2), %s4154_s16, 1  ;;  %s4677_s21 = smov (!%p168_p2), 4  }
   0x6   : > { %171 = sbr.rel (%p168_p2) target bundleno = 878 (0x36e), region = 28  ;;  %s4678_s22 = smov (!%p168_p2), 8  }
   0x7   : > { %s4679_s23 = smov (!%p168_p2), 12   ;;  %s4680_s24 = smov (!%p168_p2), 16  }
   0x8   : > { %s4681_s25 = smov (!%p168_p2), 20   ;;  %s4682_s26 = smov (!%p168_p2), 24  }
   0x9   : > { %s4683_s5 = smov (!%p168_p2), 28   ;;  %s4684_s8 = smov (!%p168_p2), 32  }
   0xb   : > { %s6319_s16 = smov (!%p199_p3, %s4154_s16), 1  ;;  %vm329_vm0 = vsmask.f32 3328  ;;  %vm330_vm1 = vsmask.f32 7440  ;;  %vm248_vm3 = vcmask 27648  }
   0xc   : > { %s4633_s17 = smul.u32 216, %s6319_s16  ;;  %vm4735_vm2 = vmor %vm329_vm0, %vm330_vm1  ;;  %vm941_vm4 = vcmask 1042432   ;;  %vm942_vm5 = vcmask 1046532   ;;  %vm812_vm7 = vcmask 60448   ;;  %vm1152_vm8 = vcmask 93248   ;;  %s4535_s9 = sshll.u32 %s6319_s16, 7 }
   0xd   : > { %vm4879_vm6 = vmor %vm941_vm4, %vm942_vm5  ;;  %vm3550_vm9 = vcmask 1041408   ;;  %vm1346_vm10 = vcmask 126048   ;;  %vm1907_vm11 = vcmask 158848   ;;  %vm2244_vm12 = vcmask 191648   ;;  %s6108_s12 = scalar_lea.vmem %s6311_s2, %s4535_s9 }
   0xe   : > { %s4724_s20 = scalar_lea.vmem %s6309_s0, %s4633_s17  ;;  %vm2438_vm13 = vcmask 224448   ;;  %vm2999_vm14 = vcmask 257248   ;;  %vm3336_vm15 = vcmask 290048   ;;  %vm3501_vm0 = vcmask 293888   ;;  %s211_s17 = scalar_lea.vmem %s6312_s3, %s6319_s16 }
   0xf   : > { %v284_v0 = vld [vmem:[%s4724_s20 + $0xc] sm:$0xf]  ;;  %v285_v1 = vld [vmem:[%s4724_s20 + $0x10] sm:$0xf]  ;;  %v281_v2 = vld [vmem:[%s4724_s20] sm:$0xf] }
  0x10   : > { %v357_v3 = vshrl.u32 %v284_v0, 16  ;;  %v360_v4 = vshll.u32 %v284_v0, 16  ;;  %v366_v5 = vshll.u32 %v285_v1, 16  ;;  %v370_v6 = vshrl.u32 %v285_v1, 16  ;;  %v282_v7 = vld [vmem:[%s4724_s20 + $0x4] sm:$0xf] }
  0x11   : > { %v333_v8 = vshrl.u32 %v281_v2, 16  ;;  %v336_v9 = vshll.u32 %v281_v2, 16  ;;  %v342_v10 = vshll.u32 %v282_v7, 16  ;;  %v346_v11 = vshrl.u32 %v282_v7, 16  ;;  %v286_v12 = vld [vmem:[%s4724_s20 + $0x14] sm:$0x1] }
  0x12   : > { %v359_v13 = vrot.slane %v357_v3, 4  ;;  %v362_v14 = vrot.slane %v360_v4, 5  ;;  %v368_v15 = vrot.slane %v366_v5, 5  ;;  %v372_v16 = vrot.slane %v370_v6, 4  ;;  %v283_v17 = vld [vmem:[%s4724_s20 + $0x8] sm:$0x1] }
  0x13   : > { %v335_v18 = vrot.slane %v333_v8, 4  ;;  %v338_v19 = vrot.slane %v336_v9, 5  ;;  %v344_v20 = vrot.slane %v342_v10, 5  ;;  %v348_v21 = vrot.slane %v346_v11, 4  ;;  %v288_v22 = vld [vmem:[%s4724_s20 + $0x1c] sm:$0xf] }
  0x14   : > { %v363_v23 = vor.u32 %v362_v14, %v359_v13  ;;  %v373_v24 = vor.u32 %v372_v16, %v368_v15  ;;  %v376_v25 = vshll.u32 %v286_v12, 16  ;;  %v352_v26 = vshll.u32 %v283_v17, 16  ;;  %v289_v30 = vld [vmem:[%s4724_s20 + $0x20] sm:$0x1]  ;;  %v287_v33 = vld [vmem:[%s4724_s20 + $0x18] sm:$0xf] }
  0x15   : > { %v339_v28 = vor.u32 %v338_v19, %v335_v18  ;;  %v349_v29 = vor.u32 %v348_v21, %v344_v20  ;;  %v390_v31 = vshll.u32 %v288_v22, 16  ;;  %v394_v32 = vshrl.u32 %v288_v22, 16  ;;  %v291_v42 = vld [vmem:[%s4724_s20 + $0x28] sm:$0xf]  ;;  %v292_v47 = vld [vmem:[%s4724_s20 + $0x2c] sm:$0x1] }
  0x16   : > { %v364_v34 = vrot.slane %v363_v23, 4  ;;  %v374_v35 = vrot.slane %v373_v24, 4  ;;  %v378_v36 = vrot.slane %v376_v25, 5  ;;  %v354_v37 = vrot.slane %v352_v26, 5  ;;  %v290_v48 = vld [vmem:[%s4724_s20 + $0x24] sm:$0xf] }
  0x17   : > { %v340_v38 = vrot.slane %v339_v28, 4  ;;  %v350_v39 = vrot.slane %v349_v29, 4  ;;  %v392_v40 = vrot.slane %v390_v31, 5  ;;  %v396_v41 = vrot.slane %v394_v32, 4  ;;  %v294_v53 = vld [vmem:[%s4724_s20 + $0x34] sm:$0xf] }
  0x18   : > { %v369_v43 = vsel %vm4735_vm2, %v364_v34, %v368_v15  ;;  %v379_v44 = vsel %vm4735_vm2, %v374_v35, %v378_v36  ;;  %v400_v45 = vshll.u32 %v289_v30, 16  ;;  %v381_v46 = vshrl.u32 %v287_v33, 16  ;;  %v295_v62 = vld [vmem:[%s4724_s20 + $0x38] sm:$0x1]  ;;  %v293_v3 = vld [vmem:[%s4724_s20 + $0x30] sm:$0xf] }
  0x19   : > { %720 = vrot.lane.b32.xlu1 %v369_v43, %s4677_s21  ;;  %v345_v49 = vsel %vm4735_vm2, %v340_v38, %v344_v20  ;;  %v355_v50 = vsel %vm4735_vm2, %v350_v39, %v354_v37  ;;  %v397_v51 = vor.u32 %v396_v41, %v392_v40  ;;  %v384_v52 = vshll.u32 %v287_v33, 16  ;;  %v297_v8 = vld [vmem:[%s4724_s20 + $0x40] sm:$0xf]  ;;  %v298_v17 = vld [vmem:[%s4724_s20 + $0x44] sm:$0x1] }
  0x1a   : > { %716 = vrot.lane.b32.xlu0 %v345_v49, %s4677_s21  ;;  %v402_v54 = vrot.slane %v400_v45, 5  ;;  %v383_v55 = vrot.slane %v381_v46, 4  ;;  %v414_v56 = vshll.u32 %v291_v42, 16  ;;  %v418_v57 = vshrl.u32 %v291_v42, 16  ;;  %v296_v22 = vld [vmem:[%s4724_s20 + $0x3c] sm:$0xf] }
  0x1b   : > { %v398_v58 = vrot.slane %v397_v51, 4  ;;  %v386_v59 = vrot.slane %v384_v52, 5  ;;  %v424_v60 = vshll.u32 %v292_v47, 16  ;;  %v405_v61 = vshrl.u32 %v290_v48, 16  ;;  %v300_v28 = vld [vmem:[%s4724_s20 + $0x4c] sm:$0xf] }
  0x1c   : > { %v416_v63 = vrot.slane %v414_v56, 5  ;;  %v420_v0 = vrot.slane %v418_v57, 4  ;;  %v408_v1 = vshll.u32 %v290_v48, 16  ;;  %v438_v2 = vshll.u32 %v294_v53, 16  ;;  %v301_v37 = vld [vmem:[%s4724_s20 + $0x50] sm:$0x1] }
  0x1d   : > { %722 = vrot.lane.b32.xlu1 %v379_v44, %s4677_s21  ;;  %v403_v4 = vsel %vm4735_vm2, %v398_v58, %v402_v54  ;;  %v387_v5 = vor.u32 %v386_v59, %v383_v55  ;;  %v426_v6 = vrot.slane %v424_v60, 5  ;;  %v407_v7 = vrot.slane %v405_v61, 4  ;;  %v299_v42 = vld [vmem:[%s4724_s20 + $0x48] sm:$0xf]  ;;  %v303_v47 = vld [vmem:[%s4724_s20 + $0x58] sm:$0xf] }
  0x1e   : > { %718 = vrot.lane.b32.xlu0 %v355_v50, %s4677_s21  ;;  %v421_v9 = vor.u32 %v420_v0, %v416_v63  ;;  %v410_v10 = vrot.slane %v408_v1, 5  ;;  %v440_v11 = vrot.slane %v438_v2, 5  ;;  %v442_v12 = vshrl.u32 %v294_v53, 16  ;;  %v304_v56 = vld [vmem:[%s4724_s20 + $0x5c] sm:$0x1] }
  0x1f   : > { %v388_v13 = vrot.slane %v387_v5, 4  ;;  %v448_v14 = vshll.u32 %v295_v62, 16  ;;  %v429_v15 = vshrl.u32 %v293_v3, 16  ;;  %v432_v16 = vshll.u32 %v293_v3, 16  ;;  %v302_v61 = vld [vmem:[%s4724_s20 + $0x54] sm:$0xf] }
  0x20   : > { %v422_v18 = vrot.slane %v421_v9, 4  ;;  %v411_v19 = vor.u32 %v410_v10, %v407_v7  ;;  %v444_v20 = vrot.slane %v442_v12, 4  ;;  %v462_v21 = vshll.u32 %v297_v8, 16 }
  0x21   : > { %726 = vrot.lane.b32.xlu1 %v403_v4, %s4677_s21  ;;  %v393_v23 = vsel %vm4735_vm2, %v388_v13, %v392_v40  ;;  %v450_v24 = vrot.slane %v448_v14, 5  ;;  %v431_v25 = vrot.slane %v429_v15, 4  ;;  %v434_v26 = vrot.slane %v432_v16, 5  ;;  %v307_v15 = vld [vmem:[%s4724_s20 + $0x68] sm:$0x1] }
  0x22   : > { %724 = vrot.lane.b32.xlu0 %v393_v23, %s4677_s21  ;;  %v427_v29 = vsel %vm4735_vm2, %v422_v18, %v426_v6  ;;  %v412_v30 = vrot.slane %v411_v19, 4  ;;  %v445_v31 = vor.u32 %v444_v20, %v440_v11  ;;  %v464_v32 = vrot.slane %v462_v21, 5  ;;  %v306_v6 = vld [vmem:[%s4724_s20 + $0x64] sm:$0xf]  ;;  %v305_v16 = vld [vmem:[%s4724_s20 + $0x60] sm:$0xf] }
  0x23   : > { %v435_v33 = vor.u32 %v434_v26, %v431_v25  ;;  %v466_v34 = vshrl.u32 %v297_v8, 16  ;;  %v472_v35 = vshll.u32 %v298_v17, 16  ;;  %v453_v36 = vshrl.u32 %v296_v22, 16  ;;  %v309_v25 = vld [vmem:[%s4724_s20 + $0x70] sm:$0xf] }
  0x24   : > { %v417_v38 = vsel %vm4735_vm2, %v412_v30, %v416_v63  ;;  %v446_v39 = vrot.slane %v445_v31, 4  ;;  %v456_v40 = vshll.u32 %v296_v22, 16  ;;  %v486_v41 = vshll.u32 %v300_v28, 16 }
  0x25   : > { %730 = vrot.lane.b32.xlu1 %v427_v29, %s4677_s21  ;;  %v436_v43 = vrot.slane %v435_v33, 4  ;;  %v468_v44 = vrot.slane %v466_v34, 4  ;;  %v474_v45 = vrot.slane %v472_v35, 5  ;;  %v455_v46 = vrot.slane %v453_v36, 4  ;;  %v310_v35 = vld [vmem:[%s4724_s20 + $0x74] sm:$0x1] }
  0x26   : > { %728 = vrot.lane.b32.xlu0 %v417_v38, %s4677_s21  ;;  %v451_v48 = vsel %vm4735_vm2, %v446_v39, %v450_v24  ;;  %v458_v49 = vrot.slane %v456_v40, 5  ;;  %v488_v50 = vrot.slane %v486_v41, 5  ;;  %v490_v51 = vshrl.u32 %v300_v28, 16  ;;  %v308_v36 = vld [vmem:[%s4724_s20 + $0x6c] sm:$0xf] }
  0x27   : > { %v441_v52 = vsel %vm4735_vm2, %v436_v43, %v440_v11  ;;  %v469_v53 = vor.u32 %v468_v44, %v464_v32  ;;  %v496_v54 = vshll.u32 %v301_v37, 16  ;;  %v477_v55 = vshrl.u32 %v299_v42, 16 }
  0x28   : > { %v459_v57 = vor.u32 %v458_v49, %v455_v46  ;;  %v492_v58 = vrot.slane %v490_v51, 4  ;;  %v480_v59 = vshll.u32 %v299_v42, 16  ;;  %v510_v60 = vshll.u32 %v303_v47, 16 }
  0x29   : > { %734 = vrot.lane.b32.xlu1 %v451_v48, %s4677_s21  ;;  %v470_v62 = vrot.slane %v469_v53, 4  ;;  %v498_v63 = vrot.slane %v496_v54, 5  ;;  %v479_v0 = vrot.slane %v477_v55, 4  ;;  %v514_v1 = vshrl.u32 %v303_v47, 16  ;;  %v313_v54 = vld [vmem:[%s4724_s20 + $0x80] sm:$0x1] }
  0x2a   : > { %732 = vrot.lane.b32.xlu0 %v441_v52, %s4677_s21  ;;  %v460_v2 = vrot.slane %v459_v57, 4  ;;  %v493_v3 = vor.u32 %v492_v58, %v488_v50  ;;  %v482_v4 = vrot.slane %v480_v59, 5  ;;  %v512_v5 = vrot.slane %v510_v60, 5  ;;  %v311_v55 = vld [vmem:[%s4724_s20 + $0x78] sm:$0xf] }
  0x2b   : > { %v475_v7 = vsel %vm4735_vm2, %v470_v62, %v474_v45  ;;  %v516_v8 = vrot.slane %v514_v1, 4  ;;  %v520_v9 = vshll.u32 %v304_v56, 16  ;;  %v501_v10 = vshrl.u32 %v302_v61, 16  ;;  %v312_v45 = vld [vmem:[%s4724_s20 + $0x7c] sm:$0xf] }
  0x2c   : > { %v465_v11 = vsel %vm4735_vm2, %v460_v2, %v464_v32  ;;  %v494_v12 = vrot.slane %v493_v3, 4  ;;  %v483_v13 = vor.u32 %v482_v4, %v479_v0  ;;  %v504_v14 = vshll.u32 %v302_v61, 16  ;;  %v315_v0 = vld [vmem:[%s4724_s20 + $0x88] sm:$0xf] }
  0x2d   : > { %738 = vrot.lane.b32.xlu1 %v475_v7, %s4677_s21  ;;  %v517_v17 = vor.u32 %v516_v8, %v512_v5  ;;  %v522_v18 = vrot.slane %v520_v9, 5  ;;  %v503_v19 = vrot.slane %v501_v10, 4  ;;  %v534_v20 = vshll.u32 %v306_v6, 16  ;;  %v314_v10 = vld [vmem:[%s4724_s20 + $0x84] sm:$0xf] }
  0x2e   : > { %736 = vrot.lane.b32.xlu0 %v465_v11, %s4677_s21  ;;  %v499_v21 = vsel %vm4735_vm2, %v494_v12, %v498_v63  ;;  %v484_v22 = vrot.slane %v483_v13, 4  ;;  %v506_v23 = vrot.slane %v504_v14, 5  ;;  %v538_v24 = vshrl.u32 %v306_v6, 16 }
  0x2f   : > { %v518_v26 = vrot.slane %v517_v17, 4  ;;  %v536_v28 = vrot.slane %v534_v20, 5  ;;  %v544_v29 = vshll.u32 %v307_v15, 16  ;;  %v525_v30 = vshrl.u32 %v305_v16, 16 }
  0x30   : > { %v489_v31 = vsel %vm4735_vm2, %v484_v22, %v488_v50  ;;  %v507_v32 = vor.u32 %v506_v23, %v503_v19  ;;  %v540_v33 = vrot.slane %v538_v24, 4  ;;  %v528_v34 = vshll.u32 %v305_v16, 16  ;;  %v318_v19 = vld [vmem:[%s4724_s20 + $0x94] sm:$0xf]  ;;  %v319_v24 = vld [vmem:[%s4724_s20 + $0x98] sm:$0x1] }
  0x31   : > { %742 = vrot.lane.b32.xlu1 %v499_v21, %s4677_s21  ;;  %v523_v37 = vsel %vm4735_vm2, %v518_v26, %v522_v18  ;;  %v546_v38 = vrot.slane %v544_v29, 5  ;;  %v527_v39 = vrot.slane %v525_v30, 4  ;;  %v558_v40 = vshll.u32 %v309_v25, 16  ;;  %v317_v30 = vld [vmem:[%s4724_s20 + $0x90] sm:$0xf] }
  0x32   : > { %740 = vrot.lane.b32.xlu0 %v489_v31, %s4677_s21  ;;  %v508_v41 = vrot.slane %v507_v32, 4  ;;  %v541_v42 = vor.u32 %v540_v33, %v536_v28  ;;  %v530_v43 = vrot.slane %v528_v34, 5  ;;  %v562_v44 = vshrl.u32 %v309_v25, 16 }
  0x33   : > { %v560_v46 = vrot.slane %v558_v40, 5  ;;  %v568_v47 = vshll.u32 %v310_v35, 16  ;;  %v549_v48 = vshrl.u32 %v308_v36, 16  ;;  %v552_v49 = vshll.u32 %v308_v36, 16 }
  0x34   : > { %v513_v50 = vsel %vm4735_vm2, %v508_v41, %v512_v5  ;;  %v542_v51 = vrot.slane %v541_v42, 4  ;;  %v531_v52 = vor.u32 %v530_v43, %v527_v39  ;;  %v564_v53 = vrot.slane %v562_v44, 4  ;;  %v316_v5 = vld [vmem:[%s4724_s20 + $0x8c] sm:$0x1]  ;;  %v321_v39 = vld [vmem:[%s4724_s20 + $0xa0] sm:$0xf] }
  0x35   : > { %746 = vrot.lane.b32.xlu1 %v523_v37, %s4677_s21  ;;  %v570_v56 = vrot.slane %v568_v47, 5  ;;  %v551_v57 = vrot.slane %v549_v48, 4  ;;  %v554_v58 = vrot.slane %v552_v49, 5  ;;  %v582_v59 = vshll.u32 %v312_v45, 16  ;;  %v322_v48 = vld [vmem:[%s4724_s20 + $0xa4] sm:$0x1] }
  0x36   : > { %744 = vrot.lane.b32.xlu0 %v513_v50, %s4677_s21  ;;  %v547_v60 = vsel %vm4735_vm2, %v542_v51, %v546_v38  ;;  %v532_v61 = vrot.slane %v531_v52, 4  ;;  %v565_v62 = vor.u32 %v564_v53, %v560_v46  ;;  %v586_v63 = vshrl.u32 %v312_v45, 16  ;;  %v320_v49 = vld [vmem:[%s4724_s20 + $0x9c] sm:$0xf] }
  0x37   : > { %v555_v1 = vor.u32 %v554_v58, %v551_v57  ;;  %v584_v2 = vrot.slane %v582_v59, 5  ;;  %v592_v3 = vshll.u32 %v313_v54, 16  ;;  %v573_v4 = vshrl.u32 %v311_v55, 16  ;;  %v324_v58 = vld [vmem:[%s4724_s20 + $0xac] sm:$0xf] }
  0x38   : > { %v537_v6 = vsel %vm4735_vm2, %v532_v61, %v536_v28  ;;  %v566_v7 = vrot.slane %v565_v62, 4  ;;  %v588_v8 = vrot.slane %v586_v63, 4  ;;  %v576_v9 = vshll.u32 %v311_v55, 16 }
  0x39   : > { %750 = vrot.lane.b32.xlu1 %v547_v60, %s4677_s21  ;;  %v556_v11 = vrot.slane %v555_v1, 4  ;;  %v594_v12 = vrot.slane %v592_v3, 5  ;;  %v575_v13 = vrot.slane %v573_v4, 4  ;;  %v606_v14 = vshll.u32 %v315_v0, 16  ;;  %v325_v3 = vld [vmem:[%s4724_s20 + $0xb0] sm:$0x1] }
  0x3a   : > { %748 = vrot.lane.b32.xlu0 %v537_v6, %s4677_s21  ;;  %v571_v15 = vsel %vm4735_vm2, %v566_v7, %v570_v56  ;;  %v589_v16 = vor.u32 %v588_v8, %v584_v2  ;;  %v578_v17 = vrot.slane %v576_v9, 5  ;;  %v610_v18 = vshrl.u32 %v315_v0, 16  ;;  %v323_v4 = vld [vmem:[%s4724_s20 + $0xa8] sm:$0xf] }
  0x3b   : > { %v561_v20 = vsel %vm4735_vm2, %v556_v11, %v560_v46  ;;  %v608_v21 = vrot.slane %v606_v14, 5  ;;  %v616_v22 = vshll.u32 %v316_v5, 16  ;;  %v597_v23 = vshrl.u32 %v314_v10, 16 }
  0x3c   : > { %v590_v25 = vrot.slane %v589_v16, 4  ;;  %v579_v26 = vor.u32 %v578_v17, %v575_v13  ;;  %v612_v28 = vrot.slane %v610_v18, 4  ;;  %v600_v29 = vshll.u32 %v314_v10, 16  ;;  %v327_v13 = vld [vmem:[%s4724_s20 + $0xb8] sm:$0xf] }
  0x3d   : > { %754 = vrot.lane.b32.xlu1 %v571_v15, %s4677_s21  ;;  %v618_v31 = vrot.slane %v616_v22, 5  ;;  %v599_v32 = vrot.slane %v597_v23, 4  ;;  %v630_v33 = vshll.u32 %v318_v19, 16  ;;  %v634_v34 = vshrl.u32 %v318_v19, 16  ;;  %v328_v22 = vld [vmem:[%s4724_s20 + $0xbc] sm:$0x1] }
  0x3e   : > { %752 = vrot.lane.b32.xlu0 %v561_v20, %s4677_s21  ;;  %v595_v35 = vsel %vm4735_vm2, %v590_v25, %v594_v12  ;;  %v580_v36 = vrot.slane %v579_v26, 4  ;;  %v613_v37 = vor.u32 %v612_v28, %v608_v21  ;;  %v602_v38 = vrot.slane %v600_v29, 5  ;;  %v326_v23 = vld [vmem:[%s4724_s20 + $0xb4] sm:$0xf] }
  0x3f   : > { %v632_v40 = vrot.slane %v630_v33, 5  ;;  %v636_v41 = vrot.slane %v634_v34, 4  ;;  %v640_v42 = vshll.u32 %v319_v24, 16  ;;  %v621_v43 = vshrl.u32 %v317_v30, 16 }
  0x40   : > { %v585_v44 = vsel %vm4735_vm2, %v580_v36, %v584_v2  ;;  %v614_v45 = vrot.slane %v613_v37, 4  ;;  %v603_v46 = vor.u32 %v602_v38, %v599_v32  ;;  %v624_v47 = vshll.u32 %v317_v30, 16  ;;  %v846_v37 = vld [vmem:[%s4724_s20 + $0x4] sm:$0xf] }
  0x41   : > { %758 = vrot.lane.b32.xlu1 %v595_v35, %s4677_s21  ;;  %v637_v50 = vor.u32 %v636_v41, %v632_v40  ;;  %v642_v51 = vrot.slane %v640_v42, 5  ;;  %v623_v52 = vrot.slane %v621_v43, 4  ;;  %v654_v53 = vshll.u32 %v321_v39, 16 }
  0x42   : > { %756 = vrot.lane.b32.xlu0 %v585_v44, %s4677_s21  ;;  %v619_v54 = vsel %vm4735_vm2, %v614_v45, %v618_v31  ;;  %v604_v55 = vrot.slane %v603_v46, 4  ;;  %v626_v56 = vrot.slane %v624_v47, 5  ;;  %v658_v57 = vshrl.u32 %v321_v39, 16 }
  0x43   : > { %v638_v59 = vrot.slane %v637_v50, 4  ;;  %v656_v60 = vrot.slane %v654_v53, 5  ;;  %v664_v61 = vshll.u32 %v322_v48, 16  ;;  %v645_v62 = vshrl.u32 %v320_v49, 16  ;;  %v847_v48 = vld [vmem:[%s4724_s20 + $0x8] sm:$0x1] }
  0x44   : > { %v609_v63 = vsel %vm4735_vm2, %v604_v55, %v608_v21  ;;  %v627_v0 = vor.u32 %v626_v56, %v623_v52  ;;  %v660_v1 = vrot.slane %v658_v57, 4  ;;  %v648_v2 = vshll.u32 %v320_v49, 16  ;;  %v218_v56 = vld [vmem:[%s4724_s20 + $0xc] sm:$0xf] }
  0x45   : > { %762 = vrot.lane.b32.xlu1 %v619_v54, %s4677_s21  ;;  %v643_v5 = vsel %vm4735_vm2, %v638_v59, %v642_v51  ;;  %v666_v6 = vrot.slane %v664_v61, 5  ;;  %v647_v7 = vrot.slane %v645_v62, 4  ;;  %v678_v8 = vshll.u32 %v324_v58, 16  ;;  %v849_v51 = vld [vmem:[%s4724_s20 + $0x10] sm:$0xf] }
  0x46   : > { %760 = vrot.lane.b32.xlu0 %v609_v63, %s4677_s21  ;;  %v628_v9 = vrot.slane %v627_v0, 4  ;;  %v661_v10 = vor.u32 %v660_v1, %v656_v60  ;;  %v650_v11 = vrot.slane %v648_v2, 5  ;;  %v682_v12 = vshrl.u32 %v324_v58, 16  ;;  %v845_v54 = vld [vmem:[%s4724_s20] sm:$0xe] }
  0x47   : > { %v680_v14 = vrot.slane %v678_v8, 5  ;;  %v688_v15 = vshll.u32 %v325_v3, 16  ;;  %v669_v16 = vshrl.u32 %v323_v4, 16  ;;  %v672_v17 = vshll.u32 %v323_v4, 16  ;;  %251 = vst.msk [vmem:[#allocation2 + $0x8] sm:$0xf] %vm248_vm3, %v218_v56 }
  0x48   : > { %v633_v18 = vsel %vm4735_vm2, %v628_v9, %v632_v40  ;;  %v662_v19 = vrot.slane %v661_v10, 4  ;;  %v651_v20 = vor.u32 %v650_v11, %v647_v7  ;;  %v684_v21 = vrot.slane %v682_v12, 4  ;;  %v216_v61 = vld [vmem:[%s4724_s20] sm:$0xf]  ;;  %v850_v0 = vld [vmem:[%s4724_s20 + $0x14] sm:$0x1] }
  0x49   : > { %766 = vrot.lane.b32.xlu1 %v643_v5, %s4677_s21  ;;  %v690_v24 = vrot.slane %v688_v15, 5  ;;  %v671_v25 = vrot.slane %v669_v16, 4  ;;  %v674_v26 = vrot.slane %v672_v17, 5  ;;  %v702_v28 = vshll.u32 %v327_v13, 16  ;;  %v852_v1 = vld [vmem:[%s4724_s20 + $0x1c] sm:$0xf] }
  0x4a   : > { %764 = vrot.lane.b32.xlu0 %v633_v18, %s4677_s21  ;;  %v667_v29 = vsel %vm4735_vm2, %v662_v19, %v666_v6  ;;  %v652_v30 = vrot.slane %v651_v20, 4  ;;  %v685_v31 = vor.u32 %v684_v21, %v680_v14  ;;  %v706_v32 = vshrl.u32 %v327_v13, 16  ;;  %249 = vst.msk [vmem:[#allocation2] sm:$0xf] %vm248_vm3, %v216_v61  ;;  %v848_v3 = vld [vmem:[%s4724_s20 + $0xc] sm:$0xe] }
  0x4b   : > { %v675_v33 = vor.u32 %v674_v26, %v671_v25  ;;  %v704_v34 = vrot.slane %v702_v28, 5  ;;  %v712_v35 = vshll.u32 %v328_v22, 16  ;;  %v693_v36 = vshrl.u32 %v326_v23, 16  ;;  %v219_v4 = vld [vmem:[%s4724_s20 + $0x10] sm:$0xf] }
  0x4c   : > { %v657_v38 = vsel %vm4735_vm2, %v652_v30, %v656_v60  ;;  %v686_v39 = vrot.slane %v685_v31, 4  ;;  %v708_v40 = vrot.slane %v706_v32, 4  ;;  %v696_v41 = vshll.u32 %v326_v23, 16  ;;  %v217_v5 = vld [vmem:[%s4724_s20 + $0x4] sm:$0xf] }
  0x4d   : > { %770 = vrot.lane.b32.xlu1 %v667_v29, %s4677_s21  ;;  %v676_v42 = vrot.slane %v675_v33, 4  ;;  %v714_v43 = vrot.slane %v712_v35, 5  ;;  %v695_v44 = vrot.slane %v693_v36, 4  ;;  %v946_v49 = vrot.slane %v846_v37, 5  ;;  %252 = vst.msk [vmem:[#allocation2 + $0xc] sm:$0xf] %vm248_vm3, %v219_v4 }
  0x4e   : > { %768 = vrot.lane.b32.xlu0 %v657_v38, %s4677_s21  ;;  %v691_v45 = vsel %vm4735_vm2, %v686_v39, %v690_v24  ;;  %v709_v46 = vor.u32 %v708_v40, %v704_v34  ;;  %v698_v47 = vrot.slane %v696_v41, 5  ;;  %v949_v55 = vrot.slane %v847_v48, 5  ;;  %250 = vst.msk [vmem:[#allocation2 + $0x4] sm:$0xf] %vm248_vm3, %v217_v5  ;;  %v853_v12 = vld [vmem:[%s4724_s20 + $0x20] sm:$0x1] }
  0x4f   : > { %v681_v50 = vsel %vm4735_vm2, %v676_v42, %v680_v14  ;;  %v948_v59 = vrot.slane %v946_v49, 4  ;;  %v953_v60 = vrot.slane %v849_v51, 5  ;;  %v4162_v63 = vrot.slane %v845_v54, 9  ;;  %v855_v13 = vld [vmem:[%s4724_s20 + $0x28] sm:$0xf] }
  0x50   : > { %v710_v52 = vrot.slane %v709_v46, 4  ;;  %v699_v53 = vor.u32 %v698_v47, %v695_v44  ;;  %v956_v8 = vrot.slane %v850_v0, 5  ;;  %v960_v9 = vrot.slane %v852_v1, 5  ;;  %v851_v14 = vld [vmem:[%s4724_s20 + $0x18] sm:$0xe] }
  0x51   : > { %774 = vrot.lane.b32.xlu1 %v691_v45, %s4677_s21  ;;  %v950_v6 = vsel %vm4879_vm6, %v948_v59, %v949_v55  ;;  %v955_v7 = vrot.slane %v953_v60, 4  ;;  %v947_v10 = vsel %vm4879_vm6, %v4162_v63, %v946_v49  ;;  %v4163_v11 = vrot.slane %v848_v3, 9  ;;  %v221_v15 = vld [vmem:[%s4724_s20 + $0x1c] sm:$0xf]  ;;  %v220_v16 = vld [vmem:[%s4724_s20 + $0x18] sm:$0xf] }
  0x52   : > { %772 = vrot.lane.b32.xlu0 %v681_v50, %s4677_s21  ;;  %v715_v57 = vsel %vm4735_vm2, %v710_v52, %v714_v43  ;;  %v700_v58 = vrot.slane %v699_v53, 4  ;;  %254 = vst.msk [vmem:[#allocation2 + $0x14] sm:$0xf] %vm248_vm3, %v221_v15  ;;  %v962_v18 = vrot.slane %v960_v9, 4  ;;  %v963_v19 = vrot.slane %v853_v12, 5 }
  0x53   : > { %v957_v17 = vsel %vm4879_vm6, %v955_v7, %v956_v8  ;;  %v967_v20 = vrot.slane %v855_v13, 5  ;;  %253 = vst.msk [vmem:[#allocation2 + $0x10] sm:$0xf] %vm248_vm3, %v220_v16  ;;  %v954_v21 = vsel %vm4879_vm6, %v4163_v11, %v953_v60  ;;  %v4164_v22 = vrot.slane %v851_v14, 9  ;;  %v856_v23 = vld [vmem:[%s4724_s20 + $0x2c] sm:$0x1] }
  0x54   : > { %v705_v2 = vsel %vm4735_vm2, %v700_v58, %v704_v34  ;;  %v858_v24 = vld [vmem:[%s4724_s20 + $0x34] sm:$0xf]  ;;  %v854_v25 = vld [vmem:[%s4724_s20 + $0x24] sm:$0xe]  ;;  %v223_v26 = vld [vmem:[%s4724_s20 + $0x28] sm:$0xf]  ;;  %v964_v29 = vsel %vm4879_vm6, %v962_v18, %v963_v19 }
  0x55   : > { %778 = vrot.lane.b32.xlu1 %v715_v57, %s4677_s21  ;;  %256 = vst.msk [vmem:[#allocation2 + $0x1c] sm:$0xf] %vm248_vm3, %v223_v26  ;;  %v222_v28 = vld [vmem:[%s4724_s20 + $0x24] sm:$0xf]  ;;  %v969_v30 = vrot.slane %v967_v20, 4  ;;  %v970_v31 = vrot.slane %v856_v23, 5  ;;  %v961_v34 = vsel %vm4879_vm6, %v4164_v22, %v960_v9 }
  0x56   : > { %776 = vrot.lane.b32.xlu0 %v705_v2, %s4677_s21  ;;  %v859_v32 = vld [vmem:[%s4724_s20 + $0x38] sm:$0x1]  ;;  %v974_v33 = vrot.slane %v858_v24, 5  ;;  %255 = vst.msk [vmem:[#allocation2 + $0x18] sm:$0xf] %vm248_vm3, %v222_v28  ;;  %v4165_v35 = vrot.slane %v854_v25, 9 }
  0x57   : > { %v861_v36 = vld [vmem:[%s4724_s20 + $0x40] sm:$0xf]  ;;  %v225_v37 = vld [vmem:[%s4724_s20 + $0x34] sm:$0xf]  ;;  %v857_v38 = vld [vmem:[%s4724_s20 + $0x30] sm:$0xe]  ;;  %v971_v41 = vsel %vm4879_vm6, %v969_v30, %v970_v31 }
  0x58   : > { %258 = vst.msk [vmem:[#allocation2 + $0x24] sm:$0xf] %vm248_vm3, %v225_v37  ;;  %v224_v39 = vld [vmem:[%s4724_s20 + $0x30] sm:$0xf]  ;;  %v862_v40 = vld [vmem:[%s4724_s20 + $0x44] sm:$0x1]  ;;  %v968_v46 = vsel %vm4879_vm6, %v4165_v35, %v967_v20 }
  0x59   : > { %1058 = vrot.lane.b32.xlu1 %v950_v6, %s4678_s22  ;;  %257 = vst.msk [vmem:[#allocation2 + $0x20] sm:$0xf] %vm248_vm3, %v224_v39  ;;  %v976_v42 = vrot.slane %v974_v33, 4  ;;  %v977_v43 = vrot.slane %v859_v32, 5  ;;  %v981_v44 = vrot.slane %v861_v36, 5  ;;  %v4166_v47 = vrot.slane %v857_v38, 9 }
  0x5a   : > { %1056 = vrot.lane.b32.xlu0 %v947_v10, %s4678_s22  ;;  %v227_v45 = vld [vmem:[%s4724_s20 + $0x40] sm:$0xf]  ;;  %v864_v48 = vld [vmem:[%s4724_s20 + $0x4c] sm:$0xf]  ;;  %v226_v49 = vld [vmem:[%s4724_s20 + $0x3c] sm:$0xf] }
  0x5b   : > { %260 = vst.msk [vmem:[#allocation2 + $0x2c] sm:$0xf] %vm248_vm3, %v227_v45  ;;  %v860_v50 = vld [vmem:[%s4724_s20 + $0x3c] sm:$0xe]  ;;  %259 = vst.msk [vmem:[#allocation2 + $0x28] sm:$0xf] %vm248_vm3, %v226_v49  ;;  %v978_v53 = vsel %vm4879_vm6, %v976_v42, %v977_v43  ;;  %v975_v58 = vsel %vm4879_vm6, %v4166_v47, %v974_v33 }
  0x5c   : > { %v865_v51 = vld [vmem:[%s4724_s20 + $0x50] sm:$0x1]  ;;  %v229_v52 = vld [vmem:[%s4724_s20 + $0x4c] sm:$0xf]  ;;  %v983_v54 = vrot.slane %v981_v44, 4  ;;  %v984_v55 = vrot.slane %v862_v40, 5 }
  0x5d   : > { %1062 = vrot.lane.b32.xlu1 %v957_v17, %s4678_s22  ;;  %v988_v56 = vrot.slane %v864_v48, 5  ;;  %262 = vst.msk [vmem:[#allocation2 + $0x34] sm:$0xf] %vm248_vm3, %v229_v52  ;;  %v228_v57 = vld [vmem:[%s4724_s20 + $0x48] sm:$0xf]  ;;  %v4167_v59 = vrot.slane %v860_v50, 9 }
  0x5e   : > { %1060 = vrot.lane.b32.xlu0 %v954_v21, %s4678_s22  ;;  %v867_v60 = vld [vmem:[%s4724_s20 + $0x58] sm:$0xf]  ;;  %261 = vst.msk [vmem:[#allocation2 + $0x30] sm:$0xf] %vm248_vm3, %v228_v57  ;;  %v863_v63 = vld [vmem:[%s4724_s20 + $0x48] sm:$0xe]  ;;  %v985_v5 = vsel %vm4879_vm6, %v983_v54, %v984_v55 }
  0x5f   : > { %v231_v61 = vld [vmem:[%s4724_s20 + $0x58] sm:$0xf]  ;;  %v868_v0 = vld [vmem:[%s4724_s20 + $0x5c] sm:$0x1]  ;;  %v230_v1 = vld [vmem:[%s4724_s20 + $0x54] sm:$0xf]  ;;  %v982_v10 = vsel %vm4879_vm6, %v4167_v59, %v981_v44 }
  0x60   : > { %264 = vst.msk [vmem:[#allocation2 + $0x3c] sm:$0xf] %vm248_vm3, %v231_v61  ;;  %v991_v2 = vrot.slane %v865_v51, 5  ;;  %263 = vst.msk [vmem:[#allocation2 + $0x38] sm:$0xf] %vm248_vm3, %v230_v1  ;;  %v990_v6 = vrot.slane %v988_v56, 4 }
  0x61   : > { %1066 = vrot.lane.b32.xlu1 %v964_v29, %s4678_s22  ;;  %v233_v3 = vld [vmem:[%s4724_s20 + $0x64] sm:$0xf]  ;;  %v232_v4 = vld [vmem:[%s4724_s20 + $0x60] sm:$0xf]  ;;  %v995_v7 = vrot.slane %v867_v60, 5  ;;  %v4168_v11 = vrot.slane %v863_v63, 9 }
  0x62   : > { %1064 = vrot.lane.b32.xlu0 %v961_v34, %s4678_s22  ;;  %266 = vst.msk [vmem:[#allocation2 + $0x44] sm:$0xf] %vm248_vm3, %v233_v3  ;;  %265 = vst.msk [vmem:[#allocation2 + $0x40] sm:$0xf] %vm248_vm3, %v232_v4  ;;  %v235_v8 = vld [vmem:[%s4724_s20 + $0x70] sm:$0xf]  ;;  %v992_v19 = vsel %vm4879_vm6, %v990_v6, %v991_v2 }
  0x63   : > { %v234_v9 = vld [vmem:[%s4724_s20 + $0x6c] sm:$0xf]  ;;  %v870_v12 = vld [vmem:[%s4724_s20 + $0x64] sm:$0xf]  ;;  %268 = vst.msk [vmem:[#allocation2 + $0x4c] sm:$0xf] %vm248_vm3, %v235_v8  ;;  %v989_v24 = vsel %vm4879_vm6, %v4168_v11, %v988_v56 }
  0x64   : > { %267 = vst.msk [vmem:[#allocation2 + $0x48] sm:$0xf] %vm248_vm3, %v234_v9  ;;  %v237_v13 = vld [vmem:[%s4724_s20 + $0x7c] sm:$0xf]  ;;  %v866_v14 = vld [vmem:[%s4724_s20 + $0x54] sm:$0xe] }
  0x65   : > { %1070 = vrot.lane.b32.xlu1 %v971_v41, %s4678_s22  ;;  %270 = vst.msk [vmem:[#allocation2 + $0x54] sm:$0xf] %vm248_vm3, %v237_v13  ;;  %v236_v15 = vld [vmem:[%s4724_s20 + $0x78] sm:$0xf]  ;;  %v998_v16 = vrot.slane %v868_v0, 5  ;;  %v997_v20 = vrot.slane %v995_v7, 4 }
  0x66   : > { %1068 = vrot.lane.b32.xlu0 %v968_v46, %s4678_s22  ;;  %269 = vst.msk [vmem:[#allocation2 + $0x50] sm:$0xf] %vm248_vm3, %v236_v15  ;;  %v239_v17 = vld [vmem:[%s4724_s20 + $0x88] sm:$0xf]  ;;  %v238_v18 = vld [vmem:[%s4724_s20 + $0x84] sm:$0xf] }
  0x67   : > { %v1002_v21 = vrot.slane %v870_v12, 5  ;;  %272 = vst.msk [vmem:[#allocation2 + $0x5c] sm:$0xf] %vm248_vm3, %v239_v17  ;;  %271 = vst.msk [vmem:[#allocation2 + $0x58] sm:$0xf] %vm248_vm3, %v238_v18  ;;  %v4169_v25 = vrot.slane %v866_v14, 9  ;;  %v999_v32 = vsel %vm4879_vm6, %v997_v20, %v998_v16 }
  0x68   : > { %v241_v22 = vld [vmem:[%s4724_s20 + $0x94] sm:$0xf]  ;;  %v240_v23 = vld [vmem:[%s4724_s20 + $0x90] sm:$0xf]  ;;  %v871_v26 = vld [vmem:[%s4724_s20 + $0x68] sm:$0x1] }
  0x69   : > { %1074 = vrot.lane.b32.xlu1 %v978_v53, %s4678_s22  ;;  %v873_v28 = vld [vmem:[%s4724_s20 + $0x70] sm:$0xf]  ;;  %274 = vst.msk [vmem:[#allocation2 + $0x64] sm:$0xf] %vm248_vm3, %v241_v22  ;;  %273 = vst.msk [vmem:[#allocation2 + $0x60] sm:$0xf] %vm248_vm3, %v240_v23  ;;  %v996_v36 = vsel %vm4879_vm6, %v4169_v25, %v995_v7 }
  0x6a   : > { %1072 = vrot.lane.b32.xlu0 %v975_v58, %s4678_s22  ;;  %v869_v29 = vld [vmem:[%s4724_s20 + $0x60] sm:$0xe]  ;;  %v242_v31 = vld [vmem:[%s4724_s20 + $0x9c] sm:$0xf]  ;;  %v1004_v33 = vrot.slane %v1002_v21, 4  ;;  %v1005_v34 = vrot.slane %v871_v26, 5 }
  0x6b   : > { %v243_v30 = vld [vmem:[%s4724_s20 + $0xa0] sm:$0xf]  ;;  %v1009_v35 = vrot.slane %v873_v28, 5  ;;  %275 = vst.msk [vmem:[#allocation2 + $0x68] sm:$0xf] %vm248_vm3, %v242_v31  ;;  %v4170_v37 = vrot.slane %v869_v29, 9 }
  0x6c   : > { %276 = vst.msk [vmem:[#allocation2 + $0x6c] sm:$0xf] %vm248_vm3, %v243_v30  ;;  %v874_v38 = vld [vmem:[%s4724_s20 + $0x74] sm:$0x1]  ;;  %v876_v39 = vld [vmem:[%s4724_s20 + $0x7c] sm:$0xf]  ;;  %v1006_v43 = vsel %vm4879_vm6, %v1004_v33, %v1005_v34 }
  0x6d   : > { %1078 = vrot.lane.b32.xlu1 %v985_v5, %s4678_s22  ;;  %v872_v40 = vld [vmem:[%s4724_s20 + $0x6c] sm:$0xe]  ;;  %v244_v42 = vld [vmem:[%s4724_s20 + $0xa8] sm:$0xf]  ;;  %v1011_v44 = vrot.slane %v1009_v35, 4  ;;  %v1012_v45 = vrot.slane %v874_v38, 5  ;;  %v1003_v48 = vsel %vm4879_vm6, %v4170_v37, %v1002_v21 }
  0x6e   : > { %1076 = vrot.lane.b32.xlu0 %v982_v10, %s4678_s22  ;;  %v245_v41 = vld [vmem:[%s4724_s20 + $0xac] sm:$0xf]  ;;  %277 = vst.msk [vmem:[#allocation2 + $0x70] sm:$0xf] %vm248_vm3, %v244_v42  ;;  %v877_v46 = vld [vmem:[%s4724_s20 + $0x80] sm:$0x1] }
  0x6f   : > { %278 = vst.msk [vmem:[#allocation2 + $0x74] sm:$0xf] %vm248_vm3, %v245_v41  ;;  %v1016_v47 = vrot.slane %v876_v39, 5  ;;  %v4171_v49 = vrot.slane %v872_v40, 9  ;;  %v879_v50 = vld [vmem:[%s4724_s20 + $0x88] sm:$0xf]  ;;  %v1013_v54 = vsel %vm4879_vm6, %v1011_v44, %v1012_v45 }
  0x70   : > { %v247_v51 = vld [vmem:[%s4724_s20 + $0xb8] sm:$0xf]  ;;  %v246_v53 = vld [vmem:[%s4724_s20 + $0xb4] sm:$0xf]  ;;  %v1019_v56 = vrot.slane %v877_v46, 5  ;;  %v1023_v57 = vrot.slane %v879_v50, 5 }
  0x71   : > { %1082 = vrot.lane.b32.xlu1 %v992_v19, %s4678_s22  ;;  %v875_v52 = vld [vmem:[%s4724_s20 + $0x78] sm:$0xe]  ;;  %280 = vst.msk [vmem:[#allocation2 + $0x7c] sm:$0xf] %vm248_vm3, %v247_v51  ;;  %279 = vst.msk [vmem:[#allocation2 + $0x78] sm:$0xf] %vm248_vm3, %v246_v53  ;;  %v1010_v58 = vsel %vm4879_vm6, %v4171_v49, %v1009_v35 }
  0x72   : > { %1080 = vrot.lane.b32.xlu0 %v989_v24, %s4678_s22  ;;  %v1018_v55 = vrot.slane %v1016_v47, 4  ;;  %v4172_v59 = vrot.slane %v875_v52, 9  ;;  %v880_v60 = vld [vmem:[%s4724_s20 + $0x8c] sm:$0x1]  ;;  %v882_v61 = vld [vmem:[%s4724_s20 + $0x94] sm:$0xf] }
  0x73   : > { %v878_v63 = vld [vmem:[%s4724_s20 + $0x84] sm:$0xe]  ;;  %v1025_v1 = vrot.slane %v1023_v57, 4  ;;  %v1026_v2 = vrot.slane %v880_v60, 5  ;;  %v1030_v3 = vrot.slane %v882_v61, 5  ;;  %vm3875_vm1 = vcmask 31744  }
  0x74   : > { %v1020_v0 = vsel %vm4879_vm6, %v1018_v55, %v1019_v56  ;;  %v1017_v4 = vsel %vm4879_vm6, %v4172_v59, %v1016_v47  ;;  %v4173_v5 = vrot.slane %v878_v63, 9  ;;  %v883_v6 = vld [vmem:[%s4724_s20 + $0x98] sm:$0x1]  ;;  %v885_v7 = vld [vmem:[%s4724_s20 + $0xa0] sm:$0xf] }
  0x75   : > { %1086 = vrot.lane.b32.xlu1 %v999_v32, %s4678_s22  ;;  %v881_v8 = vld [vmem:[%s4724_s20 + $0x90] sm:$0xe]  ;;  %v1027_v9 = vsel %vm4879_vm6, %v1025_v1, %v1026_v2  ;;  %v1032_v10 = vrot.slane %v1030_v3, 4  ;;  %v1033_v11 = vrot.slane %v883_v6, 5  ;;  %v1037_v12 = vrot.slane %v885_v7, 5 }
  0x76   : > { %1084 = vrot.lane.b32.xlu0 %v996_v36, %s4678_s22  ;;  %v1024_v13 = vsel %vm4879_vm6, %v4173_v5, %v1023_v57  ;;  %v4174_v14 = vrot.slane %v881_v8, 9  ;;  %v886_v15 = vld [vmem:[%s4724_s20 + $0xa4] sm:$0x1]  ;;  %v888_v16 = vld [vmem:[%s4724_s20 + $0xac] sm:$0xf] }
  0x77   : > { %v884_v17 = vld [vmem:[%s4724_s20 + $0x9c] sm:$0xe]  ;;  %v1034_v18 = vsel %vm4879_vm6, %v1032_v10, %v1033_v11  ;;  %v1039_v19 = vrot.slane %v1037_v12, 4  ;;  %v1040_v20 = vrot.slane %v886_v15, 5  ;;  %v1044_v21 = vrot.slane %v888_v16, 5 }
  0x78   : > { %v1031_v22 = vsel %vm4879_vm6, %v4174_v14, %v1030_v3  ;;  %v4175_v23 = vrot.slane %v884_v17, 9  ;;  %v889_v24 = vld [vmem:[%s4724_s20 + $0xb0] sm:$0x1]  ;;  %v891_v25 = vld [vmem:[%s4724_s20 + $0xb8] sm:$0xf] }
  0x79   : > { %1090 = vrot.lane.b32.xlu1 %v1006_v43, %s4678_s22  ;;  %v887_v26 = vld [vmem:[%s4724_s20 + $0xa8] sm:$0xe]  ;;  %v1041_v28 = vsel %vm4879_vm6, %v1039_v19, %v1040_v20  ;;  %v1046_v29 = vrot.slane %v1044_v21, 4  ;;  %v1047_v30 = vrot.slane %v889_v24, 5  ;;  %v1051_v31 = vrot.slane %v891_v25, 5 }
  0x7a   : > { %1088 = vrot.lane.b32.xlu0 %v1003_v48, %s4678_s22  ;;  %v1038_v33 = vsel %vm4879_vm6, %v4175_v23, %v1037_v12  ;;  %v4176_v34 = vrot.slane %v887_v26, 9  ;;  %v892_v35 = vld [vmem:[%s4724_s20 + $0xbc] sm:$0x1]  ;;  %v890_v37 = vld [vmem:[%s4724_s20 + $0xb4] sm:$0xe] }
  0x7b   : > { %v1048_v38 = vsel %vm4879_vm6, %v1046_v29, %v1047_v30  ;;  %v1053_v39 = vrot.slane %v1051_v31, 4  ;;  %v1054_v40 = vrot.slane %v892_v35, 5  ;;  %v4177_v43 = vrot.slane %v890_v37, 9  ;;  %v4179_v49 = vld [vmem:[%s4724_s20 + $0x10] sm:$0xf] }
  0x7c   : > { %v1045_v42 = vsel %vm4879_vm6, %v4176_v34, %v1044_v21  ;;  %v4178_v51 = vld [vmem:[%s4724_s20 + $0xc] sm:$0xf]  ;;  %v4181_v53 = vld [vmem:[%s4724_s20 + $0x1c] sm:$0xf]  ;;  %v4180_v55 = vld [vmem:[%s4724_s20 + $0x18] sm:$0xf] }
  0x7d   : > { %1094 = vrot.lane.b32.xlu1 %v1013_v54, %s4678_s22  ;;  %v1055_v45 = vsel %vm4879_vm6, %v1053_v39, %v1054_v40  ;;  %v1052_v47 = vsel %vm4879_vm6, %v4177_v43, %v1051_v31  ;;  %v4183_v57 = vld [vmem:[%s4724_s20 + $0x28] sm:$0xf]  ;;  %v4182_v59 = vld [vmem:[%s4724_s20 + $0x24] sm:$0xf]  ;;  %v4185_v61 = vld [vmem:[%s4724_s20 + $0x34] sm:$0xf] }
  0x7e   : > { %1092 = vrot.lane.b32.xlu0 %v1010_v58, %s4678_s22  ;;  %v4187_v2 = vld [vmem:[%s4724_s20 + $0x40] sm:$0xf]  ;;  %v4211_v5 = vld [vmem:[%s4724_s20 + $0x10] sm:$0xf]  ;;  %v4210_v7 = vld [vmem:[%s4724_s20 + $0xc] sm:$0xf] }
  0x7f   : > { %v4189_v8 = vld [vmem:[%s4724_s20 + $0x4c] sm:$0xf]  ;;  %v1441_v10 = vshrl.u32 %v4211_v5, 16  ;;  %v4188_v12 = vld [vmem:[%s4724_s20 + $0x48] sm:$0xf]  ;;  %v1431_v14 = vshll.u32 %v4210_v7, 16 }
  0x80   : > { %v4214_v15 = vld [vmem:[%s4724_s20 + $0x1c] sm:$0xf]  ;;  %v4213_v17 = vld [vmem:[%s4724_s20 + $0x18] sm:$0xf]  ;;  %v4190_v19 = vld [vmem:[%s4724_s20 + $0x54] sm:$0xf] }
  0x81   : > { %1098 = vrot.lane.b32.xlu1 %v1020_v0, %s4678_s22  ;;  %v4184_v0 = vld [vmem:[%s4724_s20 + $0x30] sm:$0xf]  ;;  %v1443_v21 = vrot.slane %v1441_v10, 4  ;;  %v1465_v23 = vshrl.u32 %v4214_v15, 16  ;;  %v4212_v25 = vld [vmem:[%s4724_s20 + $0x14] sm:$0x1] }
  0x82   : > { %1096 = vrot.lane.b32.xlu0 %v1017_v4, %s4678_s22  ;;  %v4186_v4 = vld [vmem:[%s4724_s20 + $0x3c] sm:$0xf]  ;;  %v1452_v29 = vshrl.u32 %v4213_v17, 16  ;;  %v1455_v30 = vshll.u32 %v4213_v17, 16  ;;  %v1447_v34 = vshll.u32 %v4212_v25, 16 }
  0x83   : > { %v4215_v40 = vld [vmem:[%s4724_s20 + $0x20] sm:$0x1] }
  0x85   : > { %1102 = vrot.lane.b32.xlu1 %v1027_v9, %s4678_s22  ;;  %v1437_v9 = vshll.u32 %v4211_v5, 16 }
  0x86   : > { %1100 = vrot.lane.b32.xlu0 %v1024_v13, %s4678_s22  ;;  %v1428_v13 = vshrl.u32 %v4210_v7, 16  ;;  %v4263_v7 = vld [vmem:[%s4724_s20 + $0x20] sm:$0x1] }
  0x87   : > { %v1439_v20 = vrot.slane %v1437_v9, 5 }
  0x88   : > { %v1430_v26 = vrot.slane %v1428_v13, 4  ;;  %v4261_v13 = vld [vmem:[%s4724_s20 + $0x18] sm:$0xe] }
  0x89   : > { %1106 = vrot.lane.b32.xlu1 %v1034_v18, %s4678_s22  ;;  %v4191_v18 = vld [vmem:[%s4724_s20 + $0x58] sm:$0xf] }
  0x8a   : > { %1104 = vrot.lane.b32.xlu0 %v1031_v22, %s4678_s22  ;;  %v1461_v22 = vshll.u32 %v4214_v15, 16 }
  0x8b   : > { %v721_v32 = vpop.permute.xlu1 %720 }
  0x8c   : > { %815 = vst.msk [vmem:[#allocation2 + $0x8] sm:$0xf] %vm812_vm7, %v721_v32  ;;  %v717_v36 = vpop.permute.xlu0 %716  ;;  %v4193_v32 = vld [vmem:[%s4724_s20 + $0x64] sm:$0xf]  ;;  %v1463_v35 = vrot.slane %v1461_v22, 5 }
  0x8d   : > { %813 = vst.msk [vmem:[#allocation2] sm:$0xf] %vm812_vm7, %v717_v36  ;;  %1110 = vrot.lane.b32.xlu1 %v1041_v28, %s4678_s22  ;;  %v1433_v28 = vrot.slane %v1431_v14, 5  ;;  %v1467_v36 = vrot.slane %v1465_v23, 4  ;;  %v4354_v14 = vld [vmem:[%s4724_s20 + $0x18] sm:$0xf] }
  0x8e   : > { %1108 = vrot.lane.b32.xlu0 %v1038_v33, %s4678_s22  ;;  %v1444_v33 = vor.u32 %v1443_v21, %v1439_v20  ;;  %v4307_v23 = vrot.slane %v4261_v13, 9  ;;  %v2523_v25 = vshll.u32 %v4354_v14, 16  ;;  %v5232_v13 = vld [vmem:[%s4724_s20 + $0x28] sm:$0xf] }
  0x8f   : > { %v723_v41 = vpop.permute.xlu1 %722  ;;  %v1434_v39 = vor.u32 %v1433_v28, %v1430_v26  ;;  %v4357_v26 = vld [vmem:[%s4724_s20 + $0x24] sm:$0xf] }
  0x90   : > { %816 = vst.msk [vmem:[#allocation2 + $0xc] sm:$0xf] %vm812_vm7, %v723_v41  ;;  %v719_v44 = vpop.permute.xlu0 %718  ;;  %v1454_v41 = vrot.slane %v1452_v29, 4 }
  0x91   : > { %814 = vst.msk [vmem:[#allocation2 + $0x4] sm:$0xf] %vm812_vm7, %v719_v44  ;;  %1114 = vrot.lane.b32.xlu1 %v1048_v38, %s4678_s22  ;;  %v4192_v38 = vld [vmem:[%s4724_s20 + $0x60] sm:$0xf]  ;;  %v4195_v44 = vld [vmem:[%s4724_s20 + $0x70] sm:$0xf] }
  0x92   : > { %1112 = vrot.lane.b32.xlu0 %v1045_v42, %s4678_s22  ;;  %v1457_v42 = vrot.slane %v1455_v30, 5 }
  0x93   : > { %v727_v46 = vpop.permute.xlu1 %726 }
  0x94   : > { %818 = vst.msk [vmem:[#allocation2 + $0x14] sm:$0xf] %vm812_vm7, %v727_v46  ;;  %v725_v48 = vpop.permute.xlu0 %724  ;;  %v1449_v46 = vrot.slane %v1447_v34, 5  ;;  %v2544_v34 = vshrl.u32 %v4357_v26, 16 }
  0x95   : > { %817 = vst.msk [vmem:[#allocation2 + $0x10] sm:$0xf] %vm812_vm7, %v725_v48  ;;  %1118 = vrot.lane.b32.xlu1 %v1055_v45, %s4678_s22  ;;  %v1445_v45 = vrot.slane %v1444_v33, 4  ;;  %v1471_v48 = vshll.u32 %v4215_v40, 16  ;;  %v2525_v40 = vrot.slane %v2523_v25, 5  ;;  %v4651_v25 = vld [vmem:[%s6310_s1 + $0x8] sm:$0xff]  }
  0x96   : > { %1116 = vrot.lane.b32.xlu0 %v1052_v47, %s4678_s22  ;;  %v1468_v47 = vor.u32 %v1467_v36, %v1463_v35 }
  0x97   : > { %v731_v50 = vpop.permute.xlu1 %730 }
  0x98   : > { %820 = vst.msk [vmem:[#allocation2 + $0x1c] sm:$0xf] %vm812_vm7, %v731_v50  ;;  %v729_v52 = vpop.permute.xlu0 %728  ;;  %v4194_v50 = vld [vmem:[%s4724_s20 + $0x6c] sm:$0xf] }
  0x99   : > { %819 = vst.msk [vmem:[#allocation2 + $0x18] sm:$0xf] %vm812_vm7, %v729_v52  ;;  %1252 = vrot.lane.b32.xlu1 %v4179_v49, %s4679_s23  ;;  %v1458_v52 = vor.u32 %v1457_v42, %v1454_v41  ;;  %v4359_v42 = vld [vmem:[%s4724_s20 + $0x2c] sm:$0x1] }
  0x9a   : > { %1250 = vrot.lane.b32.xlu0 %v4178_v51, %s4679_s23  ;;  %v1435_v51 = vrot.slane %v1434_v39, 4 }
  0x9b   : > { %v735_v54 = vpop.permute.xlu1 %734 }
  0x9c   : > { %822 = vst.msk [vmem:[#allocation2 + $0x24] sm:$0xf] %vm812_vm7, %v735_v54  ;;  %v733_v56 = vpop.permute.xlu0 %732 }
  0x9d   : > { %821 = vst.msk [vmem:[#allocation2 + $0x20] sm:$0xf] %vm812_vm7, %v733_v56  ;;  %1256 = vrot.lane.b32.xlu1 %v4181_v53, %s4679_s23  ;;  %v4259_v53 = vld [vmem:[%s4724_s20 + $0x10] sm:$0xf]  ;;  %v1469_v56 = vrot.slane %v1468_v47, 4 }
  0x9e   : > { %1254 = vrot.lane.b32.xlu0 %v4180_v55, %s4679_s23  ;;  %v1450_v55 = vsel %vm4735_vm2, %v1445_v45, %v1449_v46  ;;  %v4323_v45 = vld [vmem:[%s4724_s20 + $0x1c] sm:$0xf] }
  0x9f   : > { %v739_v58 = vpop.permute.xlu1 %738 }
  0xa0   : > { %824 = vst.msk [vmem:[#allocation2 + $0x2c] sm:$0xf] %vm812_vm7, %v739_v58  ;;  %v737_v60 = vpop.permute.xlu0 %736  ;;  %v2038_v58 = vrot.slane %v4259_v53, 5 }
  0xa1   : > { %823 = vst.msk [vmem:[#allocation2 + $0x28] sm:$0xf] %vm812_vm7, %v737_v60  ;;  %1260 = vrot.lane.b32.xlu1 %v4183_v57, %s4679_s23  ;;  %v1473_v57 = vrot.slane %v1471_v48, 5  ;;  %v2546_v48 = vrot.slane %v2544_v34, 4 }
  0xa2   : > { %1258 = vrot.lane.b32.xlu0 %v4182_v59, %s4679_s23  ;;  %v4262_v59 = vld [vmem:[%s4724_s20 + $0x1c] sm:$0xf]  ;;  %v2040_v5 = vrot.slane %v2038_v58, 4 }
  0xa3   : > { %v743_v63 = vpop.permute.xlu1 %742 }
  0xa4   : > { %826 = vst.msk [vmem:[#allocation2 + $0x34] sm:$0xf] %vm812_vm7, %v743_v63  ;;  %v741_v1 = vpop.permute.xlu0 %740  ;;  %v1459_v63 = vrot.slane %v1458_v52, 4 }
  0xa5   : > { %825 = vst.msk [vmem:[#allocation2 + $0x30] sm:$0xf] %vm812_vm7, %v741_v1  ;;  %1264 = vrot.lane.b32.xlu1 %v4185_v61, %s4679_s23  ;;  %v1440_v61 = vsel %vm4735_vm2, %v1435_v51, %v1439_v20  ;;  %v4358_v20 = vld [vmem:[%s4724_s20 + $0x28] sm:$0xf]  ;;  %v4322_v51 = vld [vmem:[%s4724_s20 + $0x18] sm:$0xf] }
  0xa6   : > { %1262 = vrot.lane.b32.xlu0 %v4184_v0, %s4679_s23  ;;  %v4260_v0 = vld [vmem:[%s4724_s20 + $0x14] sm:$0x1]  ;;  %v1464_v9 = vsel %vm4735_vm2, %v1459_v63, %v1463_v35  ;;  %v2553_v30 = vshll.u32 %v4358_v20, 16  ;;  %v2547_v35 = vshll.u32 %v4357_v26, 16 }
  0xa7   : > { %v747_v3 = vpop.permute.xlu1 %746 }
  0xa8   : > { %828 = vst.msk [vmem:[#allocation2 + $0x3c] sm:$0xf] %vm812_vm7, %v747_v3  ;;  %v745_v6 = vpop.permute.xlu0 %744  ;;  %v2045_v3 = vrot.slane %v4262_v59, 5 }
  0xa9   : > { %827 = vst.msk [vmem:[#allocation2 + $0x38] sm:$0xf] %vm812_vm7, %v745_v6  ;;  %1268 = vrot.lane.b32.xlu1 %v4187_v2, %s4679_s23  ;;  %v4258_v2 = vld [vmem:[%s4724_s20 + $0xc] sm:$0xe]  ;;  %v2041_v6 = vrot.slane %v4260_v0, 5 }
  0xaa   : > { %1266 = vrot.lane.b32.xlu0 %v4186_v4, %s4679_s23  ;;  %v1474_v4 = vsel %vm4735_vm2, %v1469_v56, %v1473_v57  ;;  %v4306_v10 = vrot.slane %v4258_v2, 9  ;;  %v2047_v15 = vrot.slane %v2045_v3, 4  ;;  %v4324_v0 = vld [vmem:[%s4724_s20 + $0x24] sm:$0xf]  ;;  %v5217_v2 = vld [vmem:[%s4724_s20 + $0x20] sm:$0x1] }
  0xab   : > { %v751_v11 = vpop.permute.xlu1 %750  ;;  %v2042_v17 = vsel %vm4879_vm6, %v2040_v5, %v2041_v6  ;;  %v4216_v5 = vld [vmem:[%s4724_s20 + $0x24] sm:$0xf]  ;;  %v4650_v6 = vld [vmem:[%s6310_s1 + $0x10] ss:$0 sps:$4 sm:$0x33]  }
  0xac   : > { %830 = vst.msk [vmem:[#allocation2 + $0x44] sm:$0xf] %vm812_vm7, %v751_v11  ;;  %v749_v16 = vpop.permute.xlu0 %748  ;;  %v4355_v11 = vld [vmem:[%s4724_s20 + $0x1c] sm:$0xf]  ;;  %v2039_v22 = vsel %vm4879_vm6, %v4306_v10, %v2038_v58  ;;  %4631 = vmatprep.subr.msk.bf16.mxu0 %vm3550_vm9, %v4650_v6  ;;  %4632 = vmatprep.subr.msk.bf16.mxu1 %vm3550_vm9, %v4650_v6 }
  0xad   : > { %829 = vst.msk [vmem:[#allocation2 + $0x40] sm:$0xf] %vm812_vm7, %v749_v16  ;;  %1272 = vrot.lane.b32.xlu1 %v4189_v8, %s4679_s23  ;;  %v2048_v16 = vrot.slane %v4263_v7, 5 }
  0xae   : > { %1270 = vrot.lane.b32.xlu0 %v4188_v12, %s4679_s23 }
  0xaf   : > { %v755_v24 = vpop.permute.xlu1 %754  ;;  %v2049_v29 = vsel %vm4879_vm6, %v2047_v15, %v2048_v16  ;;  %v3552_v15 = vsel %vm3550_vm9, %v4650_v6, 0  ;;  %v4265_v6 = vld [vmem:[%s4724_s20 + $0x28] sm:$0xf] }
  0xb0   : > { %832 = vst.msk [vmem:[#allocation2 + $0x4c] sm:$0xf] %vm812_vm7, %v755_v24  ;;  %v753_v31 = vpop.permute.xlu0 %752  ;;  %v2520_v24 = vshrl.u32 %v4354_v14, 16  ;;  %4588 = vmatpush3.bf16.msra.mxu0 %v3552_v15  ;;  %4628 = vmatpush3.bf16.msra.mxu1 %v3552_v15 }
  0xb1   : > { %831 = vst.msk [vmem:[#allocation2 + $0x48] sm:$0xf] %vm812_vm7, %v753_v31  ;;  %1276 = vrot.lane.b32.xlu1 %v4191_v18, %s4679_s23  ;;  %v2529_v18 = vshll.u32 %v4355_v11, 16  ;;  %v2557_v31 = vshrl.u32 %v4358_v20, 16  ;;  %v4220_v20 = vld [vmem:[%s4724_s20 + $0x34] sm:$0xf]  ;;  %4589 = vmatprep.subr.bf16.mxu0 %v4651_v25 }
  0xb2   : > { %1274 = vrot.lane.b32.xlu0 %v4190_v19, %s4679_s23  ;;  %v2533_v19 = vshrl.u32 %v4355_v11, 16  ;;  %v2522_v39 = vrot.slane %v2520_v24, 4  ;;  %v4219_v24 = vld [vmem:[%s4724_s20 + $0x30] sm:$0xf]  ;;  %v1509_v34 = vshll.u32 %v4220_v20, 16  ;;  %4626 = vmatprep.subr.bf16.mxu1 %v4651_v25 }
  0xb3   : > { %v759_v37 = vpop.permute.xlu1 %758 }
  0xb4   : > { %834 = vst.msk [vmem:[#allocation2 + $0x54] sm:$0xf] %vm812_vm7, %v759_v37  ;;  %v757_v43 = vpop.permute.xlu0 %756  ;;  %v2535_v33 = vrot.slane %v2533_v19, 4  ;;  %v2046_v37 = vsel %vm4879_vm6, %v4307_v23, %v2045_v3  ;;  %v2526_v52 = vor.u32 %v2525_v40, %v2522_v39  ;;  %v1479_v19 = vshll.u32 %v4216_v5, 16  ;;  %4590 = vmatpush3.bf16.msra.mxu0 %v4651_v25  ;;  %4629 = vmatpush3.bf16.msra.mxu1 %v4651_v25 }
  0xb5   : > { %833 = vst.msk [vmem:[#allocation2 + $0x50] sm:$0xf] %vm812_vm7, %v757_v43  ;;  %1280 = vrot.lane.b32.xlu1 %v4193_v32, %s4679_s23  ;;  %v5190_v32 = vrot.slane %v2529_v18, 5  ;;  %v5199_v43 = vrot.slane %v2553_v30, 5  ;;  %v1476_v18 = vshrl.u32 %v4216_v5, 16  ;;  %v1500_v40 = vshrl.u32 %v4219_v24, 16 }
  0xb6   : > { %1278 = vrot.lane.b32.xlu0 %v4192_v38, %s4679_s23  ;;  %v4356_v38 = vld [vmem:[%s4724_s20 + $0x20] sm:$0x1]  ;;  %v1481_v39 = vrot.slane %v1479_v19, 5 }
  0xb7   : > { %v763_v49 = vpop.permute.xlu1 %762  ;;  %v2536_v46 = vor.u32 %v2535_v33, %v5190_v32  ;;  %v2539_v47 = vshll.u32 %v4356_v38, 16  ;;  %v1478_v38 = vrot.slane %v1476_v18, 4  ;;  %v4264_v18 = vld [vmem:[%s4724_s20 + $0x24] sm:$0xe] }
  0xb8   : > { %836 = vst.msk [vmem:[#allocation2 + $0x5c] sm:$0xf] %vm812_vm7, %v763_v49  ;;  %v761_v54 = vpop.permute.xlu0 %760  ;;  %v2549_v49 = vrot.slane %v2547_v35, 5  ;;  %v1513_v35 = vshrl.u32 %v4220_v20, 16 }
  0xb9   : > { %835 = vst.msk [vmem:[#allocation2 + $0x58] sm:$0xf] %vm812_vm7, %v761_v54  ;;  %1284 = vrot.lane.b32.xlu1 %v4195_v44, %s4679_s23  ;;  %v2559_v44 = vrot.slane %v2557_v31, 4  ;;  %v2563_v54 = vshll.u32 %v4359_v42, 16  ;;  %v2537_v57 = vrot.slane %v2536_v46, 4  ;;  %v2541_v58 = vrot.slane %v2539_v47, 5 }
  0xba   : > { %1282 = vrot.lane.b32.xlu0 %v4194_v50, %s4679_s23  ;;  %v2550_v59 = vor.u32 %v2549_v49, %v2546_v48 }
  0xbb   : > { %v767_v60 = vpop.permute.xlu1 %766  ;;  %v2560_v56 = vor.u32 %v2559_v44, %v5199_v43  ;;  %v2542_v11 = vsel %vm4735_vm2, %v2537_v57, %v2541_v58  ;;  %v4405_v44 = vld [vmem:[%s4724_s20 + $0x24] sm:$0xe]  ;;  %v1502_v57 = vrot.slane %v1500_v40, 4 }
  0xbc   : > { %838 = vst.msk [vmem:[#allocation2 + $0x64] sm:$0xf] %vm812_vm7, %v767_v60  ;;  %v765_v1 = vpop.permute.xlu0 %764  ;;  %v5212_v60 = vld [vmem:[%s4724_s20 + $0x1c] sm:$0xf] }
  0xbd   : > { %837 = vst.msk [vmem:[#allocation2 + $0x60] sm:$0xf] %vm812_vm7, %v765_v1  ;;  %1813 = vrot.lane.b32.xlu1 %v1450_v55, %s4680_s24  ;;  %v4325_v55 = vld [vmem:[%s4724_s20 + $0x28] sm:$0xf]  ;;  %v2527_v1 = vrot.slane %v2526_v52, 4  ;;  %v2561_v7 = vrot.slane %v2560_v56, 4 }
  0xbe   : > { %1811 = vrot.lane.b32.xlu0 %v1440_v61, %s4680_s24  ;;  %v4217_v61 = vld [vmem:[%s4724_s20 + $0x28] sm:$0xf]  ;;  %v1515_v52 = vrot.slane %v1513_v35, 4  ;;  %v4221_v56 = vld [vmem:[%s4724_s20 + $0x38] sm:$0x1] }
  0xbf   : > { %v771_v8 = vpop.permute.xlu1 %770  ;;  %v1485_v10 = vshll.u32 %v4217_v61, 16  ;;  %v1489_v14 = vshrl.u32 %v4217_v61, 16 }
  0xc0   : > { %840 = vst.msk [vmem:[#allocation2 + $0x6c] sm:$0xf] %vm812_vm7, %v771_v8  ;;  %v769_v12 = vpop.permute.xlu0 %768  ;;  %v3130_v8 = vrot.slane %v5212_v60, 5 }
  0xc1   : > { %839 = vst.msk [vmem:[#allocation2 + $0x68] sm:$0xf] %vm812_vm7, %v769_v12  ;;  %1817 = vrot.lane.b32.xlu1 %v1474_v4, %s4680_s24  ;;  %v2565_v4 = vrot.slane %v2563_v54, 5  ;;  %v2551_v12 = vrot.slane %v2550_v59, 4  ;;  %v5249_v30 = vrot.slane %v1485_v10, 5  ;;  %v1491_v33 = vrot.slane %v1489_v14, 4 }
  0xc2   : > { %1815 = vrot.lane.b32.xlu0 %v1464_v9, %s4680_s24  ;;  %v4402_v9 = vld [vmem:[%s4724_s20 + $0x18] sm:$0xe]  ;;  %v4451_v54 = vrot.slane %v4405_v44, 9 }
  0xc3   : > { %v775_v21 = vpop.permute.xlu1 %774  ;;  %v4450_v23 = vrot.slane %v4402_v9, 9  ;;  %v2566_v26 = vsel %vm4735_vm2, %v2561_v7, %v2565_v4  ;;  %v2556_v31 = vsel %vm4735_vm2, %v2551_v12, %v5199_v43  ;;  %v4652_v43 = vld [vmem:[%s6310_s1] sm:$0xff]   ;;  %v1492_v49 = vor.u32 %v1491_v33, %v5249_v30  ;;  %v4268_v12 = vld [vmem:[%s4724_s20 + $0x34] sm:$0xf] }
  0xc4   : > { %842 = vst.msk [vmem:[#allocation2 + $0x74] sm:$0xf] %vm812_vm7, %v775_v21  ;;  %v773_v28 = vpop.permute.xlu0 %772  ;;  %4591 = vmatprep.subr.bf16.mxu0 %v4652_v43  ;;  %4627 = vmatprep.subr.bf16.mxu1 %v4652_v43  ;;  %v2059_v19 = vrot.slane %v4268_v12, 5 }
  0xc5   : > { %841 = vst.msk [vmem:[#allocation2 + $0x70] sm:$0xf] %vm812_vm7, %v773_v28  ;;  %2150 = vrot.lane.b32.xlu1 %v2042_v17, %s4681_s25  ;;  %v2532_v17 = vsel %vm4735_vm2, %v2527_v1, %v5190_v32  ;;  %v3132_v28 = vrot.slane %v3130_v8, 4  ;;  %v4407_v32 = vld [vmem:[%s4724_s20 + $0x2c] sm:$0x1]  ;;  %v3131_v46 = vsel %vm4879_vm6, %v4450_v23, %v3130_v8  ;;  %4592 = vmatpush3.bf16.msra.mxu0 %v4652_v43  ;;  %v1493_v61 = vrot.slane %v1492_v49, 4 }
  0xc6   : > { %2148 = vrot.lane.b32.xlu0 %v2039_v22, %s4681_s25  ;;  %v3133_v22 = vrot.slane %v5217_v2, 5  ;;  %v3140_v48 = vrot.slane %v4407_v32, 5  ;;  %4630 = vmatpush3.bf16.msra.mxu1 %v4652_v43  ;;  %v1519_v1 = vshll.u32 %v4221_v56, 16  ;;  %v4269_v23 = vld [vmem:[%s4724_s20 + $0x38] sm:$0x1]  ;;  %v2061_v32 = vrot.slane %v2059_v19, 4 }
  0xc7   : > { %v779_v36 = vpop.permute.xlu1 %778  ;;  %v2062_v33 = vrot.slane %v4269_v23, 5 }
  0xc8   : > { %844 = vst.msk [vmem:[#allocation2 + $0x7c] sm:$0xf] %vm812_vm7, %v779_v36  ;;  %v777_v41 = vpop.permute.xlu0 %776  ;;  %v1521_v10 = vrot.slane %v1519_v1, 5 }
  0xc9   : > { %843 = vst.msk [vmem:[#allocation2 + $0x78] sm:$0xf] %vm812_vm7, %v777_v41  ;;  %2154 = vrot.lane.b32.xlu1 %v2049_v29, %s4681_s25  ;;  %v3137_v29 = vrot.slane %v5232_v13, 5  ;;  %v1503_v41 = vshll.u32 %v4219_v24, 16  ;;  %v2063_v49 = vsel %vm4879_vm6, %v2061_v32, %v2062_v33 }
  0xca   : > { %2152 = vrot.lane.b32.xlu0 %v2046_v37, %s4681_s25  ;;  %v4218_v37 = vld [vmem:[%s4724_s20 + $0x2c] sm:$0x1] }
  0xcb   : > { %v1059_v50 = vpop.permute.xlu1 %1058  ;;  %v3139_v47 = vrot.slane %v3137_v29, 4  ;;  %v1505_v58 = vrot.slane %v1503_v41, 5 }
  0xcc   : > { %1154 = vst.msk [vmem:[#allocation2 + $0x4] sm:$0xf] %vm1152_vm8, %v1059_v50  ;;  %v1057_v53 = vpop.permute.xlu0 %1056  ;;  %v1495_v50 = vshll.u32 %v4218_v37, 16  ;;  %v4364_v37 = vld [vmem:[%s4724_s20 + $0x40] sm:$0xf] }
  0xcd   : > { %1153 = vst.msk [vmem:[#allocation2] sm:$0xf] %vm1152_vm8, %v1057_v53  ;;  %2344 = vrot.lane.b32.xlu1 %v4323_v45, %s4682_s26  ;;  %v3134_v45 = vsel %vm4879_vm6, %v3132_v28, %v3133_v22  ;;  %v3141_v60 = vsel %vm4879_vm6, %v3139_v47, %v3140_v48  ;;  %v1506_v5 = vor.u32 %v1505_v58, %v1502_v57  ;;  %v4361_v28 = vld [vmem:[%s4724_s20 + $0x34] sm:$0xf] }
  0xce   : > { %2342 = vrot.lane.b32.xlu0 %v4322_v51, %s4682_s26  ;;  %v5270_v51 = vrot.slane %v1509_v34, 5  ;;  %v2577_v35 = vshll.u32 %v4361_v28, 16 }
  0xcf   : > { %v1063_v63 = vpop.permute.xlu1 %1062  ;;  %v1507_v15 = vrot.slane %v1506_v5, 4 }
  0xd0   : > { %1156 = vst.msk [vmem:[#allocation2 + $0xc] sm:$0xf] %vm1152_vm8, %v1063_v63  ;;  %v1061_v3 = vpop.permute.xlu0 %1060  ;;  %v1497_v63 = vrot.slane %v1495_v50, 5  ;;  %v5324_v50 = vrot.slane %v2577_v35, 5  ;;  %v4226_v35 = vld [vmem:[%s4724_s20 + $0x4c] sm:$0xf] }
  0xd1   : > { %1155 = vst.msk [vmem:[#allocation2 + $0x8] sm:$0xf] %vm1152_vm8, %v1061_v3  ;;  %2348 = vrot.lane.b32.xlu1 %v4325_v55, %s4682_s26  ;;  %v1482_v55 = vor.u32 %v1481_v39, %v1478_v38  ;;  %v3138_v3 = vsel %vm4879_vm6, %v4451_v54, %v3137_v29  ;;  %v1512_v25 = vsel %vm4735_vm2, %v1507_v15, %v5270_v51  ;;  %v4363_v38 = vld [vmem:[%s4724_s20 + $0x3c] sm:$0xf]  ;;  %v4362_v54 = vld [vmem:[%s4724_s20 + $0x38] sm:$0x1] }
  0xd2   : > { %2346 = vrot.lane.b32.xlu0 %v4324_v0, %s4682_s26  ;;  %v1516_v0 = vor.u32 %v1515_v52, %v5270_v51  ;;  %v1498_v8 = vsel %vm4735_vm2, %v1493_v61, %v1497_v63  ;;  %v2592_v47 = vshrl.u32 %v4363_v38, 16  ;;  %v2595_v48 = vshll.u32 %v4363_v38, 16  ;;  %v4327_v63 = vld [vmem:[%s4724_s20 + $0x34] sm:$0xf]  ;;  %v4328_v15 = vld [vmem:[%s4724_s20 + $0x3c] sm:$0xf] }
  0xd3   : > { %v1067_v16 = vpop.permute.xlu1 %1066  ;;  %v1483_v4 = vrot.slane %v1482_v55, 4  ;;  %v2587_v1 = vshll.u32 %v4362_v54, 16 }
  0xd4   : > { %1158 = vst.msk [vmem:[#allocation2 + $0x14] sm:$0xf] %vm1152_vm8, %v1067_v16  ;;  %v1065_v21 = vpop.permute.xlu0 %1064  ;;  %v1517_v9 = vrot.slane %v1516_v0, 4  ;;  %v4266_v16 = vld [vmem:[%s4724_s20 + $0x2c] sm:$0x1]  ;;  %v2597_v61 = vrot.slane %v2595_v48, 5 }
  0xd5   : > { %1157 = vst.msk [vmem:[#allocation2 + $0x10] sm:$0xf] %vm1152_vm8, %v1065_v21  ;;  %2905 = vrot.lane.b32.xlu1 %v2542_v11, %s4683_s5  ;;  %v2052_v11 = vrot.slane %v4265_v6, 5  ;;  %v1488_v14 = vsel %vm4735_vm2, %v1483_v4, %v5249_v30  ;;  %v2055_v22 = vrot.slane %v4266_v16, 5  ;;  %v4267_v30 = vld [vmem:[%s4724_s20 + $0x30] sm:$0xe] }
  0xd6   : > { %2903 = vrot.lane.b32.xlu0 %v2532_v17, %s4683_s5  ;;  %v1522_v20 = vsel %vm4735_vm2, %v1517_v9, %v1521_v10  ;;  %v4309_v41 = vrot.slane %v4267_v30, 9  ;;  %v4326_v4 = vld [vmem:[%s4724_s20 + $0x30] sm:$0xf]  ;;  %v4409_v10 = vld [vmem:[%s4724_s20 + $0x34] sm:$0xf]  ;;  %v1561_v48 = vshrl.u32 %v4226_v35, 16 }
  0xd7   : > { %v1071_v36 = vpop.permute.xlu1 %1070  ;;  %v2054_v21 = vrot.slane %v2052_v11, 4 }
  0xd8   : > { %1160 = vst.msk [vmem:[#allocation2 + $0x1c] sm:$0xf] %vm1152_vm8, %v1071_v36  ;;  %v1069_v42 = vpop.permute.xlu0 %1068  ;;  %v2581_v36 = vshrl.u32 %v4361_v28, 16  ;;  %v5358_v28 = vld [vmem:[%s4724_s20 + $0x40] sm:$0xf] }
  0xd9   : > { %1159 = vst.msk [vmem:[#allocation2 + $0x18] sm:$0xf] %vm1152_vm8, %v1069_v42  ;;  %2909 = vrot.lane.b32.xlu1 %v2566_v26, %s4683_s5  ;;  %v4308_v26 = vrot.slane %v4264_v18, 9  ;;  %v2056_v34 = vsel %vm4879_vm6, %v2054_v21, %v2055_v22 }
  0xda   : > { %2907 = vrot.lane.b32.xlu0 %v2556_v31, %s4683_s5  ;;  %v4360_v31 = vld [vmem:[%s4724_s20 + $0x30] sm:$0xf]  ;;  %v2583_v51 = vrot.slane %v2581_v36, 4 }
  0xdb   : > { %v1075_v53 = vpop.permute.xlu1 %1074  ;;  %v2053_v40 = vsel %vm4879_vm6, %v4308_v26, %v2052_v11  ;;  %v2568_v42 = vshrl.u32 %v4360_v31, 16  ;;  %v2571_v44 = vshll.u32 %v4360_v31, 16  ;;  %v4329_v11 = vld [vmem:[%s4724_s20 + $0x40] sm:$0xf]  ;;  %v4408_v26 = vld [vmem:[%s4724_s20 + $0x30] sm:$0xe] }
  0xdc   : > { %1162 = vst.msk [vmem:[#allocation2 + $0x24] sm:$0xf] %vm1152_vm8, %v1075_v53  ;;  %v1073_v59 = vpop.permute.xlu0 %1072  ;;  %v2060_v53 = vsel %vm4879_vm6, %v4309_v41, %v2059_v19  ;;  %v2584_v0 = vor.u32 %v2583_v51, %v5324_v50  ;;  %v3144_v19 = vrot.slane %v4409_v10, 5 }
  0xdd   : > { %1161 = vst.msk [vmem:[#allocation2 + $0x20] sm:$0xf] %vm1152_vm8, %v1073_v59  ;;  %3242 = vrot.lane.b32.xlu1 %v3134_v45, %s4684_s8  ;;  %v2601_v45 = vshll.u32 %v4364_v37, 16  ;;  %v2570_v55 = vrot.slane %v2568_v42, 4  ;;  %v2573_v56 = vrot.slane %v2571_v44, 5  ;;  %v4452_v42 = vrot.slane %v4408_v26, 9 }
  0xde   : > { %3240 = vrot.lane.b32.xlu0 %v3131_v46, %s4684_s8  ;;  %v2605_v46 = vshrl.u32 %v4364_v37, 16  ;;  %v2585_v12 = vrot.slane %v2584_v0, 4  ;;  %v3146_v37 = vrot.slane %v3144_v19, 4  ;;  %v3151_v44 = vrot.slane %v5358_v28, 5 }
  0xdf   : > { %v1079_v2 = vpop.permute.xlu1 %1078  ;;  %v5332_v58 = vrot.slane %v2601_v45, 5  ;;  %v2574_v5 = vor.u32 %v2573_v56, %v2570_v55  ;;  %v4411_v56 = vld [vmem:[%s4724_s20 + $0x3c] sm:$0xe] }
  0xe0   : > { %1164 = vst.msk [vmem:[#allocation2 + $0x2c] sm:$0xf] %vm1152_vm8, %v1079_v2  ;;  %v1077_v7 = vpop.permute.xlu0 %1076  ;;  %v2607_v59 = vrot.slane %v2605_v46, 4  ;;  %v4365_v2 = vld [vmem:[%s4724_s20 + $0x44] sm:$0x1] }
  0xe1   : > { %1163 = vst.msk [vmem:[#allocation2 + $0x28] sm:$0xf] %vm1152_vm8, %v1077_v7  ;;  %3246 = vrot.lane.b32.xlu1 %v3141_v60, %s4684_s8  ;;  %v2594_v60 = vrot.slane %v2592_v47, 4  ;;  %v2575_v16 = vrot.slane %v2574_v5, 4  ;;  %v1557_v47 = vshll.u32 %v4226_v35, 16 }
  0xe2   : > { %3244 = vrot.lane.b32.xlu0 %v3138_v3, %s4684_s8  ;;  %v2608_v7 = vor.u32 %v2607_v59, %v5332_v58  ;;  %v3153_v59 = vrot.slane %v3151_v44, 4  ;;  %v4227_v5 = vld [vmem:[%s4724_s20 + $0x50] sm:$0x1] }
  0xe3   : > { %v1083_v13 = vpop.permute.xlu1 %1082  ;;  %v2598_v9 = vor.u32 %v2597_v61, %v2594_v60  ;;  %v2580_v32 = vsel %vm4735_vm2, %v2575_v16, %v5324_v50  ;;  %v4224_v50 = vld [vmem:[%s4724_s20 + $0x44] sm:$0x1]  ;;  %v1559_v0 = vrot.slane %v1557_v47, 5 }
  0xe4   : > { %1166 = vst.msk [vmem:[#allocation2 + $0x34] sm:$0xf] %vm1152_vm8, %v1083_v13  ;;  %v1081_v17 = vpop.permute.xlu0 %1080  ;;  %v2589_v13 = vrot.slane %v2587_v1, 5  ;;  %v2609_v21 = vrot.slane %v2608_v7, 4  ;;  %v1563_v1 = vrot.slane %v1561_v48, 4 }
  0xe5   : > { %1165 = vst.msk [vmem:[#allocation2 + $0x30] sm:$0xf] %vm1152_vm8, %v1081_v17  ;;  %1821 = vrot.lane.b32.xlu1 %v1498_v8, %s4680_s24  ;;  %v2611_v8 = vshll.u32 %v4365_v2, 16  ;;  %v4223_v17 = vld [vmem:[%s4724_s20 + $0x40] sm:$0xf]  ;;  %v2599_v23 = vrot.slane %v2598_v9, 4 }
  0xe6   : > { %1819 = vrot.lane.b32.xlu0 %v1488_v14, %s4680_s24  ;;  %v1537_v30 = vshrl.u32 %v4223_v17, 16 }
  0xe7   : > { %v1087_v24 = vpop.permute.xlu1 %1086  ;;  %v2613_v22 = vrot.slane %v2611_v8, 5  ;;  %v2604_v41 = vsel %vm4735_vm2, %v2599_v23, %v5332_v58  ;;  %v3145_v58 = vsel %vm4879_vm6, %v4452_v42, %v3144_v19  ;;  %v4273_v42 = vld [vmem:[%s4724_s20 + $0x48] sm:$0xe] }
  0xe8   : > { %1168 = vst.msk [vmem:[#allocation2 + $0x3c] sm:$0xf] %vm1152_vm8, %v1087_v24  ;;  %v1085_v29 = vpop.permute.xlu0 %1084  ;;  %v4410_v24 = vld [vmem:[%s4724_s20 + $0x38] sm:$0x1]  ;;  %v1539_v46 = vrot.slane %v1537_v30, 4 }
  0xe9   : > { %1167 = vst.msk [vmem:[#allocation2 + $0x38] sm:$0xf] %vm1152_vm8, %v1085_v29  ;;  %1825 = vrot.lane.b32.xlu1 %v1522_v20, %s4680_s24  ;;  %v4222_v20 = vld [vmem:[%s4724_s20 + $0x3c] sm:$0xf]  ;;  %v1533_v29 = vshll.u32 %v4223_v17, 16  ;;  %v3147_v38 = vrot.slane %v4410_v24, 5 }
  0xea   : > { %1823 = vrot.lane.b32.xlu0 %v1512_v25, %s4680_s24  ;;  %v2590_v25 = vsel %vm4735_vm2, %v2585_v12, %v2589_v13  ;;  %v1524_v33 = vshrl.u32 %v4222_v20, 16  ;;  %v1564_v12 = vor.u32 %v1563_v1, %v1559_v0  ;;  %v1567_v13 = vshll.u32 %v4227_v5, 16  ;;  %v4274_v24 = vld [vmem:[%s4724_s20 + $0x4c] sm:$0xf] }
  0xeb   : > { %v1091_v39 = vpop.permute.xlu1 %1090  ;;  %v5376_v45 = vrot.slane %v1533_v29, 5  ;;  %v4272_v29 = vld [vmem:[%s4724_s20 + $0x44] sm:$0x1] }
  0xec   : > { %1170 = vst.msk [vmem:[#allocation2 + $0x44] sm:$0xf] %vm1152_vm8, %v1091_v39  ;;  %v1089_v43 = vpop.permute.xlu0 %1088  ;;  %v4225_v39 = vld [vmem:[%s4724_s20 + $0x48] sm:$0xf]  ;;  %v1526_v51 = vrot.slane %v1524_v33, 4  ;;  %v2069_v35 = vrot.slane %v4272_v29, 5 }
  0xed   : > { %1169 = vst.msk [vmem:[#allocation2 + $0x40] sm:$0xf] %vm1152_vm8, %v1089_v43  ;;  %2158 = vrot.lane.b32.xlu1 %v2056_v34, %s4681_s25  ;;  %v1527_v34 = vshll.u32 %v4222_v20, 16  ;;  %v4413_v43 = vld [vmem:[%s4724_s20 + $0x44] sm:$0x1]  ;;  %v1551_v54 = vshll.u32 %v4225_v39, 16  ;;  %v1540_v61 = vor.u32 %v1539_v46, %v5376_v45 }
  0xee   : > { %2156 = vrot.lane.b32.xlu0 %v2053_v40, %s4681_s25  ;;  %v2614_v40 = vsel %vm4735_vm2, %v2609_v21, %v2613_v22  ;;  %v3154_v60 = vrot.slane %v4413_v43, 5  ;;  %v1565_v21 = vrot.slane %v1564_v12, 4  ;;  %v1569_v22 = vrot.slane %v1567_v13, 5 }
  0xef   : > { %v1095_v52 = vpop.permute.xlu1 %1094  ;;  %v1553_v7 = vrot.slane %v1551_v54, 5  ;;  %v1541_v10 = vrot.slane %v1540_v61, 4 }
  0xf0   : > { %1172 = vst.msk [vmem:[#allocation2 + $0x4c] sm:$0xf] %vm1152_vm8, %v1095_v52  ;;  %v1093_v57 = vpop.permute.xlu0 %1092  ;;  %v1529_v52 = vrot.slane %v1527_v34, 5  ;;  %v3155_v9 = vsel %vm4879_vm6, %v3153_v59, %v3154_v60  ;;  %v1570_v33 = vsel %vm4735_vm2, %v1565_v21, %v1569_v22  ;;  %v4415_v22 = vld [vmem:[%s4724_s20 + $0x4c] sm:$0xf] }
  0xf1   : > { %1171 = vst.msk [vmem:[#allocation2 + $0x48] sm:$0xf] %vm1152_vm8, %v1093_v57  ;;  %2162 = vrot.lane.b32.xlu1 %v2063_v49, %s4681_s25  ;;  %v3148_v57 = vsel %vm4879_vm6, %v3146_v37, %v3147_v38 }
  0xf2   : > { %2160 = vrot.lane.b32.xlu0 %v2060_v53, %s4681_s25  ;;  %v1548_v53 = vshrl.u32 %v4225_v39, 16 }
  0xf3   : > { %v1099_v3 = vpop.permute.xlu1 %1098 }
  0xf4   : > { %1174 = vst.msk [vmem:[#allocation2 + $0x54] sm:$0xf] %vm1152_vm8, %v1099_v3  ;;  %v1097_v6 = vpop.permute.xlu0 %1096  ;;  %v4453_v3 = vrot.slane %v4411_v56, 9 }
  0xf5   : > { %1173 = vst.msk [vmem:[#allocation2 + $0x50] sm:$0xf] %vm1152_vm8, %v1097_v6  ;;  %2352 = vrot.lane.b32.xlu1 %v4327_v63, %s4682_s26  ;;  %v1543_v63 = vshll.u32 %v4224_v50, 16  ;;  %v1550_v6 = vrot.slane %v1548_v53, 4  ;;  %v4369_v50 = vld [vmem:[%s4724_s20 + $0x54] sm:$0xf] }
  0xf6   : > { %2350 = vrot.lane.b32.xlu0 %v4326_v4, %s4682_s26  ;;  %v1530_v4 = vor.u32 %v1529_v52, %v1526_v51  ;;  %v4311_v53 = vrot.slane %v4273_v42, 9  ;;  %v2640_v59 = vshrl.u32 %v4369_v50, 16  ;;  %v2643_v60 = vshll.u32 %v4369_v50, 16 }
  0xf7   : > { %v1103_v14 = vpop.permute.xlu1 %1102  ;;  %v1554_v17 = vor.u32 %v1553_v7, %v1550_v6 }
  0xf8   : > { %1176 = vst.msk [vmem:[#allocation2 + $0x5c] sm:$0xf] %vm1152_vm8, %v1103_v14  ;;  %v1101_v18 = vpop.permute.xlu0 %1100  ;;  %v1531_v16 = vrot.slane %v1530_v4, 4 }
  0xf9   : > { %1175 = vst.msk [vmem:[#allocation2 + $0x58] sm:$0xf] %vm1152_vm8, %v1101_v18  ;;  %2356 = vrot.lane.b32.xlu1 %v4329_v11, %s4682_s26  ;;  %v1545_v11 = vrot.slane %v1543_v63, 5  ;;  %v4271_v18 = vld [vmem:[%s4724_s20 + $0x40] sm:$0xf]  ;;  %v1555_v28 = vrot.slane %v1554_v17, 4 }
  0xfa   : > { %2354 = vrot.lane.b32.xlu0 %v4328_v15, %s4682_s26  ;;  %v3152_v15 = vsel %vm4879_vm6, %v4453_v3, %v3151_v44  ;;  %v2066_v23 = vrot.slane %v4271_v18, 5  ;;  %v1536_v26 = vsel %vm4735_vm2, %v1531_v16, %v5376_v45  ;;  %v4366_v44 = vld [vmem:[%s4724_s20 + $0x48] sm:$0xf]  ;;  %v4368_v3 = vld [vmem:[%s4724_s20 + $0x50] sm:$0x1] }
  0xfb   : > { %v1107_v31 = vpop.permute.xlu1 %1106  ;;  %v1546_v20 = vsel %vm4735_vm2, %v1541_v10, %v1545_v11  ;;  %v1560_v38 = vsel %vm4735_vm2, %v1555_v28, %v1559_v0  ;;  %v2616_v54 = vshrl.u32 %v4366_v44, 16  ;;  %v2645_v10 = vrot.slane %v2643_v60, 5  ;;  %v4331_v11 = vld [vmem:[%s4724_s20 + $0x4c] sm:$0xf]  ;;  %v4330_v16 = vld [vmem:[%s4724_s20 + $0x48] sm:$0xf] }
  0xfc   : > { %1178 = vst.msk [vmem:[#allocation2 + $0x64] sm:$0xf] %vm1152_vm8, %v1107_v31  ;;  %v1105_v36 = vpop.permute.xlu0 %1104  ;;  %v4270_v31 = vld [vmem:[%s4724_s20 + $0x3c] sm:$0xe]  ;;  %v2068_v34 = vrot.slane %v2066_v23, 4  ;;  %v2635_v13 = vshll.u32 %v4368_v3, 16 }
  0xfd   : > { %1177 = vst.msk [vmem:[#allocation2 + $0x60] sm:$0xf] %vm1152_vm8, %v1105_v36  ;;  %2913 = vrot.lane.b32.xlu1 %v2590_v25, %s4683_s5  ;;  %v4275_v36 = vld [vmem:[%s4724_s20 + $0x50] sm:$0x1]  ;;  %v4310_v39 = vrot.slane %v4270_v31, 9  ;;  %v2618_v4 = vrot.slane %v2616_v54, 4 }
  0xfe   : > { %2911 = vrot.lane.b32.xlu0 %v2580_v32, %s4683_s5  ;;  %v2073_v32 = vrot.slane %v4274_v24, 5  ;;  %v2076_v45 = vrot.slane %v4275_v36, 5  ;;  %v2070_v46 = vsel %vm4879_vm6, %v2068_v34, %v2069_v35  ;;  %v4332_v28 = vld [vmem:[%s4724_s20 + $0x54] sm:$0xf] }
  0xff   : > { %v1111_v49 = vpop.permute.xlu1 %1110  ;;  %v2067_v52 = vsel %vm4879_vm6, %v4310_v39, %v2066_v23  ;;  %v4333_v23 = vld [vmem:[%s4724_s20 + $0x58] sm:$0xf]  ;;  %v4414_v39 = vld [vmem:[%s4724_s20 + $0x48] sm:$0xe] }
 0x100   : > { %1180 = vst.msk [vmem:[#allocation2 + $0x6c] sm:$0xf] %vm1152_vm8, %v1111_v49  ;;  %v1109_v55 = vpop.permute.xlu0 %1108  ;;  %v2075_v43 = vrot.slane %v2073_v32, 4  ;;  %v4370_v49 = vld [vmem:[%s4724_s20 + $0x58] sm:$0xf]  ;;  %v4454_v54 = vrot.slane %v4414_v39, 9 }
 0x101   : > { %1179 = vst.msk [vmem:[#allocation2 + $0x68] sm:$0xf] %vm1152_vm8, %v1109_v55  ;;  %2917 = vrot.lane.b32.xlu1 %v2614_v40, %s4683_s5  ;;  %v4367_v40 = vld [vmem:[%s4724_s20 + $0x4c] sm:$0xf]  ;;  %v2619_v55 = vshll.u32 %v4366_v44, 16 }
 0x102   : > { %2915 = vrot.lane.b32.xlu0 %v2604_v41, %s4683_s5  ;;  %v2625_v47 = vshll.u32 %v4367_v40, 16  ;;  %v2629_v48 = vshrl.u32 %v4367_v40, 16  ;;  %v2077_v61 = vsel %vm4879_vm6, %v2075_v43, %v2076_v45  ;;  %v5473_v40 = vld [vmem:[%s4724_s20 + $0x58] sm:$0xf] }
 0x103   : > { %v1115_v2 = vpop.permute.xlu1 %1114  ;;  %v2621_v5 = vrot.slane %v2619_v55, 5  ;;  %v3165_v55 = vrot.slane %v5473_v40, 5 }
 0x104   : > { %1182 = vst.msk [vmem:[#allocation2 + $0x74] sm:$0xf] %vm1152_vm8, %v1115_v2  ;;  %v1113_v8 = vpop.permute.xlu0 %1112  ;;  %v5439_v63 = vrot.slane %v2625_v47, 5  ;;  %v2631_v0 = vrot.slane %v2629_v48, 4  ;;  %v2074_v2 = vsel %vm4879_vm6, %v4311_v53, %v2073_v32  ;;  %v3158_v32 = vrot.slane %v4415_v22, 5 }
 0x105   : > { %1181 = vst.msk [vmem:[#allocation2 + $0x70] sm:$0xf] %vm1152_vm8, %v1113_v8  ;;  %3250 = vrot.lane.b32.xlu1 %v3148_v57, %s4684_s8  ;;  %v2649_v57 = vshll.u32 %v4370_v49, 16  ;;  %v2622_v17 = vor.u32 %v2621_v5, %v2618_v4  ;;  %v4232_v47 = vld [vmem:[%s4724_s20 + $0x64] sm:$0xf] }
 0x106   : > { %3248 = vrot.lane.b32.xlu0 %v3145_v58, %s4684_s8  ;;  %v2653_v58 = vshrl.u32 %v4370_v49, 16  ;;  %v2632_v12 = vor.u32 %v2631_v0, %v5439_v63  ;;  %v3160_v49 = vrot.slane %v3158_v32, 4  ;;  %v1609_v60 = vshrl.u32 %v4232_v47, 16  ;;  %v4417_v5 = vld [vmem:[%s4724_s20 + $0x54] sm:$0xe] }
 0x107   : > { %v1119_v14 = vpop.permute.xlu1 %1118  ;;  %v5447_v7 = vrot.slane %v2649_v57, 5  ;;  %v2623_v29 = vrot.slane %v2622_v17, 4  ;;  %v4233_v17 = vld [vmem:[%s4724_s20 + $0x68] sm:$0x1] }
 0x108   : > { %1184 = vst.msk [vmem:[#allocation2 + $0x7c] sm:$0xf] %vm1152_vm8, %v1119_v14  ;;  %v1117_v19 = vpop.permute.xlu0 %1116  ;;  %v2655_v8 = vrot.slane %v2653_v58, 4  ;;  %v4371_v14 = vld [vmem:[%s4724_s20 + $0x5c] sm:$0x1]  ;;  %v2633_v24 = vrot.slane %v2632_v12, 4 }
 0x109   : > { %1183 = vst.msk [vmem:[#allocation2 + $0x78] sm:$0xf] %vm1152_vm8, %v1117_v19  ;;  %3254 = vrot.lane.b32.xlu1 %v3155_v9, %s4684_s8  ;;  %v2642_v9 = vrot.slane %v2640_v59, 4  ;;  %v2628_v43 = vsel %vm4735_vm2, %v2623_v29, %v5439_v63  ;;  %v1605_v59 = vshll.u32 %v4232_v47, 16  ;;  %v4230_v63 = vld [vmem:[%s4724_s20 + $0x5c] sm:$0x1] }
 0x10a   : > { %3252 = vrot.lane.b32.xlu0 %v3152_v15, %s4684_s8  ;;  %v2656_v19 = vor.u32 %v2655_v8, %v5447_v7  ;;  %v3167_v8 = vrot.slane %v3165_v55, 4 }
 0x10b   : > { %v1253_v25 = vpop.permute.xlu1 %1252  ;;  %v2646_v21 = vor.u32 %v2645_v10, %v2642_v9  ;;  %v5504_v12 = vrot.slane %v1605_v59, 5 }
 0x10c   : > { %1348 = vst.msk [vmem:[#allocation2 + $0x4] sm:$0xf] %vm1346_vm10, %v1253_v25  ;;  %v1251_v30 = vpop.permute.xlu0 %1250  ;;  %v2637_v25 = vrot.slane %v2635_v13, 5  ;;  %v2657_v34 = vrot.slane %v2656_v19, 4  ;;  %v1611_v13 = vrot.slane %v1609_v60, 4 }
 0x10d   : > { %1347 = vst.msk [vmem:[#allocation2] sm:$0xf] %vm1346_vm10, %v1251_v30  ;;  %1829 = vrot.lane.b32.xlu1 %v1546_v20, %s4680_s24  ;;  %v2659_v20 = vshll.u32 %v4371_v14, 16  ;;  %v4229_v30 = vld [vmem:[%s4724_s20 + $0x58] sm:$0xf]  ;;  %v2647_v36 = vrot.slane %v2646_v21, 4 }
 0x10e   : > { %1827 = vrot.lane.b32.xlu0 %v1536_v26, %s4680_s24  ;;  %v1585_v42 = vshrl.u32 %v4229_v30, 16 }
 0x10f   : > { %v1257_v37 = vpop.permute.xlu1 %1256  ;;  %v2661_v35 = vrot.slane %v2659_v20, 5  ;;  %v2652_v53 = vsel %vm4735_vm2, %v2647_v36, %v5447_v7  ;;  %v3159_v7 = vsel %vm4879_vm6, %v4454_v54, %v3158_v32 }
 0x110   : > { %1350 = vst.msk [vmem:[#allocation2 + $0xc] sm:$0xf] %vm1346_vm10, %v1257_v37  ;;  %v1255_v41 = vpop.permute.xlu0 %1254  ;;  %v4416_v37 = vld [vmem:[%s4724_s20 + $0x50] sm:$0x1]  ;;  %v1587_v58 = vrot.slane %v1585_v42, 4 }
 0x111   : > { %1349 = vst.msk [vmem:[#allocation2 + $0x8] sm:$0xf] %vm1346_vm10, %v1255_v41  ;;  %1833 = vrot.lane.b32.xlu1 %v1570_v33, %s4680_s24  ;;  %v4228_v33 = vld [vmem:[%s4724_s20 + $0x54] sm:$0xf]  ;;  %v1581_v41 = vshll.u32 %v4229_v30, 16  ;;  %v3161_v50 = vrot.slane %v4416_v37, 5 }
 0x112   : > { %1831 = vrot.lane.b32.xlu0 %v1560_v38, %s4680_s24  ;;  %v2638_v38 = vsel %vm4735_vm2, %v2633_v24, %v2637_v25  ;;  %v1572_v45 = vshrl.u32 %v4228_v33, 16  ;;  %v1612_v24 = vor.u32 %v1611_v13, %v5504_v12  ;;  %v1615_v25 = vshll.u32 %v4233_v17, 16  ;;  %v4280_v37 = vld [vmem:[%s4724_s20 + $0x64] sm:$0xf]  ;;  %v4374_v13 = vld [vmem:[%s4724_s20 + $0x68] sm:$0x1] }
 0x113   : > { %v1261_v51 = vpop.permute.xlu1 %1260  ;;  %v5491_v57 = vrot.slane %v1581_v41, 5  ;;  %v4278_v41 = vld [vmem:[%s4724_s20 + $0x5c] sm:$0x1] }
 0x114   : > { %1352 = vst.msk [vmem:[#allocation2 + $0x14] sm:$0xf] %vm1346_vm10, %v1261_v51  ;;  %v1259_v56 = vpop.permute.xlu0 %1258  ;;  %v4231_v51 = vld [vmem:[%s4724_s20 + $0x60] sm:$0xf]  ;;  %v1574_v0 = vrot.slane %v1572_v45, 4  ;;  %v2083_v47 = vrot.slane %v4278_v41, 5 }
 0x115   : > { %1351 = vst.msk [vmem:[#allocation2 + $0x10] sm:$0xf] %vm1346_vm10, %v1259_v56  ;;  %2166 = vrot.lane.b32.xlu1 %v2070_v46, %s4681_s25  ;;  %v1575_v46 = vshll.u32 %v4228_v33, 16  ;;  %v4419_v56 = vld [vmem:[%s4724_s20 + $0x5c] sm:$0x1]  ;;  %v1599_v3 = vshll.u32 %v4231_v51, 16  ;;  %v1588_v10 = vor.u32 %v1587_v58, %v5491_v57 }
 0x116   : > { %2164 = vrot.lane.b32.xlu0 %v2067_v52, %s4681_s25  ;;  %v2662_v52 = vsel %vm4735_vm2, %v2657_v34, %v2661_v35  ;;  %v3168_v9 = vrot.slane %v4419_v56, 5  ;;  %v1613_v34 = vrot.slane %v1612_v24, 4  ;;  %v1617_v35 = vrot.slane %v1615_v25, 5  ;;  %v4334_v25 = vld [vmem:[%s4724_s20 + $0x60] sm:$0xf] }
 0x117   : > { %v1265_v1 = vpop.permute.xlu1 %1264  ;;  %v1601_v19 = vrot.slane %v1599_v3, 5  ;;  %v1589_v22 = vrot.slane %v1588_v10, 4  ;;  %v4376_v3 = vld [vmem:[%s4724_s20 + $0x70] sm:$0xf] }
 0x118   : > { %1354 = vst.msk [vmem:[#allocation2 + $0x1c] sm:$0xf] %vm1346_vm10, %v1265_v1  ;;  %v1263_v6 = vpop.permute.xlu0 %1262  ;;  %v1577_v1 = vrot.slane %v1575_v46, 5  ;;  %v3169_v21 = vsel %vm4879_vm6, %v3167_v8, %v3168_v9  ;;  %v1618_v45 = vsel %vm4735_vm2, %v1613_v34, %v1617_v35  ;;  %v2697_v10 = vshll.u32 %v4376_v3, 16 }
 0x119   : > { %1353 = vst.msk [vmem:[#allocation2 + $0x18] sm:$0xf] %vm1346_vm10, %v1263_v6  ;;  %2170 = vrot.lane.b32.xlu1 %v2077_v61, %s4681_s25  ;;  %v3162_v6 = vsel %vm4879_vm6, %v3160_v49, %v3161_v50  ;;  %v4279_v49 = vld [vmem:[%s4724_s20 + $0x60] sm:$0xe] }
 0x11a   : > { %2168 = vrot.lane.b32.xlu0 %v2074_v2, %s4681_s25  ;;  %v1596_v2 = vshrl.u32 %v4231_v51, 16  ;;  %v4313_v58 = vrot.slane %v4279_v49, 9  ;;  %v4424_v49 = vld [vmem:[%s4724_s20 + $0x70] sm:$0xf] }
 0x11b   : > { %v1269_v15 = vpop.permute.xlu1 %1268 }
 0x11c   : > { %1356 = vst.msk [vmem:[#allocation2 + $0x24] sm:$0xf] %vm1346_vm10, %v1269_v15  ;;  %v1267_v18 = vpop.permute.xlu0 %1266  ;;  %v4455_v15 = vrot.slane %v4417_v5, 9  ;;  %v4375_v5 = vld [vmem:[%s4724_s20 + $0x6c] sm:$0xf] }
 0x11d   : > { %1355 = vst.msk [vmem:[#allocation2 + $0x20] sm:$0xf] %vm1346_vm10, %v1267_v18  ;;  %2360 = vrot.lane.b32.xlu1 %v4331_v11, %s4682_s26  ;;  %v1591_v11 = vshll.u32 %v4230_v63, 16  ;;  %v1598_v18 = vrot.slane %v1596_v2, 4  ;;  %v2691_v17 = vshll.u32 %v4375_v5, 16 }
 0x11e   : > { %2358 = vrot.lane.b32.xlu0 %v4330_v16, %s4682_s26  ;;  %v1578_v16 = vor.u32 %v1577_v1, %v1574_v0 }
 0x11f   : > { %v1273_v26 = vpop.permute.xlu1 %1272  ;;  %v1602_v30 = vor.u32 %v1601_v19, %v1598_v18  ;;  %v4335_v19 = vld [vmem:[%s4724_s20 + $0x64] sm:$0xf] }
 0x120   : > { %1358 = vst.msk [vmem:[#allocation2 + $0x2c] sm:$0xf] %vm1346_vm10, %v1273_v26  ;;  %v1271_v31 = vpop.permute.xlu0 %1270  ;;  %v1579_v29 = vrot.slane %v1578_v16, 4  ;;  %v2688_v16 = vshrl.u32 %v4375_v5, 16 }
 0x121   : > { %1357 = vst.msk [vmem:[#allocation2 + $0x28] sm:$0xf] %vm1346_vm10, %v1271_v31  ;;  %2364 = vrot.lane.b32.xlu1 %v4333_v23, %s4682_s26  ;;  %v1593_v23 = vrot.slane %v1591_v11, 5  ;;  %v4277_v31 = vld [vmem:[%s4724_s20 + $0x58] sm:$0xf]  ;;  %v1603_v40 = vrot.slane %v1602_v30, 4 }
 0x122   : > { %2362 = vrot.lane.b32.xlu0 %v4332_v28, %s4682_s26  ;;  %v3166_v28 = vsel %vm4879_vm6, %v4455_v15, %v3165_v55  ;;  %v2080_v36 = vrot.slane %v4277_v31, 5  ;;  %v1584_v39 = vsel %vm4735_vm2, %v1579_v29, %v5491_v57  ;;  %v4372_v55 = vld [vmem:[%s4724_s20 + $0x60] sm:$0xf]  ;;  %v2701_v11 = vshrl.u32 %v4376_v3, 16 }
 0x123   : > { %v1277_v44 = vpop.permute.xlu1 %1276  ;;  %v1594_v33 = vsel %vm4735_vm2, %v1589_v22, %v1593_v23  ;;  %v1608_v51 = vsel %vm4735_vm2, %v1603_v40, %v5504_v12  ;;  %v2664_v1 = vshrl.u32 %v4372_v55, 16  ;;  %v2667_v2 = vshll.u32 %v4372_v55, 16 }
 0x124   : > { %1360 = vst.msk [vmem:[#allocation2 + $0x34] sm:$0xf] %vm1346_vm10, %v1277_v44  ;;  %v1275_v48 = vpop.permute.xlu0 %1274  ;;  %v4276_v44 = vld [vmem:[%s4724_s20 + $0x54] sm:$0xe]  ;;  %v2082_v46 = vrot.slane %v2080_v36, 4  ;;  %v5569_v22 = vrot.slane %v2697_v10, 5 }
 0x125   : > { %1359 = vst.msk [vmem:[#allocation2 + $0x30] sm:$0xf] %vm1346_vm10, %v1275_v48  ;;  %2921 = vrot.lane.b32.xlu1 %v2638_v38, %s4683_s5  ;;  %v4281_v48 = vld [vmem:[%s4724_s20 + $0x68] sm:$0x1]  ;;  %v2669_v15 = vrot.slane %v2667_v2, 5  ;;  %v2703_v23 = vrot.slane %v2701_v11, 4 }
 0x126   : > { %2919 = vrot.lane.b32.xlu0 %v2628_v43, %s4683_s5  ;;  %v2087_v43 = vrot.slane %v4280_v37, 5  ;;  %v2090_v57 = vrot.slane %v4281_v48, 5  ;;  %v2084_v59 = vsel %vm4879_vm6, %v2082_v46, %v2083_v47  ;;  %v2690_v29 = vrot.slane %v2688_v16, 4  ;;  %v4420_v48 = vld [vmem:[%s4724_s20 + $0x60] sm:$0xe] }
 0x127   : > { %v1281_v61 = vpop.permute.xlu1 %1280  ;;  %v2693_v30 = vrot.slane %v2691_v17, 5 }
 0x128   : > { %1362 = vst.msk [vmem:[#allocation2 + $0x3c] sm:$0xf] %vm1346_vm10, %v1281_v61  ;;  %v1279_v4 = vpop.permute.xlu0 %1278  ;;  %v2089_v56 = vrot.slane %v2087_v43, 4 }
 0x129   : > { %1361 = vst.msk [vmem:[#allocation2 + $0x38] sm:$0xf] %vm1346_vm10, %v1279_v4  ;;  %2925 = vrot.lane.b32.xlu1 %v2662_v52, %s4683_s5  ;;  %v4312_v52 = vrot.slane %v4276_v44, 9  ;;  %v2694_v41 = vor.u32 %v2693_v30, %v2690_v29 }
 0x12a   : > { %2923 = vrot.lane.b32.xlu0 %v2652_v53, %s4683_s5  ;;  %v4373_v53 = vld [vmem:[%s4724_s20 + $0x64] sm:$0xf] }
 0x12b   : > { %v1285_v14 = vpop.permute.xlu1 %1284  ;;  %v2673_v60 = vshll.u32 %v4373_v53, 16  ;;  %v2677_v61 = vshrl.u32 %v4373_v53, 16  ;;  %v2081_v0 = vsel %vm4879_vm6, %v4312_v52, %v2080_v36  ;;  %v2704_v36 = vor.u32 %v2703_v23, %v5569_v22  ;;  %v4235_v53 = vld [vmem:[%s4724_s20 + $0x70] sm:$0xf] }
 0x12c   : > { %1364 = vst.msk [vmem:[#allocation2 + $0x44] sm:$0xf] %vm1346_vm10, %v1285_v14  ;;  %v1283_v20 = vpop.permute.xlu0 %1282  ;;  %v2666_v14 = vrot.slane %v2664_v1, 4  ;;  %v2695_v52 = vrot.slane %v2694_v41, 4  ;;  %v1633_v1 = vshrl.u32 %v4235_v53, 16 }
 0x12d   : > { %1363 = vst.msk [vmem:[#allocation2 + $0x40] sm:$0xf] %vm1346_vm10, %v1283_v20  ;;  %3258 = vrot.lane.b32.xlu1 %v3162_v6, %s4684_s8  ;;  %v2091_v6 = vsel %vm4879_vm6, %v2089_v56, %v2090_v57  ;;  %v5560_v8 = vrot.slane %v2673_v60, 5  ;;  %v2679_v9 = vrot.slane %v2677_v61, 4  ;;  %v2705_v46 = vrot.slane %v2704_v36, 4 }
 0x12e   : > { %3256 = vrot.lane.b32.xlu0 %v3159_v7, %s4684_s8  ;;  %v2088_v7 = vsel %vm4879_vm6, %v4313_v58, %v2087_v43  ;;  %v4422_v43 = vld [vmem:[%s4724_s20 + $0x68] sm:$0x1]  ;;  %v4234_v57 = vld [vmem:[%s4724_s20 + $0x6c] sm:$0xf]  ;;  %v4456_v58 = vrot.slane %v4420_v48, 9  ;;  %v2700_v3 = vsel %vm4735_vm2, %v2695_v52, %v5569_v22 }
 0x12f   : > { %v1814_v26 = vpop.permute.xlu1 %1813  ;;  %v2680_v20 = vor.u32 %v2679_v9, %v5560_v8  ;;  %v3175_v56 = vrot.slane %v4422_v43, 5  ;;  %v4425_v61 = vld [vmem:[%s4724_s20 + $0x74] sm:$0x1]  ;;  %v1623_v5 = vshll.u32 %v4234_v57, 16  ;;  %v4237_v9 = vld [vmem:[%s4724_s20 + $0x78] sm:$0xf] }
 0x130   : > { %1909 = vst.msk [vmem:[#allocation2 + $0x4] sm:$0xf] %vm1907_vm11, %v1814_v26  ;;  %v1812_v32 = vpop.permute.xlu0 %1811  ;;  %v2670_v26 = vor.u32 %v2669_v15, %v2666_v14  ;;  %v1635_v15 = vrot.slane %v1633_v1, 4  ;;  %v1644_v22 = vshrl.u32 %v4237_v9, 16  ;;  %v1647_v23 = vshll.u32 %v4237_v9, 16 }
 0x131   : > { %1908 = vst.msk [vmem:[#allocation2] sm:$0xf] %vm1907_vm11, %v1812_v32  ;;  %3262 = vrot.lane.b32.xlu1 %v3169_v21, %s4684_s8  ;;  %v2683_v21 = vshll.u32 %v4374_v13, 16  ;;  %v4421_v32 = vld [vmem:[%s4724_s20 + $0x64] sm:$0xf]  ;;  %v2681_v34 = vrot.slane %v2680_v20, 4 }
 0x132   : > { %3260 = vrot.lane.b32.xlu0 %v3166_v28, %s4684_s8  ;;  %v4377_v28 = vld [vmem:[%s4724_s20 + $0x74] sm:$0x1]  ;;  %v2671_v40 = vrot.slane %v2670_v26, 4  ;;  %v3172_v44 = vrot.slane %v4421_v32, 5  ;;  %v1649_v36 = vrot.slane %v1647_v23, 5 }
 0x133   : > { %v1818_v38 = vpop.permute.xlu1 %1817  ;;  %v2685_v35 = vrot.slane %v2683_v21, 5  ;;  %v2707_v37 = vshll.u32 %v4377_v28, 16  ;;  %v1625_v21 = vrot.slane %v1623_v5, 5  ;;  %v4283_v48 = vld [vmem:[%s4724_s20 + $0x70] sm:$0xf] }
 0x134   : > { %1911 = vst.msk [vmem:[#allocation2 + $0xc] sm:$0xf] %vm1907_vm11, %v1818_v38  ;;  %v1816_v42 = vpop.permute.xlu0 %1815  ;;  %v3174_v55 = vrot.slane %v3172_v44, 4  ;;  %v3173_v10 = vsel %vm4879_vm6, %v4456_v58, %v3172_v44  ;;  %v4381_v23 = vld [vmem:[%s4724_s20 + $0x84] sm:$0xf] }
 0x135   : > { %1910 = vst.msk [vmem:[#allocation2 + $0x8] sm:$0xf] %vm1907_vm11, %v1816_v42  ;;  %1837 = vrot.lane.b32.xlu1 %v1594_v33, %s4680_s24  ;;  %v4337_v33 = vld [vmem:[%s4724_s20 + $0x70] sm:$0xf]  ;;  %v2709_v47 = vrot.slane %v2707_v37, 5 }
 0x136   : > { %1835 = vrot.lane.b32.xlu0 %v1584_v39, %s4680_s24  ;;  %v4336_v39 = vld [vmem:[%s4724_s20 + $0x6c] sm:$0xf] }
 0x137   : > { %v2151_v50 = vpop.permute.xlu1 %2150  ;;  %v2710_v60 = vsel %vm4735_vm2, %v2705_v46, %v2709_v47 }
 0x138   : > { %2246 = vst.msk [vmem:[#allocation2 + $0x4] sm:$0xf] %vm2244_vm12, %v2151_v50  ;;  %v2149_v54 = vpop.permute.xlu0 %2148 }
 0x139   : > { %2245 = vst.msk [vmem:[#allocation2] sm:$0xf] %vm2244_vm12, %v2149_v54  ;;  %1841 = vrot.lane.b32.xlu1 %v1618_v45, %s4680_s24  ;;  %v2686_v45 = vsel %vm4735_vm2, %v2681_v34, %v2685_v35  ;;  %v4239_v34 = vld [vmem:[%s4724_s20 + $0x80] sm:$0x1]  ;;  %v1646_v35 = vrot.slane %v1644_v22, 4 }
 0x13a   : > { %1839 = vrot.lane.b32.xlu0 %v1608_v51, %s4680_s24  ;;  %v2676_v51 = vsel %vm4735_vm2, %v2671_v40, %v5560_v8  ;;  %v3176_v8 = vsel %vm4879_vm6, %v3174_v55, %v3175_v56  ;;  %v4196_v40 = vld [vmem:[%s4724_s20 + $0x78] sm:$0xf]  ;;  %v1663_v43 = vshll.u32 %v4239_v34, 16  ;;  %v4286_v55 = vld [vmem:[%s4724_s20 + $0x7c] sm:$0xf] }
 0x13b   : > { %v2155_v63 = vpop.permute.xlu1 %2154  ;;  %v1650_v47 = vor.u32 %v1649_v36, %v1646_v35  ;;  %v2736_v35 = vshrl.u32 %v4381_v23, 16  ;;  %v2739_v36 = vshll.u32 %v4381_v23, 16 }
 0x13c   : > { %2248 = vst.msk [vmem:[#allocation2 + $0xc] sm:$0xf] %vm2244_vm12, %v2155_v63  ;;  %v2153_v4 = vpop.permute.xlu0 %2152  ;;  %v4423_v63 = vld [vmem:[%s4724_s20 + $0x6c] sm:$0xe] }
 0x13d   : > { %2247 = vst.msk [vmem:[#allocation2 + $0x8] sm:$0xf] %vm2244_vm12, %v2153_v4  ;;  %2174 = vrot.lane.b32.xlu1 %v2084_v59, %s4681_s25  ;;  %v3179_v59 = vrot.slane %v4424_v49, 5  ;;  %v1620_v4 = vshrl.u32 %v4234_v57, 16  ;;  %v4457_v13 = vrot.slane %v4423_v63, 9  ;;  %v1651_v58 = vrot.slane %v1650_v47, 4 }
 0x13e   : > { %2172 = vrot.lane.b32.xlu0 %v2081_v0, %s4681_s25  ;;  %v1629_v0 = vshll.u32 %v4235_v53, 16  ;;  %v1665_v53 = vrot.slane %v1663_v43, 5  ;;  %v2101_v63 = vrot.slane %v4286_v55, 5  ;;  %v4338_v43 = vld [vmem:[%s4724_s20 + $0x78] sm:$0xf]  ;;  %v2738_v47 = vrot.slane %v2736_v35, 4 }
 0x13f   : > { %v2345_v12 = vpop.permute.xlu1 %2344  ;;  %v3181_v11 = vrot.slane %v3179_v59, 4  ;;  %v1622_v20 = vrot.slane %v1620_v4, 4  ;;  %v3180_v32 = vsel %vm4879_vm6, %v4457_v13, %v3179_v59  ;;  %v4284_v59 = vld [vmem:[%s4724_s20 + $0x74] sm:$0x1]  ;;  %v4285_v4 = vld [vmem:[%s4724_s20 + $0x78] sm:$0xe] }
 0x140   : > { %2440 = vst.msk [vmem:[#allocation2 + $0x4] sm:$0xf] %vm2438_vm13, %v2345_v12  ;;  %v2343_v18 = vpop.permute.xlu0 %2342  ;;  %v3182_v12 = vrot.slane %v4425_v61, 5  ;;  %v5616_v14 = vrot.slane %v1629_v0, 5  ;;  %v4282_v61 = vld [vmem:[%s4724_s20 + $0x6c] sm:$0xe] }
 0x141   : > { %2439 = vst.msk [vmem:[#allocation2] sm:$0xf] %vm2438_vm13, %v2343_v18  ;;  %2178 = vrot.lane.b32.xlu1 %v2091_v6, %s4681_s25  ;;  %v4238_v6 = vld [vmem:[%s4724_s20 + $0x7c] sm:$0xf]  ;;  %v4315_v13 = vrot.slane %v4285_v4, 9 }
 0x142   : > { %2176 = vrot.lane.b32.xlu0 %v2088_v7, %s4681_s25  ;;  %v1653_v16 = vshll.u32 %v4238_v6, 16  ;;  %v1657_v17 = vshrl.u32 %v4238_v6, 16  ;;  %v1636_v26 = vor.u32 %v1635_v15, %v5616_v14  ;;  %v4243_v35 = vld [vmem:[%s4724_s20 + $0x90] sm:$0xf] }
 0x143   : > { %v2349_v24 = vpop.permute.xlu1 %2348 }
 0x144   : > { %2442 = vst.msk [vmem:[#allocation2 + $0xc] sm:$0xf] %vm2438_vm13, %v2349_v24  ;;  %v2347_v31 = vpop.permute.xlu0 %2346  ;;  %v5626_v29 = vrot.slane %v1653_v16, 5  ;;  %v1659_v30 = vrot.slane %v1657_v17, 4  ;;  %v1637_v41 = vrot.slane %v1636_v26, 4 }
 0x145   : > { %2441 = vst.msk [vmem:[#allocation2 + $0x8] sm:$0xf] %vm2438_vm13, %v2347_v31  ;;  %2368 = vrot.lane.b32.xlu1 %v4335_v19, %s4682_s26  ;;  %v4236_v19 = vld [vmem:[%s4724_s20 + $0x74] sm:$0x1] }
 0x146   : > { %2366 = vrot.lane.b32.xlu0 %v4334_v25, %s4682_s26  ;;  %v3183_v25 = vsel %vm4879_vm6, %v3181_v11, %v3182_v12  ;;  %v1639_v28 = vshll.u32 %v4236_v19, 16  ;;  %v1660_v44 = vor.u32 %v1659_v30, %v5626_v29  ;;  %v1656_v6 = vsel %vm4735_vm2, %v1651_v58, %v5626_v29 }
 0x147   : > { %v2906_v38 = vpop.permute.xlu1 %2905  ;;  %v2103_v11 = vrot.slane %v2101_v63, 4 }
 0x148   : > { %3001 = vst.msk [vmem:[#allocation2 + $0x4] sm:$0xf] %vm2999_vm14, %v2906_v38  ;;  %v2904_v42 = vpop.permute.xlu0 %2903  ;;  %v1661_v52 = vrot.slane %v1660_v44, 4 }
 0x149   : > { %3000 = vst.msk [vmem:[#allocation2] sm:$0xf] %vm2999_vm14, %v2904_v42  ;;  %2372 = vrot.lane.b32.xlu1 %v4337_v33, %s4682_s26  ;;  %v1626_v33 = vor.u32 %v1625_v21, %v1622_v20  ;;  %v1641_v42 = vrot.slane %v1639_v28, 5  ;;  %v4382_v21 = vld [vmem:[%s4724_s20 + $0x88] sm:$0xf] }
 0x14a   : > { %2370 = vrot.lane.b32.xlu0 %v4336_v39, %s4682_s26  ;;  %v4197_v39 = vld [vmem:[%s4724_s20 + $0x7c] sm:$0xf]  ;;  %v1666_v0 = vsel %vm4735_vm2, %v1661_v52, %v1665_v53  ;;  %v2745_v29 = vshll.u32 %v4382_v21, 16  ;;  %v2749_v30 = vshrl.u32 %v4382_v21, 16 }
 0x14b   : > { %v2910_v50 = vpop.permute.xlu1 %2909  ;;  %v1627_v46 = vrot.slane %v1626_v33, 4 }
 0x14c   : > { %3003 = vst.msk [vmem:[#allocation2 + $0xc] sm:$0xf] %vm2999_vm14, %v2910_v50  ;;  %v2908_v54 = vpop.permute.xlu0 %2907 }
 0x14d   : > { %3002 = vst.msk [vmem:[#allocation2 + $0x8] sm:$0xf] %vm2999_vm14, %v2908_v54  ;;  %2929 = vrot.lane.b32.xlu1 %v2686_v45, %s4683_s5  ;;  %v2094_v54 = vrot.slane %v4283_v48, 5  ;;  %v1632_v57 = vsel %vm4735_vm2, %v1627_v46, %v5616_v14  ;;  %v4383_v46 = vld [vmem:[%s4724_s20 + $0x8c] sm:$0x1]  ;;  %v2741_v48 = vrot.slane %v2739_v36, 5 }
 0x14e   : > { %2927 = vrot.lane.b32.xlu0 %v2676_v51, %s4683_s5  ;;  %v1642_v51 = vsel %vm4735_vm2, %v1637_v41, %v1641_v42  ;;  %v2747_v41 = vrot.slane %v2745_v29, 5  ;;  %v2751_v42 = vrot.slane %v2749_v30, 4 }
 0x14f   : > { %v3243_v2 = vpop.permute.xlu1 %3242  ;;  %v2096_v1 = vrot.slane %v2094_v54, 4  ;;  %v2742_v58 = vor.u32 %v2741_v48, %v2738_v47  ;;  %v1695_v47 = vshll.u32 %v4243_v35, 16 }
 0x150   : > { %3338 = vst.msk [vmem:[#allocation2 + $0x4] sm:$0xf] %vm3336_vm15, %v3243_v2  ;;  %v3241_v7 = vpop.permute.xlu0 %3240  ;;  %v2097_v2 = vrot.slane %v4284_v59, 5  ;;  %v2752_v53 = vor.u32 %v2751_v42, %v2747_v41  ;;  %v4427_v59 = vld [vmem:[%s4724_s20 + $0x7c] sm:$0xf] }
 0x151   : > { %3337 = vst.msk [vmem:[#allocation2] sm:$0xf] %vm3336_vm15, %v3241_v7  ;;  %2933 = vrot.lane.b32.xlu1 %v2710_v60, %s4683_s5  ;;  %v4314_v7 = vrot.slane %v4282_v61, 9 }
 0x152   : > { %2931 = vrot.lane.b32.xlu0 %v2700_v3, %s4683_s5  ;;  %v4287_v3 = vld [vmem:[%s4724_s20 + $0x80] sm:$0x1]  ;;  %v2098_v14 = vsel %vm4879_vm6, %v2096_v1, %v2097_v2  ;;  %v3186_v1 = vrot.slane %v4427_v59, 5  ;;  %v4430_v2 = vld [vmem:[%s4724_s20 + $0x88] sm:$0xf] }
 0x153   : > { %v3247_v18 = vpop.permute.xlu1 %3246  ;;  %v2104_v12 = vrot.slane %v4287_v3, 5 }
 0x154   : > { %3340 = vst.msk [vmem:[#allocation2 + $0xc] sm:$0xf] %vm3336_vm15, %v3247_v18  ;;  %v3245_v24 = vpop.permute.xlu0 %3244  ;;  %v2095_v18 = vsel %vm4879_vm6, %v4314_v7, %v2094_v54  ;;  %v2755_v54 = vshll.u32 %v4383_v46, 16  ;;  %v1692_v46 = vshrl.u32 %v4243_v35, 16 }
 0x155   : > { %3339 = vst.msk [vmem:[#allocation2 + $0x8] sm:$0xf] %vm3336_vm15, %v3245_v24  ;;  %3266 = vrot.lane.b32.xlu1 %v3176_v8, %s4684_s8  ;;  %v4379_v8 = vld [vmem:[%s4724_s20 + $0x7c] sm:$0xf]  ;;  %v2105_v24 = vsel %vm4879_vm6, %v2103_v11, %v2104_v12  ;;  %v3188_v11 = vrot.slane %v3186_v1, 4 }
 0x156   : > { %3264 = vrot.lane.b32.xlu0 %v3173_v10, %s4684_s8  ;;  %v4378_v10 = vld [vmem:[%s4724_s20 + $0x78] sm:$0xf]  ;;  %v2721_v15 = vshll.u32 %v4379_v8, 16  ;;  %v2725_v16 = vshrl.u32 %v4379_v8, 16  ;;  %v1694_v59 = vrot.slane %v1692_v46, 4 }
 0x157   : > { %v1822_v31 = vpop.permute.xlu1 %1821  ;;  %v2712_v19 = vshrl.u32 %v4378_v10, 16  ;;  %v2715_v20 = vshll.u32 %v4378_v10, 16  ;;  %v4426_v8 = vld [vmem:[%s4724_s20 + $0x78] sm:$0xe]  ;;  %v4387_v46 = vld [vmem:[%s4724_s20 + $0x9c] sm:$0xf] }
 0x158   : > { %1913 = vst.msk [vmem:[#allocation2 + $0x14] sm:$0xf] %vm1907_vm11, %v1822_v31  ;;  %v1820_v37 = vpop.permute.xlu0 %1819  ;;  %v4653_v38 = vld [vmem:[#allocation2] sm:$0xff]   ;;  %v2723_v26 = vrot.slane %v2721_v15, 5  ;;  %v2727_v28 = vrot.slane %v2725_v16, 4 }
 0x159   : > { %1912 = vst.msk [vmem:[#allocation2 + $0x10] sm:$0xf] %vm1907_vm11, %v1820_v37  ;;  %3270 = vrot.lane.b32.xlu1 %v3183_v25, %s4684_s8  ;;  %4593 = vmatprep.mubr.msk.bf16.mxu0 %vm3501_vm0, %v4653_v38  ;;  %v2102_v25 = vsel %vm4879_vm6, %v4315_v13, %v2101_v63  ;;  %v2714_v33 = vrot.slane %v2712_v19, 4  ;;  %v2717_v34 = vrot.slane %v2715_v20, 5  ;;  %v4339_v38 = vld [vmem:[%s4724_s20 + $0x7c] sm:$0xf] }
 0x15a   : > { %3268 = vrot.lane.b32.xlu0 %v3180_v32, %s4684_s8  ;;  %v4380_v32 = vld [vmem:[%s4724_s20 + $0x80] sm:$0x1]  ;;  %v2753_v63 = vrot.slane %v2752_v53, 4  ;;  %v4431_v13 = vld [vmem:[%s4724_s20 + $0x8c] sm:$0x1] }
 0x15b   : > { %v1826_v45 = vpop.permute.xlu1 %1825  ;;  %v4240_v20 = vld [vmem:[%s4724_s20 + $0x84] sm:$0xf] }
 0x15c   : > { %1915 = vst.msk [vmem:[#allocation2 + $0x1c] sm:$0xf] %vm1907_vm11, %v1826_v45  ;;  %v1824_v49 = vpop.permute.xlu0 %1823  ;;  %v4654_v50 = vld [vmem:[#allocation2 + $0x8] sm:$0xff]   ;;  %v2718_v45 = vor.u32 %v2717_v34, %v2714_v33  ;;  %v1668_v30 = vshrl.u32 %v4240_v20, 16 }
 0x15d   : > { %1914 = vst.msk [vmem:[#allocation2 + $0x18] sm:$0xf] %vm1907_vm11, %v1824_v49  ;;  %1288 = vrot.lane.b32.xlu1 %v4197_v39, %s4679_s23  ;;  %4594 = vmatmul.mubr.msk.bf16.vlgmr.msra.gmra.mxu0 %vm3501_vm0, %v4654_v50  ;;  %v2728_v39 = vor.u32 %v2727_v28, %v2723_v26  ;;  %v4341_v50 = vld [vmem:[%s4724_s20 + $0x88] sm:$0xf] }
 0x15e   : > { %1286 = vrot.lane.b32.xlu0 %v4196_v40, %s4679_s23  ;;  %v2731_v40 = vshll.u32 %v4380_v32, 16  ;;  %v4244_v32 = vld [vmem:[%s4724_s20 + $0x94] sm:$0xf] }
 0x15f   : > { %v2159_v56 = vpop.permute.xlu1 %2158  ;;  %v1705_v42 = vshrl.u32 %v4244_v32, 16 }
 0x160   : > { %2250 = vst.msk [vmem:[#allocation2 + $0x14] sm:$0xf] %vm2244_vm12, %v2159_v56  ;;  %v2157_v60 = vpop.permute.xlu0 %2156  ;;  %v2733_v52 = vrot.slane %v2731_v40, 5  ;;  %v4340_v56 = vld [vmem:[%s4724_s20 + $0x84] sm:$0xf] }
 0x161   : > { %2249 = vst.msk [vmem:[#allocation2 + $0x10] sm:$0xf] %vm2244_vm12, %v2157_v60  ;;  %1845 = vrot.lane.b32.xlu1 %v1642_v51, %s4680_s24  ;;  %v2729_v51 = vrot.slane %v2728_v39, 4 }
 0x162   : > { %1843 = vrot.lane.b32.xlu0 %v1632_v57, %s4680_s24  ;;  %v2719_v57 = vrot.slane %v2718_v45, 4 }
 0x163   : > { %v2163_v5 = vpop.permute.xlu1 %2162  ;;  %v2734_v61 = vsel %vm4735_vm2, %v2729_v51, %v2733_v52 }
 0x164   : > { %2252 = vst.msk [vmem:[#allocation2 + $0x1c] sm:$0xf] %vm2244_vm12, %v2163_v5  ;;  %v2161_v9 = vpop.permute.xlu0 %2160  ;;  %v2724_v4 = vsel %vm4735_vm2, %v2719_v57, %v2723_v26  ;;  %v2743_v5 = vrot.slane %v2742_v58, 4  ;;  %v4245_v58 = vld [vmem:[%s4724_s20 + $0x98] sm:$0x1] }
 0x165   : > { %2251 = vst.msk [vmem:[#allocation2 + $0x18] sm:$0xf] %vm2244_vm12, %v2161_v9  ;;  %1849 = vrot.lane.b32.xlu1 %v1666_v0, %s4680_s24  ;;  %v2757_v0 = vrot.slane %v2755_v54, 5  ;;  %v3193_v9 = vrot.slane %v4430_v2, 5  ;;  %v1707_v54 = vrot.slane %v1705_v42, 4 }
 0x166   : > { %1847 = vrot.lane.b32.xlu0 %v1656_v6, %s4680_s24  ;;  %v4428_v6 = vld [vmem:[%s4724_s20 + $0x80] sm:$0x1]  ;;  %v2748_v16 = vsel %vm4735_vm2, %v2743_v5, %v2747_v41  ;;  %v1701_v41 = vshll.u32 %v4244_v32, 16  ;;  %v4200_v5 = vld [vmem:[%s4724_s20 + $0x90] sm:$0xf] }
 0x167   : > { %v2353_v17 = vpop.permute.xlu1 %2352  ;;  %v2758_v10 = vsel %vm4735_vm2, %v2753_v63, %v2757_v0  ;;  %v3189_v12 = vrot.slane %v4428_v6, 5  ;;  %v3195_v21 = vrot.slane %v3193_v9, 4  ;;  %v4201_v63 = vld [vmem:[%s4724_s20 + $0x94] sm:$0xf] }
 0x168   : > { %2444 = vst.msk [vmem:[#allocation2 + $0x14] sm:$0xf] %vm2438_vm13, %v2353_v17  ;;  %v2351_v22 = vpop.permute.xlu0 %2350  ;;  %v4458_v17 = vrot.slane %v4426_v8, 9  ;;  %v1703_v53 = vrot.slane %v1701_v41, 5  ;;  %v4289_v8 = vld [vmem:[%s4724_s20 + $0x88] sm:$0xf] }
 0x169   : > { %2443 = vst.msk [vmem:[#allocation2 + $0x10] sm:$0xf] %vm2438_vm13, %v2351_v22  ;;  %2182 = vrot.lane.b32.xlu1 %v2098_v14, %s4681_s25  ;;  %v4429_v14 = vld [vmem:[%s4724_s20 + $0x84] sm:$0xe]  ;;  %v3196_v22 = vrot.slane %v4431_v13, 5  ;;  %v2108_v13 = vrot.slane %v4289_v8, 5 }
 0x16a   : > { %2180 = vrot.lane.b32.xlu0 %v2095_v18, %s4681_s25  ;;  %v4241_v18 = vld [vmem:[%s4724_s20 + $0x88] sm:$0xf]  ;;  %v4459_v23 = vrot.slane %v4429_v14, 9  ;;  %v3187_v29 = vsel %vm4879_vm6, %v4458_v17, %v3186_v1  ;;  %v1708_v2 = vor.u32 %v1707_v54, %v1703_v53  ;;  %v4292_v14 = vld [vmem:[%s4724_s20 + $0x94] sm:$0xf] }
 0x16b   : > { %v2357_v31 = vpop.permute.xlu1 %2356  ;;  %v1681_v26 = vshrl.u32 %v4241_v18, 16  ;;  %v3197_v36 = vsel %vm4879_vm6, %v3195_v21, %v3196_v22  ;;  %v2115_v21 = vrot.slane %v4292_v14, 5  ;;  %v4386_v54 = vld [vmem:[%s4724_s20 + $0x98] sm:$0x1] }
 0x16c   : > { %2446 = vst.msk [vmem:[#allocation2 + $0x1c] sm:$0xf] %vm2438_vm13, %v2357_v31  ;;  %v2355_v37 = vpop.permute.xlu0 %2354  ;;  %v1671_v31 = vshll.u32 %v4240_v20, 16  ;;  %v4288_v20 = vld [vmem:[%s4724_s20 + $0x84] sm:$0xe] }
 0x16d   : > { %2445 = vst.msk [vmem:[#allocation2 + $0x18] sm:$0xf] %vm2438_vm13, %v2355_v37  ;;  %2186 = vrot.lane.b32.xlu1 %v2105_v24, %s4681_s25  ;;  %v3190_v24 = vsel %vm4879_vm6, %v3188_v11, %v3189_v12  ;;  %v3194_v37 = vsel %vm4879_vm6, %v4459_v23, %v3193_v9  ;;  %v1683_v40 = vrot.slane %v1681_v26, 4  ;;  %v1709_v11 = vrot.slane %v1708_v2, 4  ;;  %v4291_v26 = vld [vmem:[%s4724_s20 + $0x90] sm:$0xe] }
 0x16e   : > { %2184 = vrot.lane.b32.xlu0 %v2102_v25, %s4681_s25  ;;  %v1677_v25 = vshll.u32 %v4241_v18, 16  ;;  %v1673_v45 = vrot.slane %v1671_v31, 5  ;;  %v4290_v18 = vld [vmem:[%s4724_s20 + $0x8c] sm:$0x1]  ;;  %v2110_v23 = vrot.slane %v2108_v13, 4 }
 0x16f   : > { %v2914_v44 = vpop.permute.xlu1 %2913  ;;  %v4385_v31 = vld [vmem:[%s4724_s20 + $0x94] sm:$0xf] }
 0x170   : > { %3005 = vst.msk [vmem:[#allocation2 + $0x14] sm:$0xf] %vm2999_vm14, %v2914_v44  ;;  %v2912_v49 = vpop.permute.xlu0 %2911  ;;  %v1679_v39 = vrot.slane %v1677_v25, 5  ;;  %v4293_v25 = vld [vmem:[%s4724_s20 + $0x98] sm:$0x1] }
 0x171   : > { %3004 = vst.msk [vmem:[#allocation2 + $0x10] sm:$0xf] %vm2999_vm14, %v2912_v49  ;;  %2376 = vrot.lane.b32.xlu1 %v4339_v38, %s4682_s26  ;;  %v4242_v38 = vld [vmem:[%s4724_s20 + $0x8c] sm:$0x1]  ;;  %v2118_v35 = vrot.slane %v4293_v25, 5 }
 0x172   : > { %2374 = vrot.lane.b32.xlu0 %v4338_v43, %s4682_s26  ;;  %v1670_v43 = vrot.slane %v1668_v30, 4  ;;  %v1684_v51 = vor.u32 %v1683_v40, %v1679_v39  ;;  %v1687_v52 = vshll.u32 %v4242_v38, 16  ;;  %v4316_v30 = vrot.slane %v4288_v20, 9 }
 0x173   : > { %v2918_v55 = vpop.permute.xlu1 %2917  ;;  %v2769_v38 = vshll.u32 %v4385_v31, 16 }
 0x174   : > { %3007 = vst.msk [vmem:[#allocation2 + $0x1c] sm:$0xf] %vm2999_vm14, %v2918_v55  ;;  %v2916_v60 = vpop.permute.xlu0 %2915  ;;  %v1674_v57 = vor.u32 %v1673_v45, %v1670_v43  ;;  %v1685_v0 = vrot.slane %v1684_v51, 4  ;;  %v1689_v1 = vrot.slane %v1687_v52, 5  ;;  %v2109_v41 = vsel %vm4879_vm6, %v4316_v30, %v2108_v13  ;;  %v4388_v43 = vld [vmem:[%s4724_s20 + $0xa0] sm:$0xf] }
 0x175   : > { %3006 = vst.msk [vmem:[#allocation2 + $0x18] sm:$0xf] %vm2999_vm14, %v2916_v60  ;;  %2380 = vrot.lane.b32.xlu1 %v4341_v50, %s4682_s26  ;;  %v4199_v50 = vld [vmem:[%s4724_s20 + $0x88] sm:$0xf]  ;;  %v1697_v60 = vrot.slane %v1695_v47, 5  ;;  %v2793_v51 = vshll.u32 %v4388_v43, 16 }
 0x176   : > { %2378 = vrot.lane.b32.xlu0 %v4340_v56, %s4682_s26  ;;  %v4198_v56 = vld [vmem:[%s4724_s20 + $0x84] sm:$0xf]  ;;  %v1675_v6 = vrot.slane %v1674_v57, 4  ;;  %v2797_v52 = vshrl.u32 %v4388_v43, 16  ;;  %v2784_v57 = vshrl.u32 %v4387_v46, 16 }
 0x177   : > { %v3251_v3 = vpop.permute.xlu1 %3250 }
 0x178   : > { %3342 = vst.msk [vmem:[#allocation2 + $0x14] sm:$0xf] %vm3336_vm15, %v3251_v3  ;;  %v3249_v7 = vpop.permute.xlu0 %3248  ;;  %v1711_v3 = vshll.u32 %v4245_v58, 16  ;;  %v2787_v58 = vshll.u32 %v4387_v46, 16 }
 0x179   : > { %3341 = vst.msk [vmem:[#allocation2 + $0x10] sm:$0xf] %vm3336_vm15, %v3249_v7  ;;  %2937 = vrot.lane.b32.xlu1 %v2734_v61, %s4683_s5  ;;  %v1698_v7 = vor.u32 %v1697_v60, %v1694_v59  ;;  %v4343_v60 = vld [vmem:[%s4724_s20 + $0x94] sm:$0xf] }
 0x17a   : > { %2935 = vrot.lane.b32.xlu0 %v2724_v4, %s4683_s5  ;;  %v1713_v12 = vrot.slane %v1711_v3, 5  ;;  %v4342_v3 = vld [vmem:[%s4724_s20 + $0x90] sm:$0xf] }
 0x17b   : > { %v3255_v15 = vpop.permute.xlu1 %3254  ;;  %v1699_v17 = vrot.slane %v1698_v7, 4  ;;  %v2789_v7 = vrot.slane %v2787_v58, 5  ;;  %v4249_v58 = vld [vmem:[%s4724_s20 + $0xa8] sm:$0xf] }
 0x17c   : > { %3344 = vst.msk [vmem:[#allocation2 + $0x1c] sm:$0xf] %vm3336_vm15, %v3255_v15  ;;  %v3253_v19 = vpop.permute.xlu0 %3252  ;;  %v1714_v22 = vsel %vm4735_vm2, %v1709_v11, %v1713_v12 }
 0x17d   : > { %3343 = vst.msk [vmem:[#allocation2 + $0x18] sm:$0xf] %vm3336_vm15, %v3253_v19  ;;  %2941 = vrot.lane.b32.xlu1 %v2758_v10, %s4683_s5  ;;  %v1690_v10 = vsel %vm4735_vm2, %v1685_v0, %v1689_v1  ;;  %v5804_v0 = vrot.slane %v2793_v51, 5  ;;  %v2799_v1 = vrot.slane %v2797_v52, 4 }
 0x17e   : > { %2939 = vrot.lane.b32.xlu0 %v2748_v16, %s4683_s5  ;;  %v1680_v16 = vsel %vm4735_vm2, %v1675_v6, %v1679_v39  ;;  %v2773_v39 = vshrl.u32 %v4385_v31, 16  ;;  %v2786_v6 = vrot.slane %v2784_v57, 4 }
 0x17f   : > { %v1830_v28 = vpop.permute.xlu1 %1829  ;;  %v2800_v12 = vor.u32 %v2799_v1, %v5804_v0 }
 0x180   : > { %1917 = vst.msk [vmem:[#allocation2 + $0x24] sm:$0xf] %vm1907_vm11, %v1830_v28  ;;  %v1828_v33 = vpop.permute.xlu0 %1827  ;;  %v4655_v34 = vld [vmem:[#allocation2 + $0x10] sm:$0xff]  }
 0x181   : > { %1916 = vst.msk [vmem:[#allocation2 + $0x20] sm:$0xf] %vm1907_vm11, %v1828_v33  ;;  %3274 = vrot.lane.b32.xlu1 %v3190_v24, %s4684_s8  ;;  %4597 = vmatprep.mubr.msk.bf16.mxu0 %vm3501_vm0, %v4655_v34  ;;  %v2111_v24 = vrot.slane %v4290_v18, 5  ;;  %v4384_v33 = vld [vmem:[%s4724_s20 + $0x90] sm:$0xf]  ;;  %v2117_v34 = vrot.slane %v2115_v21, 4 }
 0x182   : > { %3272 = vrot.lane.b32.xlu0 %v3187_v29, %s4684_s8  ;;  %v1704_v29 = vsel %vm4735_vm2, %v1699_v17, %v1703_v53  ;;  %v2760_v42 = vshrl.u32 %v4384_v33, 16  ;;  %v2790_v17 = vor.u32 %v2789_v7, %v2786_v6  ;;  %v4433_v18 = vld [vmem:[%s4724_s20 + $0x94] sm:$0xf]  ;;  %v1740_v6 = vshrl.u32 %v4249_v58, 16 }
 0x183   : > { %v1834_v44 = vpop.permute.xlu1 %1833  ;;  %v2119_v47 = vsel %vm4879_vm6, %v2117_v34, %v2118_v35  ;;  %v1743_v7 = vshll.u32 %v4249_v58, 16 }
 0x184   : > { %1919 = vst.msk [vmem:[#allocation2 + $0x2c] sm:$0xf] %vm1907_vm11, %v1834_v44  ;;  %v1832_v48 = vpop.permute.xlu0 %1831  ;;  %v4656_v49 = vld [vmem:[#allocation2 + $0x18] sm:$0xff]   ;;  %v2763_v44 = vshll.u32 %v4384_v33, 16 }
 0x185   : > { %1918 = vst.msk [vmem:[#allocation2 + $0x28] sm:$0xf] %vm1907_vm11, %v1832_v48  ;;  %3278 = vrot.lane.b32.xlu1 %v3197_v36, %s4684_s8  ;;  %4598 = vmatmul.mubr.msk.bf16.gmra.mxu0 %vm3501_vm0, %v4656_v49  ;;  %v4317_v36 = vrot.slane %v4291_v26, 9  ;;  %v2771_v49 = vrot.slane %v2769_v38, 5  ;;  %v4435_v38 = vld [vmem:[%s4724_s20 + $0x9c] sm:$0xe] }
 0x186   : > { %3276 = vrot.lane.b32.xlu0 %v3194_v37, %s4684_s8  ;;  %v2112_v37 = vsel %vm4879_vm6, %v2110_v23, %v2111_v24  ;;  %v3200_v23 = vrot.slane %v4433_v18, 5  ;;  %v4436_v24 = vld [vmem:[%s4724_s20 + $0xa0] sm:$0xf]  ;;  %v1742_v18 = vrot.slane %v1740_v6, 4 }
 0x187   : > { %v2167_v55 = vpop.permute.xlu1 %2166  ;;  %v2116_v48 = vsel %vm4879_vm6, %v4317_v36, %v2115_v21  ;;  %v2801_v21 = vrot.slane %v2800_v12, 4  ;;  %v3207_v33 = vrot.slane %v4436_v24, 5 }
 0x188   : > { %2254 = vst.msk [vmem:[#allocation2 + $0x24] sm:$0xf] %vm2244_vm12, %v2167_v55  ;;  %v2165_v61 = vpop.permute.xlu0 %2164  ;;  %v2762_v55 = vrot.slane %v2760_v42, 4  ;;  %v3202_v35 = vrot.slane %v3200_v23, 4  ;;  %v4247_v42 = vld [vmem:[%s4724_s20 + $0xa0] sm:$0xf] }
 0x189   : > { %2253 = vst.msk [vmem:[#allocation2 + $0x20] sm:$0xf] %vm2244_vm12, %v2165_v61  ;;  %1292 = vrot.lane.b32.xlu1 %v4199_v50, %s4679_s23  ;;  %v2775_v50 = vrot.slane %v2773_v39, 4  ;;  %v3209_v46 = vrot.slane %v3207_v33, 4  ;;  %v1729_v51 = vshrl.u32 %v4247_v42, 16 }
 0x18a   : > { %1290 = vrot.lane.b32.xlu0 %v4198_v56, %s4679_s23  ;;  %v2765_v56 = vrot.slane %v2763_v44, 5 }
 0x18b   : > { %v2171_v4 = vpop.permute.xlu1 %2170  ;;  %v2776_v61 = vor.u32 %v2775_v50, %v2771_v49  ;;  %v1725_v50 = vshll.u32 %v4247_v42, 16 }
 0x18c   : > { %2256 = vst.msk [vmem:[#allocation2 + $0x2c] sm:$0xf] %vm2244_vm12, %v2171_v4  ;;  %v2169_v9 = vpop.permute.xlu0 %2168  ;;  %v2766_v4 = vor.u32 %v2765_v56, %v2762_v55  ;;  %v4250_v56 = vld [vmem:[%s4724_s20 + $0xac] sm:$0xf] }
 0x18d   : > { %2255 = vst.msk [vmem:[#allocation2 + $0x28] sm:$0xf] %vm2244_vm12, %v2169_v9  ;;  %1296 = vrot.lane.b32.xlu1 %v4201_v63, %s4679_s23  ;;  %v2779_v63 = vshll.u32 %v4386_v54, 16  ;;  %v4345_v9 = vld [vmem:[%s4724_s20 + $0xa0] sm:$0xf]  ;;  %v1753_v1 = vshrl.u32 %v4250_v56, 16 }
 0x18e   : > { %1294 = vrot.lane.b32.xlu0 %v4200_v5, %s4679_s23  ;;  %v4389_v5 = vld [vmem:[%s4724_s20 + $0xa4] sm:$0x1] }
 0x18f   : > { %v2361_v15 = vpop.permute.xlu1 %2360  ;;  %v2781_v11 = vrot.slane %v2779_v63, 5  ;;  %v2803_v13 = vshll.u32 %v4389_v5, 16  ;;  %v1731_v63 = vrot.slane %v1729_v51, 4 }
 0x190   : > { %2448 = vst.msk [vmem:[#allocation2 + $0x24] sm:$0xf] %vm2438_vm13, %v2361_v15  ;;  %v2359_v19 = vpop.permute.xlu0 %2358  ;;  %v4344_v15 = vld [vmem:[%s4724_s20 + $0x9c] sm:$0xf] }
 0x191   : > { %2447 = vst.msk [vmem:[#allocation2 + $0x20] sm:$0xf] %vm2438_vm13, %v2359_v19  ;;  %1853 = vrot.lane.b32.xlu1 %v1690_v10, %s4680_s24  ;;  %v2777_v10 = vrot.slane %v2776_v61, 4  ;;  %v1727_v61 = vrot.slane %v1725_v50, 5 }
 0x192   : > { %1851 = vrot.lane.b32.xlu0 %v1680_v16, %s4680_s24  ;;  %v2767_v16 = vrot.slane %v2766_v4, 4 }
 0x193   : > { %v2365_v28 = vpop.permute.xlu1 %2364  ;;  %v2782_v20 = vsel %vm4735_vm2, %v2777_v10, %v2781_v11  ;;  %v1732_v10 = vor.u32 %v1731_v63, %v1727_v61 }
 0x194   : > { %2450 = vst.msk [vmem:[#allocation2 + $0x2c] sm:$0xf] %vm2438_vm13, %v2365_v28  ;;  %v2363_v32 = vpop.permute.xlu0 %2362  ;;  %v2772_v26 = vsel %vm4735_vm2, %v2767_v16, %v2771_v49  ;;  %v2791_v28 = vrot.slane %v2790_v17, 4  ;;  %v4251_v17 = vld [vmem:[%s4724_s20 + $0xb0] sm:$0x1] }
 0x195   : > { %2449 = vst.msk [vmem:[#allocation2 + $0x28] sm:$0xf] %vm2438_vm13, %v2363_v32  ;;  %1857 = vrot.lane.b32.xlu1 %v1714_v22, %s4680_s24  ;;  %v2805_v22 = vrot.slane %v2803_v13, 5  ;;  %v4432_v32 = vld [vmem:[%s4724_s20 + $0x90] sm:$0xe]  ;;  %v1755_v13 = vrot.slane %v1753_v1, 4 }
 0x196   : > { %1855 = vrot.lane.b32.xlu0 %v1704_v29, %s4680_s24  ;;  %v4434_v29 = vld [vmem:[%s4724_s20 + $0x98] sm:$0x1] }
 0x197   : > { %v2922_v40 = vpop.permute.xlu1 %2921  ;;  %v2806_v34 = vsel %vm4735_vm2, %v2801_v21, %v2805_v22  ;;  %v3203_v36 = vrot.slane %v4434_v29, 5  ;;  %v4205_v21 = vld [vmem:[%s4724_s20 + $0xac] sm:$0xf]  ;;  %v1733_v22 = vrot.slane %v1732_v10, 4 }
 0x198   : > { %3009 = vst.msk [vmem:[#allocation2 + $0x24] sm:$0xf] %vm2999_vm14, %v2922_v40  ;;  %v2920_v45 = vpop.permute.xlu0 %2919  ;;  %v2796_v40 = vsel %vm4735_vm2, %v2791_v28, %v5804_v0  ;;  %v1749_v0 = vshll.u32 %v4250_v56, 16  ;;  %v4204_v28 = vld [vmem:[%s4724_s20 + $0xa8] sm:$0xf] }
 0x199   : > { %3008 = vst.msk [vmem:[#allocation2 + $0x20] sm:$0xf] %vm2999_vm14, %v2920_v45  ;;  %2190 = vrot.lane.b32.xlu1 %v2112_v37, %s4681_s25  ;;  %v4437_v37 = vld [vmem:[%s4724_s20 + $0xa4] sm:$0x1]  ;;  %v4246_v45 = vld [vmem:[%s4724_s20 + $0x9c] sm:$0xf]  ;;  %v3204_v49 = vsel %vm4879_vm6, %v3202_v35, %v3203_v36 }
 0x19a   : > { %2188 = vrot.lane.b32.xlu0 %v2109_v41, %s4681_s25  ;;  %v4460_v41 = vrot.slane %v4432_v32, 9  ;;  %v1716_v54 = vshrl.u32 %v4246_v45, 16  ;;  %v1719_v55 = vshll.u32 %v4246_v45, 16  ;;  %v1751_v12 = vrot.slane %v1749_v0, 5 }
 0x19b   : > { %v2926_v53 = vpop.permute.xlu1 %2925 }
 0x19c   : > { %3011 = vst.msk [vmem:[#allocation2 + $0x2c] sm:$0xf] %vm2999_vm14, %v2926_v53  ;;  %v2924_v59 = vpop.permute.xlu0 %2923  ;;  %v3201_v53 = vsel %vm4879_vm6, %v4460_v41, %v3200_v23  ;;  %v1718_v4 = vrot.slane %v1716_v54, 4  ;;  %v1721_v5 = vrot.slane %v1719_v55, 5  ;;  %v1756_v24 = vor.u32 %v1755_v13, %v1751_v12  ;;  %v4296_v41 = vld [vmem:[%s4724_s20 + $0xa4] sm:$0x1] }
 0x19d   : > { %3010 = vst.msk [vmem:[#allocation2 + $0x28] sm:$0xf] %vm2999_vm14, %v2924_v59  ;;  %2194 = vrot.lane.b32.xlu1 %v2119_v47, %s4681_s25  ;;  %v3210_v47 = vrot.slane %v4437_v37, 5  ;;  %v4298_v37 = vld [vmem:[%s4724_s20 + $0xac] sm:$0xf] }
 0x19e   : > { %2192 = vrot.lane.b32.xlu0 %v2116_v48, %s4681_s25  ;;  %v4461_v48 = vrot.slane %v4435_v38, 9  ;;  %v1722_v16 = vor.u32 %v1721_v5, %v1718_v4  ;;  %v4390_v55 = vld [vmem:[%s4724_s20 + $0xa8] sm:$0xf]  ;;  %v4393_v5 = vld [vmem:[%s4724_s20 + $0xb4] sm:$0xf] }
 0x19f   : > { %v3259_v2 = vpop.permute.xlu1 %3258  ;;  %v3211_v59 = vsel %vm4879_vm6, %v3209_v46, %v3210_v47  ;;  %v2125_v47 = vrot.slane %v4296_v41, 5  ;;  %v2808_v1 = vshrl.u32 %v4390_v55, 16  ;;  %v4392_v13 = vld [vmem:[%s4724_s20 + $0xb0] sm:$0x1] }
 0x1a0   : > { %3346 = vst.msk [vmem:[#allocation2 + $0x24] sm:$0xf] %vm3336_vm15, %v3259_v2  ;;  %v3257_v8 = vpop.permute.xlu0 %3256  ;;  %v1723_v29 = vrot.slane %v1722_v16, 4  ;;  %v2832_v16 = vshrl.u32 %v4393_v5, 16 }
 0x1a1   : > { %3345 = vst.msk [vmem:[#allocation2 + $0x20] sm:$0xf] %vm3336_vm15, %v3257_v8  ;;  %2384 = vrot.lane.b32.xlu1 %v4343_v60, %s4682_s26  ;;  %v3208_v60 = vsel %vm4879_vm6, %v4461_v48, %v3207_v33  ;;  %v4299_v48 = vld [vmem:[%s4724_s20 + $0xb0] sm:$0x1] }
 0x1a2   : > { %2382 = vrot.lane.b32.xlu0 %v4342_v3, %s4682_s26  ;;  %v4248_v3 = vld [vmem:[%s4724_s20 + $0xa4] sm:$0x1] }
 0x1a3   : > { %v3263_v14 = vpop.permute.xlu1 %3262  ;;  %v1735_v11 = vshll.u32 %v4248_v3, 16  ;;  %v4394_v3 = vld [vmem:[%s4724_s20 + $0xb8] sm:$0xf] }
 0x1a4   : > { %3348 = vst.msk [vmem:[#allocation2 + $0x2c] sm:$0xf] %vm3336_vm15, %v3263_v14  ;;  %v3261_v19 = vpop.permute.xlu0 %3260  ;;  %v2841_v10 = vshll.u32 %v4394_v3, 16 }
 0x1a5   : > { %3347 = vst.msk [vmem:[#allocation2 + $0x28] sm:$0xf] %vm3336_vm15, %v3261_v19  ;;  %2388 = vrot.lane.b32.xlu1 %v4345_v9, %s4682_s26  ;;  %v4203_v9 = vld [vmem:[%s4724_s20 + $0xa0] sm:$0xf]  ;;  %v1745_v19 = vrot.slane %v1743_v7, 5  ;;  %v1737_v23 = vrot.slane %v1735_v11, 5 }
 0x1a6   : > { %2386 = vrot.lane.b32.xlu0 %v4344_v15, %s4682_s26  ;;  %v4202_v15 = vld [vmem:[%s4724_s20 + $0x9c] sm:$0xf]  ;;  %v2845_v11 = vshrl.u32 %v4394_v3, 16 }
 0x1a7   : > { %v1838_v25 = vpop.permute.xlu1 %1837  ;;  %v1738_v33 = vsel %vm4735_vm2, %v1733_v22, %v1737_v23  ;;  %v2827_v22 = vshll.u32 %v4392_v13, 16  ;;  %v5926_v23 = vrot.slane %v2841_v10, 5 }
 0x1a8   : > { %1921 = vst.msk [vmem:[#allocation2 + $0x34] sm:$0xf] %vm1907_vm11, %v1838_v25  ;;  %v1836_v30 = vpop.permute.xlu0 %1835  ;;  %v4657_v31 = vld [vmem:[#allocation2 + $0x20] sm:$0xff]   ;;  %v1759_v25 = vshll.u32 %v4251_v17, 16  ;;  %v2835_v17 = vshll.u32 %v4393_v5, 16 }
 0x1a9   : > { %1920 = vst.msk [vmem:[#allocation2 + $0x30] sm:$0xf] %vm1907_vm11, %v1836_v30  ;;  %2945 = vrot.lane.b32.xlu1 %v2782_v20, %s4683_s5  ;;  %4601 = vmatprep.mubr.msk.bf16.mxu0 %vm3501_vm0, %v4657_v31  ;;  %v1746_v30 = vor.u32 %v1745_v19, %v1742_v18  ;;  %v4295_v31 = vld [vmem:[%s4724_s20 + $0xa0] sm:$0xf]  ;;  %v4347_v19 = vld [vmem:[%s4724_s20 + $0xac] sm:$0xf] }
 0x1aa   : > { %2943 = vrot.lane.b32.xlu0 %v2772_v26, %s4683_s5  ;;  %v1761_v35 = vrot.slane %v1759_v25, 5  ;;  %v2122_v36 = vrot.slane %v4295_v31, 5 }
 0x1ab   : > { %v1842_v39 = vpop.permute.xlu1 %1841 }
 0x1ac   : > { %1923 = vst.msk [vmem:[#allocation2 + $0x3c] sm:$0xf] %vm1907_vm11, %v1842_v39  ;;  %v1840_v44 = vpop.permute.xlu0 %1839  ;;  %v4658_v43 = vld [vmem:[#allocation2 + $0x28] sm:$0xff]   ;;  %v1728_v39 = vsel %vm4735_vm2, %v1723_v29, %v1727_v61  ;;  %v2124_v46 = vrot.slane %v2122_v36, 4  ;;  %v2834_v29 = vrot.slane %v2832_v16, 4 }
 0x1ad   : > { %1922 = vst.msk [vmem:[#allocation2 + $0x38] sm:$0xf] %vm1907_vm11, %v1840_v44  ;;  %2949 = vrot.lane.b32.xlu1 %v2806_v34, %s4683_s5  ;;  %4602 = vmatmul.mubr.msk.bf16.gmra.mxu0 %vm3501_vm0, %v4658_v43  ;;  %v1757_v34 = vrot.slane %v1756_v24, 4  ;;  %v4294_v44 = vld [vmem:[%s4724_s20 + $0x9c] sm:$0xe]  ;;  %v2129_v43 = vrot.slane %v4298_v37, 5 }
 0x1ae   : > { %2947 = vrot.lane.b32.xlu0 %v2796_v40, %s4683_s5  ;;  %v1747_v40 = vrot.slane %v1746_v30, 4  ;;  %v2847_v24 = vrot.slane %v2845_v11, 4  ;;  %v2837_v30 = vrot.slane %v2835_v17, 5  ;;  %v4255_v17 = vld [vmem:[%s4724_s20 + $0xc0] sm:$0xf] }
 0x1af   : > { %v2175_v52 = vpop.permute.xlu1 %2174  ;;  %v1762_v45 = vsel %vm4735_vm2, %v1757_v34, %v1761_v35  ;;  %v2131_v56 = vrot.slane %v2129_v43, 4  ;;  %v4348_v34 = vld [vmem:[%s4724_s20 + $0xb4] sm:$0xf] }
 0x1b0   : > { %2258 = vst.msk [vmem:[#allocation2 + $0x34] sm:$0xf] %vm2244_vm12, %v2175_v52  ;;  %v2173_v57 = vpop.permute.xlu0 %2172  ;;  %v1752_v51 = vsel %vm4735_vm2, %v1747_v40, %v1751_v12  ;;  %v4318_v52 = vrot.slane %v4294_v44, 9  ;;  %v2848_v37 = vor.u32 %v2847_v24, %v5926_v23  ;;  %v2838_v41 = vor.u32 %v2837_v30, %v2834_v29 }
 0x1b1   : > { %2257 = vst.msk [vmem:[#allocation2 + $0x30] sm:$0xf] %vm2244_vm12, %v2173_v57  ;;  %3282 = vrot.lane.b32.xlu1 %v3204_v49, %s4684_s8  ;;  %v4297_v49 = vld [vmem:[%s4724_s20 + $0xa8] sm:$0xe]  ;;  %v2132_v57 = vrot.slane %v4299_v48, 5  ;;  %v1788_v29 = vshrl.u32 %v4255_v17, 16 }
 0x1b2   : > { %3280 = vrot.lane.b32.xlu0 %v3201_v53, %s4684_s8  ;;  %v4391_v53 = vld [vmem:[%s4724_s20 + $0xac] sm:$0xf]  ;;  %v4319_v58 = vrot.slane %v4297_v49, 9  ;;  %v2123_v0 = vsel %vm4879_vm6, %v4318_v52, %v2122_v36  ;;  %v2829_v36 = vrot.slane %v2827_v22, 5  ;;  %v4442_v49 = vld [vmem:[%s4724_s20 + $0xb8] sm:$0xf] }
 0x1b3   : > { %v2179_v2 = vpop.permute.xlu1 %2178  ;;  %v2821_v61 = vshrl.u32 %v4391_v53, 16  ;;  %v2133_v6 = vsel %vm4879_vm6, %v2131_v56, %v2132_v57  ;;  %v2839_v52 = vrot.slane %v2838_v41, 4  ;;  %v3221_v56 = vrot.slane %v4442_v49, 5 }
 0x1b4   : > { %2260 = vst.msk [vmem:[#allocation2 + $0x3c] sm:$0xf] %vm2244_vm12, %v2179_v2  ;;  %v2177_v8 = vpop.permute.xlu0 %2176  ;;  %v2811_v2 = vshll.u32 %v4390_v55, 16  ;;  %v2130_v7 = vsel %vm4879_vm6, %v4319_v58, %v2129_v43  ;;  %v4438_v55 = vld [vmem:[%s4724_s20 + $0xa8] sm:$0xe]  ;;  %v1791_v30 = vshll.u32 %v4255_v17, 16 }
 0x1b5   : > { %2259 = vst.msk [vmem:[#allocation2 + $0x38] sm:$0xf] %vm2244_vm12, %v2177_v8  ;;  %3286 = vrot.lane.b32.xlu1 %v3211_v59, %s4684_s8  ;;  %v2126_v59 = vsel %vm4879_vm6, %v2124_v46, %v2125_v47  ;;  %v2849_v46 = vrot.slane %v2848_v37, 4  ;;  %v3223_v5 = vrot.slane %v3221_v56, 4  ;;  %v1790_v41 = vrot.slane %v1788_v29, 4 }
 0x1b6   : > { %3284 = vrot.lane.b32.xlu0 %v3208_v60, %s4684_s8  ;;  %v2817_v60 = vshll.u32 %v4391_v53, 16  ;;  %v4440_v53 = vld [vmem:[%s4724_s20 + $0xb0] sm:$0x1] }
 0x1b7   : > { %v2369_v14 = vpop.permute.xlu1 %2368 }
 0x1b8   : > { %2452 = vst.msk [vmem:[#allocation2 + $0x34] sm:$0xf] %vm2438_vm13, %v2369_v14  ;;  %v2367_v20 = vpop.permute.xlu0 %2366  ;;  %v5916_v8 = vrot.slane %v2817_v60, 5  ;;  %v2810_v14 = vrot.slane %v2808_v1, 4  ;;  %v4443_v60 = vld [vmem:[%s4724_s20 + $0xbc] sm:$0x1] }
 0x1b9   : > { %2451 = vst.msk [vmem:[#allocation2 + $0x30] sm:$0xf] %vm2438_vm13, %v2367_v20  ;;  %1300 = vrot.lane.b32.xlu1 %v4203_v9, %s4679_s23  ;;  %v2823_v9 = vrot.slane %v2821_v61, 4  ;;  %v4346_v20 = vld [vmem:[%s4724_s20 + $0xa8] sm:$0xf]  ;;  %v4462_v1 = vrot.slane %v4438_v55, 9 }
 0x1ba   : > { %1298 = vrot.lane.b32.xlu0 %v4202_v15, %s4679_s23  ;;  %v2813_v15 = vrot.slane %v2811_v2, 5  ;;  %v4441_v61 = vld [vmem:[%s4724_s20 + $0xb4] sm:$0xe]  ;;  %v4253_v2 = vld [vmem:[%s4724_s20 + $0xb8] sm:$0xf] }
 0x1bb   : > { %v2373_v26 = vpop.permute.xlu1 %2372  ;;  %v1777_v10 = vshrl.u32 %v4253_v2, 16 }
 0x1bc   : > { %2454 = vst.msk [vmem:[#allocation2 + $0x3c] sm:$0xf] %vm2438_vm13, %v2373_v26  ;;  %v2371_v32 = vpop.permute.xlu0 %2370  ;;  %v2814_v26 = vor.u32 %v2813_v15, %v2810_v14  ;;  %v4256_v15 = vld [vmem:[%s4724_s20 + $0xc4] sm:$0xf] }
 0x1bd   : > { %2453 = vst.msk [vmem:[#allocation2 + $0x38] sm:$0xf] %vm2438_vm13, %v2371_v32  ;;  %1304 = vrot.lane.b32.xlu1 %v4205_v21, %s4679_s23  ;;  %v2824_v21 = vor.u32 %v2823_v9, %v5916_v8  ;;  %v1773_v9 = vshll.u32 %v4253_v2, 16  ;;  %v1797_v22 = vshll.u32 %v4256_v15, 16  ;;  %v4300_v2 = vld [vmem:[%s4724_s20 + $0xb4] sm:$0xe] }
 0x1be   : > { %1302 = vrot.lane.b32.xlu0 %v4204_v28, %s4679_s23  ;;  %v4395_v28 = vld [vmem:[%s4724_s20 + $0xbc] sm:$0x1]  ;;  %v2815_v40 = vrot.slane %v2814_v26, 4 }
 0x1bf   : > { %v2930_v38 = vpop.permute.xlu1 %2929  ;;  %v2825_v35 = vrot.slane %v2824_v21, 4  ;;  %v1779_v21 = vrot.slane %v1777_v10, 4 }
 0x1c0   : > { %3013 = vst.msk [vmem:[#allocation2 + $0x34] sm:$0xf] %vm2999_vm14, %v2930_v38  ;;  %v2928_v42 = vpop.permute.xlu0 %2927  ;;  %v2851_v38 = vshll.u32 %v4395_v28, 16 }
 0x1c1   : > { %3012 = vst.msk [vmem:[#allocation2 + $0x30] sm:$0xf] %vm2999_vm14, %v2928_v42  ;;  %1861 = vrot.lane.b32.xlu1 %v1738_v33, %s4680_s24  ;;  %v4349_v33 = vld [vmem:[%s4724_s20 + $0xb8] sm:$0xf]  ;;  %v4439_v42 = vld [vmem:[%s4724_s20 + $0xac] sm:$0xf] }
 0x1c2   : > { %1859 = vrot.lane.b32.xlu0 %v1728_v39, %s4680_s24  ;;  %v2853_v47 = vrot.slane %v2851_v38, 5  ;;  %v3214_v48 = vrot.slane %v4439_v42, 5  ;;  %v4206_v38 = vld [vmem:[%s4724_s20 + $0xb4] sm:$0xf]  ;;  %v1793_v42 = vrot.slane %v1791_v30, 5 }
 0x1c3   : > { %v2934_v50 = vpop.permute.xlu1 %2933 }
 0x1c4   : > { %3015 = vst.msk [vmem:[#allocation2 + $0x3c] sm:$0xf] %vm2999_vm14, %v2934_v50  ;;  %v2932_v54 = vpop.permute.xlu0 %2931  ;;  %v2854_v57 = vsel %vm4735_vm2, %v2849_v46, %v2853_v47  ;;  %v3216_v58 = vrot.slane %v3214_v48, 4 }
 0x1c5   : > { %3014 = vst.msk [vmem:[#allocation2 + $0x38] sm:$0xf] %vm2999_vm14, %v2932_v54  ;;  %1865 = vrot.lane.b32.xlu1 %v1762_v45, %s4680_s24  ;;  %v2830_v45 = vsel %vm4735_vm2, %v2825_v35, %v2829_v36  ;;  %v1799_v35 = vrot.slane %v1797_v22, 5 }
 0x1c6   : > { %1863 = vrot.lane.b32.xlu0 %v1752_v51, %s4680_s24  ;;  %v2820_v51 = vsel %vm4735_vm2, %v2815_v40, %v5916_v8  ;;  %v4257_v40 = vld [vmem:[%s4724_s20 + $0xc8] sm:$0x1] }
 0x1c7   : > { %v3267_v63 = vpop.permute.xlu1 %3266 }
 0x1c8   : > { %3350 = vst.msk [vmem:[#allocation2 + $0x34] sm:$0xf] %vm3336_vm15, %v3267_v63  ;;  %v3265_v4 = vpop.permute.xlu0 %3264 }
 0x1c9   : > { %3349 = vst.msk [vmem:[#allocation2 + $0x30] sm:$0xf] %vm3336_vm15, %v3265_v4  ;;  %2198 = vrot.lane.b32.xlu1 %v2126_v59, %s4681_s25  ;;  %v3217_v59 = vrot.slane %v4440_v53, 5  ;;  %v4252_v4 = vld [vmem:[%s4724_s20 + $0xb4] sm:$0xf] }
 0x1ca   : > { %2196 = vrot.lane.b32.xlu0 %v2123_v0, %s4681_s25  ;;  %v2844_v0 = vsel %vm4735_vm2, %v2839_v52, %v5926_v23  ;;  %v1764_v13 = vshrl.u32 %v4252_v4, 16  ;;  %v1767_v14 = vshll.u32 %v4252_v4, 16  ;;  %v1801_v23 = vshrl.u32 %v4256_v15, 16  ;;  %v4301_v53 = vld [vmem:[%s4724_s20 + $0xb8] sm:$0xf] }
 0x1cb   : > { %v3271_v12 = vpop.permute.xlu1 %3270  ;;  %v3218_v8 = vsel %vm4879_vm6, %v3216_v58, %v3217_v59  ;;  %v1794_v52 = vor.u32 %v1793_v42, %v1790_v41  ;;  %v2136_v58 = vrot.slane %v4301_v53, 5  ;;  %v4304_v59 = vld [vmem:[%s4724_s20 + $0xc4] sm:$0xf] }
 0x1cc   : > { %3352 = vst.msk [vmem:[#allocation2 + $0x3c] sm:$0xf] %vm3336_vm15, %v3271_v12  ;;  %v3269_v18 = vpop.permute.xlu0 %3268  ;;  %v3215_v12 = vsel %vm4879_vm6, %v4462_v1, %v3214_v48  ;;  %v1766_v26 = vrot.slane %v1764_v13, 4  ;;  %v1769_v28 = vrot.slane %v1767_v14, 5  ;;  %v1803_v36 = vrot.slane %v1801_v23, 4 }
 0x1cd   : > { %3351 = vst.msk [vmem:[#allocation2 + $0x38] sm:$0xf] %vm3336_vm15, %v3269_v18  ;;  %2202 = vrot.lane.b32.xlu1 %v2133_v6, %s4681_s25  ;;  %v3224_v6 = vrot.slane %v4443_v60, 5  ;;  %v1807_v48 = vshll.u32 %v4257_v40, 16  ;;  %v4396_v14 = vld [vmem:[%s4724_s20 + $0xc0] sm:$0xf] }
 0x1ce   : > { %2200 = vrot.lane.b32.xlu0 %v2130_v7, %s4681_s25  ;;  %v4463_v7 = vrot.slane %v4441_v61, 9  ;;  %v1804_v47 = vor.u32 %v1803_v36, %v1799_v35  ;;  %v2856_v23 = vshrl.u32 %v4396_v14, 16 }
 0x1cf   : > { %v1289_v25 = vpop.permute.xlu1 %1288  ;;  %v3225_v18 = vsel %vm4879_vm6, %v3223_v5, %v3224_v6  ;;  %v2138_v5 = vrot.slane %v2136_v58, 4 }
 0x1d0   : > { %1366 = vst.msk [vmem:[#allocation2 + $0x4c] sm:$0xf] %vm1346_vm10, %v1289_v25  ;;  %v1287_v31 = vpop.permute.xlu0 %1286  ;;  %v4659_v32 = vld [vmem:[#allocation2 + $0x30] sm:$0xff]   ;;  %v4254_v25 = vld [vmem:[%s4724_s20 + $0xbc] sm:$0x1] }
 0x1d1   : > { %1365 = vst.msk [vmem:[#allocation2 + $0x48] sm:$0xf] %vm1346_vm10, %v1287_v31  ;;  %2392 = vrot.lane.b32.xlu1 %v4347_v19, %s4682_s26  ;;  %4605 = vmatprep.mubr.msk.bf16.mxu0 %vm3501_vm0, %v4659_v32  ;;  %v3222_v19 = vsel %vm4879_vm6, %v4463_v7, %v3221_v56  ;;  %v4207_v32 = vld [vmem:[%s4724_s20 + $0xb8] sm:$0xf]  ;;  %v1805_v56 = vrot.slane %v1804_v47, 4 }
 0x1d2   : > { %2390 = vrot.lane.b32.xlu0 %v4346_v20, %s4682_s26  ;;  %v1775_v20 = vrot.slane %v1773_v9, 5  ;;  %v4305_v7 = vld [vmem:[%s4724_s20 + $0xc8] sm:$0x1] }
 0x1d3   : > { %v1846_v39 = vpop.permute.xlu1 %1845 }
 0x1d4   : > { %1925 = vst.msk [vmem:[#allocation2 + $0x44] sm:$0xf] %vm1907_vm11, %v1846_v39  ;;  %v1844_v44 = vpop.permute.xlu0 %1843  ;;  %v4660_v43 = vld [vmem:[#allocation2 + $0x38] sm:$0xff]   ;;  %v1770_v39 = vor.u32 %v1769_v28, %v1766_v26  ;;  %v4399_v28 = vld [vmem:[%s4724_s20 + $0xcc] sm:$0xf] }
 0x1d5   : > { %1924 = vst.msk [vmem:[#allocation2 + $0x40] sm:$0xf] %vm1907_vm11, %v1844_v44  ;;  %2396 = vrot.lane.b32.xlu1 %v4349_v33, %s4682_s26  ;;  %4606 = vmatmul.mubr.msk.bf16.gmra.mxu0 %vm3501_vm0, %v4660_v43  ;;  %v1780_v33 = vor.u32 %v1779_v21, %v1775_v20  ;;  %v4209_v43 = vld [vmem:[%s4724_s20 + $0xc4] sm:$0xf]  ;;  %v2883_v40 = vshll.u32 %v4399_v28, 16 }
 0x1d6   : > { %2394 = vrot.lane.b32.xlu0 %v4348_v34, %s4682_s26  ;;  %v1783_v34 = vshll.u32 %v4254_v25, 16  ;;  %v4400_v25 = vld [vmem:[%s4724_s20 + $0xd0] sm:$0xf] }
 0x1d7   : > { %v1850_v50 = vpop.permute.xlu1 %1849  ;;  %v2885_v53 = vrot.slane %v2883_v40, 5 }
 0x1d8   : > { %1927 = vst.msk [vmem:[#allocation2 + $0x4c] sm:$0xf] %vm1907_vm11, %v1850_v50  ;;  %v1848_v54 = vpop.permute.xlu0 %1847  ;;  %v1785_v46 = vrot.slane %v1783_v34, 5  ;;  %v4208_v50 = vld [vmem:[%s4724_s20 + $0xc0] sm:$0xf]  ;;  %v2889_v34 = vshll.u32 %v4400_v25, 16 }
 0x1d9   : > { %1926 = vst.msk [vmem:[#allocation2 + $0x48] sm:$0xf] %vm1907_vm11, %v1848_v54  ;;  %2953 = vrot.lane.b32.xlu1 %v2830_v45, %s4683_s5  ;;  %v1781_v45 = vrot.slane %v1780_v33, 4 }
 0x1da   : > { %2951 = vrot.lane.b32.xlu0 %v2820_v51, %s4683_s5  ;;  %v1771_v51 = vrot.slane %v1770_v39, 4  ;;  %v2880_v39 = vshrl.u32 %v4399_v28, 16  ;;  %v2891_v47 = vrot.slane %v2889_v34, 5 }
 0x1db   : > { %v2183_v63 = vpop.permute.xlu1 %2182  ;;  %v1786_v55 = vsel %vm4735_vm2, %v1781_v45, %v1785_v46 }
 0x1dc   : > { %2262 = vst.msk [vmem:[#allocation2 + $0x44] sm:$0xf] %vm2244_vm12, %v2183_v63  ;;  %v2181_v3 = vpop.permute.xlu0 %2180  ;;  %v1776_v61 = vsel %vm4735_vm2, %v1771_v51, %v1775_v20  ;;  %v1795_v63 = vrot.slane %v1794_v52, 4  ;;  %v4401_v51 = vld [vmem:[%s4724_s20 + $0xd4] sm:$0x1]  ;;  %v2882_v52 = vrot.slane %v2880_v39, 4 }
 0x1dd   : > { %2261 = vst.msk [vmem:[#allocation2 + $0x40] sm:$0xf] %vm2244_vm12, %v2181_v3  ;;  %2957 = vrot.lane.b32.xlu1 %v2854_v57, %s4683_s5  ;;  %v1809_v57 = vrot.slane %v1807_v48, 5  ;;  %v2143_v3 = vrot.slane %v4304_v59, 5 }
 0x1de   : > { %2955 = vrot.lane.b32.xlu0 %v2844_v0, %s4683_s5  ;;  %v4302_v0 = vld [vmem:[%s4724_s20 + $0xbc] sm:$0x1]  ;;  %v1800_v10 = vsel %vm4735_vm2, %v1795_v63, %v1799_v35  ;;  %v2893_v35 = vshrl.u32 %v4400_v25, 16  ;;  %v4352_v63 = vld [vmem:[%s4724_s20 + $0xcc] sm:$0xf] }
 0x1df   : > { %v2187_v11 = vpop.permute.xlu1 %2186  ;;  %v1810_v4 = vsel %vm4735_vm2, %v1805_v56, %v1809_v57  ;;  %v2139_v6 = vrot.slane %v4302_v0, 5  ;;  %v2145_v15 = vrot.slane %v2143_v3, 4  ;;  %v4353_v56 = vld [vmem:[%s4724_s20 + $0xd0] sm:$0xf] }
 0x1e0   : > { %2264 = vst.msk [vmem:[#allocation2 + $0x4c] sm:$0xf] %vm2244_vm12, %v2187_v11  ;;  %v2185_v16 = vpop.permute.xlu0 %2184  ;;  %v4320_v11 = vrot.slane %v4300_v2, 9  ;;  %v2895_v48 = vrot.slane %v2893_v35, 4  ;;  %v4445_v2 = vld [vmem:[%s4724_s20 + $0xc4] sm:$0xf] }
 0x1e1   : > { %2263 = vst.msk [vmem:[#allocation2 + $0x48] sm:$0xf] %vm2244_vm12, %v2185_v16  ;;  %3290 = vrot.lane.b32.xlu1 %v3218_v8, %s4684_s8  ;;  %v4303_v8 = vld [vmem:[%s4724_s20 + $0xc0] sm:$0xe]  ;;  %v2146_v16 = vrot.slane %v4305_v7, 5  ;;  %v3228_v7 = vrot.slane %v4445_v2, 5 }
 0x1e2   : > { %3288 = vrot.lane.b32.xlu0 %v3215_v12, %s4684_s8  ;;  %v4397_v12 = vld [vmem:[%s4724_s20 + $0xc4] sm:$0xf]  ;;  %v4321_v17 = vrot.slane %v4303_v8, 9  ;;  %v2137_v22 = vsel %vm4879_vm6, %v4320_v11, %v2136_v58  ;;  %v2896_v59 = vor.u32 %v2895_v48, %v2891_v47  ;;  %v4446_v11 = vld [vmem:[%s4724_s20 + $0xc8] sm:$0x1] }
 0x1e3   : > { %v2377_v24 = vpop.permute.xlu1 %2376  ;;  %v2869_v20 = vshrl.u32 %v4397_v12, 16  ;;  %v2147_v29 = vsel %vm4879_vm6, %v2145_v15, %v2146_v16  ;;  %v3230_v16 = vrot.slane %v3228_v7, 4 }
 0x1e4   : > { %2456 = vst.msk [vmem:[#allocation2 + $0x44] sm:$0xf] %vm2438_vm13, %v2377_v24  ;;  %v2375_v31 = vpop.permute.xlu0 %2374  ;;  %v2859_v24 = vshll.u32 %v4396_v14, 16  ;;  %v2144_v30 = vsel %vm4879_vm6, %v4321_v17, %v2143_v3  ;;  %v4444_v14 = vld [vmem:[%s4724_s20 + $0xc0] sm:$0xe]  ;;  %v3231_v17 = vrot.slane %v4446_v11, 5 }
 0x1e5   : > { %2455 = vst.msk [vmem:[#allocation2 + $0x40] sm:$0xf] %vm2438_vm13, %v2375_v31  ;;  %3294 = vrot.lane.b32.xlu1 %v3225_v18, %s4684_s8  ;;  %v2140_v18 = vsel %vm4879_vm6, %v2138_v5, %v2139_v6  ;;  %v4398_v31 = vld [vmem:[%s4724_s20 + $0xc8] sm:$0x1]  ;;  %v2871_v33 = vrot.slane %v2869_v20, 4  ;;  %v2897_v5 = vrot.slane %v2896_v59, 4 }
 0x1e6   : > { %3292 = vrot.lane.b32.xlu0 %v3222_v19, %s4684_s8  ;;  %v2865_v19 = vshll.u32 %v4397_v12, 16  ;;  %v2875_v46 = vshll.u32 %v4398_v31, 16  ;;  %v4448_v12 = vld [vmem:[%s4724_s20 + $0xd0] sm:$0xf]  ;;  %v3232_v25 = vsel %vm4879_vm6, %v3230_v16, %v3231_v17 }
 0x1e7   : > { %v2381_v37 = vpop.permute.xlu1 %2380 }
 0x1e8   : > { %2458 = vst.msk [vmem:[#allocation2 + $0x4c] sm:$0xf] %vm2438_vm13, %v2381_v37  ;;  %v2379_v44 = vpop.permute.xlu0 %2378  ;;  %v2858_v37 = vrot.slane %v2856_v23, 4  ;;  %v2877_v58 = vrot.slane %v2875_v46, 5 }
 0x1e9   : > { %2457 = vst.msk [vmem:[#allocation2 + $0x48] sm:$0xf] %vm2438_vm13, %v2379_v44  ;;  %1308 = vrot.lane.b32.xlu1 %v4207_v32, %s4679_s23  ;;  %v6039_v32 = vrot.slane %v2865_v19, 5  ;;  %v4351_v44 = vld [vmem:[%s4724_s20 + $0xc4] sm:$0xf] }
 0x1ea   : > { %1306 = vrot.lane.b32.xlu0 %v4206_v38, %s4679_s23  ;;  %v2861_v38 = vrot.slane %v2859_v24, 5  ;;  %v4447_v24 = vld [vmem:[%s4724_s20 + $0xcc] sm:$0xe] }
 0x1eb   : > { %v2938_v49 = vpop.permute.xlu1 %2937  ;;  %v2872_v45 = vor.u32 %v2871_v33, %v6039_v32 }
 0x1ec   : > { %3017 = vst.msk [vmem:[#allocation2 + $0x44] sm:$0xf] %vm2999_vm14, %v2938_v49  ;;  %v2936_v54 = vpop.permute.xlu0 %2935 }
 0x1ed   : > { %3016 = vst.msk [vmem:[#allocation2 + $0x40] sm:$0xf] %vm2999_vm14, %v2936_v54  ;;  %1312 = vrot.lane.b32.xlu1 %v4209_v43, %s4679_s23  ;;  %v4350_v43 = vld [vmem:[%s4724_s20 + $0xc0] sm:$0xf]  ;;  %v2873_v57 = vrot.slane %v2872_v45, 4 }
 0x1ee   : > { %1310 = vrot.lane.b32.xlu0 %v4208_v50, %s4679_s23  ;;  %v2862_v50 = vor.u32 %v2861_v38, %v2858_v37 }
 0x1ef   : > { %v2942_v60 = vpop.permute.xlu1 %2941 }
 0x1f0   : > { %3019 = vst.msk [vmem:[#allocation2 + $0x4c] sm:$0xf] %vm2999_vm14, %v2942_v60  ;;  %v2940_v1 = vpop.permute.xlu0 %2939  ;;  %v2899_v60 = vshll.u32 %v4401_v51, 16  ;;  %v2863_v0 = vrot.slane %v2862_v50, 4 }
 0x1f1   : > { %3018 = vst.msk [vmem:[#allocation2 + $0x48] sm:$0xf] %vm2999_vm14, %v2940_v1  ;;  %1869 = vrot.lane.b32.xlu1 %v1786_v55, %s4680_s24  ;;  %v2886_v1 = vor.u32 %v2885_v53, %v2882_v52 }
 0x1f2   : > { %1867 = vrot.lane.b32.xlu0 %v1776_v61, %s4680_s24  ;;  %v2901_v6 = vrot.slane %v2899_v60, 5 }
 0x1f3   : > { %v3275_v9 = vpop.permute.xlu1 %3274 }
 0x1f4   : > { %3354 = vst.msk [vmem:[#allocation2 + $0x44] sm:$0xf] %vm3336_vm15, %v3275_v9  ;;  %v3273_v13 = vpop.permute.xlu0 %3272  ;;  %v2868_v9 = vsel %vm4735_vm2, %v2863_v0, %v6039_v32  ;;  %v2902_v15 = vsel %vm4735_vm2, %v2897_v5, %v2901_v6 }
 0x1f5   : > { %3353 = vst.msk [vmem:[#allocation2 + $0x40] sm:$0xf] %vm3336_vm15, %v3273_v13  ;;  %1873 = vrot.lane.b32.xlu1 %v1810_v4, %s4680_s24  ;;  %v2878_v4 = vsel %vm4735_vm2, %v2873_v57, %v2877_v58 }
 0x1f6   : > { %1871 = vrot.lane.b32.xlu0 %v1800_v10, %s4680_s24  ;;  %v2887_v10 = vrot.slane %v2886_v1, 4 }
 0x1f7   : > { %v3279_v21 = vpop.permute.xlu1 %3278 }
 0x1f8   : > { %3356 = vst.msk [vmem:[#allocation2 + $0x4c] sm:$0xf] %vm3336_vm15, %v3279_v21  ;;  %v3277_v26 = vpop.permute.xlu0 %3276  ;;  %v2892_v20 = vsel %vm4735_vm2, %v2887_v10, %v2891_v47  ;;  %v4464_v21 = vrot.slane %v4444_v14, 9  ;;  %vm3945_vm2 = vcmask 24576  }
 0x1f9   : > { %3355 = vst.msk [vmem:[#allocation2 + $0x48] sm:$0xf] %vm3336_vm15, %v3277_v26  ;;  %2206 = vrot.lane.b32.xlu1 %v2140_v18, %s4681_s25  ;;  %v3235_v18 = vrot.slane %v4448_v12, 5 }
 0x1fa   : > { %2204 = vrot.lane.b32.xlu0 %v2137_v22, %s4681_s25  ;;  %v4449_v22 = vld [vmem:[%s4724_s20 + $0xd4] sm:$0x1]  ;;  %v3229_v27 = vsel %vm4879_vm6, %v4464_v21, %v3228_v7  ;;  %s214_s20 = scalar_lea.vmem %s6313_s4, %s6319_s16 }
 0x1fb   : > { %v1293_v36 = vpop.permute.xlu1 %1292  ;;  %v3237_v26 = vrot.slane %v3235_v18, 4  ;;  %v3238_v28 = vrot.slane %v4449_v22, 5 }
 0x1fc   : > { %1368 = vst.msk [vmem:[#allocation2 + $0x54] sm:$0xf] %vm1346_vm10, %v1293_v36  ;;  %v1291_v41 = vpop.permute.xlu0 %1290  ;;  %v4661_v42 = vld [vmem:[#allocation2 + $0x40] sm:$0xff]  }
 0x1fd   : > { %1367 = vst.msk [vmem:[#allocation2 + $0x50] sm:$0xf] %vm1346_vm10, %v1291_v41  ;;  %2210 = vrot.lane.b32.xlu1 %v2147_v29, %s4681_s25  ;;  %4609 = vmatprep.mubr.msk.bf16.mxu1 %vm3501_vm0, %v4661_v42  ;;  %v3239_v32 = vsel %vm4879_vm6, %v3237_v26, %v3238_v28 }
 0x1fe   : > { %2208 = vrot.lane.b32.xlu0 %v2144_v30, %s4681_s25  ;;  %v4465_v30 = vrot.slane %v4447_v24, 9 }
 0x1ff   : > { %v1297_v49 = vpop.permute.xlu1 %1296 }
 0x200   : > { %1370 = vst.msk [vmem:[#allocation2 + $0x5c] sm:$0xf] %vm1346_vm10, %v1297_v49  ;;  %v1295_v54 = vpop.permute.xlu0 %1294  ;;  %v4662_v55 = vld [vmem:[#allocation2 + $0x48] sm:$0xff]   ;;  %v3236_v34 = vsel %vm4879_vm6, %v4465_v30, %v3235_v18 }
 0x201   : > { %1369 = vst.msk [vmem:[#allocation2 + $0x58] sm:$0xf] %vm1346_vm10, %v1295_v54  ;;  %2400 = vrot.lane.b32.xlu1 %v4351_v44, %s4682_s26  ;;  %4610 = vmatmul.mubr.msk.bf16.vlgmr.msra.gmra.mxu1 %vm3501_vm0, %v4662_v55 }
 0x202   : > { %2398 = vrot.lane.b32.xlu0 %v4350_v43, %s4682_s26 }
 0x203   : > { %v1854_v61 = vpop.permute.xlu1 %1853 }
 0x204   : > { %1929 = vst.msk [vmem:[#allocation2 + $0x54] sm:$0xf] %vm1907_vm11, %v1854_v61  ;;  %v1852_v3 = vpop.permute.xlu0 %1851 }
 0x205   : > { %1928 = vst.msk [vmem:[#allocation2 + $0x50] sm:$0xf] %vm1907_vm11, %v1852_v3  ;;  %2404 = vrot.lane.b32.xlu1 %v4353_v56, %s4682_s26 }
 0x206   : > { %2402 = vrot.lane.b32.xlu0 %v4352_v63, %s4682_s26 }
 0x207   : > { %v1858_v8 = vpop.permute.xlu1 %1857 }
 0x208   : > { %1931 = vst.msk [vmem:[#allocation2 + $0x5c] sm:$0xf] %vm1907_vm11, %v1858_v8  ;;  %v1856_v13 = vpop.permute.xlu0 %1855 }
 0x209   : > { %1930 = vst.msk [vmem:[#allocation2 + $0x58] sm:$0xf] %vm1907_vm11, %v1856_v13  ;;  %2961 = vrot.lane.b32.xlu1 %v2878_v4, %s4683_s5 }
 0x20a   : > { %2959 = vrot.lane.b32.xlu0 %v2868_v9, %s4683_s5 }
 0x20b   : > { %v2191_v19 = vpop.permute.xlu1 %2190 }
 0x20c   : > { %2266 = vst.msk [vmem:[#allocation2 + $0x54] sm:$0xf] %vm2244_vm12, %v2191_v19  ;;  %v2189_v23 = vpop.permute.xlu0 %2188 }
 0x20d   : > { %2265 = vst.msk [vmem:[#allocation2 + $0x50] sm:$0xf] %vm2244_vm12, %v2189_v23  ;;  %2965 = vrot.lane.b32.xlu1 %v2902_v15, %s4683_s5 }
 0x20e   : > { %2963 = vrot.lane.b32.xlu0 %v2892_v20, %s4683_s5 }
 0x20f   : > { %v2195_v29 = vpop.permute.xlu1 %2194 }
 0x210   : > { %2268 = vst.msk [vmem:[#allocation2 + $0x5c] sm:$0xf] %vm2244_vm12, %v2195_v29  ;;  %v2193_v31 = vpop.permute.xlu0 %2192 }
 0x211   : > { %2267 = vst.msk [vmem:[#allocation2 + $0x58] sm:$0xf] %vm2244_vm12, %v2193_v31  ;;  %3298 = vrot.lane.b32.xlu1 %v3232_v25, %s4684_s8 }
 0x212   : > { %3296 = vrot.lane.b32.xlu0 %v3229_v27, %s4684_s8 }
 0x213   : > { %v2385_v33 = vpop.permute.xlu1 %2384 }
 0x214   : > { %2460 = vst.msk [vmem:[#allocation2 + $0x54] sm:$0xf] %vm2438_vm13, %v2385_v33  ;;  %v2383_v35 = vpop.permute.xlu0 %2382 }
 0x215   : > { %2459 = vst.msk [vmem:[#allocation2 + $0x50] sm:$0xf] %vm2438_vm13, %v2383_v35  ;;  %3302 = vrot.lane.b32.xlu1 %v3239_v32, %s4684_s8 }
 0x216   : > { %3300 = vrot.lane.b32.xlu0 %v3236_v34, %s4684_s8 }
 0x217   : > { %v2389_v36 = vpop.permute.xlu1 %2388 }
 0x218   : > { %2462 = vst.msk [vmem:[#allocation2 + $0x5c] sm:$0xf] %vm2438_vm13, %v2389_v36  ;;  %v2387_v37 = vpop.permute.xlu0 %2386 }
 0x219   : > { %2461 = vst.msk [vmem:[#allocation2 + $0x58] sm:$0xf] %vm2438_vm13, %v2387_v37 }
 0x21b   : > { %v2946_v38 = vpop.permute.xlu1 %2945 }
 0x21c   : > { %3021 = vst.msk [vmem:[#allocation2 + $0x54] sm:$0xf] %vm2999_vm14, %v2946_v38  ;;  %v2944_v62 = vpop.permute.xlu0 %2943 }
 0x21d   : > { %3020 = vst.msk [vmem:[#allocation2 + $0x50] sm:$0xf] %vm2999_vm14, %v2944_v62  ;;  %v4595_v39 = vpop.f32.mrf.mxu0 }
 0x21e   : > { %v4538_v40 = vpack.c.bf16 %v4595_v39, %v4595_v39  ;;  %v3949_v49 = vmul.f32 %v4595_v39, %v4595_v39  ;;  %v3879_v57 = vsel %vm3875_vm1, %v4595_v39, 0.0 }
 0x21f   : > { %v2950_v41 = vpop.permute.xlu1 %2949  ;;  %v3588_v44 = vpop.f32.mrf.mxu0 }
 0x220   : > { %3023 = vst.msk [vmem:[#allocation2 + $0x5c] sm:$0xf] %vm2999_vm14, %v2950_v41  ;;  %v2948_v42 = vpop.permute.xlu0 %2947  ;;  %v4536_v43 = vpack.c.bf16 %v3588_v44, %v3588_v44  ;;  %v3947_v46 = vmul.f32 %v3588_v44, %v3588_v44  ;;  %v3876_v52 = vsel %vm3875_vm1, %v3588_v44, 0.0  ;;  %v3982_v2 = vsel %vm3875_vm1, %v3949_v49, 0.0 }
 0x221   : > { %3845 = vst.msk [vmem:[%s6108_s12 + $0x8] sm:$0xf] %vm248_vm3, %v4538_v40  ;;  %v4596_v45 = vpop.f32.mrf.mxu0 }
 0x222   : > { %3022 = vst.msk [vmem:[#allocation2 + $0x58] sm:$0xf] %vm2999_vm14, %v2948_v42  ;;  %v4539_v47 = vpack.c.bf16 %v4596_v45, %v4596_v45  ;;  %v3979_v58 = vsel %vm3875_vm1, %v3947_v46, 0.0  ;;  %v3950_v59 = vmul.f32 %v4596_v45, %v4596_v45  ;;  %v3881_v3 = vsel %vm3875_vm1, %v4596_v45, 0.0 }
 0x223   : > { %3843 = vst.msk [vmem:[%s6108_s12] sm:$0xf] %vm248_vm3, %v4536_v43  ;;  %v3283_v48 = vpop.permute.xlu1 %3282  ;;  %v3591_v51 = vpop.f32.mrf.mxu0 }
 0x224   : > { %3358 = vst.msk [vmem:[#allocation2 + $0x54] sm:$0xf] %vm3336_vm15, %v3283_v48  ;;  %v3281_v50 = vpop.permute.xlu0 %3280  ;;  %v4537_v53 = vpack.c.bf16 %v3591_v51, %v3591_v51  ;;  %v3877_v54 = vsel %vm3875_vm1, %v3591_v51, 0.0  ;;  %v3948_v55 = vmul.f32 %v3591_v51, %v3591_v51  ;;  %v3984_v6 = vsel %vm3875_vm1, %v3950_v59, 0.0 }
 0x225   : > { %3846 = vst.msk [vmem:[%s6108_s12 + $0xc] sm:$0xf] %vm248_vm3, %v4539_v47  ;;  %v3878_v56 = vadd.f32 %v3877_v54, %v3876_v52 }
 0x226   : > { %3357 = vst.msk [vmem:[#allocation2 + $0x50] sm:$0xf] %vm3336_vm15, %v3281_v50  ;;  %v3980_v60 = vsel %vm3875_vm1, %v3948_v55, 0.0 }
 0x227   : > { %3844 = vst.msk [vmem:[%s6108_s12 + $0x4] sm:$0xf] %vm248_vm3, %v4537_v53  ;;  %v3287_v61 = vpop.permute.xlu1 %3286  ;;  %v3880_v63 = vadd.f32 %v3879_v57, %v3878_v56  ;;  %v3981_v0 = vadd.f32 %v3980_v60, %v3979_v58 }
 0x228   : > { %3360 = vst.msk [vmem:[#allocation2 + $0x5c] sm:$0xf] %vm3336_vm15, %v3287_v61  ;;  %v3285_v1 = vpop.permute.xlu0 %3284 }
 0x229   : > { %3359 = vst.msk [vmem:[#allocation2 + $0x58] sm:$0xf] %vm3336_vm15, %v3285_v1  ;;  %v3983_v4 = vadd.f32 %v3982_v2, %v3981_v0  ;;  %v3882_v5 = vadd.f32 %v3881_v3, %v3880_v63 }
 0x22b   : > { %v1301_v7 = vpop.permute.xlu1 %1300  ;;  %v3985_v10 = vadd.f32 %v3984_v6, %v3983_v4 }
 0x22c   : > { %1372 = vst.msk [vmem:[#allocation2 + $0x64] sm:$0xf] %vm1346_vm10, %v1301_v7  ;;  %v1299_v8 = vpop.permute.xlu0 %1298 }
 0x22d   : > { %v4663_v9 = vld [vmem:[#allocation2 + $0x50] sm:$0xff]   ;;  %1371 = vst.msk [vmem:[#allocation2 + $0x60] sm:$0xf] %vm1346_vm10, %v1299_v8 }
 0x22e   : > { %4613 = vmatprep.mubr.msk.bf16.mxu1 %vm3501_vm0, %v4663_v9 }
 0x22f   : > { %v1305_v11 = vpop.permute.xlu1 %1304 }
 0x230   : > { %1374 = vst.msk [vmem:[#allocation2 + $0x6c] sm:$0xf] %vm1346_vm10, %v1305_v11  ;;  %v1303_v12 = vpop.permute.xlu0 %1302  ;;  %v4664_v13 = vld [vmem:[#allocation2 + $0x58] sm:$0xff]  }
 0x231   : > { %1373 = vst.msk [vmem:[#allocation2 + $0x68] sm:$0xf] %vm1346_vm10, %v1303_v12  ;;  %4614 = vmatmul.mubr.msk.bf16.gmra.mxu1 %vm3501_vm0, %v4664_v13 }
 0x233   : > { %v1862_v14 = vpop.permute.xlu1 %1861 }
 0x234   : > { %1933 = vst.msk [vmem:[#allocation2 + $0x64] sm:$0xf] %vm1907_vm11, %v1862_v14  ;;  %v1860_v15 = vpop.permute.xlu0 %1859 }
 0x235   : > { %1932 = vst.msk [vmem:[#allocation2 + $0x60] sm:$0xf] %vm1907_vm11, %v1860_v15 }
 0x237   : > { %v1866_v16 = vpop.permute.xlu1 %1865 }
 0x238   : > { %1935 = vst.msk [vmem:[#allocation2 + $0x6c] sm:$0xf] %vm1907_vm11, %v1866_v16  ;;  %v1864_v17 = vpop.permute.xlu0 %1863 }
 0x239   : > { %1934 = vst.msk [vmem:[#allocation2 + $0x68] sm:$0xf] %vm1907_vm11, %v1864_v17 }
 0x23b   : > { %v2199_v18 = vpop.permute.xlu1 %2198 }
 0x23c   : > { %2270 = vst.msk [vmem:[#allocation2 + $0x64] sm:$0xf] %vm2244_vm12, %v2199_v18  ;;  %v2197_v19 = vpop.permute.xlu0 %2196 }
 0x23d   : > { %2269 = vst.msk [vmem:[#allocation2 + $0x60] sm:$0xf] %vm2244_vm12, %v2197_v19 }
 0x23f   : > { %v2203_v20 = vpop.permute.xlu1 %2202 }
 0x240   : > { %2272 = vst.msk [vmem:[#allocation2 + $0x6c] sm:$0xf] %vm2244_vm12, %v2203_v20  ;;  %v2201_v21 = vpop.permute.xlu0 %2200 }
 0x241   : > { %2271 = vst.msk [vmem:[#allocation2 + $0x68] sm:$0xf] %vm2244_vm12, %v2201_v21 }
 0x243   : > { %v2393_v22 = vpop.permute.xlu1 %2392 }
 0x244   : > { %2464 = vst.msk [vmem:[#allocation2 + $0x64] sm:$0xf] %vm2438_vm13, %v2393_v22  ;;  %v2391_v23 = vpop.permute.xlu0 %2390 }
 0x245   : > { %2463 = vst.msk [vmem:[#allocation2 + $0x60] sm:$0xf] %vm2438_vm13, %v2391_v23  ;;  %v4599_v24 = vpop.f32.mrf.mxu0 }
 0x246   : > { %v4542_v25 = vpack.c.bf16 %v4599_v24, %v4599_v24  ;;  %v3953_v39 = vmul.f32 %v4599_v24, %v4599_v24  ;;  %v3887_v43 = vsel %vm3875_vm1, %v4599_v24, 0.0 }
 0x247   : > { %v2397_v26 = vpop.permute.xlu1 %2396  ;;  %v3604_v29 = vpop.f32.mrf.mxu0 }
 0x248   : > { %2466 = vst.msk [vmem:[#allocation2 + $0x6c] sm:$0xf] %vm2438_vm13, %v2397_v26  ;;  %v2395_v28 = vpop.permute.xlu0 %2394  ;;  %v4540_v27 = vpack.c.bf16 %v3604_v29, %v3604_v29  ;;  %v3883_v30 = vsel %vm3875_vm1, %v3604_v29, 0.0  ;;  %v3951_v31 = vmul.f32 %v3604_v29, %v3604_v29  ;;  %v3990_v51 = vsel %vm3875_vm1, %v3953_v39, 0.0 }
 0x249   : > { %3849 = vst.msk [vmem:[%s6108_s12 + $0x18] sm:$0xf] %vm248_vm3, %v4542_v25  ;;  %v3884_v32 = vadd.f32 %v3883_v30, %v3882_v5  ;;  %v4600_v33 = vpop.f32.mrf.mxu0 }
 0x24a   : > { %2465 = vst.msk [vmem:[#allocation2 + $0x68] sm:$0xf] %vm2438_vm13, %v2395_v28  ;;  %v3986_v34 = vsel %vm3875_vm1, %v3951_v31, 0.0  ;;  %v4543_v35 = vpack.c.bf16 %v4600_v33, %v4600_v33  ;;  %v3954_v45 = vmul.f32 %v4600_v33, %v4600_v33  ;;  %v3889_v52 = vsel %vm3875_vm1, %v4600_v33, 0.0 }
 0x24b   : > { %3847 = vst.msk [vmem:[%s6108_s12 + $0x10] sm:$0xf] %vm248_vm3, %v4540_v27  ;;  %v2954_v36 = vpop.permute.xlu1 %2953  ;;  %v3987_v37 = vadd.f32 %v3986_v34, %v3985_v10  ;;  %v3607_v62 = vpop.f32.mrf.mxu0 }
 0x24c   : > { %3025 = vst.msk [vmem:[#allocation2 + $0x64] sm:$0xf] %vm2999_vm14, %v2954_v36  ;;  %v2952_v38 = vpop.permute.xlu0 %2951  ;;  %v4541_v40 = vpack.c.bf16 %v3607_v62, %v3607_v62  ;;  %v3885_v41 = vsel %vm3875_vm1, %v3607_v62, 0.0  ;;  %v3952_v42 = vmul.f32 %v3607_v62, %v3607_v62  ;;  %v3992_v55 = vsel %vm3875_vm1, %v3954_v45, 0.0 }
 0x24d   : > { %3850 = vst.msk [vmem:[%s6108_s12 + $0x1c] sm:$0xf] %vm248_vm3, %v4543_v35  ;;  %v3886_v44 = vadd.f32 %v3885_v41, %v3884_v32 }
 0x24e   : > { %3024 = vst.msk [vmem:[#allocation2 + $0x60] sm:$0xf] %vm2999_vm14, %v2952_v38  ;;  %v3988_v46 = vsel %vm3875_vm1, %v3952_v42, 0.0 }
 0x24f   : > { %3848 = vst.msk [vmem:[%s6108_s12 + $0x14] sm:$0xf] %vm248_vm3, %v4541_v40  ;;  %v2958_v47 = vpop.permute.xlu1 %2957  ;;  %v3888_v48 = vadd.f32 %v3887_v43, %v3886_v44  ;;  %v3989_v49 = vadd.f32 %v3988_v46, %v3987_v37 }
 0x250   : > { %3027 = vst.msk [vmem:[#allocation2 + $0x6c] sm:$0xf] %vm2999_vm14, %v2958_v47  ;;  %v2956_v50 = vpop.permute.xlu0 %2955 }
 0x251   : > { %3026 = vst.msk [vmem:[#allocation2 + $0x68] sm:$0xf] %vm2999_vm14, %v2956_v50  ;;  %v3991_v53 = vadd.f32 %v3990_v51, %v3989_v49  ;;  %v3890_v54 = vadd.f32 %v3889_v52, %v3888_v48 }
 0x253   : > { %v3291_v56 = vpop.permute.xlu1 %3290  ;;  %v3993_v58 = vadd.f32 %v3992_v55, %v3991_v53 }
 0x254   : > { %3362 = vst.msk [vmem:[#allocation2 + $0x64] sm:$0xf] %vm3336_vm15, %v3291_v56  ;;  %v3289_v57 = vpop.permute.xlu0 %3288 }
 0x255   : > { %3361 = vst.msk [vmem:[#allocation2 + $0x60] sm:$0xf] %vm3336_vm15, %v3289_v57 }
 0x257   : > { %v3295_v59 = vpop.permute.xlu1 %3294 }
 0x258   : > { %3364 = vst.msk [vmem:[#allocation2 + $0x6c] sm:$0xf] %vm3336_vm15, %v3295_v59  ;;  %v3293_v60 = vpop.permute.xlu0 %3292 }
 0x259   : > { %3363 = vst.msk [vmem:[#allocation2 + $0x68] sm:$0xf] %vm3336_vm15, %v3293_v60 }
 0x25b   : > { %v1309_v61 = vpop.permute.xlu1 %1308 }
 0x25c   : > { %1376 = vst.msk [vmem:[#allocation2 + $0x74] sm:$0xf] %vm1346_vm10, %v1309_v61  ;;  %v1307_v63 = vpop.permute.xlu0 %1306  ;;  %v4665_v0 = vld [vmem:[#allocation2 + $0x60] sm:$0xff]  }
 0x25d   : > { %1375 = vst.msk [vmem:[#allocation2 + $0x70] sm:$0xf] %vm1346_vm10, %v1307_v63  ;;  %4617 = vmatprep.mubr.msk.bf16.mxu1 %vm3501_vm0, %v4665_v0 }
 0x25f   : > { %v1313_v1 = vpop.permute.xlu1 %1312 }
 0x260   : > { %1378 = vst.msk [vmem:[#allocation2 + $0x7c] sm:$0xf] %vm1346_vm10, %v1313_v1  ;;  %v1311_v2 = vpop.permute.xlu0 %1310  ;;  %v4666_v3 = vld [vmem:[#allocation2 + $0x68] sm:$0xff]  }
 0x261   : > { %1377 = vst.msk [vmem:[#allocation2 + $0x78] sm:$0xf] %vm1346_vm10, %v1311_v2  ;;  %4618 = vmatmul.mubr.msk.bf16.gmra.mxu1 %vm3501_vm0, %v4666_v3 }
 0x263   : > { %v1870_v4 = vpop.permute.xlu1 %1869 }
 0x264   : > { %1937 = vst.msk [vmem:[#allocation2 + $0x74] sm:$0xf] %vm1907_vm11, %v1870_v4  ;;  %v1868_v5 = vpop.permute.xlu0 %1867 }
 0x265   : > { %1936 = vst.msk [vmem:[#allocation2 + $0x70] sm:$0xf] %vm1907_vm11, %v1868_v5 }
 0x267   : > { %v1874_v6 = vpop.permute.xlu1 %1873 }
 0x268   : > { %1939 = vst.msk [vmem:[#allocation2 + $0x7c] sm:$0xf] %vm1907_vm11, %v1874_v6  ;;  %v1872_v7 = vpop.permute.xlu0 %1871 }
 0x269   : > { %1938 = vst.msk [vmem:[#allocation2 + $0x78] sm:$0xf] %vm1907_vm11, %v1872_v7 }
 0x26b   : > { %v2207_v8 = vpop.permute.xlu1 %2206 }
 0x26c   : > { %2274 = vst.msk [vmem:[#allocation2 + $0x74] sm:$0xf] %vm2244_vm12, %v2207_v8  ;;  %v2205_v9 = vpop.permute.xlu0 %2204 }
 0x26d   : > { %2273 = vst.msk [vmem:[#allocation2 + $0x70] sm:$0xf] %vm2244_vm12, %v2205_v9  ;;  %v4603_v10 = vpop.f32.mrf.mxu0 }
 0x26e   : > { %v4546_v11 = vpack.c.bf16 %v4603_v10, %v4603_v10  ;;  %v3957_v26 = vmul.f32 %v4603_v10, %v4603_v10  ;;  %v3895_v31 = vsel %vm3875_vm1, %v4603_v10, 0.0 }
 0x26f   : > { %v2211_v12 = vpop.permute.xlu1 %2210  ;;  %v3620_v14 = vpop.f32.mrf.mxu0 }
 0x270   : > { %2276 = vst.msk [vmem:[#allocation2 + $0x7c] sm:$0xf] %vm2244_vm12, %v2211_v12  ;;  %v2209_v13 = vpop.permute.xlu0 %2208  ;;  %v4544_v15 = vpack.c.bf16 %v3620_v14, %v3620_v14  ;;  %v3891_v16 = vsel %vm3875_vm1, %v3620_v14, 0.0  ;;  %v3955_v17 = vmul.f32 %v3620_v14, %v3620_v14  ;;  %v3998_v38 = vsel %vm3875_vm1, %v3957_v26, 0.0 }
 0x271   : > { %3853 = vst.msk [vmem:[%s6108_s12 + $0x28] sm:$0xf] %vm248_vm3, %v4546_v11  ;;  %v3892_v18 = vadd.f32 %v3891_v16, %v3890_v54  ;;  %v4604_v19 = vpop.f32.mrf.mxu0 }
 0x272   : > { %2275 = vst.msk [vmem:[#allocation2 + $0x78] sm:$0xf] %vm2244_vm12, %v2209_v13  ;;  %v3994_v20 = vsel %vm3875_vm1, %v3955_v17, 0.0  ;;  %v4547_v21 = vpack.c.bf16 %v4604_v19, %v4604_v19  ;;  %v3958_v32 = vmul.f32 %v4604_v19, %v4604_v19  ;;  %v3897_v62 = vsel %vm3875_vm1, %v4604_v19, 0.0 }
 0x273   : > { %3851 = vst.msk [vmem:[%s6108_s12 + $0x20] sm:$0xf] %vm248_vm3, %v4544_v15  ;;  %v2401_v22 = vpop.permute.xlu1 %2400  ;;  %v3995_v23 = vadd.f32 %v3994_v20, %v3993_v58  ;;  %v3623_v25 = vpop.f32.mrf.mxu0 }
 0x274   : > { %2468 = vst.msk [vmem:[#allocation2 + $0x74] sm:$0xf] %vm2438_vm13, %v2401_v22  ;;  %v2399_v24 = vpop.permute.xlu0 %2398  ;;  %v4545_v28 = vpack.c.bf16 %v3623_v25, %v3623_v25  ;;  %v3893_v29 = vsel %vm3875_vm1, %v3623_v25, 0.0  ;;  %v3956_v27 = vmul.f32 %v3623_v25, %v3623_v25  ;;  %v4000_v41 = vsel %vm3875_vm1, %v3958_v32, 0.0 }
 0x275   : > { %3854 = vst.msk [vmem:[%s6108_s12 + $0x2c] sm:$0xf] %vm248_vm3, %v4547_v21  ;;  %v3894_v30 = vadd.f32 %v3893_v29, %v3892_v18 }
 0x276   : > { %2467 = vst.msk [vmem:[#allocation2 + $0x70] sm:$0xf] %vm2438_vm13, %v2399_v24  ;;  %v3996_v33 = vsel %vm3875_vm1, %v3956_v27, 0.0 }
 0x277   : > { %3852 = vst.msk [vmem:[%s6108_s12 + $0x24] sm:$0xf] %vm248_vm3, %v4545_v28  ;;  %v2405_v34 = vpop.permute.xlu1 %2404  ;;  %v3896_v35 = vadd.f32 %v3895_v31, %v3894_v30  ;;  %v3997_v36 = vadd.f32 %v3996_v33, %v3995_v23 }
 0x278   : > { %2470 = vst.msk [vmem:[#allocation2 + $0x7c] sm:$0xf] %vm2438_vm13, %v2405_v34  ;;  %v2403_v37 = vpop.permute.xlu0 %2402 }
 0x279   : > { %2469 = vst.msk [vmem:[#allocation2 + $0x78] sm:$0xf] %vm2438_vm13, %v2403_v37  ;;  %v3999_v39 = vadd.f32 %v3998_v38, %v3997_v36  ;;  %v3898_v40 = vadd.f32 %v3897_v62, %v3896_v35 }
 0x27b   : > { %v2962_v42 = vpop.permute.xlu1 %2961  ;;  %v4001_v43 = vadd.f32 %v4000_v41, %v3999_v39 }
 0x27c   : > { %3029 = vst.msk [vmem:[#allocation2 + $0x74] sm:$0xf] %vm2999_vm14, %v2962_v42  ;;  %v2960_v44 = vpop.permute.xlu0 %2959 }
 0x27d   : > { %3028 = vst.msk [vmem:[#allocation2 + $0x70] sm:$0xf] %vm2999_vm14, %v2960_v44 }
 0x27f   : > { %v2966_v45 = vpop.permute.xlu1 %2965 }
 0x280   : > { %3031 = vst.msk [vmem:[#allocation2 + $0x7c] sm:$0xf] %vm2999_vm14, %v2966_v45  ;;  %v2964_v46 = vpop.permute.xlu0 %2963 }
 0x281   : > { %3030 = vst.msk [vmem:[#allocation2 + $0x78] sm:$0xf] %vm2999_vm14, %v2964_v46 }
 0x283   : > { %v3299_v47 = vpop.permute.xlu1 %3298 }
 0x284   : > { %3366 = vst.msk [vmem:[#allocation2 + $0x74] sm:$0xf] %vm3336_vm15, %v3299_v47  ;;  %v3297_v48 = vpop.permute.xlu0 %3296 }
 0x285   : > { %3365 = vst.msk [vmem:[#allocation2 + $0x70] sm:$0xf] %vm3336_vm15, %v3297_v48 }
 0x287   : > { %v3303_v49 = vpop.permute.xlu1 %3302 }
 0x288   : > { %3368 = vst.msk [vmem:[#allocation2 + $0x7c] sm:$0xf] %vm3336_vm15, %v3303_v49  ;;  %v3301_v50 = vpop.permute.xlu0 %3300 }
 0x289   : > { %3367 = vst.msk [vmem:[#allocation2 + $0x78] sm:$0xf] %vm3336_vm15, %v3301_v50 }
 0x28c   : > { %v4667_v51 = vld [vmem:[#allocation2 + $0x70] sm:$0xff]  }
 0x28d   : > { %4621 = vmatprep.mubr.msk.bf16.mxu1 %vm3501_vm0, %v4667_v51 }
 0x290   : > { %v4668_v52 = vld [vmem:[#allocation2 + $0x78] sm:$0xff]  }
 0x291   : > { %4622 = vmatmul.mubr.msk.bf16.gmra.mxu1 %vm3501_vm0, %v4668_v52 }
 0x295   : > { %v4607_v53 = vpop.f32.mrf.mxu0 }
 0x296   : > { %v4550_v54 = vpack.c.bf16 %v4607_v53, %v4607_v53  ;;  %v3961_v2 = vmul.f32 %v4607_v53, %v4607_v53  ;;  %v3903_v7 = vsel %vm3875_vm1, %v4607_v53, 0.0 }
 0x297   : > { %v3636_v55 = vpop.f32.mrf.mxu0 }
 0x298   : > { %3857 = vst.msk [vmem:[%s6108_s12 + $0x38] sm:$0xf] %vm248_vm3, %v4550_v54  ;;  %v4548_v56 = vpack.c.bf16 %v3636_v55, %v3636_v55  ;;  %v3899_v57 = vsel %vm3875_vm1, %v3636_v55, 0.0  ;;  %v3959_v58 = vmul.f32 %v3636_v55, %v3636_v55  ;;  %v4006_v12 = vsel %vm3875_vm1, %v3961_v2, 0.0 }
 0x299   : > { %v3900_v59 = vadd.f32 %v3899_v57, %v3898_v40  ;;  %v4608_v60 = vpop.f32.mrf.mxu0 }
 0x29a   : > { %3855 = vst.msk [vmem:[%s6108_s12 + $0x30] sm:$0xf] %vm248_vm3, %v4548_v56  ;;  %v4002_v61 = vsel %vm3875_vm1, %v3959_v58, 0.0  ;;  %v4551_v63 = vpack.c.bf16 %v4608_v60, %v4608_v60  ;;  %v3962_v8 = vmul.f32 %v4608_v60, %v4608_v60  ;;  %v3905_v13 = vsel %vm3875_vm1, %v4608_v60, 0.0 }
 0x29b   : > { %v4003_v0 = vadd.f32 %v4002_v61, %v4001_v43  ;;  %v3639_v1 = vpop.f32.mrf.mxu0 }
 0x29c   : > { %3858 = vst.msk [vmem:[%s6108_s12 + $0x3c] sm:$0xf] %vm248_vm3, %v4551_v63  ;;  %v4549_v3 = vpack.c.bf16 %v3639_v1, %v3639_v1  ;;  %v3901_v4 = vsel %vm3875_vm1, %v3639_v1, 0.0  ;;  %v3960_v5 = vmul.f32 %v3639_v1, %v3639_v1  ;;  %v4008_v16 = vsel %vm3875_vm1, %v3962_v8, 0.0 }
 0x29d   : > { %v3902_v6 = vadd.f32 %v3901_v4, %v3900_v59 }
 0x29e   : > { %3856 = vst.msk [vmem:[%s6108_s12 + $0x34] sm:$0xf] %vm248_vm3, %v4549_v3  ;;  %v4004_v9 = vsel %vm3875_vm1, %v3960_v5, 0.0 }
 0x29f   : > { %v3904_v10 = vadd.f32 %v3903_v7, %v3902_v6  ;;  %v4005_v11 = vadd.f32 %v4004_v9, %v4003_v0 }
 0x2a1   : > { %v4007_v14 = vadd.f32 %v4006_v12, %v4005_v11  ;;  %v3906_v15 = vadd.f32 %v3905_v13, %v3904_v10 }
 0x2a3   : > { %v4009_v17 = vadd.f32 %v4008_v16, %v4007_v14 }
 0x2c1   : > { %v4611_v18 = vpop.f32.mrf.mxu1 }
 0x2c2   : > { %v4554_v19 = vpack.c.bf16 %v4611_v18, %v4611_v18  ;;  %v3965_v30 = vmul.f32 %v4611_v18, %v4611_v18  ;;  %v3911_v35 = vsel %vm3875_vm1, %v4611_v18, 0.0 }
 0x2c3   : > { %v3652_v20 = vpop.f32.mrf.mxu1 }
 0x2c4   : > { %3861 = vst.msk [vmem:[%s6108_s12 + $0x48] sm:$0xf] %vm248_vm3, %v4554_v19  ;;  %v4552_v21 = vpack.c.bf16 %v3652_v20, %v3652_v20  ;;  %v3907_v22 = vsel %vm3875_vm1, %v3652_v20, 0.0  ;;  %v3963_v23 = vmul.f32 %v3652_v20, %v3652_v20  ;;  %v4014_v39 = vsel %vm3875_vm1, %v3965_v30, 0.0 }
 0x2c5   : > { %v3908_v24 = vadd.f32 %v3907_v22, %v3906_v15  ;;  %v4612_v25 = vpop.f32.mrf.mxu1 }
 0x2c6   : > { %3859 = vst.msk [vmem:[%s6108_s12 + $0x40] sm:$0xf] %vm248_vm3, %v4552_v21  ;;  %v4010_v26 = vsel %vm3875_vm1, %v3963_v23, 0.0  ;;  %v4555_v28 = vpack.c.bf16 %v4612_v25, %v4612_v25  ;;  %v3966_v36 = vmul.f32 %v4612_v25, %v4612_v25  ;;  %v3913_v40 = vsel %vm3875_vm1, %v4612_v25, 0.0 }
 0x2c7   : > { %v4011_v29 = vadd.f32 %v4010_v26, %v4009_v17  ;;  %v3655_v27 = vpop.f32.mrf.mxu1 }
 0x2c8   : > { %3862 = vst.msk [vmem:[%s6108_s12 + $0x4c] sm:$0xf] %vm248_vm3, %v4555_v28  ;;  %v4553_v31 = vpack.c.bf16 %v3655_v27, %v3655_v27  ;;  %v3909_v32 = vsel %vm3875_vm1, %v3655_v27, 0.0  ;;  %v3964_v33 = vmul.f32 %v3655_v27, %v3655_v27  ;;  %v4016_v44 = vsel %vm3875_vm1, %v3966_v36, 0.0 }
 0x2c9   : > { %v3910_v34 = vadd.f32 %v3909_v32, %v3908_v24 }
 0x2ca   : > { %3860 = vst.msk [vmem:[%s6108_s12 + $0x44] sm:$0xf] %vm248_vm3, %v4553_v31  ;;  %v4012_v37 = vsel %vm3875_vm1, %v3964_v33, 0.0 }
 0x2cb   : > { %v3912_v38 = vadd.f32 %v3911_v35, %v3910_v34  ;;  %v4013_v62 = vadd.f32 %v4012_v37, %v4011_v29 }
 0x2cd   : > { %v4015_v41 = vadd.f32 %v4014_v39, %v4013_v62  ;;  %v3914_v42 = vadd.f32 %v3913_v40, %v3912_v38 }
 0x2cf   : > { %v4017_v43 = vadd.f32 %v4016_v44, %v4015_v41 }
 0x2f1   : > { %v4615_v45 = vpop.f32.mrf.mxu1 }
 0x2f2   : > { %v4558_v46 = vpack.c.bf16 %v4615_v45, %v4615_v45  ;;  %v3969_v57 = vmul.f32 %v4615_v45, %v4615_v45  ;;  %v3919_v63 = vsel %vm3875_vm1, %v4615_v45, 0.0 }
 0x2f3   : > { %v3668_v47 = vpop.f32.mrf.mxu1 }
 0x2f4   : > { %3865 = vst.msk [vmem:[%s6108_s12 + $0x58] sm:$0xf] %vm248_vm3, %v4558_v46  ;;  %v4556_v48 = vpack.c.bf16 %v3668_v47, %v3668_v47  ;;  %v3915_v49 = vsel %vm3875_vm1, %v3668_v47, 0.0  ;;  %v3967_v50 = vmul.f32 %v3668_v47, %v3668_v47  ;;  %v4022_v4 = vsel %vm3875_vm1, %v3969_v57, 0.0 }
 0x2f5   : > { %v3916_v51 = vadd.f32 %v3915_v49, %v3914_v42  ;;  %v4616_v52 = vpop.f32.mrf.mxu1 }
 0x2f6   : > { %3863 = vst.msk [vmem:[%s6108_s12 + $0x50] sm:$0xf] %vm248_vm3, %v4556_v48  ;;  %v4018_v53 = vsel %vm3875_vm1, %v3967_v50, 0.0  ;;  %v4559_v54 = vpack.c.bf16 %v4616_v52, %v4616_v52  ;;  %v3970_v0 = vmul.f32 %v4616_v52, %v4616_v52  ;;  %v3921_v5 = vsel %vm3875_vm1, %v4616_v52, 0.0 }
 0x2f7   : > { %v4019_v55 = vadd.f32 %v4018_v53, %v4017_v43  ;;  %v3671_v56 = vpop.f32.mrf.mxu1 }
 0x2f8   : > { %3866 = vst.msk [vmem:[%s6108_s12 + $0x5c] sm:$0xf] %vm248_vm3, %v4559_v54  ;;  %v4557_v58 = vpack.c.bf16 %v3671_v56, %v3671_v56  ;;  %v3917_v59 = vsel %vm3875_vm1, %v3671_v56, 0.0  ;;  %v3968_v60 = vmul.f32 %v3671_v56, %v3671_v56  ;;  %v4024_v8 = vsel %vm3875_vm1, %v3970_v0, 0.0 }
 0x2f9   : > { %v3918_v61 = vadd.f32 %v3917_v59, %v3916_v51 }
 0x2fa   : > { %3864 = vst.msk [vmem:[%s6108_s12 + $0x54] sm:$0xf] %vm248_vm3, %v4557_v58  ;;  %v4020_v1 = vsel %vm3875_vm1, %v3968_v60, 0.0 }
 0x2fb   : > { %v3920_v2 = vadd.f32 %v3919_v63, %v3918_v61  ;;  %v4021_v3 = vadd.f32 %v4020_v1, %v4019_v55 }
 0x2fd   : > { %v4023_v6 = vadd.f32 %v4022_v4, %v4021_v3  ;;  %v3922_v7 = vadd.f32 %v3921_v5, %v3920_v2 }
 0x2ff   : > { %v4025_v9 = vadd.f32 %v4024_v8, %v4023_v6 }
 0x321   : > { %v4619_v10 = vpop.f32.mrf.mxu1 }
 0x322   : > { %v4562_v11 = vpack.c.bf16 %v4619_v10, %v4619_v10  ;;  %v3973_v28 = vmul.f32 %v4619_v10, %v4619_v10  ;;  %v3927_v27 = vsel %vm3875_vm1, %v4619_v10, 0.0 }
 0x323   : > { %v3684_v12 = vpop.f32.mrf.mxu1 }
 0x324   : > { %3869 = vst.msk [vmem:[%s6108_s12 + $0x68] sm:$0xf] %vm248_vm3, %v4562_v11  ;;  %v4560_v13 = vpack.c.bf16 %v3684_v12, %v3684_v12  ;;  %v3971_v18 = vmul.f32 %v3684_v12, %v3684_v12  ;;  %v3923_v19 = vsel %vm3875_vm1, %v3684_v12, 0.0  ;;  %v4030_v32 = vsel %vm3875_vm1, %v3973_v28, 0.0 }
 0x325   : > { %v4620_v14 = vpop.f32.mrf.mxu1  ;;  %v3924_v23 = vadd.f32 %v3923_v19, %v3922_v7 }
 0x326   : > { %3867 = vst.msk [vmem:[%s6108_s12 + $0x60] sm:$0xf] %vm248_vm3, %v4560_v13  ;;  %v4563_v15 = vpack.c.bf16 %v4620_v14, %v4620_v14  ;;  %v4026_v21 = vsel %vm3875_vm1, %v3971_v18, 0.0  ;;  %v3974_v33 = vmul.f32 %v4620_v14, %v4620_v14  ;;  %v3929_v37 = vsel %vm3875_vm1, %v4620_v14, 0.0 }
 0x327   : > { %v3687_v16 = vpop.f32.mrf.mxu1  ;;  %v4027_v25 = vadd.f32 %v4026_v21, %v4025_v9 }
 0x328   : > { %3870 = vst.msk [vmem:[%s6108_s12 + $0x6c] sm:$0xf] %vm248_vm3, %v4563_v15  ;;  %v4561_v17 = vpack.c.bf16 %v3687_v16, %v3687_v16  ;;  %v3972_v20 = vmul.f32 %v3687_v16, %v3687_v16  ;;  %v3925_v22 = vsel %vm3875_vm1, %v3687_v16, 0.0  ;;  %v4032_v42 = vsel %vm3875_vm1, %v3974_v33, 0.0 }
 0x329   : > { %v3926_v26 = vadd.f32 %v3925_v22, %v3924_v23 }
 0x32a   : > { %3868 = vst.msk [vmem:[%s6108_s12 + $0x64] sm:$0xf] %vm248_vm3, %v4561_v17  ;;  %v4028_v24 = vsel %vm3875_vm1, %v3972_v20, 0.0 }
 0x32b   : > { %v4029_v29 = vadd.f32 %v4028_v24, %v4027_v25  ;;  %v3928_v30 = vadd.f32 %v3927_v27, %v3926_v26 }
 0x32d   : > { %v4031_v35 = vadd.f32 %v4030_v32, %v4029_v29  ;;  %v3930_v40 = vadd.f32 %v3929_v37, %v3928_v30 }
 0x32f   : > { %v4033_v46 = vadd.f32 %v4032_v42, %v4031_v35 }
 0x351   : > { %v4623_v31 = vpop.f32.mrf.mxu1 }
 0x352   : > { %v4566_v34 = vpack.c.bf16 %v4623_v31, %v4623_v31  ;;  %v3977_v48 = vmul.f32 %v4623_v31, %v4623_v31  ;;  %v3935_v54 = vsel %vm3875_vm1, %v4623_v31, 0.0 }
 0x353   : > { %v3700_v36 = vpop.f32.mrf.mxu1 }
 0x354   : > { %3873 = vst.msk [vmem:[%s6108_s12 + $0x78] sm:$0xf] %vm248_vm3, %v4566_v34  ;;  %v4564_v38 = vpack.c.bf16 %v3700_v36, %v3700_v36  ;;  %v3931_v62 = vsel %vm3875_vm1, %v3700_v36, 0.0  ;;  %v3975_v39 = vmul.f32 %v3700_v36, %v3700_v36  ;;  %v4038_v59 = vsel %vm3875_vm1, %v3977_v48, 0.0 }
 0x355   : > { %v4624_v41 = vpop.f32.mrf.mxu1  ;;  %v3932_v45 = vadd.f32 %v3931_v62, %v3930_v40 }
 0x356   : > { %3871 = vst.msk [vmem:[%s6108_s12 + $0x70] sm:$0xf] %vm248_vm3, %v4564_v38  ;;  %v4034_v44 = vsel %vm3875_vm1, %v3975_v39, 0.0  ;;  %v4567_v43 = vpack.c.bf16 %v4624_v41, %v4624_v41  ;;  %v3978_v55 = vmul.f32 %v4624_v41, %v4624_v41  ;;  %v3937_v60 = vsel %vm3875_vm1, %v4624_v41, 0.0 }
 0x357   : > { %v3703_v47 = vpop.f32.mrf.mxu1  ;;  %v4035_v52 = vadd.f32 %v4034_v44, %v4033_v46 }
 0x358   : > { %3874 = vst.msk [vmem:[%s6108_s12 + $0x7c] sm:$0xf] %vm248_vm3, %v4567_v43  ;;  %v4565_v49 = vpack.c.bf16 %v3703_v47, %v3703_v47  ;;  %v3933_v50 = vsel %vm3875_vm1, %v3703_v47, 0.0  ;;  %v3976_v51 = vmul.f32 %v3703_v47, %v3703_v47  ;;  %v4040_v0 = vsel %vm3875_vm1, %v3978_v55, 0.0 }
 0x359   : > { %v3934_v53 = vadd.f32 %v3933_v50, %v3932_v45 }
 0x35a   : > { %3872 = vst.msk [vmem:[%s6108_s12 + $0x74] sm:$0xf] %vm248_vm3, %v4565_v49  ;;  %v4036_v56 = vsel %vm3875_vm1, %v3976_v51, 0.0 }
 0x35b   : > { %v3936_v57 = vadd.f32 %v3935_v54, %v3934_v53  ;;  %v4037_v58 = vadd.f32 %v4036_v56, %v4035_v52 }
 0x35d   : > { %v3938_v61 = vadd.f32 %v3937_v60, %v3936_v57  ;;  %v4039_v63 = vadd.f32 %v4038_v59, %v4037_v58 }
 0x35f   : > { %v3939_v1 = vrot.slane %v3938_v61, 4  ;;  %v4041_v2 = vadd.f32 %v4040_v0, %v4039_v63 }
 0x361   : > { %v3940_v3 = vadd.f32 %v3939_v1, %v3938_v61  ;;  %v4042_v4 = vrot.slane %v4041_v2, 4 }
 0x363   : > { %v3941_v5 = vrot.slane %v3940_v3, 2  ;;  %v4043_v6 = vadd.f32 %v4042_v4, %v4041_v2 }
 0x365   : > { %v3942_v7 = vadd.f32 %v3941_v5, %v3940_v3  ;;  %v4044_v8 = vrot.slane %v4043_v6, 2 }
 0x367   : > { %v3943_v9 = vrot.slane %v3942_v7, 1  ;;  %v4045_v10 = vadd.f32 %v4044_v8, %v4043_v6 }
 0x369   : > { %v3944_v11 = vadd.f32 %v3943_v9, %v3942_v7  ;;  %v4046_v12 = vrot.slane %v4045_v10, 1 }
 0x36b   : > { %3946 = vst.msk [vmem:[%s211_s17] sm:$0x1] %vm3945_vm2, %v3944_v11  ;;  %v4047_v13 = vadd.f32 %v4046_v12, %v4045_v10 }
 0x36d   : > { %4048 = vst.msk [vmem:[%s214_s20] sm:$0x1] %vm3945_vm2, %v4047_v13 }
 0x36e PF: > { %s15_s15 = sadd.s32 1, %s4675_s15  }
 0x36f   : > { %p12_p4 = scmp.ge.s32.totalorder %s15_s15, 4  }
 0x371   :  { %14 = sbr.rel (!%p12_p4) target bundleno = 1 (0x1), region = 84 }

// kernel: basic_block.4
= control target key start
LH: loop header
LB: loop body
LE: loop exit
PB: predicated region body
PF: predicated region fallthrough
CT: control target
= control target key end

     0   :  { %s5434_s21 = smov 0   ;;  %s6934_s0 = inlined_call_operand.vmem [shape: bf16[2,16,16,4], index: 0, kind: input, shape index: {}]   ;;  %s6935_s1 = inlined_call_operand.vmem [shape: f32[1,4], index: 1, kind: input, shape index: {}]   ;;  %s6936_s2 = inlined_call_operand.vmem [shape: f32[1,4], index: 2, kind: input, shape index: {}]   ;;  %s6937_s3 = inlined_call_operand.vmem [shape: bf16[36,4], index: 3, kind: input, shape index: {}]   ;;  %s6938_s4 = inlined_call_operand.vmem [shape: bf16[2,16,16,4], index: 4, kind: output, shape index: {0}]   ;;  %s6939_s5 = inlined_call_operand.vmem [shape: f32[2,1,4], index: 5, kind: output, shape index: {1}]   ;;  %s6940_s6 = inlined_call_operand.vmem [shape: f32[2,1,4], index: 6, kind: output, shape index: {2}]  }
   0x1 LB: > { %s4972_s22 = sadd.s32 4294967295, %s5388_s21   ;;  %p4976_p0 = scmp.ge.s32.totalorder %s5388_s21, 1  ;;  %s5388_s21 = sphi %s5434_s21, %s17_s21  }
   0x2   : > { %p217_p1 = scmp.lt.s32.totalorder %s5388_s21, 3 }
   0x4   : > { %p218_p2 = pnand %p4976_p0, %p217_p1 }
   0x5   : > { %p253_p3 = scmp.lt.s32.totalorder (!%p218_p2), %s4972_s22, 1  ;;  %s5391_s7 = smov (!%p218_p2), 4  }
   0x6   : > { %221 = sbr.rel (%p218_p2) target bundleno = 982 (0x3d6), region = 36  ;;  %s5392_s12 = smov (!%p218_p2), 8  }
   0x7   : > { %s5393_s13 = smov (!%p218_p2), 12   ;;  %s5394_s14 = smov (!%p218_p2), 16  }
   0x8   : > { %s5395_s15 = smov (!%p218_p2), 20   ;;  %s5396_s16 = smov (!%p218_p2), 24  }
   0x9   : > { %s5397_s19 = smov (!%p218_p2), 28   ;;  %s5398_s28 = smov (!%p218_p2), 32  }
   0xb   : > { %vm444_vm0 = vcmask 27648   ;;  %v5390_v0 = vmov 0   ;;  %s6952_s22 = smov (!%p253_p3, %s4972_s22), 1  ;;  %vm447_vm1 = vcmask 24576   ;;  %vm1149_vm2 = vsmask.f32 3328 }
   0xc   : > { %445 = vst.msk [vmem:[#allocation2] sm:$0xf] %vm444_vm0, %v5390_v0  ;;  %446 = vst.msk [vmem:[#allocation2 + $0x4] sm:$0xf] %vm444_vm0, %v5390_v0  ;;  %s5132_s23 = sshll.u32 %s6952_s22, 7  ;;  %vm1761_vm11 = vcmask 1042432  }
   0xd   : > { %449 = vst.msk [vmem:[#allocation2 + $0xc] sm:$0xf] %vm444_vm0, %v5390_v0  ;;  %450 = vst.msk [vmem:[#allocation2 + $0x10] sm:$0xf] %vm444_vm0, %v5390_v0  ;;  %s5508_s26 = scalar_lea.vmem %s6934_s0, %s5132_s23  ;;  %vm1150_vm3 = vsmask.f32 7440  ;;  %s6731_s10 = scalar_lea.vmem %s6938_s4, %s5132_s23 }
   0xe   : > { %452 = vst.msk [vmem:[#allocation2 + $0x18] sm:$0xf] %vm444_vm0, %v5390_v0  ;;  %453 = vst.msk [vmem:[#allocation2 + $0x1c] sm:$0xf] %vm444_vm0, %v5390_v0  ;;  %v5199_v1 = vld [vmem:[%s5508_s26] sm:$0xff]   ;;  %v5262_v3 = vld [vmem:[%s5508_s26 + $0x8] sm:$0xff]  }
   0xf   : > { %455 = vst.msk [vmem:[#allocation2 + $0x24] sm:$0xf] %vm444_vm0, %v5390_v0  ;;  %456 = vst.msk [vmem:[#allocation2 + $0x28] sm:$0xf] %vm444_vm0, %v5390_v0  ;;  %v5514_v2 = vld [vmem:[%s6935_s1] ss:$0 sm:$0xff]  ;;  %v5200_v6 = vunpack.c.l.bf16 %v5199_v1  ;;  %v5201_v7 = vunpack.c.h.bf16 %v5199_v1  ;;  %v5204_v8 = vunpack.c.l.bf16 %v5262_v3  ;;  %v5205_v9 = vunpack.c.h.bf16 %v5262_v3 }
  0x10   : > { %458 = vst.msk [vmem:[#allocation2 + $0x30] sm:$0xf] %vm444_vm0, %v5390_v0  ;;  %459 = vst.msk [vmem:[#allocation2 + $0x34] sm:$0xf] %vm444_vm0, %v5390_v0  ;;  %vm596_vm4 = vsmask.f32 256 }
  0x11   : > { %461 = vst.msk [vmem:[#allocation2 + $0x3c] sm:$0xf] %vm444_vm0, %v5390_v0  ;;  %462 = vst.msk [vmem:[#allocation2 + $0x40] sm:$0xf] %vm444_vm0, %v5390_v0  ;;  %vm597_vm5 = vsmask.f32 4368  ;;  %v341_v15 = vmul.f32 %v5200_v6, %v5514_v2  ;;  %v342_v16 = vmul.f32 %v5201_v7, %v5514_v2  ;;  %v343_v17 = vmul.f32 %v5204_v8, %v5514_v2 }
  0x12   : > { %464 = vst.msk [vmem:[#allocation2 + $0x48] sm:$0xf] %vm444_vm0, %v5390_v0  ;;  %465 = vst.msk [vmem:[#allocation2 + $0x4c] sm:$0xf] %vm444_vm0, %v5390_v0  ;;  %v5520_v14 = vld [vmem:[%s6936_s2] ss:$0 sm:$0xff]  ;;  %v344_v18 = vmul.f32 %v5205_v9, %v5514_v2 }
  0x13   : > { %467 = vst.msk [vmem:[#allocation2 + $0x54] sm:$0xf] %vm444_vm0, %v5390_v0  ;;  %468 = vst.msk [vmem:[#allocation2 + $0x58] sm:$0xf] %vm444_vm0, %v5390_v0  ;;  %v1101_v4 = vld [vmem:[#allocation2] sm:$0xf]  ;;  %v380_v25 = vadd.f32 %v5520_v14, %v341_v15  ;;  %v381_v26 = vadd.f32 %v5520_v14, %v342_v16  ;;  %v382_v28 = vadd.f32 %v5520_v14, %v343_v17 }
  0x14   : > { %470 = vst.msk [vmem:[#allocation2 + $0x60] sm:$0xf] %vm444_vm0, %v5390_v0  ;;  %471 = vst.msk [vmem:[#allocation2 + $0x64] sm:$0xf] %vm444_vm0, %v5390_v0  ;;  %v1102_v5 = vld [vmem:[#allocation2 + $0x4] sm:$0xf]  ;;  %v383_v31 = vadd.f32 %v5520_v14, %v344_v18 }
  0x15   : > { %473 = vst.msk [vmem:[#allocation2 + $0x6c] sm:$0xf] %vm444_vm0, %v5390_v0  ;;  %474 = vst.msk [vmem:[#allocation2 + $0x70] sm:$0xf] %vm444_vm0, %v5390_v0  ;;  %v1153_v10 = vshrl.u32 %v1101_v4, 16  ;;  %v1156_v11 = vshll.u32 %v1101_v4, 16 }
  0x16   : > { %476 = vst.msk [vmem:[#allocation2 + $0x78] sm:$0xf] %vm444_vm0, %v5390_v0  ;;  %477 = vst.msk [vmem:[#allocation2 + $0x7c] sm:$0xf] %vm444_vm0, %v5390_v0  ;;  %v1162_v12 = vshll.u32 %v1102_v5, 16  ;;  %v1166_v13 = vshrl.u32 %v1102_v5, 16 }
  0x17   : > { %479 = vst.msk [vmem:[#allocation2 + $0x84] sm:$0xf] %vm444_vm0, %v5390_v0  ;;  %480 = vst.msk [vmem:[#allocation2 + $0x88] sm:$0xf] %vm444_vm0, %v5390_v0  ;;  %vm921_vm6 = vsmask.f32 7938 }
  0x18   : > { %482 = vst.msk [vmem:[#allocation2 + $0x90] sm:$0xf] %vm444_vm0, %v5390_v0  ;;  %483 = vst.msk [vmem:[#allocation2 + $0x94] sm:$0xf] %vm444_vm0, %v5390_v0  ;;  %v5263_v19 = vld [vmem:[%s5508_s26 + $0x10] sm:$0xff]   ;;  %v1155_v20 = vrot.slane %v1153_v10, 4 }
  0x19   : > { %485 = vst.msk [vmem:[#allocation2 + $0x9c] sm:$0xf] %vm444_vm0, %v5390_v0  ;;  %486 = vst.msk [vmem:[#allocation2 + $0xa0] sm:$0xf] %vm444_vm0, %v5390_v0  ;;  %v1158_v21 = vrot.slane %v1156_v11, 5  ;;  %v1164_v22 = vrot.slane %v1162_v12, 5  ;;  %v5208_v32 = vunpack.c.l.bf16 %v5263_v19  ;;  %v5209_v41 = vunpack.c.h.bf16 %v5263_v19 }
  0x1a   : > { %488 = vst.msk [vmem:[#allocation2 + $0xa8] sm:$0xf] %vm444_vm0, %v5390_v0  ;;  %489 = vst.msk [vmem:[#allocation2 + $0xac] sm:$0xf] %vm444_vm0, %v5390_v0  ;;  %v1168_v23 = vrot.slane %v1166_v13, 4  ;;  %v412_v34 = vmax.f32 %v380_v25, 0.0 }
  0x1b   : > { %491 = vst.msk [vmem:[#allocation2 + $0xb4] sm:$0xf] %vm444_vm0, %v5390_v0  ;;  %492 = vst.msk [vmem:[#allocation2 + $0xb8] sm:$0xf] %vm444_vm0, %v5390_v0  ;;  %v1159_v29 = vor.u32 %v1158_v21, %v1155_v20  ;;  %v413_v35 = vmax.f32 %v381_v26, 0.0  ;;  %v414_v37 = vmax.f32 %v382_v28, 0.0  ;;  %v345_v45 = vmul.f32 %v5208_v32, %v5514_v2 }
  0x1c   : > { %494 = vst.msk [vmem:[#allocation2 + $0xc0] sm:$0xf] %vm444_vm0, %v5390_v0  ;;  %495 = vst.msk [vmem:[#allocation2 + $0xc4] sm:$0xf] %vm444_vm0, %v5390_v0  ;;  %v1169_v30 = vor.u32 %v1168_v23, %v1164_v22  ;;  %v415_v40 = vmax.f32 %v383_v31, 0.0  ;;  %v5134_v42 = vpack.c.bf16 %v412_v34, %v412_v34  ;;  %v346_v49 = vmul.f32 %v5209_v41, %v5514_v2  ;;  %v5264_v54 = vld [vmem:[%s5508_s26 + $0x18] sm:$0xff]  }
  0x1d   : > { %497 = vst.msk [vmem:[#allocation2 + $0xcc] sm:$0xf] %vm444_vm0, %v5390_v0  ;;  %498 = vst.msk [vmem:[#allocation2 + $0xd0] sm:$0xf] %vm444_vm0, %v5390_v0  ;;  %v1160_v38 = vrot.slane %v1159_v29, 4  ;;  %v5135_v43 = vpack.c.bf16 %v413_v35, %v413_v35  ;;  %v5136_v44 = vpack.c.bf16 %v414_v37, %v414_v37  ;;  %v384_v63 = vadd.f32 %v5520_v14, %v345_v45  ;;  %v5265_v20 = vld [vmem:[%s5508_s26 + $0x20] sm:$0xff]  }
  0x1e   : > { %448 = vst.msk [vmem:[#allocation2 + $0x8] sm:$0x1] %vm447_vm1, %v5390_v0  ;;  %451 = vst.msk [vmem:[#allocation2 + $0x14] sm:$0x1] %vm447_vm1, %v5390_v0  ;;  %v1170_v39 = vrot.slane %v1169_v30, 4  ;;  %v5137_v48 = vpack.c.bf16 %v415_v40, %v415_v40  ;;  %v600_v50 = vshrl.u32 %v5134_v42, 16  ;;  %v5212_v7 = vunpack.c.l.bf16 %v5264_v54 }
  0x1f   : > { %454 = vst.msk [vmem:[#allocation2 + $0x20] sm:$0x1] %vm447_vm1, %v5390_v0  ;;  %457 = vst.msk [vmem:[#allocation2 + $0x2c] sm:$0x1] %vm447_vm1, %v5390_v0  ;;  %v603_v51 = vshll.u32 %v5134_v42, 16  ;;  %v608_v52 = vshrl.u32 %v5135_v43, 16  ;;  %v5213_v8 = vunpack.c.h.bf16 %v5264_v54  ;;  %v5216_v34 = vunpack.c.l.bf16 %v5265_v20 }
  0x20   : > { %460 = vst.msk [vmem:[#allocation2 + $0x38] sm:$0x1] %vm447_vm1, %v5390_v0  ;;  %463 = vst.msk [vmem:[#allocation2 + $0x44] sm:$0x1] %vm447_vm1, %v5390_v0  ;;  %v611_v53 = vshll.u32 %v5135_v43, 16  ;;  %v617_v56 = vshrl.u32 %v5136_v44, 16  ;;  %v347_v31 = vmul.f32 %v5212_v7, %v5514_v2 }
  0x21   : > { %466 = vst.msk [vmem:[#allocation2 + $0x50] sm:$0x1] %vm447_vm1, %v5390_v0  ;;  %469 = vst.msk [vmem:[#allocation2 + $0x5c] sm:$0x1] %vm447_vm1, %v5390_v0  ;;  %v620_v57 = vshll.u32 %v5136_v44, 16  ;;  %v625_v58 = vshrl.u32 %v5137_v48, 16  ;;  %v348_v32 = vmul.f32 %v5213_v8, %v5514_v2  ;;  %v349_v45 = vmul.f32 %v5216_v34, %v5514_v2 }
  0x22   : > { %472 = vst.msk [vmem:[#allocation2 + $0x68] sm:$0x1] %vm447_vm1, %v5390_v0  ;;  %475 = vst.msk [vmem:[#allocation2 + $0x74] sm:$0x1] %vm447_vm1, %v5390_v0  ;;  %v628_v59 = vshll.u32 %v5137_v48, 16  ;;  %v602_v60 = vrot.slane %v600_v50, 7  ;;  %v386_v41 = vadd.f32 %v5520_v14, %v347_v31 }
  0x23   : > { %478 = vst.msk [vmem:[#allocation2 + $0x80] sm:$0x1] %vm447_vm1, %v5390_v0  ;;  %481 = vst.msk [vmem:[#allocation2 + $0x8c] sm:$0x1] %vm447_vm1, %v5390_v0  ;;  %v610_v61 = vrot.slane %v608_v52, 7  ;;  %v619_v5 = vrot.slane %v617_v56, 7  ;;  %v387_v42 = vadd.f32 %v5520_v14, %v348_v32  ;;  %v5590_v52 = vadd.f32 %v5520_v14, %v349_v45 }
  0x24   : > { %484 = vst.msk [vmem:[#allocation2 + $0x98] sm:$0x1] %vm447_vm1, %v5390_v0  ;;  %487 = vst.msk [vmem:[#allocation2 + $0xa4] sm:$0x1] %vm447_vm1, %v5390_v0  ;;  %v923_v1 = vld [vmem:[#allocation2 + $0xc] sm:$0xf]  ;;  %v605_v9 = vor.u32 %v603_v51, %v602_v60 }
  0x25   : > { %490 = vst.msk [vmem:[#allocation2 + $0xb0] sm:$0x1] %vm447_vm1, %v5390_v0  ;;  %493 = vst.msk [vmem:[#allocation2 + $0xbc] sm:$0x1] %vm447_vm1, %v5390_v0  ;;  %v1103_v24 = vld [vmem:[#allocation2 + $0x8] sm:$0x1]  ;;  %v613_v11 = vor.u32 %v611_v53, %v610_v61  ;;  %v622_v16 = vor.u32 %v620_v57, %v619_v5 }
  0x26   : > { %496 = vst.msk [vmem:[#allocation2 + $0xc8] sm:$0x1] %vm447_vm1, %v5390_v0  ;;  %499 = vst.msk [vmem:[#allocation2 + $0xd4] sm:$0x1] %vm447_vm1, %v5390_v0  ;;  %v1172_v27 = vshll.u32 %v1103_v24, 16  ;;  %v385_v0 = vadd.f32 %v5520_v14, %v346_v49  ;;  %v627_v6 = vrot.slane %v625_v58, 7 }
  0x27   : > { %vm5533_vm7 = vmor %vm1149_vm2, %vm1150_vm3  ;;  %v929_v4 = vld [vmem:[#allocation2 + $0x14] sm:$0x1]  ;;  %v606_v10 = vrot.slane %v602_v60, 4  ;;  %v615_v12 = vrot.slane %v610_v61, 4  ;;  %v932_v13 = vld [vmem:[#allocation2 + $0x18] sm:$0xf] }
  0x28   : > { %v1174_v36 = vrot.slane %v1172_v27, 5  ;;  %v1165_v46 = vsel %vm5533_vm7, %v1160_v38, %v1164_v22  ;;  %vm5547_vm8 = vmor %vm596_vm4, %vm597_vm5  ;;  %v936_v15 = vld [vmem:[#allocation2 + $0x20] sm:$0x1]  ;;  %v623_v17 = vrot.slane %v619_v5, 4  ;;  %v630_v18 = vor.u32 %v628_v59, %v627_v6  ;;  %v5266_v25 = vld [vmem:[%s5508_s26 + $0x28] sm:$0xff]  }
  0x29   : > { %1536 = vrot.lane.b32.xlu0 %v1165_v46, %s5391_s7  ;;  %vm5553_vm9 = vmand %vm444_vm0, %vm921_vm6  ;;  %v632_v19 = vrot.slane %v627_v6, 4  ;;  %v614_v21 = vsel %vm5547_vm8, %v606_v10, %v613_v11  ;;  %v416_v24 = vmax.f32 %v384_v63, 0.0  ;;  %v417_v29 = vmax.f32 %v385_v0, 0.0  ;;  %v939_v7 = vld [vmem:[#allocation2 + $0x24] sm:$0xf] }
  0x2a   : > { %v1175_v47 = vsel %vm5533_vm7, %v1170_v39, %v1174_v36  ;;  %vm5561_vm10 = vmand %vm447_vm1, %vm596_vm4  ;;  %v924_v22 = vsel %vm5553_vm9, %v605_v9, %v923_v1  ;;  %926 = vst.msk [vmem:[#allocation2 + $0x10] sm:$0xf] %vm444_vm0, %v614_v21  ;;  %v631_v26 = vsel %vm5547_vm8, %v623_v17, %v630_v18  ;;  %v933_v27 = vsel %vm5553_vm9, %v622_v16, %v932_v13 }
  0x2b   : > { %v930_v23 = vsel %vm5561_vm10, %v615_v12, %v929_v4  ;;  %925 = vst [vmem:[#allocation2 + $0xc] sm:$0xf] %v924_v22  ;;  %v937_v28 = vsel %vm5561_vm10, %v632_v19, %v936_v15  ;;  %934 = vst [vmem:[#allocation2 + $0x18] sm:$0xf] %v933_v27  ;;  %v5138_v30 = vpack.c.bf16 %v416_v24, %v416_v24  ;;  %v5217_v36 = vunpack.c.h.bf16 %v5265_v20 }
  0x2c   : > { %931 = vst [vmem:[#allocation2 + $0x14] sm:$0x1] %v930_v23  ;;  %935 = vst.msk [vmem:[#allocation2 + $0x1c] sm:$0xf] %vm444_vm0, %v631_v26  ;;  %v5139_v35 = vpack.c.bf16 %v417_v29, %v417_v29  ;;  %v5220_v37 = vunpack.c.l.bf16 %v5266_v25  ;;  %v5221_v38 = vunpack.c.h.bf16 %v5266_v25  ;;  %v418_v48 = vmax.f32 %v386_v41, 0.0 }
  0x2d   : > { %1538 = vrot.lane.b32.xlu0 %v1175_v47, %s5391_s7  ;;  %938 = vst [vmem:[#allocation2 + $0x20] sm:$0x1] %v937_v28  ;;  %v634_v39 = vshrl.u32 %v5138_v30, 16  ;;  %v637_v40 = vshll.u32 %v5138_v30, 16  ;;  %v350_v46 = vmul.f32 %v5217_v36, %v5514_v2  ;;  %v419_v49 = vmax.f32 %v387_v42, 0.0 }
  0x2e   : > { %v642_v43 = vshrl.u32 %v5139_v35, 16  ;;  %v645_v44 = vshll.u32 %v5139_v35, 16  ;;  %v351_v50 = vmul.f32 %v5220_v37, %v5514_v2  ;;  %v5596_v54 = vmul.f32 %v5221_v38, %v5514_v2  ;;  %v943_v36 = vld [vmem:[#allocation2 + $0x2c] sm:$0x1]  ;;  %v1034_v62 = vld [vmem:[#allocation2 + $0xc8] sm:$0x1] }
  0x2f   : > { %v636_v47 = vrot.slane %v634_v39, 7  ;;  %v5593_v53 = vadd.f32 %v5520_v14, %v350_v46  ;;  %v5140_v60 = vpack.c.bf16 %v418_v48, %v418_v48  ;;  %v5598_v61 = vpack.c.bf16 %v419_v49, %v419_v49 }
  0x30   : > { %v644_v51 = vrot.slane %v642_v43, 7  ;;  %v5601_v63 = vadd.f32 %v5520_v14, %v351_v50  ;;  %vm1762_vm12 = vcmask 1046532   ;;  %vm1632_vm14 = vcmask 60448  }
  0x31   : > { %v1105_v57 = vld [vmem:[#allocation2 + $0x10] sm:$0xf]  ;;  %v639_v59 = vor.u32 %v637_v40, %v636_v47  ;;  %v640_v12 = vrot.slane %v636_v47, 4  ;;  %v651_v40 = vshrl.u32 %v5140_v60, 16  ;;  %v659_v48 = vshrl.u32 %v5598_v61, 16  ;;  %vm5901_vm13 = vmor %vm1761_vm11, %vm1762_vm12 }
  0x32   : > { %v1104_v56 = vld [vmem:[#allocation2 + $0xc] sm:$0xf]  ;;  %v1186_v4 = vshll.u32 %v1105_v57, 16  ;;  %v1190_v5 = vshrl.u32 %v1105_v57, 16  ;;  %v1107_v6 = vld [vmem:[#allocation2 + $0x18] sm:$0xf]  ;;  %v647_v29 = vor.u32 %v645_v44, %v644_v51 }
  0x33   : > { %v1106_v58 = vld [vmem:[#allocation2 + $0x14] sm:$0x1]  ;;  %v1177_v0 = vshrl.u32 %v1104_v56, 16  ;;  %v1180_v1 = vshll.u32 %v1104_v56, 16  ;;  %v1108_v9 = vld [vmem:[#allocation2 + $0x1c] sm:$0xf]  ;;  %v940_v30 = vsel %vm5553_vm9, %v639_v59, %v939_v7 }
  0x34   : > { %v1196_v8 = vshll.u32 %v1106_v58, 16  ;;  %v1201_v10 = vshrl.u32 %v1107_v6, 16  ;;  %v1204_v11 = vshll.u32 %v1107_v6, 16  ;;  %v1188_v16 = vrot.slane %v1186_v4, 5  ;;  %v1109_v18 = vld [vmem:[#allocation2 + $0x20] sm:$0x1] }
  0x35   : > { %v1179_v13 = vrot.slane %v1177_v0, 4  ;;  %v1182_v15 = vrot.slane %v1180_v1, 5  ;;  %v1192_v17 = vrot.slane %v1190_v5, 4  ;;  %v1210_v22 = vshll.u32 %v1108_v9, 16  ;;  %941 = vst [vmem:[#allocation2 + $0x24] sm:$0xf] %v940_v30 }
  0x36   : > { %v1198_v19 = vrot.slane %v1196_v8, 5  ;;  %v1203_v20 = vrot.slane %v1201_v10, 4  ;;  %v1206_v21 = vrot.slane %v1204_v11, 5  ;;  %v1214_v25 = vshrl.u32 %v1108_v9, 16  ;;  %v950_v4 = vld [vmem:[#allocation2 + $0x38] sm:$0x1] }
  0x37   : > { %v1183_v23 = vor.u32 %v1182_v15, %v1179_v13  ;;  %v1193_v24 = vor.u32 %v1192_v17, %v1188_v16  ;;  %v1220_v26 = vshll.u32 %v1109_v18, 16  ;;  %v1212_v28 = vrot.slane %v1210_v22, 5 }
  0x38   : > { %v1207_v27 = vor.u32 %v1206_v21, %v1203_v20  ;;  %v1216_v34 = vrot.slane %v1214_v25, 4  ;;  %v648_v38 = vsel %vm5547_vm8, %v640_v12, %v647_v29  ;;  %v649_v39 = vrot.slane %v644_v51, 4  ;;  %v946_v51 = vld [vmem:[#allocation2 + $0x30] sm:$0xf]  ;;  %v953_v25 = vld [vmem:[#allocation2 + $0x3c] sm:$0xf] }
  0x39   : > { %v1184_v31 = vrot.slane %v1183_v23, 4  ;;  %v1194_v32 = vrot.slane %v1193_v24, 4  ;;  %v1222_v35 = vrot.slane %v1220_v26, 5  ;;  %942 = vst.msk [vmem:[#allocation2 + $0x28] sm:$0xf] %vm444_vm0, %v648_v38  ;;  %v654_v44 = vshll.u32 %v5140_v60, 16 }
  0x3a   : > { %v1208_v37 = vrot.slane %v1207_v27, 4  ;;  %v1217_v43 = vor.u32 %v1216_v34, %v1212_v28  ;;  %v944_v46 = vsel %vm5561_vm10, %v649_v39, %v943_v36  ;;  %v653_v47 = vrot.slane %v651_v40, 7 }
  0x3b   : > { %v1189_v41 = vsel %vm5533_vm7, %v1184_v31, %v1188_v16  ;;  %v1199_v42 = vsel %vm5533_vm7, %v1194_v32, %v1198_v19  ;;  %945 = vst [vmem:[#allocation2 + $0x2c] sm:$0x1] %v944_v46  ;;  %v662_v50 = vshll.u32 %v5598_v61, 16  ;;  %v420_v56 = vmax.f32 %v5590_v52, 0.0  ;;  %v957_v32 = vld [vmem:[#allocation2 + $0x44] sm:$0x1] }
  0x3c   : > { %1540 = vrot.lane.b32.xlu1 %v1189_v41, %s5391_s7  ;;  %v1213_v45 = vsel %vm5533_vm7, %v1208_v37, %v1212_v28  ;;  %v1218_v49 = vrot.slane %v1217_v43, 4  ;;  %v421_v57 = vmax.f32 %v5593_v53, 0.0  ;;  %v656_v58 = vor.u32 %v654_v44, %v653_v47  ;;  %v1110_v61 = vld [vmem:[#allocation2 + $0x24] sm:$0xf] }
  0x3d   : > { %1544 = vrot.lane.b32.xlu0 %v1213_v45, %s5391_s7  ;;  %v657_v59 = vrot.slane %v653_v47, 4  ;;  %v661_v60 = vrot.slane %v659_v48, 7  ;;  %v391_v0 = vadd.f32 %v5520_v14, %v5596_v54  ;;  %v5142_v5 = vpack.c.bf16 %v420_v56, %v420_v56 }
  0x3e   : > { %v1223_v1 = vsel %vm5533_vm7, %v1218_v49, %v1222_v35  ;;  %v5143_v6 = vpack.c.bf16 %v421_v57, %v421_v57  ;;  %v422_v7 = vmax.f32 %v5601_v63, 0.0  ;;  %v947_v53 = vsel %vm5553_vm9, %v656_v58, %v946_v51 }
  0x3f   : > { %v664_v52 = vor.u32 %v662_v50, %v661_v60  ;;  %v666_v8 = vrot.slane %v661_v60, 4  ;;  %v423_v9 = vmax.f32 %v391_v0, 0.0  ;;  %v1225_v10 = vshrl.u32 %v1110_v61, 16  ;;  %948 = vst [vmem:[#allocation2 + $0x30] sm:$0xf] %v947_v53 }
  0x40   : > { %1542 = vrot.lane.b32.xlu1 %v1199_v42, %s5391_s7  ;;  %v1228_v11 = vshll.u32 %v1110_v61, 16  ;;  %v668_v54 = vshrl.u32 %v5142_v5, 16  ;;  %v671_v12 = vshll.u32 %v5142_v5, 16  ;;  %v1111_v13 = vld [vmem:[#allocation2 + $0x28] sm:$0xf]  ;;  %v676_v16 = vshrl.u32 %v5143_v6, 16 }
  0x41   : > { %v665_v15 = vsel %vm5547_vm8, %v657_v59, %v664_v52  ;;  %v951_v63 = vsel %vm5561_vm10, %v666_v8, %v950_v4  ;;  %v679_v17 = vshll.u32 %v5143_v6, 16  ;;  %v1227_v18 = vrot.slane %v1225_v10, 4  ;;  %v5267_v42 = vld [vmem:[%s5508_s26 + $0x30] sm:$0xff]  }
  0x42   : > { %v1230_v19 = vrot.slane %v1228_v11, 5  ;;  %v1234_v20 = vshll.u32 %v1111_v13, 16  ;;  %v1238_v21 = vshrl.u32 %v1111_v13, 16  ;;  %949 = vst.msk [vmem:[#allocation2 + $0x34] sm:$0xf] %vm444_vm0, %v665_v15  ;;  %v670_v23 = vrot.slane %v668_v54, 7 }
  0x43   : > { %952 = vst [vmem:[#allocation2 + $0x38] sm:$0x1] %v951_v63  ;;  %v1112_v22 = vld [vmem:[#allocation2 + $0x2c] sm:$0x1]  ;;  %v678_v24 = vrot.slane %v676_v16, 7  ;;  %v5144_v26 = vpack.c.bf16 %v422_v7, %v422_v7  ;;  %v5145_v27 = vpack.c.bf16 %v423_v9, %v423_v9  ;;  %v5224_v60 = vunpack.c.l.bf16 %v5267_v42 }
  0x44   : > { %1546 = vrot.lane.b32.xlu1 %v1223_v1, %s5391_s7  ;;  %v1231_v28 = vor.u32 %v1230_v19, %v1227_v18  ;;  %v1236_v29 = vrot.slane %v1234_v20, 5  ;;  %v1240_v30 = vrot.slane %v1238_v21, 4  ;;  %v1244_v31 = vshll.u32 %v1112_v22, 16  ;;  %v960_v7 = vld [vmem:[#allocation2 + $0x48] sm:$0xf] }
  0x45   : > { %v673_v34 = vor.u32 %v671_v12, %v670_v23  ;;  %v674_v35 = vrot.slane %v670_v23, 4  ;;  %v681_v36 = vor.u32 %v679_v17, %v678_v24  ;;  %v683_v37 = vrot.slane %v678_v24, 4  ;;  %v5268_v12 = vld [vmem:[%s5508_s26 + $0x38] sm:$0xff]   ;;  %v964_v20 = vld [vmem:[#allocation2 + $0x50] sm:$0x1] }
  0x46   : > { %v1232_v38 = vrot.slane %v1231_v28, 4  ;;  %v1241_v39 = vor.u32 %v1240_v30, %v1236_v29  ;;  %v1246_v40 = vrot.slane %v1244_v31, 5  ;;  %v685_v41 = vshrl.u32 %v5144_v26, 16  ;;  %v1113_v43 = vld [vmem:[#allocation2 + $0x30] sm:$0xf] }
  0x47   : > { %v682_v44 = vsel %vm5547_vm8, %v674_v35, %v681_v36  ;;  %v954_v45 = vsel %vm5553_vm9, %v673_v34, %v953_v25  ;;  %v958_v46 = vsel %vm5561_vm10, %v683_v37, %v957_v32  ;;  %v688_v47 = vshll.u32 %v5144_v26, 16 }
  0x48   : > { %v1237_v48 = vsel %vm5533_vm7, %v1232_v38, %v1236_v29  ;;  %v1242_v49 = vrot.slane %v1241_v39, 4  ;;  %v1249_v50 = vshrl.u32 %v1113_v43, 16  ;;  %v1252_v51 = vshll.u32 %v1113_v43, 16  ;;  %955 = vst [vmem:[#allocation2 + $0x3c] sm:$0xf] %v954_v45 }
  0x49   : > { %956 = vst.msk [vmem:[#allocation2 + $0x40] sm:$0xf] %vm444_vm0, %v682_v44  ;;  %959 = vst [vmem:[#allocation2 + $0x44] sm:$0x1] %v958_v46  ;;  %1548 = vrot.lane.b32.xlu0 %v1237_v48, %s5391_s7  ;;  %v1114_v56 = vld [vmem:[#allocation2 + $0x34] sm:$0xf]  ;;  %v5225_v0 = vunpack.c.h.bf16 %v5267_v42  ;;  %v353_v16 = vmul.f32 %v5224_v60, %v5514_v2  ;;  %v5229_v28 = vunpack.c.h.bf16 %v5268_v12 }
  0x4a   : > { %v1115_v57 = vld [vmem:[#allocation2 + $0x38] sm:$0x1]  ;;  %v687_v58 = vrot.slane %v685_v41, 7  ;;  %v693_v59 = vshrl.u32 %v5145_v27, 16  ;;  %v1247_v1 = vsel %vm5533_vm7, %v1242_v49, %v1246_v40  ;;  %v1251_v4 = vrot.slane %v1249_v50, 4  ;;  %v5665_v42 = vld [vmem:[%s5508_s26 + $0x40] sm:$0xff]  }
  0x4b   : > { %v1254_v5 = vrot.slane %v1252_v51, 5  ;;  %v1258_v6 = vshll.u32 %v1114_v56, 16  ;;  %1550 = vrot.lane.b32.xlu1 %v1247_v1, %s5391_s7  ;;  %v1262_v61 = vshrl.u32 %v1114_v56, 16  ;;  %v1268_v52 = vshll.u32 %v1115_v57, 16 }
  0x4c   : > { %v690_v53 = vor.u32 %v688_v47, %v687_v58  ;;  %v691_v8 = vrot.slane %v687_v58, 4  ;;  %v695_v11 = vrot.slane %v693_v59, 7  ;;  %v696_v54 = vshll.u32 %v5145_v27, 16 }
  0x4d   : > { %v1255_v9 = vor.u32 %v1254_v5, %v1251_v4  ;;  %v1260_v10 = vrot.slane %v1258_v6, 5  ;;  %v1264_v13 = vrot.slane %v1262_v61, 4  ;;  %v1270_v15 = vrot.slane %v1268_v52, 5 }
  0x4e   : > { %v961_v63 = vsel %vm5553_vm9, %v690_v53, %v960_v7  ;;  %v698_v18 = vor.u32 %v696_v54, %v695_v11  ;;  %v700_v19 = vrot.slane %v695_v11, 4  ;;  %v354_v21 = vmul.f32 %v5225_v0, %v5514_v2 }
  0x4f   : > { %v1256_v17 = vrot.slane %v1255_v9, 4  ;;  %962 = vst [vmem:[#allocation2 + $0x48] sm:$0xf] %v961_v63  ;;  %v1265_v22 = vor.u32 %v1264_v13, %v1260_v10  ;;  %v1116_v23 = vld [vmem:[#allocation2 + $0x3c] sm:$0xf]  ;;  %v392_v26 = vadd.f32 %v5520_v14, %v353_v16  ;;  %v5228_v27 = vunpack.c.l.bf16 %v5268_v12 }
  0x50   : > { %v1117_v24 = vld [vmem:[#allocation2 + $0x40] sm:$0xf]  ;;  %v1118_v25 = vld [vmem:[#allocation2 + $0x44] sm:$0x1]  ;;  %v1273_v30 = vshrl.u32 %v1116_v23, 16  ;;  %v1276_v31 = vshll.u32 %v1116_v23, 16  ;;  %v699_v37 = vsel %vm5547_vm8, %v691_v8, %v698_v18  ;;  %v965_v41 = vsel %vm5561_vm10, %v700_v19, %v964_v20 }
  0x51   : > { %v1261_v29 = vsel %vm5533_vm7, %v1256_v17, %v1260_v10  ;;  %v1282_v32 = vshll.u32 %v1117_v24, 16  ;;  %v1266_v34 = vrot.slane %v1265_v22, 4  ;;  %v1286_v35 = vshrl.u32 %v1117_v24, 16  ;;  %963 = vst.msk [vmem:[#allocation2 + $0x4c] sm:$0xf] %vm444_vm0, %v699_v37 }
  0x52   : > { %1552 = vrot.lane.b32.xlu0 %v1261_v29, %s5391_s7  ;;  %v1292_v36 = vshll.u32 %v1118_v25, 16  ;;  %v1275_v38 = vrot.slane %v1273_v30, 4  ;;  %v1278_v39 = vrot.slane %v1276_v31, 5  ;;  %966 = vst [vmem:[#allocation2 + $0x50] sm:$0x1] %v965_v41  ;;  %v393_v46 = vadd.f32 %v5520_v14, %v354_v21 }
  0x53   : > { %v1284_v40 = vrot.slane %v1282_v32, 5  ;;  %v1271_v43 = vsel %vm5533_vm7, %v1266_v34, %v1270_v15  ;;  %v1288_v44 = vrot.slane %v1286_v35, 4  ;;  %v424_v48 = vmax.f32 %v392_v26, 0.0  ;;  %v967_v21 = vld [vmem:[#allocation2 + $0x54] sm:$0xf] }
  0x54   : > { %v1294_v45 = vrot.slane %v1292_v36, 5  ;;  %1554 = vrot.lane.b32.xlu1 %v1271_v43, %s5391_s7  ;;  %v1279_v47 = vor.u32 %v1278_v39, %v1275_v38  ;;  %v355_v49 = vmul.f32 %v5228_v27, %v5514_v2  ;;  %v356_v50 = vmul.f32 %v5229_v28, %v5514_v2  ;;  %v971_v28 = vld [vmem:[#allocation2 + $0x5c] sm:$0x1]  ;;  %v5270_v38 = vld [vmem:[%s5508_s26 + $0x48] sm:$0xff]  }
  0x55   : > { %v1289_v51 = vor.u32 %v1288_v44, %v1284_v40  ;;  %v425_v57 = vmax.f32 %v393_v46, 0.0  ;;  %v5232_v58 = vunpack.c.l.bf16 %v5665_v42  ;;  %v5233_v59 = vunpack.c.h.bf16 %v5665_v42 }
  0x56   : > { %v1119_v56 = vld [vmem:[#allocation2 + $0x48] sm:$0xf]  ;;  %v1280_v60 = vrot.slane %v1279_v47, 4  ;;  %v5146_v4 = vpack.c.bf16 %v424_v48, %v424_v48  ;;  %v394_v7 = vadd.f32 %v5520_v14, %v355_v49  ;;  %v395_v61 = vadd.f32 %v5520_v14, %v356_v50  ;;  %v5697_v47 = vld [vmem:[%s5508_s26 + $0x50] sm:$0xff]  }
  0x57   : > { %v1297_v0 = vshrl.u32 %v1119_v56, 16  ;;  %v1300_v1 = vshll.u32 %v1119_v56, 16  ;;  %v1290_v5 = vrot.slane %v1289_v51, 4  ;;  %v5147_v6 = vpack.c.bf16 %v425_v57, %v425_v57 }
  0x58   : > { %v1285_v52 = vsel %vm5533_vm7, %v1280_v60, %v1284_v40  ;;  %v702_v9 = vshrl.u32 %v5146_v4, 16  ;;  %v1120_v11 = vld [vmem:[#allocation2 + $0x4c] sm:$0xf]  ;;  %v705_v54 = vshll.u32 %v5146_v4, 16  ;;  %v426_v22 = vmax.f32 %v394_v7, 0.0 }
  0x59   : > { %v1299_v53 = vrot.slane %v1297_v0, 4  ;;  %v1302_v8 = vrot.slane %v1300_v1, 5  ;;  %1556 = vrot.lane.b32.xlu0 %v1285_v52, %s5391_s7  ;;  %v1295_v10 = vsel %vm5533_vm7, %v1290_v5, %v1294_v45  ;;  %v710_v12 = vshrl.u32 %v5147_v6, 16  ;;  %v1121_v17 = vld [vmem:[#allocation2 + $0x50] sm:$0x1] }
  0x5a   : > { %v713_v13 = vshll.u32 %v5147_v6, 16  ;;  %1558 = vrot.lane.b32.xlu1 %v1295_v10, %s5391_s7  ;;  %v1306_v63 = vshll.u32 %v1120_v11, 16  ;;  %v1310_v16 = vshrl.u32 %v1120_v11, 16  ;;  %v704_v18 = vrot.slane %v702_v9, 7  ;;  %v974_v1 = vld [vmem:[#allocation2 + $0x60] sm:$0xf] }
  0x5b   : > { %v1303_v15 = vor.u32 %v1302_v8, %v1299_v53  ;;  %v1316_v19 = vshll.u32 %v1121_v17, 16  ;;  %v712_v20 = vrot.slane %v710_v12, 7  ;;  %v427_v23 = vmax.f32 %v395_v61, 0.0  ;;  %v978_v61 = vld [vmem:[#allocation2 + $0x68] sm:$0x1] }
  0x5c   : > { %v1308_v25 = vrot.slane %v1306_v63, 5  ;;  %v1312_v26 = vrot.slane %v1310_v16, 4  ;;  %v707_v27 = vor.u32 %v705_v54, %v704_v18  ;;  %v708_v30 = vrot.slane %v704_v18, 4 }
  0x5d   : > { %v1304_v24 = vrot.slane %v1303_v15, 4  ;;  %v1318_v29 = vrot.slane %v1316_v19, 5  ;;  %v715_v31 = vor.u32 %v713_v13, %v712_v20  ;;  %v717_v32 = vrot.slane %v712_v20, 4 }
  0x5e   : > { %v1313_v35 = vor.u32 %v1312_v26, %v1308_v25  ;;  %v968_v36 = vsel %vm5553_vm9, %v707_v27, %v967_v21  ;;  %v5148_v37 = vpack.c.bf16 %v426_v22, %v426_v22  ;;  %v5149_v41 = vpack.c.bf16 %v427_v23, %v427_v23 }
  0x5f   : > { %v1309_v34 = vsel %vm5533_vm7, %v1304_v24, %v1308_v25  ;;  %v716_v39 = vsel %vm5547_vm8, %v708_v30, %v715_v31  ;;  %969 = vst [vmem:[#allocation2 + $0x54] sm:$0xf] %v968_v36  ;;  %v972_v40 = vsel %vm5561_vm10, %v717_v32, %v971_v28  ;;  %v357_v42 = vmul.f32 %v5232_v58, %v5514_v2 }
  0x60   : > { %1560 = vrot.lane.b32.xlu0 %v1309_v34, %s5391_s7  ;;  %v1314_v43 = vrot.slane %v1313_v35, 4  ;;  %970 = vst.msk [vmem:[#allocation2 + $0x58] sm:$0xf] %vm444_vm0, %v716_v39  ;;  %973 = vst [vmem:[#allocation2 + $0x5c] sm:$0x1] %v972_v40  ;;  %v719_v44 = vshrl.u32 %v5148_v37, 16  ;;  %v358_v46 = vmul.f32 %v5233_v59, %v5514_v2  ;;  %v5236_v51 = vunpack.c.l.bf16 %v5270_v38 }
  0x61   : > { %v722_v45 = vshll.u32 %v5148_v37, 16  ;;  %v727_v48 = vshrl.u32 %v5149_v41, 16  ;;  %v730_v49 = vshll.u32 %v5149_v41, 16  ;;  %v396_v50 = vadd.f32 %v5520_v14, %v357_v42 }
  0x62   : > { %v1319_v56 = vsel %vm5533_vm7, %v1314_v43, %v1318_v29  ;;  %v721_v57 = vrot.slane %v719_v44, 7  ;;  %v397_v58 = vadd.f32 %v5520_v14, %v358_v46  ;;  %v5237_v60 = vunpack.c.h.bf16 %v5270_v38  ;;  %v981_v38 = vld [vmem:[#allocation2 + $0x6c] sm:$0xf] }
  0x63   : > { %1562 = vrot.lane.b32.xlu1 %v1319_v56, %s5391_s7  ;;  %v729_v0 = vrot.slane %v727_v48, 7  ;;  %v428_v4 = vmax.f32 %v396_v50, 0.0  ;;  %v359_v59 = vmul.f32 %v5236_v51, %v5514_v2  ;;  %v5240_v5 = vunpack.c.l.bf16 %v5697_v47  ;;  %v985_v56 = vld [vmem:[#allocation2 + $0x74] sm:$0x1] }
  0x64   : > { %v724_v6 = vor.u32 %v722_v45, %v721_v57  ;;  %v725_v7 = vrot.slane %v721_v57, 4  ;;  %v429_v52 = vmax.f32 %v397_v58, 0.0  ;;  %v360_v53 = vmul.f32 %v5237_v60, %v5514_v2 }
  0x65   : > { %v732_v8 = vor.u32 %v730_v49, %v729_v0  ;;  %v734_v9 = vrot.slane %v729_v0, 4  ;;  %v5150_v10 = vpack.c.bf16 %v428_v4, %v428_v4  ;;  %v398_v11 = vadd.f32 %v5520_v14, %v359_v59 }
  0x66   : > { %v1122_v54 = vld [vmem:[#allocation2 + $0x54] sm:$0xf]  ;;  %v975_v12 = vsel %vm5553_vm9, %v724_v6, %v974_v1  ;;  %v5151_v13 = vpack.c.bf16 %v429_v52, %v429_v52  ;;  %v399_v15 = vadd.f32 %v5520_v14, %v360_v53  ;;  %v5241_v63 = vunpack.c.h.bf16 %v5697_v47 }
  0x67   : > { %v1123_v16 = vld [vmem:[#allocation2 + $0x58] sm:$0xf]  ;;  %v1321_v17 = vshrl.u32 %v1122_v54, 16  ;;  %v1324_v18 = vshll.u32 %v1122_v54, 16  ;;  %v1124_v19 = vld [vmem:[#allocation2 + $0x5c] sm:$0x1]  ;;  %v733_v20 = vsel %vm5547_vm8, %v725_v7, %v732_v8  ;;  %v979_v21 = vsel %vm5561_vm10, %v734_v9, %v978_v61 }
  0x68   : > { %976 = vst [vmem:[#allocation2 + $0x60] sm:$0xf] %v975_v12  ;;  %v1330_v22 = vshll.u32 %v1123_v16, 16  ;;  %v1334_v23 = vshrl.u32 %v1123_v16, 16  ;;  %v1340_v24 = vshll.u32 %v1124_v19, 16  ;;  %v736_v25 = vshrl.u32 %v5150_v10, 16 }
  0x69   : > { %977 = vst.msk [vmem:[#allocation2 + $0x64] sm:$0xf] %vm444_vm0, %v733_v20  ;;  %980 = vst [vmem:[#allocation2 + $0x68] sm:$0x1] %v979_v21  ;;  %v1323_v26 = vrot.slane %v1321_v17, 4  ;;  %v1326_v27 = vrot.slane %v1324_v18, 5  ;;  %v361_v58 = vmul.f32 %v5240_v5, %v5514_v2 }
  0x6a   : > { %v739_v28 = vshll.u32 %v5150_v10, 16  ;;  %v744_v29 = vshrl.u32 %v5151_v13, 16  ;;  %v1332_v30 = vrot.slane %v1330_v22, 5  ;;  %v1336_v31 = vrot.slane %v1334_v23, 4  ;;  %v1037_v16 = vld [vmem:[#allocation2] sm:$0xf] }
  0x6b   : > { %v1342_v32 = vrot.slane %v1340_v24, 5  ;;  %v738_v34 = vrot.slane %v736_v25, 7  ;;  %v1327_v35 = vor.u32 %v1326_v27, %v1323_v26  ;;  %v747_v37 = vshll.u32 %v5151_v13, 16  ;;  %1069 = vst.msk [vmem:[#allocation3] sm:$0xf] %vm444_vm0, %v1037_v16 }
  0x6c   : > { %v746_v36 = vrot.slane %v744_v29, 7  ;;  %v430_v39 = vmax.f32 %v398_v11, 0.0  ;;  %v1337_v40 = vor.u32 %v1336_v31, %v1332_v30  ;;  %v431_v43 = vmax.f32 %v399_v15, 0.0  ;;  %v5732_v11 = vld [vmem:[%s5508_s26 + $0x58] sm:$0xff]   ;;  %v1039_v21 = vld [vmem:[#allocation2 + $0xc] sm:$0xf] }
  0x6d   : > { %v741_v41 = vor.u32 %v739_v28, %v738_v34  ;;  %v742_v42 = vrot.slane %v738_v34, 4  ;;  %v1328_v44 = vrot.slane %v1327_v35, 4  ;;  %v988_v23 = vld [vmem:[#allocation2 + $0x78] sm:$0xf]  ;;  %v362_v24 = vmul.f32 %v5241_v63, %v5514_v2  ;;  %1071 = vst.msk [vmem:[#allocation3 + $0x8] sm:$0xf] %vm444_vm0, %v1039_v21 }
  0x6e   : > { %v749_v45 = vor.u32 %v747_v37, %v746_v36  ;;  %v751_v46 = vrot.slane %v746_v36, 4  ;;  %v5152_v48 = vpack.c.bf16 %v430_v39, %v430_v39  ;;  %v1338_v49 = vrot.slane %v1337_v40, 4  ;;  %v1038_v31 = vld [vmem:[#allocation2 + $0x4] sm:$0xf] }
  0x6f   : > { %v1125_v50 = vld [vmem:[#allocation2 + $0x60] sm:$0xf]  ;;  %v982_v51 = vsel %vm5553_vm9, %v741_v41, %v981_v38  ;;  %v5153_v57 = vpack.c.bf16 %v431_v43, %v431_v43  ;;  %v1333_v60 = vsel %vm5533_vm7, %v1328_v44, %v1332_v30  ;;  %v400_v25 = vadd.f32 %v5520_v14, %v361_v58  ;;  %1070 = vst.msk [vmem:[#allocation3 + $0x4] sm:$0xf] %vm444_vm0, %v1038_v31  ;;  %v1040_v44 = vld [vmem:[#allocation2 + $0x10] sm:$0xf] }
  0x70   : > { %v1126_v0 = vld [vmem:[#allocation2 + $0x64] sm:$0xf]  ;;  %v1345_v1 = vshrl.u32 %v1125_v50, 16  ;;  %v1348_v4 = vshll.u32 %v1125_v50, 16  ;;  %v1127_v59 = vld [vmem:[#allocation2 + $0x68] sm:$0x1]  ;;  %v750_v6 = vsel %vm5547_vm8, %v742_v42, %v749_v45  ;;  %1564 = vrot.lane.b32.xlu0 %v1333_v60, %s5391_s7  ;;  %v1343_v7 = vsel %vm5533_vm7, %v1338_v49, %v1342_v32 }
  0x71   : > { %983 = vst [vmem:[#allocation2 + $0x6c] sm:$0xf] %v982_v51  ;;  %v1354_v61 = vshll.u32 %v1126_v0, 16  ;;  %v1358_v52 = vshrl.u32 %v1126_v0, 16  ;;  %v1364_v5 = vshll.u32 %v1127_v59, 16  ;;  %1566 = vrot.lane.b32.xlu1 %v1343_v7, %s5391_s7  ;;  %v986_v9 = vsel %vm5561_vm10, %v751_v46, %v985_v56 }
  0x72   : > { %984 = vst.msk [vmem:[#allocation2 + $0x70] sm:$0xf] %vm444_vm0, %v750_v6  ;;  %v1347_v53 = vrot.slane %v1345_v1, 4  ;;  %v1350_v8 = vrot.slane %v1348_v4, 5  ;;  %v753_v10 = vshrl.u32 %v5152_v48, 16  ;;  %v756_v15 = vshll.u32 %v5152_v48, 16 }
  0x73   : > { %v1356_v54 = vrot.slane %v1354_v61, 5  ;;  %v1360_v12 = vrot.slane %v1358_v52, 4  ;;  %v1366_v13 = vrot.slane %v1364_v5, 5  ;;  %987 = vst [vmem:[#allocation2 + $0x74] sm:$0x1] %v986_v9  ;;  %v761_v19 = vshrl.u32 %v5153_v57, 16 }
  0x74   : > { %v1351_v17 = vor.u32 %v1350_v8, %v1347_v53  ;;  %v755_v18 = vrot.slane %v753_v10, 7  ;;  %v764_v20 = vshll.u32 %v5153_v57, 16  ;;  %v5244_v26 = vunpack.c.l.bf16 %v5732_v11  ;;  %v992_v43 = vld [vmem:[#allocation2 + $0x80] sm:$0x1]  ;;  %1072 = vst.msk [vmem:[#allocation3 + $0xc] sm:$0xf] %vm444_vm0, %v1040_v44 }
  0x75   : > { %v1361_v22 = vor.u32 %v1360_v12, %v1356_v54  ;;  %v763_v30 = vrot.slane %v761_v19, 7  ;;  %v401_v35 = vadd.f32 %v5520_v14, %v362_v24  ;;  %v432_v36 = vmax.f32 %v400_v25, 0.0  ;;  %v5761_v4 = vld [vmem:[%s6935_s1] ss:$0 sm:$0xff]  ;;  %v1041_v6 = vld [vmem:[#allocation2 + $0x18] sm:$0xf] }
  0x76   : > { %v1352_v27 = vrot.slane %v1351_v17, 4  ;;  %v758_v28 = vor.u32 %v756_v15, %v755_v18  ;;  %v759_v29 = vrot.slane %v755_v18, 4  ;;  %v5245_v37 = vunpack.c.h.bf16 %v5732_v11  ;;  %v1042_v7 = vld [vmem:[#allocation2 + $0x1c] sm:$0xf]  ;;  %v5766_v8 = vld [vmem:[%s5508_s26 + $0x60] sm:$0xff]  }
  0x77   : > { %v1362_v32 = vrot.slane %v1361_v22, 4  ;;  %v766_v39 = vor.u32 %v764_v20, %v763_v30  ;;  %v768_v50 = vrot.slane %v763_v30, 4  ;;  %v433_v58 = vmax.f32 %v401_v35, 0.0  ;;  %1073 = vst.msk [vmem:[#allocation3 + $0x10] sm:$0xf] %vm444_vm0, %v1041_v6 }
  0x78   : > { %v1128_v34 = vld [vmem:[#allocation2 + $0x6c] sm:$0xf]  ;;  %v1357_v2 = vsel %vm5533_vm7, %v1352_v27, %v1356_v54  ;;  %v989_v14 = vsel %vm5553_vm9, %v758_v28, %v988_v23  ;;  %v5154_v1 = vpack.c.bf16 %v432_v36, %v432_v36  ;;  %v363_v59 = vmul.f32 %v5761_v4, %v5244_v26  ;;  %1074 = vst.msk [vmem:[#allocation3 + $0x14] sm:$0xf] %vm444_vm0, %v1042_v7  ;;  %v5773_v54 = vld [vmem:[%s6936_s2] ss:$0 sm:$0xff] }
  0x79   : > { %v1129_v47 = vld [vmem:[#allocation2 + $0x70] sm:$0xf]  ;;  %v1369_v63 = vshrl.u32 %v1128_v34, 16  ;;  %v1372_v38 = vshll.u32 %v1128_v34, 16  ;;  %1568 = vrot.lane.b32.xlu0 %v1357_v2, %s5391_s7  ;;  %v1367_v40 = vsel %vm5533_vm7, %v1362_v32, %v1366_v13  ;;  %v767_v49 = vsel %vm5547_vm8, %v759_v29, %v766_v39  ;;  %990 = vst [vmem:[#allocation2 + $0x78] sm:$0xf] %v989_v14 }
  0x7a   : > { %v1378_v41 = vshll.u32 %v1129_v47, 16  ;;  %v1382_v42 = vshrl.u32 %v1129_v47, 16  ;;  %1570 = vrot.lane.b32.xlu1 %v1367_v40, %s5391_s7  ;;  %v1130_v48 = vld [vmem:[#allocation2 + $0x74] sm:$0x1]  ;;  %991 = vst.msk [vmem:[#allocation2 + $0x7c] sm:$0xf] %vm444_vm0, %v767_v49  ;;  %v993_v0 = vsel %vm5561_vm10, %v768_v50, %v992_v43  ;;  %v5155_v5 = vpack.c.bf16 %v433_v58, %v433_v58 }
  0x7b   : > { %v1371_v45 = vrot.slane %v1369_v63, 4  ;;  %v1374_v46 = vrot.slane %v1372_v38, 5  ;;  %v1388_v57 = vshll.u32 %v1130_v48, 16  ;;  %994 = vst [vmem:[#allocation2 + $0x80] sm:$0x1] %v993_v0  ;;  %v364_v53 = vmul.f32 %v5761_v4, %v5245_v37 }
  0x7c   : > { %v1380_v51 = vrot.slane %v1378_v41, 5  ;;  %v1384_v56 = vrot.slane %v1382_v42, 4  ;;  %v770_v10 = vshrl.u32 %v5154_v1, 16  ;;  %v773_v11 = vshll.u32 %v5154_v1, 16  ;;  %v1043_v13 = vld [vmem:[#allocation2 + $0x24] sm:$0xf] }
  0x7d   : > { %v1375_v60 = vor.u32 %v1374_v46, %v1371_v45  ;;  %v1390_v52 = vrot.slane %v1388_v57, 5  ;;  %v402_v12 = vadd.f32 %v5773_v54, %v363_v59  ;;  %v778_v16 = vshrl.u32 %v5155_v5, 16  ;;  %1075 = vst.msk [vmem:[#allocation3 + $0x18] sm:$0xf] %vm444_vm0, %v1043_v13  ;;  %v1044_v19 = vld [vmem:[#allocation2 + $0x28] sm:$0xf] }
  0x7e   : > { %v1385_v61 = vor.u32 %v1384_v56, %v1380_v51  ;;  %v781_v17 = vshll.u32 %v5155_v5, 16  ;;  %v403_v18 = vadd.f32 %v5773_v54, %v364_v53  ;;  %v772_v21 = vrot.slane %v770_v10, 7  ;;  %1076 = vst.msk [vmem:[#allocation3 + $0x1c] sm:$0xf] %vm444_vm0, %v1044_v19  ;;  %v995_v27 = vld [vmem:[#allocation2 + $0x84] sm:$0xf] }
  0x7f   : > { %v1376_v9 = vrot.slane %v1375_v60, 4  ;;  %v434_v22 = vmax.f32 %v402_v12, 0.0  ;;  %v5248_v23 = vunpack.c.l.bf16 %v5766_v8  ;;  %v780_v26 = vrot.slane %v778_v16, 7  ;;  %v999_v63 = vld [vmem:[#allocation2 + $0x8c] sm:$0x1] }
  0x80   : > { %v1386_v15 = vrot.slane %v1385_v61, 4  ;;  %v1131_v25 = vld [vmem:[#allocation2 + $0x78] sm:$0xf]  ;;  %v435_v28 = vmax.f32 %v403_v18, 0.0  ;;  %v5249_v29 = vunpack.c.h.bf16 %v5766_v8  ;;  %v775_v34 = vor.u32 %v773_v11, %v772_v21  ;;  %v1045_v46 = vld [vmem:[#allocation2 + $0x30] sm:$0xf] }
  0x81   : > { %v1381_v20 = vsel %vm5533_vm7, %v1376_v9, %v1380_v51  ;;  %v1132_v30 = vld [vmem:[#allocation2 + $0x7c] sm:$0xf]  ;;  %v1393_v31 = vshrl.u32 %v1131_v25, 16  ;;  %v1396_v32 = vshll.u32 %v1131_v25, 16  ;;  %v776_v35 = vrot.slane %v772_v21, 4  ;;  %v5795_v56 = vld [vmem:[%s5508_s26 + $0x68] sm:$0xff]  }
  0x82   : > { %1572 = vrot.lane.b32.xlu0 %v1381_v20, %s5391_s7  ;;  %v1391_v24 = vsel %vm5533_vm7, %v1386_v15, %v1390_v52  ;;  %v1402_v36 = vshll.u32 %v1132_v30, 16  ;;  %v1406_v37 = vshrl.u32 %v1132_v30, 16  ;;  %v783_v2 = vor.u32 %v781_v17, %v780_v26  ;;  %v1133_v40 = vld [vmem:[#allocation2 + $0x80] sm:$0x1]  ;;  %1077 = vst.msk [vmem:[#allocation3 + $0x20] sm:$0xf] %vm444_vm0, %v1045_v46 }
  0x83   : > { %1574 = vrot.lane.b32.xlu1 %v1391_v24, %s5391_s7  ;;  %v785_v47 = vrot.slane %v780_v26, 4  ;;  %v1395_v38 = vrot.slane %v1393_v31, 4  ;;  %v1398_v39 = vrot.slane %v1396_v32, 5  ;;  %v996_v41 = vsel %vm5553_vm9, %v775_v34, %v995_v27  ;;  %v1046_v57 = vld [vmem:[#allocation2 + $0x34] sm:$0xf] }
  0x84   : > { %v5156_v42 = vpack.c.bf16 %v434_v22, %v434_v22  ;;  %v1404_v14 = vrot.slane %v1402_v36, 5  ;;  %v1408_v43 = vrot.slane %v1406_v37, 4  ;;  %v1412_v44 = vshll.u32 %v1133_v40, 16  ;;  %997 = vst [vmem:[#allocation2 + $0x84] sm:$0xf] %v996_v41 }
  0x85   : > { %v784_v45 = vsel %vm5547_vm8, %v776_v35, %v783_v2  ;;  %v1399_v48 = vor.u32 %v1398_v39, %v1395_v38  ;;  %v1000_v49 = vsel %vm5561_vm10, %v785_v47, %v999_v63  ;;  %v5157_v50 = vpack.c.bf16 %v435_v28, %v435_v28  ;;  %1078 = vst.msk [vmem:[#allocation3 + $0x24] sm:$0xf] %vm444_vm0, %v1046_v57  ;;  %v1047_v59 = vld [vmem:[#allocation2 + $0x3c] sm:$0xf]  ;;  %v1048_v5 = vld [vmem:[#allocation2 + $0x40] sm:$0xf] }
  0x86   : > { %998 = vst.msk [vmem:[#allocation2 + $0x88] sm:$0xf] %vm444_vm0, %v784_v45  ;;  %v787_v51 = vshrl.u32 %v5156_v42, 16  ;;  %v1409_v58 = vor.u32 %v1408_v43, %v1404_v14  ;;  %v1414_v60 = vrot.slane %v1412_v44, 5  ;;  %1001 = vst [vmem:[#allocation2 + $0x8c] sm:$0x1] %v1000_v49  ;;  %v365_v1 = vmul.f32 %v5761_v4, %v5248_v23 }
  0x87   : > { %v790_v0 = vshll.u32 %v5156_v42, 16  ;;  %v1400_v6 = vrot.slane %v1399_v48, 4  ;;  %v795_v61 = vshrl.u32 %v5157_v50, 16  ;;  %v798_v52 = vshll.u32 %v5157_v50, 16  ;;  %1079 = vst.msk [vmem:[#allocation3 + $0x28] sm:$0xf] %vm444_vm0, %v1047_v59 }
  0x88   : > { %v789_v7 = vrot.slane %v787_v51, 7  ;;  %v1410_v53 = vrot.slane %v1409_v58, 4  ;;  %v1002_v8 = vld [vmem:[#allocation2 + $0x90] sm:$0xf]  ;;  %v366_v9 = vmul.f32 %v5761_v4, %v5249_v29  ;;  %v404_v10 = vadd.f32 %v5773_v54, %v365_v1  ;;  %1080 = vst.msk [vmem:[#allocation3 + $0x2c] sm:$0xf] %vm444_vm0, %v1048_v5 }
  0x89   : > { %v5252_v11 = vunpack.c.l.bf16 %v5795_v56  ;;  %v1405_v12 = vsel %vm5533_vm7, %v1400_v6, %v1404_v14  ;;  %v797_v16 = vrot.slane %v795_v61, 7  ;;  %v1049_v17 = vld [vmem:[#allocation2 + $0x48] sm:$0xf]  ;;  %v1050_v18 = vld [vmem:[#allocation2 + $0x4c] sm:$0xf]  ;;  %v5253_v23 = vunpack.c.h.bf16 %v5795_v56  ;;  %v5275_v44 = vld [vmem:[%s5508_s26 + $0x70] sm:$0xff]  }
  0x8a   : > { %v792_v13 = vor.u32 %v790_v0, %v789_v7  ;;  %v793_v15 = vrot.slane %v789_v7, 4  ;;  %1576 = vrot.lane.b32.xlu0 %v1405_v12, %s5391_s7  ;;  %v1415_v19 = vsel %vm5533_vm7, %v1410_v53, %v1414_v60  ;;  %v1006_v20 = vld [vmem:[#allocation2 + $0x98] sm:$0x1]  ;;  %v405_v21 = vadd.f32 %v5773_v54, %v366_v9  ;;  %1081 = vst.msk [vmem:[#allocation3 + $0x30] sm:$0xf] %vm444_vm0, %v1049_v17 }
  0x8b   : > { %v436_v22 = vmax.f32 %v404_v10, 0.0  ;;  %1082 = vst.msk [vmem:[#allocation3 + $0x34] sm:$0xf] %vm444_vm0, %v1050_v18  ;;  %1578 = vrot.lane.b32.xlu1 %v1415_v19, %s5391_s7  ;;  %v1134_v24 = vld [vmem:[#allocation2 + $0x84] sm:$0xf]  ;;  %v800_v25 = vor.u32 %v798_v52, %v797_v16  ;;  %v802_v27 = vrot.slane %v797_v16, 4  ;;  %v367_v28 = vmul.f32 %v5761_v4, %v5252_v11 }
  0x8c   : > { %v1003_v26 = vsel %vm5553_vm9, %v792_v13, %v1002_v8  ;;  %v1417_v30 = vshrl.u32 %v1134_v24, 16  ;;  %v1420_v31 = vshll.u32 %v1134_v24, 16  ;;  %v437_v32 = vmax.f32 %v405_v21, 0.0  ;;  %v1051_v50 = vld [vmem:[#allocation2 + $0x54] sm:$0xf] }
  0x8d   : > { %v1135_v29 = vld [vmem:[#allocation2 + $0x88] sm:$0xf]  ;;  %1004 = vst [vmem:[#allocation2 + $0x90] sm:$0xf] %v1003_v26  ;;  %v5158_v34 = vpack.c.bf16 %v436_v22, %v436_v22  ;;  %v1136_v37 = vld [vmem:[#allocation2 + $0x8c] sm:$0x1]  ;;  %v801_v2 = vsel %vm5547_vm8, %v793_v15, %v800_v25  ;;  %v1007_v47 = vsel %vm5561_vm10, %v802_v27, %v1006_v20  ;;  %v368_v57 = vmul.f32 %v5761_v4, %v5253_v23 }
  0x8e   : > { %v1426_v35 = vshll.u32 %v1135_v29, 16  ;;  %v1430_v36 = vshrl.u32 %v1135_v29, 16  ;;  %v1419_v63 = vrot.slane %v1417_v30, 4  ;;  %v1422_v38 = vrot.slane %v1420_v31, 5  ;;  %1005 = vst.msk [vmem:[#allocation2 + $0x94] sm:$0xf] %vm444_vm0, %v801_v2 }
  0x8f   : > { %v1436_v39 = vshll.u32 %v1136_v37, 16  ;;  %1008 = vst [vmem:[#allocation2 + $0x98] sm:$0x1] %v1007_v47  ;;  %v5159_v40 = vpack.c.bf16 %v437_v32, %v437_v32  ;;  %v804_v14 = vshrl.u32 %v5158_v34, 16  ;;  %v807_v43 = vshll.u32 %v5158_v34, 16 }
  0x90   : > { %v1428_v41 = vrot.slane %v1426_v35, 5  ;;  %v1432_v42 = vrot.slane %v1430_v36, 4  ;;  %v1423_v45 = vor.u32 %v1422_v38, %v1419_v63  ;;  %v406_v58 = vadd.f32 %v5773_v54, %v367_v28  ;;  %1083 = vst.msk [vmem:[#allocation3 + $0x38] sm:$0xf] %vm444_vm0, %v1051_v50  ;;  %v1052_v60 = vld [vmem:[#allocation2 + $0x58] sm:$0xf] }
  0x91   : > { %v1438_v46 = vrot.slane %v1436_v39, 5  ;;  %v812_v48 = vshrl.u32 %v5159_v40, 16  ;;  %v815_v49 = vshll.u32 %v5159_v40, 16  ;;  %v806_v56 = vrot.slane %v804_v14, 7  ;;  %v1009_v59 = vld [vmem:[#allocation2 + $0x9c] sm:$0xf] }
  0x92   : > { %v1433_v51 = vor.u32 %v1432_v42, %v1428_v41  ;;  %v1424_v0 = vrot.slane %v1423_v45, 4  ;;  %v5256_v6 = vunpack.c.l.bf16 %v5275_v44  ;;  %v5257_v7 = vunpack.c.h.bf16 %v5275_v44  ;;  %1084 = vst.msk [vmem:[#allocation3 + $0x3c] sm:$0xf] %vm444_vm0, %v1052_v60  ;;  %v1053_v61 = vld [vmem:[#allocation2 + $0x60] sm:$0xf] }
  0x93   : > { %v814_v1 = vrot.slane %v812_v48, 7  ;;  %v809_v53 = vor.u32 %v807_v43, %v806_v56  ;;  %v810_v8 = vrot.slane %v806_v56, 4  ;;  %v407_v9 = vadd.f32 %v5773_v54, %v368_v57  ;;  %1085 = vst.msk [vmem:[#allocation3 + $0x40] sm:$0xf] %vm444_vm0, %v1053_v61  ;;  %v1013_v15 = vld [vmem:[#allocation2 + $0xa4] sm:$0x1] }
  0x94   : > { %v1434_v52 = vrot.slane %v1433_v51, 4  ;;  %v1137_v5 = vld [vmem:[#allocation2 + $0x90] sm:$0xf]  ;;  %v1429_v10 = vsel %vm5533_vm7, %v1424_v0, %v1428_v41  ;;  %v1054_v16 = vld [vmem:[#allocation2 + $0x64] sm:$0xf]  ;;  %v438_v22 = vmax.f32 %v406_v58, 0.0  ;;  %v369_v63 = vmul.f32 %v5761_v4, %v5256_v6 }
  0x95   : > { %v1441_v11 = vshrl.u32 %v1137_v5, 16  ;;  %v1444_v12 = vshll.u32 %v1137_v5, 16  ;;  %v817_v13 = vor.u32 %v815_v49, %v814_v1  ;;  %1580 = vrot.lane.b32.xlu0 %v1429_v10, %s5391_s7  ;;  %v1138_v18 = vld [vmem:[#allocation2 + $0x94] sm:$0xf]  ;;  %v1010_v20 = vsel %vm5553_vm9, %v809_v53, %v1009_v59  ;;  %1086 = vst.msk [vmem:[#allocation3 + $0x44] sm:$0xf] %vm444_vm0, %v1054_v16 }
  0x96   : > { %v1439_v17 = vsel %vm5533_vm7, %v1434_v52, %v1438_v46  ;;  %v1139_v19 = vld [vmem:[#allocation2 + $0x98] sm:$0x1]  ;;  %v819_v21 = vrot.slane %v814_v1, 4  ;;  %v1450_v25 = vshll.u32 %v1138_v18, 16  ;;  %v1454_v26 = vshrl.u32 %v1138_v18, 16 }
  0x97   : > { %1582 = vrot.lane.b32.xlu1 %v1439_v17, %s5391_s7  ;;  %v1443_v23 = vrot.slane %v1441_v11, 4  ;;  %v1446_v24 = vrot.slane %v1444_v12, 5  ;;  %1011 = vst [vmem:[#allocation2 + $0x9c] sm:$0xf] %v1010_v20  ;;  %v1460_v27 = vshll.u32 %v1139_v19, 16  ;;  %v818_v28 = vsel %vm5547_vm8, %v810_v8, %v817_v13 }
  0x98   : > { %v1014_v29 = vsel %vm5561_vm10, %v819_v21, %v1013_v15  ;;  %v439_v30 = vmax.f32 %v407_v9, 0.0  ;;  %v1452_v32 = vrot.slane %v1450_v25, 5  ;;  %v1456_v34 = vrot.slane %v1454_v26, 4  ;;  %1012 = vst.msk [vmem:[#allocation2 + $0xa0] sm:$0xf] %vm444_vm0, %v818_v28 }
  0x99   : > { %v1447_v31 = vor.u32 %v1446_v24, %v1443_v23  ;;  %1015 = vst [vmem:[#allocation2 + $0xa4] sm:$0x1] %v1014_v29  ;;  %v5160_v35 = vpack.c.bf16 %v438_v22, %v438_v22  ;;  %v1055_v36 = vld [vmem:[#allocation2 + $0x6c] sm:$0xf]  ;;  %v1056_v37 = vld [vmem:[#allocation2 + $0x70] sm:$0xf]  ;;  %v370_v38 = vmul.f32 %v5761_v4, %v5257_v7  ;;  %v408_v45 = vadd.f32 %v5773_v54, %v369_v63 }
  0x9a   : > { %v1462_v2 = vrot.slane %v1460_v27, 5  ;;  %v5161_v47 = vpack.c.bf16 %v439_v30, %v439_v30  ;;  %1087 = vst.msk [vmem:[#allocation3 + $0x48] sm:$0xf] %vm444_vm0, %v1055_v36  ;;  %1088 = vst.msk [vmem:[#allocation3 + $0x4c] sm:$0xf] %vm444_vm0, %v1056_v37  ;;  %v1457_v40 = vor.u32 %v1456_v34, %v1452_v32  ;;  %vm1972_vm15 = vcmask 93248  }
  0x9b   : > { %v1448_v39 = vrot.slane %v1447_v31, 4  ;;  %v821_v41 = vshrl.u32 %v5160_v35, 16  ;;  %v824_v42 = vshll.u32 %v5160_v35, 16  ;;  %v1057_v14 = vld [vmem:[#allocation2 + $0x78] sm:$0xf]  ;;  %v409_v46 = vadd.f32 %v5773_v54, %v370_v38 }
  0x9c   : > { %v829_v43 = vshrl.u32 %v5161_v47, 16  ;;  %v832_v44 = vshll.u32 %v5161_v47, 16  ;;  %1089 = vst.msk [vmem:[#allocation3 + $0x50] sm:$0xf] %vm444_vm0, %v1057_v14  ;;  %v1058_v48 = vld [vmem:[#allocation2 + $0x7c] sm:$0xf] }
  0x9d   : > { %v1453_v4 = vsel %vm5533_vm7, %v1448_v39, %v1452_v32  ;;  %v1458_v49 = vrot.slane %v1457_v40, 4  ;;  %v823_v50 = vrot.slane %v821_v41, 7  ;;  %v1016_v51 = vld [vmem:[#allocation2 + $0xa8] sm:$0xf]  ;;  %1090 = vst.msk [vmem:[#allocation3 + $0x54] sm:$0xf] %vm444_vm0, %v1058_v48 }
  0x9e   : > { %1584 = vrot.lane.b32.xlu0 %v1453_v4, %s5391_s7  ;;  %v1140_v56 = vld [vmem:[#allocation2 + $0x9c] sm:$0xf]  ;;  %v831_v57 = vrot.slane %v829_v43, 7  ;;  %v440_v58 = vmax.f32 %v408_v45, 0.0  ;;  %v441_v60 = vmax.f32 %v409_v46, 0.0  ;;  %vm4369_vm2 = vcmask 1041408  }
  0x9f   : > { %v1463_v54 = vsel %vm5533_vm7, %v1458_v49, %v1462_v2  ;;  %v1465_v0 = vshrl.u32 %v1140_v56, 16  ;;  %v1468_v1 = vshll.u32 %v1140_v56, 16  ;;  %v826_v59 = vor.u32 %v824_v42, %v823_v50  ;;  %v1020_v6 = vld [vmem:[#allocation2 + $0xb0] sm:$0x1]  ;;  %v1059_v7 = vld [vmem:[#allocation2 + $0x84] sm:$0xf] }
  0xa0   : > { %1586 = vrot.lane.b32.xlu1 %v1463_v54, %s5391_s7  ;;  %v1141_v61 = vld [vmem:[#allocation2 + $0xa0] sm:$0xf]  ;;  %v1142_v52 = vld [vmem:[#allocation2 + $0xa4] sm:$0x1]  ;;  %v827_v5 = vrot.slane %v823_v50, 4  ;;  %v834_v53 = vor.u32 %v832_v44, %v831_v57  ;;  %v836_v8 = vrot.slane %v831_v57, 4  ;;  %v5162_v9 = vpack.c.bf16 %v440_v58, %v440_v58  ;;  %v5883_v58 = vpop.permute.xlu0 %1536 }
  0xa1   : > { %1091 = vst.msk [vmem:[#allocation3 + $0x58] sm:$0xf] %vm444_vm0, %v1059_v7  ;;  %v1467_v10 = vrot.slane %v1465_v0, 4  ;;  %v1470_v11 = vrot.slane %v1468_v1, 5  ;;  %v1474_v12 = vshll.u32 %v1141_v61, 16  ;;  %v1478_v13 = vshrl.u32 %v1141_v61, 16 }
  0xa2   : > { %v1484_v15 = vshll.u32 %v1142_v52, 16  ;;  %v835_v16 = vsel %vm5547_vm8, %v827_v5, %v834_v53  ;;  %v1017_v17 = vsel %vm5553_vm9, %v826_v59, %v1016_v51  ;;  %v1021_v18 = vsel %vm5561_vm10, %v836_v8, %v1020_v6  ;;  %v1060_v19 = vld [vmem:[#allocation2 + $0x88] sm:$0xf]  ;;  %v1061_v27 = vld [vmem:[#allocation2 + $0x90] sm:$0xf] }
  0xa3   : > { %v1471_v20 = vor.u32 %v1470_v11, %v1467_v10  ;;  %v1476_v21 = vrot.slane %v1474_v12, 5  ;;  %v1480_v22 = vrot.slane %v1478_v13, 4  ;;  %1018 = vst [vmem:[#allocation2 + $0xa8] sm:$0xf] %v1017_v17  ;;  %1019 = vst.msk [vmem:[#allocation2 + $0xac] sm:$0xf] %vm444_vm0, %v835_v16  ;;  %v5163_v23 = vpack.c.bf16 %v441_v60, %v441_v60 }
  0xa4   : > { %1022 = vst [vmem:[#allocation2 + $0xb0] sm:$0x1] %v1021_v18  ;;  %1092 = vst.msk [vmem:[#allocation3 + $0x5c] sm:$0xf] %vm444_vm0, %v1060_v19  ;;  %v1486_v24 = vrot.slane %v1484_v15, 5  ;;  %v838_v25 = vshrl.u32 %v5162_v9, 16  ;;  %v5890_v10 = vpop.permute.xlu0 %1538 }
  0xa5   : > { %v841_v26 = vshll.u32 %v5162_v9, 16  ;;  %v1472_v28 = vrot.slane %v1471_v20, 4  ;;  %v1481_v29 = vor.u32 %v1480_v22, %v1476_v21  ;;  %v846_v30 = vshrl.u32 %v5163_v23, 16  ;;  %1093 = vst.msk [vmem:[#allocation3 + $0x60] sm:$0xf] %vm444_vm0, %v1061_v27 }
  0xa6   : > { %v849_v31 = vshll.u32 %v5163_v23, 16  ;;  %v1062_v32 = vld [vmem:[#allocation2 + $0x94] sm:$0xf]  ;;  %v840_v34 = vrot.slane %v838_v25, 7  ;;  %v1063_v38 = vld [vmem:[#allocation2 + $0x9c] sm:$0xf] }
  0xa7   : > { %1094 = vst.msk [vmem:[#allocation3 + $0x64] sm:$0xf] %vm444_vm0, %v1062_v32  ;;  %v1477_v35 = vsel %vm5533_vm7, %v1472_v28, %v1476_v21  ;;  %v1482_v36 = vrot.slane %v1481_v29, 4  ;;  %v848_v37 = vrot.slane %v846_v30, 7  ;;  %v1023_v2 = vld [vmem:[#allocation2 + $0xb4] sm:$0xf] }
  0xa8   : > { %1588 = vrot.lane.b32.xlu0 %v1477_v35, %s5391_s7  ;;  %v843_v47 = vor.u32 %v841_v26, %v840_v34  ;;  %v844_v63 = vrot.slane %v840_v34, 4  ;;  %v1027_v42 = vld [vmem:[#allocation2 + $0xbc] sm:$0x1]  ;;  %1095 = vst.msk [vmem:[#allocation3 + $0x68] sm:$0xf] %vm444_vm0, %v1063_v38  ;;  %vm2165_vm3 = vcmask 126048  }
  0xa9   : > { %v1487_v39 = vsel %vm5533_vm7, %v1482_v36, %v1486_v24  ;;  %v851_v40 = vor.u32 %v849_v31, %v848_v37  ;;  %v853_v41 = vrot.slane %v848_v37, 4  ;;  %v1064_v14 = vld [vmem:[#allocation2 + $0xa0] sm:$0xf]  ;;  %v1666_v19 = vld [vmem:[#allocation2 + $0x4] sm:$0xf]  ;;  %vm2726_vm4 = vcmask 158848  }
  0xaa   : > { %1590 = vrot.lane.b32.xlu1 %v1487_v39, %s5391_s7  ;;  %v1143_v43 = vld [vmem:[#allocation2 + $0xa8] sm:$0xf]  ;;  %v1144_v44 = vld [vmem:[#allocation2 + $0xac] sm:$0xf]  ;;  %v1024_v46 = vsel %vm5553_vm9, %v843_v47, %v1023_v2  ;;  %1096 = vst.msk [vmem:[#allocation3 + $0x6c] sm:$0xf] %vm444_vm0, %v1064_v14 }
  0xab   : > { %v1145_v45 = vld [vmem:[#allocation2 + $0xb0] sm:$0x1]  ;;  %v1489_v48 = vshrl.u32 %v1143_v43, 16  ;;  %v1492_v4 = vshll.u32 %v1143_v43, 16  ;;  %v1498_v49 = vshll.u32 %v1144_v44, 16  ;;  %v1502_v50 = vshrl.u32 %v1144_v44, 16 }
  0xac   : > { %1025 = vst [vmem:[#allocation2 + $0xb4] sm:$0xf] %v1024_v46  ;;  %v1508_v51 = vshll.u32 %v1145_v45, 16  ;;  %v852_v56 = vsel %vm5547_vm8, %v844_v63, %v851_v40  ;;  %v1028_v57 = vsel %vm5561_vm10, %v853_v41, %v1027_v42  ;;  %v1065_v52 = vld [vmem:[#allocation2 + $0xa8] sm:$0xf]  ;;  %v1766_v31 = vrot.slane %v1666_v19, 5 }
  0xad   : > { %v1491_v60 = vrot.slane %v1489_v48, 4  ;;  %v1494_v54 = vrot.slane %v1492_v4, 5  ;;  %v1500_v0 = vrot.slane %v1498_v49, 5  ;;  %v1504_v1 = vrot.slane %v1502_v50, 4  ;;  %1026 = vst.msk [vmem:[#allocation2 + $0xb8] sm:$0xf] %vm444_vm0, %v852_v56 }
  0xae   : > { %1029 = vst [vmem:[#allocation2 + $0xbc] sm:$0x1] %v1028_v57  ;;  %v1510_v7 = vrot.slane %v1508_v51, 5  ;;  %v5886_v61 = vpop.permute.xlu1 %1540  ;;  %v1066_v5 = vld [vmem:[#allocation2 + $0xac] sm:$0xf]  ;;  %v1768_v42 = vrot.slane %v1766_v31, 4 }
  0xaf   : > { %v1495_v59 = vor.u32 %v1494_v54, %v1491_v60  ;;  %v1505_v6 = vor.u32 %v1504_v1, %v1500_v0  ;;  %1097 = vst.msk [vmem:[#allocation3 + $0x70] sm:$0xf] %vm444_vm0, %v1065_v52  ;;  %1098 = vst.msk [vmem:[#allocation3 + $0x74] sm:$0xf] %vm444_vm0, %v1066_v5  ;;  %v1665_v24 = vld [vmem:[#allocation2] sm:$0xe]  ;;  %v1545_v35 = vpop.permute.xlu0 %1544 }
  0xb0   : > { %v1667_v27 = vld [vmem:[#allocation2 + $0x8] sm:$0x1]  ;;  %v1669_v34 = vld [vmem:[#allocation2 + $0x10] sm:$0xf]  ;;  %v5015_v47 = vrot.slane %v1665_v24, 9  ;;  %vm3063_vm5 = vcmask 191648  }
  0xb1   : > { %v1496_v53 = vrot.slane %v1495_v59, 4  ;;  %v1506_v8 = vrot.slane %v1505_v6, 4  ;;  %v1769_v38 = vrot.slane %v1667_v27, 5  ;;  %v1668_v39 = vld [vmem:[#allocation2 + $0xc] sm:$0xe]  ;;  %v1773_v14 = vrot.slane %v1669_v34, 5 }
  0xb2   : > { %v1543_v25 = vpop.permute.xlu1 %1542  ;;  %v1670_v44 = vld [vmem:[#allocation2 + $0x14] sm:$0x1]  ;;  %v1672_v45 = vld [vmem:[#allocation2 + $0x1c] sm:$0xf]  ;;  %v1767_v48 = vsel %vm5901_vm13, %v5015_v47, %v1766_v31  ;;  %v5016_v4 = vrot.slane %v1668_v39, 9  ;;  %vm3257_vm6 = vcmask 224448  }
  0xb3   : > { %v1146_v9 = vld [vmem:[#allocation2 + $0xb4] sm:$0xf]  ;;  %v1501_v11 = vsel %vm5533_vm7, %v1496_v53, %v1500_v0  ;;  %v1511_v12 = vsel %vm5533_vm7, %v1506_v8, %v1510_v7  ;;  %v1671_v49 = vld [vmem:[#allocation2 + $0x18] sm:$0xe]  ;;  %v1770_v51 = vsel %vm5901_vm13, %v1768_v42, %v1769_v38  ;;  %v1775_v56 = vrot.slane %v1773_v14, 4 }
  0xb4   : > { %v1513_v13 = vshrl.u32 %v1146_v9, 16  ;;  %v1516_v15 = vshll.u32 %v1146_v9, 16  ;;  %v1067_v16 = vld [vmem:[#allocation2 + $0xb4] sm:$0xf]  ;;  %1592 = vrot.lane.b32.xlu0 %v1501_v11, %s5391_s7  ;;  %1594 = vrot.lane.b32.xlu1 %v1511_v12, %s5391_s7  ;;  %v1147_v17 = vld [vmem:[#allocation2 + $0xb8] sm:$0xf]  ;;  %v1774_v1 = vsel %vm5901_vm13, %v5016_v4, %v1773_v14 }
  0xb5   : > { %v1148_v18 = vld [vmem:[#allocation2 + $0xbc] sm:$0x1]  ;;  %1099 = vst.msk [vmem:[#allocation3 + $0x78] sm:$0xf] %vm444_vm0, %v1067_v16  ;;  %v1522_v22 = vshll.u32 %v1147_v17, 16  ;;  %v1526_v23 = vshrl.u32 %v1147_v17, 16 }
  0xb6   : > { %v1515_v20 = vrot.slane %v1513_v13, 4  ;;  %v1518_v21 = vrot.slane %v1516_v15, 5  ;;  %v1532_v26 = vshll.u32 %v1148_v18, 16  ;;  %v1068_v32 = vld [vmem:[#allocation2 + $0xb8] sm:$0xf]  ;;  %v1547_v43 = vpop.permute.xlu1 %1546  ;;  %v1776_v57 = vrot.slane %v1670_v44, 5 }
  0xb7   : > { %v1524_v29 = vrot.slane %v1522_v22, 5  ;;  %v1528_v30 = vrot.slane %v1526_v23, 4  ;;  %1100 = vst.msk [vmem:[#allocation3 + $0x7c] sm:$0xf] %vm444_vm0, %v1068_v32  ;;  %v1780_v60 = vrot.slane %v1672_v45, 5  ;;  %v5017_v59 = vrot.slane %v1671_v49, 9 }
  0xb8   : > { %v1519_v28 = vor.u32 %v1518_v21, %v1515_v20  ;;  %v1534_v2 = vrot.slane %v1532_v26, 5  ;;  %v1673_v54 = vld [vmem:[#allocation2 + $0x20] sm:$0x1]  ;;  %v1675_v0 = vld [vmem:[#allocation2 + $0x28] sm:$0xf]  ;;  %v1777_v5 = vsel %vm5901_vm13, %v1775_v56, %v1776_v57  ;;  %vm3818_vm11 = vcmask 257248  }
  0xb9   : > { %v1529_v37 = vor.u32 %v1528_v30, %v1524_v29  ;;  %v1783_v7 = vrot.slane %v1673_v54, 5  ;;  %v1674_v52 = vld [vmem:[#allocation2 + $0x24] sm:$0xe]  ;;  %v1782_v53 = vrot.slane %v1780_v60, 4  ;;  %v1787_v8 = vrot.slane %v1675_v0, 5 }
  0xba   : > { %v1520_v36 = vrot.slane %v1519_v28, 4  ;;  %v1676_v9 = vld [vmem:[#allocation2 + $0x2c] sm:$0x1]  ;;  %v1678_v11 = vld [vmem:[#allocation2 + $0x34] sm:$0xf]  ;;  %v5018_v13 = vrot.slane %v1674_v52, 9 }
  0xbb   : > { %v1530_v41 = vrot.slane %v1529_v37, 4  ;;  %v1549_v50 = vpop.permute.xlu0 %1548  ;;  %1633 = vst.msk [vmem:[#allocation3] sm:$0xf] %vm1632_vm14, %v5883_v58  ;;  %1635 = vst.msk [vmem:[#allocation3 + $0x8] sm:$0xf] %vm1632_vm14, %v5886_v61  ;;  %v1781_v58 = vsel %vm5901_vm13, %v5017_v59, %v1780_v60  ;;  %v1789_v15 = vrot.slane %v1787_v8, 4 }
  0xbc   : > { %v1525_v40 = vsel %vm5533_vm7, %v1520_v36, %v1524_v29  ;;  %1634 = vst.msk [vmem:[#allocation3 + $0x4] sm:$0xf] %vm1632_vm14, %v5890_v10  ;;  %1636 = vst.msk [vmem:[#allocation3 + $0xc] sm:$0xf] %vm1632_vm14, %v1543_v25  ;;  %v1677_v61 = vld [vmem:[#allocation2 + $0x30] sm:$0xe]  ;;  %v1784_v10 = vsel %vm5901_vm13, %v1782_v53, %v1783_v7  ;;  %v1788_v21 = vsel %vm5901_vm13, %v5018_v13, %v1787_v8 }
  0xbd   : > { %1596 = vrot.lane.b32.xlu0 %v1525_v40, %s5391_s7  ;;  %v1535_v46 = vsel %vm5533_vm7, %v1530_v41, %v1534_v2  ;;  %v1551_v6 = vpop.permute.xlu1 %1550  ;;  %1637 = vst.msk [vmem:[#allocation3 + $0x10] sm:$0xf] %vm1632_vm14, %v1545_v35  ;;  %1638 = vst.msk [vmem:[#allocation3 + $0x14] sm:$0xf] %vm1632_vm14, %v1547_v43  ;;  %v1790_v16 = vrot.slane %v1676_v9, 5  ;;  %v1794_v17 = vrot.slane %v1678_v11, 5 }
  0xbe   : > { %1598 = vrot.lane.b32.xlu1 %v1535_v46, %s5391_s7  ;;  %1639 = vst.msk [vmem:[#allocation3 + $0x18] sm:$0xf] %vm1632_vm14, %v1549_v50  ;;  %1640 = vst.msk [vmem:[#allocation3 + $0x1c] sm:$0xf] %vm1632_vm14, %v1551_v6  ;;  %v1679_v19 = vld [vmem:[#allocation2 + $0x38] sm:$0x1] }
  0xbf   : > { %v1681_v20 = vld [vmem:[#allocation2 + $0x40] sm:$0xf]  ;;  %v5019_v22 = vrot.slane %v1677_v61, 9  ;;  %v1680_v23 = vld [vmem:[#allocation2 + $0x3c] sm:$0xe]  ;;  %v1791_v24 = vsel %vm5901_vm13, %v1789_v15, %v1790_v16  ;;  %v1796_v25 = vrot.slane %v1794_v17, 4 }
  0xc0   : > { %v1797_v26 = vrot.slane %v1679_v19, 5  ;;  %v1801_v27 = vrot.slane %v1681_v20, 5  ;;  %v1682_v28 = vld [vmem:[#allocation2 + $0x44] sm:$0x1]  ;;  %v1684_v29 = vld [vmem:[#allocation2 + $0x4c] sm:$0xf] }
  0xc1   : > { %1876 = vrot.lane.b32.xlu0 %v1767_v48, %s5392_s12  ;;  %v1795_v31 = vsel %vm5901_vm13, %v5019_v22, %v1794_v17  ;;  %v5020_v32 = vrot.slane %v1680_v23, 9  ;;  %v1683_v35 = vld [vmem:[#allocation2 + $0x48] sm:$0xe]  ;;  %v1804_v2 = vrot.slane %v1682_v28, 5  ;;  %v1808_v47 = vrot.slane %v1684_v29, 5 }
  0xc2   : > { %1878 = vrot.lane.b32.xlu1 %v1770_v51, %s5392_s12  ;;  %v1798_v36 = vsel %vm5901_vm13, %v1796_v25, %v1797_v26  ;;  %v1803_v37 = vrot.slane %v1801_v27, 4  ;;  %v1685_v38 = vld [vmem:[#allocation2 + $0x50] sm:$0x1]  ;;  %v1687_v39 = vld [vmem:[#allocation2 + $0x58] sm:$0xf]  ;;  %v5021_v41 = vrot.slane %v1683_v35, 9 }
  0xc3   : > { %v1802_v40 = vsel %vm5901_vm13, %v5020_v32, %v1801_v27  ;;  %v1686_v42 = vld [vmem:[#allocation2 + $0x54] sm:$0xe]  ;;  %v1810_v44 = vrot.slane %v1808_v47, 4  ;;  %v1811_v45 = vrot.slane %v1685_v38, 5  ;;  %v1815_v46 = vrot.slane %v1687_v39, 5 }
  0xc4   : > { %v1553_v12 = vpop.permute.xlu0 %1552  ;;  %v1805_v43 = vsel %vm5901_vm13, %v1803_v37, %v1804_v2  ;;  %v1688_v48 = vld [vmem:[#allocation2 + $0x5c] sm:$0x1]  ;;  %v1690_v4 = vld [vmem:[#allocation2 + $0x64] sm:$0xf]  ;;  %v1809_v49 = vsel %vm5901_vm13, %v5021_v41, %v1808_v47  ;;  %v5022_v50 = vrot.slane %v1686_v42, 9  ;;  %vm4155_vm12 = vcmask 290048  }
  0xc5   : > { %1880 = vrot.lane.b32.xlu0 %v1774_v1, %s5392_s12  ;;  %1641 = vst.msk [vmem:[#allocation3 + $0x20] sm:$0xf] %vm1632_vm14, %v1553_v12  ;;  %v1689_v51 = vld [vmem:[#allocation2 + $0x60] sm:$0xe]  ;;  %v1812_v57 = vsel %vm5901_vm13, %v1810_v44, %v1811_v45  ;;  %v1817_v60 = vrot.slane %v1815_v46, 4  ;;  %v1818_v54 = vrot.slane %v1688_v48, 5 }
  0xc6   : > { %1882 = vrot.lane.b32.xlu1 %v1777_v5, %s5392_s12  ;;  %v1555_v18 = vpop.permute.xlu1 %1554  ;;  %v1822_v0 = vrot.slane %v1690_v4, 5  ;;  %v1691_v1 = vld [vmem:[#allocation2 + $0x68] sm:$0x1]  ;;  %v1693_v59 = vld [vmem:[#allocation2 + $0x70] sm:$0xf]  ;;  %v1816_v6 = vsel %vm5901_vm13, %v5022_v50, %v1815_v46  ;;  %v5023_v7 = vrot.slane %v1689_v51, 9 }
  0xc7   : > { %1642 = vst.msk [vmem:[#allocation3 + $0x24] sm:$0xf] %vm1632_vm14, %v1555_v18  ;;  %v1692_v52 = vld [vmem:[#allocation2 + $0x6c] sm:$0xe]  ;;  %v1819_v5 = vsel %vm5901_vm13, %v1817_v60, %v1818_v54  ;;  %v1825_v8 = vrot.slane %v1691_v1, 5  ;;  %v1829_v9 = vrot.slane %v1693_v59, 5 }
  0xc8   : > { %v1824_v53 = vrot.slane %v1822_v0, 4  ;;  %v1694_v11 = vld [vmem:[#allocation2 + $0x74] sm:$0x1]  ;;  %v1696_v12 = vld [vmem:[#allocation2 + $0x7c] sm:$0xf]  ;;  %v5024_v13 = vrot.slane %v1692_v52, 9 }
  0xc9   : > { %1884 = vrot.lane.b32.xlu0 %v1781_v58, %s5392_s12  ;;  %v1823_v58 = vsel %vm5901_vm13, %v5023_v7, %v1822_v0  ;;  %v1695_v61 = vld [vmem:[#allocation2 + $0x78] sm:$0xe]  ;;  %v1831_v15 = vrot.slane %v1829_v9, 4  ;;  %v1832_v16 = vrot.slane %v1694_v11, 5  ;;  %v1836_v17 = vrot.slane %v1696_v12, 5 }
  0xca   : > { %1886 = vrot.lane.b32.xlu1 %v1784_v10, %s5392_s12  ;;  %v1826_v10 = vsel %vm5901_vm13, %v1824_v53, %v1825_v8  ;;  %v1697_v18 = vld [vmem:[#allocation2 + $0x80] sm:$0x1]  ;;  %v1699_v19 = vld [vmem:[#allocation2 + $0x88] sm:$0xf]  ;;  %v1830_v20 = vsel %vm5901_vm13, %v5024_v13, %v1829_v9  ;;  %v1698_v22 = vld [vmem:[#allocation2 + $0x84] sm:$0xe] }
  0xcb   : > { %v1557_v30 = vpop.permute.xlu0 %1556  ;;  %v1833_v23 = vsel %vm5901_vm13, %v1831_v15, %v1832_v16  ;;  %v1839_v25 = vrot.slane %v1697_v18, 5  ;;  %v1843_v26 = vrot.slane %v1699_v19, 5  ;;  %v1700_v28 = vld [vmem:[#allocation2 + $0x8c] sm:$0x1]  ;;  %v1702_v29 = vld [vmem:[#allocation2 + $0x94] sm:$0xf] }
  0xcc   : > { %1643 = vst.msk [vmem:[#allocation3 + $0x28] sm:$0xf] %vm1632_vm14, %v1557_v30  ;;  %v1559_v34 = vpop.permute.xlu1 %1558  ;;  %v5026_v32 = vrot.slane %v1698_v22, 9  ;;  %v1846_v37 = vrot.slane %v1700_v28, 5  ;;  %v1850_v2 = vrot.slane %v1702_v29, 5 }
  0xcd   : > { %1888 = vrot.lane.b32.xlu0 %v1788_v21, %s5392_s12  ;;  %1644 = vst.msk [vmem:[#allocation3 + $0x2c] sm:$0xf] %vm1632_vm14, %v1559_v34  ;;  %v5025_v21 = vrot.slane %v1695_v61, 9  ;;  %v1701_v34 = vld [vmem:[#allocation2 + $0x90] sm:$0xe] }
  0xce   : > { %1890 = vrot.lane.b32.xlu1 %v1791_v24, %s5392_s12  ;;  %v1838_v24 = vrot.slane %v1836_v17, 4  ;;  %v1703_v47 = vld [vmem:[#allocation2 + $0x98] sm:$0x1]  ;;  %v1705_v38 = vld [vmem:[#allocation2 + $0xa0] sm:$0xf]  ;;  %v1844_v39 = vsel %vm5901_vm13, %v5026_v32, %v1843_v26 }
  0xcf   : > { %v1704_v41 = vld [vmem:[#allocation2 + $0x9c] sm:$0xe]  ;;  %v1857_v44 = vrot.slane %v1705_v38, 5  ;;  %v1706_v46 = vld [vmem:[#allocation2 + $0xa4] sm:$0x1] }
  0xd0   : > { %v1840_v35 = vsel %vm5901_vm13, %v1838_v24, %v1839_v25  ;;  %v1708_v48 = vld [vmem:[#allocation2 + $0xac] sm:$0xf]  ;;  %v5028_v50 = vrot.slane %v1704_v41, 9  ;;  %v1707_v51 = vld [vmem:[#allocation2 + $0xa8] sm:$0xe]  ;;  %v1860_v60 = vrot.slane %v1706_v46, 5 }
  0xd1   : > { %1892 = vrot.lane.b32.xlu0 %v1795_v31, %s5392_s12  ;;  %v1837_v31 = vsel %vm5901_vm13, %v5025_v21, %v1836_v17  ;;  %v1864_v54 = vrot.slane %v1708_v48, 5  ;;  %v1709_v0 = vld [vmem:[#allocation2 + $0xb0] sm:$0x1]  ;;  %v1711_v1 = vld [vmem:[#allocation2 + $0xb8] sm:$0xf] }
  0xd2   : > { %1894 = vrot.lane.b32.xlu1 %v1798_v36, %s5392_s12  ;;  %v1561_v14 = vpop.permute.xlu0 %1560  ;;  %v1845_v36 = vrot.slane %v1843_v26, 4  ;;  %v1858_v59 = vsel %vm5901_vm13, %v5028_v50, %v1857_v44  ;;  %v1710_v7 = vld [vmem:[#allocation2 + $0xb4] sm:$0xe]  ;;  %v1867_v53 = vrot.slane %v1709_v0, 5  ;;  %v1871_v8 = vrot.slane %v1711_v1, 5 }
  0xd3   : > { %1645 = vst.msk [vmem:[#allocation3 + $0x30] sm:$0xf] %vm1632_vm14, %v1561_v14  ;;  %v1852_v14 = vrot.slane %v1850_v2, 4  ;;  %v1712_v11 = vld [vmem:[#allocation2 + $0xbc] sm:$0x1]  ;;  %v5030_v13 = vrot.slane %v1710_v7, 9 }
  0xd4   : > { %v1847_v42 = vsel %vm5901_vm13, %v1845_v36, %v1846_v37  ;;  %v1874_v15 = vrot.slane %v1712_v11, 5  ;;  %v2005_v18 = vld [vmem:[#allocation2 + $0xc] sm:$0xf]  ;;  %v2006_v21 = vld [vmem:[#allocation2 + $0x10] sm:$0xf] }
  0xd5   : > { %1896 = vrot.lane.b32.xlu0 %v1802_v40, %s5392_s12  ;;  %v1563_v56 = vpop.permute.xlu1 %1562  ;;  %v5027_v40 = vrot.slane %v1701_v34, 9  ;;  %v1872_v16 = vsel %vm5901_vm13, %v5030_v13, %v1871_v8  ;;  %v2007_v22 = vld [vmem:[#allocation2 + $0x18] sm:$0xf]  ;;  %v2009_v24 = vld [vmem:[#allocation2 + $0x24] sm:$0xf] }
  0xd6   : > { %1898 = vrot.lane.b32.xlu1 %v1805_v43, %s5392_s12  ;;  %1646 = vst.msk [vmem:[#allocation3 + $0x34] sm:$0xf] %vm1632_vm14, %v1563_v56  ;;  %v1853_v43 = vrot.slane %v1703_v47, 5  ;;  %v2010_v25 = vld [vmem:[#allocation2 + $0x28] sm:$0xf] }
  0xd7   : > { %v2012_v29 = vld [vmem:[#allocation2 + $0x34] sm:$0xf]  ;;  %v2014_v32 = vld [vmem:[#allocation2 + $0x40] sm:$0xf]  ;;  %v2015_v36 = vld [vmem:[#allocation2 + $0x48] sm:$0xf] }
  0xd8   : > { %v1854_v56 = vsel %vm5901_vm13, %v1852_v14, %v1853_v43  ;;  %v2201_v38 = vld [vmem:[#allocation2 + $0x18] sm:$0xf]  ;;  %v2017_v14 = vld [vmem:[#allocation2 + $0x54] sm:$0xf] }
  0xd9   : > { %1900 = vrot.lane.b32.xlu0 %v1809_v49, %s5392_s12  ;;  %v1851_v49 = vsel %vm5901_vm13, %v5027_v40, %v1850_v2  ;;  %v2274_v46 = vshll.u32 %v2201_v38, 16  ;;  %v2018_v48 = vld [vmem:[#allocation2 + $0x58] sm:$0xf] }
  0xda   : > { %1902 = vrot.lane.b32.xlu1 %v1812_v57, %s5392_s12  ;;  %v1859_v57 = vrot.slane %v1857_v44, 4 }
  0xdb   : > { %v2276_v0 = vrot.slane %v2274_v46, 5  ;;  %v3294_v46 = vld [vmem:[#allocation2 + $0x28] sm:$0xf] }
  0xdc   : > { %v1861_v52 = vsel %vm5901_vm13, %v1859_v57, %v1860_v60  ;;  %v2019_v57 = vld [vmem:[#allocation2 + $0x60] sm:$0xf] }
  0xdd   : > { %1904 = vrot.lane.b32.xlu0 %v1816_v6, %s5392_s12  ;;  %v5029_v6 = vrot.slane %v1707_v51, 9 }
  0xde   : > { %1906 = vrot.lane.b32.xlu1 %v1819_v5, %s5392_s12  ;;  %v1866_v5 = vrot.slane %v1864_v54, 4 }
  0xe0   : > { %v1868_v61 = vsel %vm5901_vm13, %v1866_v5, %v1867_v53 }
  0xe1   : > { %1908 = vrot.lane.b32.xlu0 %v1823_v58, %s5392_s12  ;;  %v1865_v58 = vsel %vm5901_vm13, %v5029_v6, %v1864_v54 }
  0xe2   : > { %1910 = vrot.lane.b32.xlu1 %v1826_v10, %s5392_s12  ;;  %v1565_v27 = vpop.permute.xlu0 %1564  ;;  %v1873_v10 = vrot.slane %v1871_v8, 4  ;;  %v2203_v8 = vld [vmem:[#allocation2 + $0x20] sm:$0x1] }
  0xe3   : > { %1647 = vst.msk [vmem:[#allocation3 + $0x38] sm:$0xf] %vm1632_vm14, %v1565_v27  ;;  %v1567_v30 = vpop.permute.xlu1 %1566  ;;  %v2011_v27 = vld [vmem:[#allocation2 + $0x30] sm:$0xf] }
  0xe4   : > { %1648 = vst.msk [vmem:[#allocation3 + $0x3c] sm:$0xf] %vm1632_vm14, %v1567_v30  ;;  %v1875_v17 = vsel %vm5901_vm13, %v1873_v10, %v1874_v15  ;;  %v2013_v30 = vld [vmem:[#allocation2 + $0x3c] sm:$0xf]  ;;  %v2290_v15 = vshll.u32 %v2203_v8, 16 }
  0xe5   : > { %1912 = vrot.lane.b32.xlu0 %v1830_v20, %s5392_s12 }
  0xe6   : > { %1914 = vrot.lane.b32.xlu1 %v1833_v23, %s5392_s12  ;;  %v2008_v23 = vld [vmem:[#allocation2 + $0x1c] sm:$0xf] }
  0xe9   : > { %1916 = vrot.lane.b32.xlu0 %v1837_v31, %s5392_s12  ;;  %v2198_v31 = vld [vmem:[#allocation2 + $0xc] sm:$0xf] }
  0xea   : > { %1918 = vrot.lane.b32.xlu1 %v1840_v35, %s5392_s12  ;;  %v2199_v35 = vld [vmem:[#allocation2 + $0x10] sm:$0xf]  ;;  %v2247_v37 = vshrl.u32 %v2198_v31, 16  ;;  %v2250_v2 = vshll.u32 %v2198_v31, 16  ;;  %v3290_v31 = vld [vmem:[#allocation2 + $0x18] sm:$0xf] }
  0xeb   : > { %v1569_v45 = vpop.permute.xlu0 %1568  ;;  %v2256_v40 = vshll.u32 %v2199_v35, 16  ;;  %v2260_v41 = vshrl.u32 %v2199_v35, 16 }
  0xec   : > { %1649 = vst.msk [vmem:[#allocation3 + $0x40] sm:$0xf] %vm1632_vm14, %v1569_v45  ;;  %v1571_v4 = vpop.permute.xlu1 %1570  ;;  %v2249_v43 = vrot.slane %v2247_v37, 4  ;;  %v2252_v44 = vrot.slane %v2250_v2, 5  ;;  %v2271_v45 = vshrl.u32 %v2201_v38, 16 }
  0xed   : > { %1920 = vrot.lane.b32.xlu0 %v1844_v39, %s5392_s12  ;;  %1650 = vst.msk [vmem:[#allocation3 + $0x44] sm:$0xf] %vm1632_vm14, %v1571_v4  ;;  %v2016_v39 = vld [vmem:[#allocation2 + $0x4c] sm:$0xf]  ;;  %v2258_v4 = vrot.slane %v2256_v40, 5  ;;  %v3342_v40 = vshll.u32 %v3290_v31, 16 }
  0xee   : > { %1922 = vrot.lane.b32.xlu1 %v1847_v42, %s5392_s12  ;;  %v2202_v42 = vld [vmem:[#allocation2 + $0x1c] sm:$0xf]  ;;  %v2253_v60 = vor.u32 %v2252_v44, %v2249_v43  ;;  %v2273_v54 = vrot.slane %v2271_v45, 4  ;;  %v2764_v37 = vld [vmem:[#allocation2 + $0x20] sm:$0x1] }
  0xef   : > { %v2280_v50 = vshll.u32 %v2202_v42, 16  ;;  %v2284_v51 = vshrl.u32 %v2202_v42, 16  ;;  %v3291_v2 = vld [vmem:[#allocation2 + $0x1c] sm:$0xf]  ;;  %v2867_v42 = vrot.slane %v2764_v37, 5 }
  0xf0   : > { %v2254_v11 = vrot.slane %v2253_v60, 4  ;;  %v3348_v44 = vshll.u32 %v3291_v2, 16  ;;  %v3352_v45 = vshrl.u32 %v3291_v2, 16  ;;  %v3376_v60 = vshrl.u32 %v3294_v46, 16 }
  0xf1   : > { %1924 = vrot.lane.b32.xlu0 %v1851_v49, %s5392_s12  ;;  %v2262_v49 = vrot.slane %v2260_v41, 4  ;;  %v2286_v5 = vrot.slane %v2284_v51, 4  ;;  %v3293_v41 = vld [vmem:[#allocation2 + $0x24] sm:$0xf]  ;;  %v3344_v51 = vrot.slane %v3342_v40, 5 }
  0xf2   : > { %1926 = vrot.lane.b32.xlu1 %v1854_v56, %s5392_s12  ;;  %v2200_v56 = vld [vmem:[#allocation2 + $0x14] sm:$0x1]  ;;  %v3853_v40 = vld [vmem:[#allocation2 + $0x20] sm:$0x1] }
  0xf3   : > { %v2263_v6 = vor.u32 %v2262_v49, %v2258_v4  ;;  %v2266_v7 = vshll.u32 %v2200_v56, 16 }
  0xf4   : > { %v1573_v9 = vpop.permute.xlu0 %1572 }
  0xf5   : > { %1928 = vrot.lane.b32.xlu0 %v1858_v59, %s5392_s12  ;;  %1651 = vst.msk [vmem:[#allocation3 + $0x48] sm:$0xf] %vm1632_vm14, %v1573_v9  ;;  %v1575_v12 = vpop.permute.xlu1 %1574  ;;  %v2020_v59 = vld [vmem:[#allocation2 + $0x64] sm:$0xf]  ;;  %v2021_v9 = vld [vmem:[#allocation2 + $0x6c] sm:$0xf] }
  0xf6   : > { %1652 = vst.msk [vmem:[#allocation3 + $0x4c] sm:$0xf] %vm1632_vm14, %v1575_v12  ;;  %1930 = vrot.lane.b32.xlu1 %v1861_v52, %s5392_s12  ;;  %v2282_v52 = vrot.slane %v2280_v50, 5  ;;  %v2277_v12 = vor.u32 %v2276_v0, %v2273_v54  ;;  %v2264_v13 = vrot.slane %v2263_v6, 4  ;;  %v6081_v0 = vrot.slane %v3348_v44, 5 }
  0xf7   : > { %v3292_v6 = vld [vmem:[#allocation2 + $0x20] sm:$0x1] }
  0xf8   : > { %v2287_v10 = vor.u32 %v2286_v5, %v2282_v52  ;;  %v3097_v5 = vld [vmem:[#allocation2 + $0x18] sm:$0xf] }
  0xf9   : > { %1932 = vrot.lane.b32.xlu0 %v1865_v58, %s5392_s12  ;;  %v2022_v58 = vld [vmem:[#allocation2 + $0x70] sm:$0xf] }
  0xfa   : > { %1934 = vrot.lane.b32.xlu1 %v1868_v61, %s5392_s12  ;;  %v2268_v61 = vrot.slane %v2266_v7, 5 }
  0xfc   : > { %v1577_v19 = vpop.permute.xlu0 %1576 }
  0xfd   : > { %1936 = vrot.lane.b32.xlu0 %v1872_v16, %s5392_s12  ;;  %1653 = vst.msk [vmem:[#allocation3 + $0x50] sm:$0xf] %vm1632_vm14, %v1577_v19  ;;  %v1579_v20 = vpop.permute.xlu1 %1578  ;;  %v2760_v16 = vld [vmem:[#allocation2 + $0x10] sm:$0xf]  ;;  %v2759_v19 = vld [vmem:[#allocation2 + $0xc] sm:$0xe] }
  0xfe   : > { %1938 = vrot.lane.b32.xlu1 %v1875_v17, %s5392_s12  ;;  %1654 = vst.msk [vmem:[#allocation3 + $0x54] sm:$0xf] %vm1632_vm14, %v1579_v20  ;;  %v2259_v17 = vsel %vm5533_vm7, %v2254_v11, %v2258_v4  ;;  %v2269_v20 = vsel %vm5533_vm7, %v2264_v13, %v2268_v61  ;;  %v3366_v4 = vshll.u32 %v3293_v41, 16  ;;  %v3378_v11 = vrot.slane %v3376_v60, 4  ;;  %v3295_v61 = vld [vmem:[#allocation2 + $0x2c] sm:$0x1]  ;;  %s265_s12 = scalar_lea.vmem %s6939_s5, %s6952_s22 }
  0xff   : > { %v3358_v13 = vshll.u32 %v3292_v6, 16 }
 0x101   : > { %2069 = vrot.lane.b32.xlu0 %v2005_v18, %s5393_s13  ;;  %v2278_v18 = vrot.slane %v2277_v12, 4  ;;  %v3098_v12 = vld [vmem:[#allocation2 + $0x1c] sm:$0xf] }
 0x102   : > { %2071 = vrot.lane.b32.xlu1 %v2006_v21, %s5393_s13  ;;  %v2288_v21 = vrot.slane %v2287_v10, 4 }
 0x105   : > { %2073 = vrot.lane.b32.xlu0 %v2007_v22, %s5393_s13  ;;  %v2292_v22 = vrot.slane %v2290_v15, 5 }
 0x106   : > { %2075 = vrot.lane.b32.xlu1 %v2008_v23, %s5393_s13  ;;  %v2857_v23 = vrot.slane %v2760_v16, 5  ;;  %v3099_v16 = vld [vmem:[#allocation2 + $0x24] sm:$0xf] }
 0x107   : > { %v1581_v26 = vpop.permute.xlu0 %1580 }
 0x108   : > { %1655 = vst.msk [vmem:[#allocation3 + $0x58] sm:$0xf] %vm1632_vm14, %v1581_v26  ;;  %v2283_v26 = vsel %vm5533_vm7, %v2278_v18, %v2282_v52  ;;  %v3368_v52 = vrot.slane %v3366_v4, 5  ;;  %v3854_v4 = vld [vmem:[#allocation2 + $0x24] sm:$0xe] }
 0x109   : > { %2077 = vrot.lane.b32.xlu0 %v2009_v24, %s5393_s13  ;;  %v1583_v28 = vpop.permute.xlu1 %1582  ;;  %v2761_v24 = vld [vmem:[#allocation2 + $0x14] sm:$0x1] }
 0x10a   : > { %2079 = vrot.lane.b32.xlu1 %v2010_v25, %s5393_s13  ;;  %1656 = vst.msk [vmem:[#allocation3 + $0x5c] sm:$0xf] %vm1632_vm14, %v1583_v28  ;;  %v2763_v25 = vld [vmem:[#allocation2 + $0x1c] sm:$0xf]  ;;  %v2860_v35 = vrot.slane %v2761_v24, 5  ;;  %v3360_v24 = vrot.slane %v3358_v13, 5 }
 0x10d   : > { %2081 = vrot.lane.b32.xlu0 %v2011_v27, %s5393_s13  ;;  %v5031_v27 = vrot.slane %v2759_v19, 9 }
 0x10e   : > { %2083 = vrot.lane.b32.xlu1 %v2012_v29, %s5393_s13 }
 0x110   : > { %v1585_v34 = vpop.permute.xlu0 %1584 }
 0x111   : > { %2085 = vrot.lane.b32.xlu0 %v2013_v30, %s5393_s13  ;;  %1657 = vst.msk [vmem:[#allocation3 + $0x60] sm:$0xf] %vm1632_vm14, %v1585_v34  ;;  %v2762_v30 = vld [vmem:[#allocation2 + $0x18] sm:$0xe]  ;;  %v2859_v34 = vrot.slane %v2857_v23, 4 }
 0x112   : > { %2087 = vrot.lane.b32.xlu1 %v2014_v32, %s5393_s13  ;;  %v1587_v47 = vpop.permute.xlu1 %1586  ;;  %v2293_v32 = vsel %vm5533_vm7, %v2288_v21, %v2292_v22  ;;  %v5032_v38 = vrot.slane %v2762_v30, 9  ;;  %v2204_v21 = vld [vmem:[#allocation2 + $0x24] sm:$0xf]  ;;  %v3100_v22 = vld [vmem:[#allocation2 + $0x28] sm:$0xf] }
 0x113   : > { %1658 = vst.msk [vmem:[#allocation3 + $0x64] sm:$0xf] %vm1632_vm14, %v1587_v47  ;;  %v2858_v47 = vsel %vm5901_vm13, %v5031_v27, %v2857_v23 }
 0x115   : > { %2089 = vrot.lane.b32.xlu0 %v2015_v36, %s5393_s13  ;;  %v2864_v36 = vrot.slane %v2763_v25, 5  ;;  %v6095_v25 = vld [vmem:[#allocation2 + $0x1c] sm:$0xf] }
 0x116   : > { %2091 = vrot.lane.b32.xlu1 %v2016_v39, %s5393_s13  ;;  %v3339_v39 = vshrl.u32 %v3290_v31, 16  ;;  %v3851_v31 = vld [vmem:[#allocation2 + $0x18] sm:$0xe]  ;;  %v3949_v2 = vrot.slane %v6095_v25, 5 }
 0x117   : > { %v2866_v43 = vrot.slane %v2864_v36, 4  ;;  %v2865_v49 = vsel %vm5901_vm13, %v5032_v38, %v2864_v36 }
 0x118   : > { %v3341_v50 = vrot.slane %v3339_v39, 4 }
 0x119   : > { %2093 = vrot.lane.b32.xlu0 %v2017_v14, %s5393_s13  ;;  %v2861_v14 = vsel %vm5901_vm13, %v2859_v34, %v2860_v35  ;;  %v2868_v54 = vsel %vm5901_vm13, %v2866_v43, %v2867_v42  ;;  %v2298_v34 = vshll.u32 %v2204_v21, 16 }
 0x11a   : > { %2095 = vrot.lane.b32.xlu1 %v2018_v48, %s5393_s13  ;;  %v1589_v1 = vpop.permute.xlu0 %1588  ;;  %v3363_v48 = vshrl.u32 %v3293_v41, 16  ;;  %v6112_v41 = vld [vmem:[#allocation2 + $0x28] sm:$0xf] }
 0x11b   : > { %1659 = vst.msk [vmem:[#allocation3 + $0x68] sm:$0xf] %vm1632_vm14, %v1589_v1  ;;  %v3354_v1 = vrot.slane %v3352_v45, 4  ;;  %v5047_v45 = vrot.slane %v3851_v31, 9 }
 0x11c   : > { %v1591_v53 = vpop.permute.xlu1 %1590  ;;  %v3365_v7 = vrot.slane %v3363_v48, 4  ;;  %v5360_v48 = vld [vmem:[%s6937_s3 + $0x8] sm:$0xff]  }
 0x11d   : > { %2097 = vrot.lane.b32.xlu0 %v2019_v57, %s5393_s13  ;;  %1660 = vst.msk [vmem:[#allocation3 + $0x6c] sm:$0xf] %vm1632_vm14, %v1591_v53  ;;  %v3372_v57 = vshll.u32 %v3294_v46, 16  ;;  %v3345_v53 = vor.u32 %v3344_v51, %v3341_v50  ;;  %v2208_v46 = vld [vmem:[#allocation2 + $0x34] sm:$0xf]  ;;  %v2300_v50 = vrot.slane %v2298_v34, 5 }
 0x11e   : > { %2099 = vrot.lane.b32.xlu1 %v2020_v59, %s5393_s13  ;;  %v3369_v15 = vor.u32 %v3368_v52, %v3365_v7  ;;  %v2328_v52 = vshll.u32 %v2208_v46, 16 }
 0x120   : > { %v3370_v27 = vrot.slane %v3369_v15, 4 }
 0x121   : > { %2101 = vrot.lane.b32.xlu0 %v2021_v9, %s5393_s13  ;;  %v6086_v9 = vrot.slane %v3372_v57, 5 }
 0x122   : > { %2103 = vrot.lane.b32.xlu1 %v2022_v58, %s5393_s13  ;;  %v3355_v58 = vor.u32 %v3354_v1, %v6081_v0  ;;  %v3956_v1 = vrot.slane %v6112_v41, 5 }
 0x123   : > { %v3379_v19 = vor.u32 %v3378_v11, %v6086_v9  ;;  %v3375_v44 = vsel %vm5533_vm7, %v3370_v27, %v6086_v9  ;;  %v2206_v9 = vld [vmem:[#allocation2 + $0x2c] sm:$0x1]  ;;  %v5361_v11 = vld [vmem:[%s6937_s3] sm:$0xff]  }
 0x124   : > { %v3356_v23 = vrot.slane %v3355_v58, 4 }
 0x125   : > { %2630 = vrot.lane.b32.xlu0 %v2259_v17, %s5394_s14  ;;  %v3346_v17 = vrot.slane %v3345_v53, 4  ;;  %v3380_v36 = vrot.slane %v3379_v19, 4  ;;  %v2314_v19 = vshll.u32 %v2206_v9, 16 }
 0x126   : > { %2632 = vrot.lane.b32.xlu1 %v2269_v20, %s5394_s14  ;;  %v1593_v28 = vpop.permute.xlu0 %1592  ;;  %v1595_v29 = vpop.permute.xlu1 %1594  ;;  %v3382_v20 = vshll.u32 %v3295_v61, 16  ;;  %v3361_v39 = vsel %vm5533_vm7, %v3356_v23, %v3360_v24  ;;  %v2209_v23 = vld [vmem:[#allocation2 + $0x38] sm:$0x1] }
 0x127   : > { %1661 = vst.msk [vmem:[#allocation3 + $0x70] sm:$0xf] %vm1632_vm14, %v1593_v28  ;;  %1662 = vst.msk [vmem:[#allocation3 + $0x74] sm:$0xf] %vm1632_vm14, %v1595_v29  ;;  %v2205_v28 = vld [vmem:[#allocation2 + $0x28] sm:$0xf]  ;;  %v3351_v30 = vsel %vm5533_vm7, %v3346_v17, %v6081_v0 }
 0x128   : > { %v5359_v29 = vld [vmem:[%s6937_s3 + $0x10] ss:$0 sps:$4 sm:$0x33]   ;;  %v3384_v37 = vrot.slane %v3382_v20, 5  ;;  %v2304_v42 = vshll.u32 %v2205_v28, 16  ;;  %v3952_v0 = vrot.slane %v3853_v40, 5 }
 0x129   : > { %2634 = vrot.lane.b32.xlu0 %v2283_v26, %s5394_s14  ;;  %5340 = vmatprep.subr.msk.bf16.mxu0 %vm4369_vm2, %v5359_v29  ;;  %v4371_v38 = vsel %vm4369_vm2, %v5359_v29, 0  ;;  %v2330_v20 = vrot.slane %v2328_v52, 5 }
 0x12a   : > { %2636 = vrot.lane.b32.xlu1 %v2293_v32, %s5394_s14  ;;  %v2295_v32 = vshrl.u32 %v2204_v21, 16  ;;  %5297 = vmatpush3.bf16.msra.mxu0 %v4371_v38  ;;  %v3385_v60 = vsel %vm5533_vm7, %v3380_v36, %v3384_v37  ;;  %v2306_v6 = vrot.slane %v2304_v42, 5 }
 0x12b   : > { %5341 = vmatprep.subr.msk.bf16.mxu1 %vm4369_vm2, %v5359_v29  ;;  %5298 = vmatprep.subr.bf16.mxu0 %v5360_v48 }
 0x12c   : > { %5337 = vmatpush3.bf16.msra.mxu1 %v4371_v38 }
 0x12d   : > { %2967 = vrot.lane.b32.xlu0 %v2858_v47, %s5395_s15  ;;  %v2207_v47 = vld [vmem:[#allocation2 + $0x30] sm:$0xf]  ;;  %5335 = vmatprep.subr.bf16.mxu1 %v5360_v48 }
 0x12e   : > { %2969 = vrot.lane.b32.xlu1 %v2861_v14, %s5395_s15  ;;  %v2308_v14 = vshrl.u32 %v2205_v28, 16  ;;  %v2319_v51 = vshrl.u32 %v2207_v47, 16  ;;  %5299 = vmatpush3.bf16.msra.mxu0 %v5360_v48 }
 0x12f   : > { %v1597_v56 = vpop.permute.xlu0 %1596  ;;  %5300 = vmatprep.subr.bf16.mxu0 %v5361_v11 }
 0x130   : > { %1663 = vst.msk [vmem:[#allocation3 + $0x78] sm:$0xf] %vm1632_vm14, %v1597_v56  ;;  %v1599_v59 = vpop.permute.xlu1 %1598  ;;  %v2322_v56 = vshll.u32 %v2207_v47, 16  ;;  %v2310_v7 = vrot.slane %v2308_v14, 4  ;;  %5338 = vmatpush3.bf16.msra.mxu1 %v5360_v48  ;;  %v2321_v13 = vrot.slane %v2319_v51, 4 }
 0x131   : > { %2971 = vrot.lane.b32.xlu0 %v2865_v49, %s5395_s15  ;;  %1664 = vst.msk [vmem:[#allocation3 + $0x7c] sm:$0xf] %vm1632_vm14, %v1599_v59  ;;  %v2297_v49 = vrot.slane %v2295_v32, 4  ;;  %v3856_v59 = vld [vmem:[#allocation2 + $0x2c] sm:$0x1]  ;;  %5336 = vmatprep.subr.bf16.mxu1 %v5361_v11  ;;  %v2338_v32 = vshll.u32 %v2209_v23, 16 }
 0x132   : > { %2973 = vrot.lane.b32.xlu1 %v2868_v54, %s5395_s15  ;;  %v3951_v54 = vrot.slane %v3949_v2, 4  ;;  %v2324_v61 = vrot.slane %v2322_v56, 5  ;;  %v3959_v17 = vrot.slane %v3856_v59, 5  ;;  %5301 = vmatpush3.bf16.msra.mxu0 %v5361_v11  ;;  %v2765_v47 = vld [vmem:[#allocation2 + $0x24] sm:$0xe]  ;;  %vm4320_vm14 = vcmask 293888  }
 0x133   : > { %v1877_v8 = vpop.permute.xlu0 %1876  ;;  %v2301_v58 = vor.u32 %v2300_v50, %v2297_v49  ;;  %v2340_v40 = vrot.slane %v2338_v32, 5  ;;  %v2767_v14 = vld [vmem:[#allocation2 + $0x2c] sm:$0x1]  ;;  %v2768_v48 = vld [vmem:[#allocation2 + $0x30] sm:$0xe] }
 0x134   : > { %1973 = vst.msk [vmem:[#allocation3] sm:$0xf] %vm1972_vm15, %v1877_v8  ;;  %v1879_v10 = vpop.permute.xlu1 %1878  ;;  %v5048_v8 = vrot.slane %v3854_v4, 9  ;;  %v3953_v15 = vsel %vm5901_vm13, %v3951_v54, %v3952_v0  ;;  %5339 = vmatpush3.bf16.msra.mxu1 %v5361_v11  ;;  %v3296_v4 = vld [vmem:[#allocation2 + $0x30] sm:$0xf]  ;;  %v2874_v51 = vrot.slane %v2767_v14, 5 }
 0x135   : > { %3161 = vrot.lane.b32.xlu0 %v3097_v5, %s5396_s16  ;;  %1974 = vst.msk [vmem:[#allocation3 + $0x4] sm:$0xf] %vm1972_vm15, %v1879_v10  ;;  %v2332_v5 = vshrl.u32 %v2208_v46, 16  ;;  %v2302_v25 = vrot.slane %v2301_v58, 4  ;;  %v3297_v54 = vld [vmem:[#allocation2 + $0x34] sm:$0xf] }
 0x136   : > { %3163 = vrot.lane.b32.xlu1 %v3098_v12, %s5396_s16  ;;  %v3950_v12 = vsel %vm5901_vm13, %v5047_v45, %v3949_v2  ;;  %v3957_v24 = vsel %vm5901_vm13, %v5048_v8, %v3956_v1  ;;  %v5033_v45 = vrot.slane %v2765_v47, 9  ;;  %v3387_v59 = vshrl.u32 %v3296_v4, 16  ;;  %v3102_v32 = vld [vmem:[#allocation2 + $0x34] sm:$0xf]  ;;  %v3103_v47 = vld [vmem:[#allocation2 + $0x3c] sm:$0xf] }
 0x137   : > { %v1881_v18 = vpop.permute.xlu0 %1880  ;;  %v2334_v21 = vrot.slane %v2332_v5, 4  ;;  %v2307_v36 = vsel %vm5533_vm7, %v2302_v25, %v2306_v6  ;;  %v3396_v9 = vshll.u32 %v3297_v54, 16  ;;  %v3400_v11 = vshrl.u32 %v3297_v54, 16  ;;  %v3104_v14 = vld [vmem:[#allocation2 + $0x40] sm:$0xf] }
 0x138   : > { %1975 = vst.msk [vmem:[#allocation3 + $0x8] sm:$0xf] %vm1972_vm15, %v1881_v18  ;;  %v1883_v26 = vpop.permute.xlu1 %1882  ;;  %v2311_v18 = vor.u32 %v2310_v7, %v2306_v6  ;;  %v3390_v6 = vshll.u32 %v3296_v4, 16  ;;  %v3299_v7 = vld [vmem:[#allocation2 + $0x3c] sm:$0xf] }
 0x139   : > { %3165 = vrot.lane.b32.xlu0 %v3099_v16, %s5396_s16  ;;  %1976 = vst.msk [vmem:[#allocation3 + $0xc] sm:$0xf] %vm1972_vm15, %v1883_v26  ;;  %v3958_v16 = vrot.slane %v3956_v1, 4  ;;  %v2325_v26 = vor.u32 %v2324_v61, %v2321_v13  ;;  %v2335_v31 = vor.u32 %v2334_v21, %v2330_v20  ;;  %v5034_v1 = vrot.slane %v2768_v48, 9  ;;  %v2211_v4 = vld [vmem:[#allocation2 + $0x40] sm:$0xf] }
 0x13a   : > { %3167 = vrot.lane.b32.xlu1 %v3100_v22, %s5396_s16  ;;  %v2312_v29 = vrot.slane %v2311_v18, 4  ;;  %v3411_v13 = vshrl.u32 %v3299_v7, 16  ;;  %v3414_v61 = vshll.u32 %v3299_v7, 16  ;;  %v3398_v21 = vrot.slane %v3396_v9, 5  ;;  %v3861_v7 = vld [vmem:[#allocation2 + $0x40] sm:$0xf] }
 0x13b   : > { %v1885_v35 = vpop.permute.xlu0 %1884  ;;  %v3960_v28 = vsel %vm5901_vm13, %v3958_v16, %v3959_v17  ;;  %v2326_v37 = vrot.slane %v2325_v26, 4  ;;  %v3392_v16 = vrot.slane %v3390_v6, 5  ;;  %v3859_v6 = vld [vmem:[#allocation2 + $0x38] sm:$0x1] }
 0x13c   : > { %1977 = vst.msk [vmem:[#allocation3 + $0x10] sm:$0xf] %vm1972_vm15, %v1885_v35  ;;  %v1887_v43 = vpop.permute.xlu1 %1886  ;;  %v2766_v35 = vld [vmem:[#allocation2 + $0x28] sm:$0xf]  ;;  %v3413_v25 = vrot.slane %v3411_v13, 4  ;;  %v3416_v26 = vrot.slane %v3414_v61, 5 }
 0x13d   : > { %3722 = vrot.lane.b32.xlu0 %v3351_v30, %s5397_s19  ;;  %1978 = vst.msk [vmem:[#allocation3 + $0x14] sm:$0xf] %vm1972_vm15, %v1887_v43  ;;  %v2316_v30 = vrot.slane %v2314_v19, 5  ;;  %v2871_v41 = vrot.slane %v2766_v35, 5  ;;  %v2769_v43 = vld [vmem:[#allocation2 + $0x34] sm:$0xf] }
 0x13e   : > { %3724 = vrot.lane.b32.xlu1 %v3361_v39, %s5397_s19  ;;  %v2336_v39 = vrot.slane %v2335_v31, 4  ;;  %v2878_v56 = vrot.slane %v2769_v43, 5 }
 0x13f   : > { %v1889_v57 = vpop.permute.xlu0 %1888  ;;  %v2317_v38 = vsel %vm5533_vm7, %v2312_v29, %v2316_v30  ;;  %v2873_v50 = vrot.slane %v2871_v41, 4  ;;  %v2872_v0 = vsel %vm5901_vm13, %v5033_v45, %v2871_v41  ;;  %v3858_v45 = vld [vmem:[#allocation2 + $0x34] sm:$0xf] }
 0x140   : > { %1979 = vst.msk [vmem:[#allocation3 + $0x18] sm:$0xf] %vm1972_vm15, %v1889_v57  ;;  %v1891_v53 = vpop.permute.xlu1 %1890  ;;  %v2341_v49 = vsel %vm5533_vm7, %v2336_v39, %v2340_v40  ;;  %v2770_v57 = vld [vmem:[#allocation2 + $0x38] sm:$0x1]  ;;  %v2880_v8 = vrot.slane %v2878_v56, 4 }
 0x141   : > { %3726 = vrot.lane.b32.xlu0 %v3375_v44, %s5397_s19  ;;  %1980 = vst.msk [vmem:[#allocation3 + $0x1c] sm:$0xf] %vm1972_vm15, %v1891_v53  ;;  %v2331_v44 = vsel %vm5533_vm7, %v2326_v37, %v2330_v20  ;;  %v2881_v5 = vrot.slane %v2770_v57, 5  ;;  %v2875_v53 = vsel %vm5901_vm13, %v2873_v50, %v2874_v51  ;;  %v3857_v50 = vld [vmem:[#allocation2 + $0x30] sm:$0xe] }
 0x142   : > { %3728 = vrot.lane.b32.xlu1 %v3385_v60, %s5397_s19  ;;  %v5049_v9 = vrot.slane %v3857_v50, 9 }
 0x143   : > { %v1893_v10 = vpop.permute.xlu0 %1892  ;;  %v2882_v20 = vsel %vm5901_vm13, %v2880_v8, %v2881_v5  ;;  %v2356_v5 = vshrl.u32 %v2211_v4, 16 }
 0x144   : > { %1981 = vst.msk [vmem:[#allocation3 + $0x20] sm:$0xf] %vm1972_vm15, %v1893_v10  ;;  %v1895_v22 = vpop.permute.xlu1 %1894  ;;  %v2879_v10 = vsel %vm5901_vm13, %v5034_v1, %v2878_v56  ;;  %v2213_v1 = vld [vmem:[#allocation2 + $0x48] sm:$0xf] }
 0x145   : > { %4059 = vrot.lane.b32.xlu0 %v3950_v12, %s5398_s28  ;;  %1982 = vst.msk [vmem:[#allocation3 + $0x24] sm:$0xf] %vm1972_vm15, %v1895_v22  ;;  %v3300_v12 = vld [vmem:[#allocation2 + $0x40] sm:$0xf]  ;;  %v3402_v22 = vrot.slane %v3400_v11, 4  ;;  %v2367_v13 = vshrl.u32 %v2213_v1, 16 }
 0x146   : > { %4061 = vrot.lane.b32.xlu1 %v3953_v15, %s5398_s28  ;;  %v3389_v15 = vrot.slane %v3387_v59, 4  ;;  %v3420_v18 = vshll.u32 %v3300_v12, 16  ;;  %v3424_v19 = vshrl.u32 %v3300_v12, 16  ;;  %v2214_v11 = vld [vmem:[#allocation2 + $0x4c] sm:$0xf]  ;;  %v2370_v61 = vshll.u32 %v2213_v1, 16 }
 0x147   : > { %v1897_v27 = vpop.permute.xlu0 %1896 }
 0x148   : > { %1983 = vst.msk [vmem:[#allocation3 + $0x28] sm:$0xf] %vm1972_vm15, %v1897_v27  ;;  %v1899_v34 = vpop.permute.xlu1 %1898  ;;  %v3101_v27 = vld [vmem:[#allocation2 + $0x30] sm:$0xf]  ;;  %v6182_v30 = vrot.slane %v3420_v18, 5  ;;  %v3426_v31 = vrot.slane %v3424_v19, 4 }
 0x149   : > { %4063 = vrot.lane.b32.xlu0 %v3957_v24, %s5398_s28  ;;  %1984 = vst.msk [vmem:[#allocation3 + $0x2c] sm:$0xf] %vm1972_vm15, %v1899_v34  ;;  %v3298_v24 = vld [vmem:[#allocation2 + $0x38] sm:$0x1]  ;;  %v3403_v34 = vor.u32 %v3402_v22, %v3398_v21  ;;  %v3860_v18 = vld [vmem:[#allocation2 + $0x3c] sm:$0xe] }
 0x14a   : > { %4065 = vrot.lane.b32.xlu1 %v3960_v28, %s5398_s28  ;;  %v3393_v28 = vor.u32 %v3392_v16, %v3389_v15  ;;  %v3406_v35 = vshll.u32 %v3298_v24, 16  ;;  %v3427_v40 = vor.u32 %v3426_v31, %v6182_v30  ;;  %v3970_v19 = vrot.slane %v3861_v7, 5 }
 0x14b   : > { %v1901_v2 = vpop.permute.xlu0 %1900  ;;  %v3404_v43 = vrot.slane %v3403_v34, 4  ;;  %v2358_v22 = vrot.slane %v2356_v5, 4  ;;  %v2380_v24 = vshrl.u32 %v2214_v11, 16  ;;  %v2372_v31 = vrot.slane %v2370_v61, 5 }
 0x14c   : > { %1985 = vst.msk [vmem:[#allocation3 + $0x30] sm:$0xf] %vm1972_vm15, %v1901_v2  ;;  %v1903_v42 = vpop.permute.xlu1 %1902  ;;  %v3417_v2 = vor.u32 %v3416_v26, %v3413_v25 }
 0x14d   : > { %2638 = vrot.lane.b32.xlu0 %v2307_v36, %s5394_s14  ;;  %1986 = vst.msk [vmem:[#allocation3 + $0x34] sm:$0xf] %vm1972_vm15, %v1903_v42  ;;  %v3301_v36 = vld [vmem:[#allocation2 + $0x44] sm:$0x1]  ;;  %v2210_v42 = vld [vmem:[#allocation2 + $0x3c] sm:$0xf] }
 0x14e   : > { %2640 = vrot.lane.b32.xlu1 %v2317_v38, %s5394_s14  ;;  %v3394_v38 = vrot.slane %v3393_v28, 4  ;;  %v3430_v41 = vshll.u32 %v3301_v36, 16  ;;  %v3418_v48 = vrot.slane %v3417_v2, 4  ;;  %v2343_v51 = vshrl.u32 %v2210_v42, 16 }
 0x14f   : > { %v1905_v46 = vpop.permute.xlu0 %1904  ;;  %v2346_v56 = vshll.u32 %v2210_v42, 16  ;;  %v5050_v28 = vrot.slane %v3860_v18, 9 }
 0x150   : > { %1987 = vst.msk [vmem:[#allocation3 + $0x38] sm:$0xf] %vm1972_vm15, %v1905_v46  ;;  %v1907_v60 = vpop.permute.xlu1 %1906  ;;  %v3432_v54 = vrot.slane %v3430_v41, 5  ;;  %v3423_v8 = vsel %vm5533_vm7, %v3418_v48, %v6182_v30  ;;  %v2345_v12 = vrot.slane %v2343_v51, 4  ;;  %v2369_v30 = vrot.slane %v2367_v13, 4 }
 0x151   : > { %2642 = vrot.lane.b32.xlu0 %v2331_v44, %s5394_s14  ;;  %1988 = vst.msk [vmem:[#allocation3 + $0x3c] sm:$0xf] %vm1972_vm15, %v1907_v60  ;;  %v3408_v44 = vrot.slane %v3406_v35, 5  ;;  %v3428_v60 = vrot.slane %v3427_v40, 4  ;;  %v3972_v35 = vrot.slane %v3970_v19, 4  ;;  %v3971_v41 = vsel %vm5901_vm13, %v5050_v28, %v3970_v19 }
 0x152   : > { %2644 = vrot.lane.b32.xlu1 %v2341_v49, %s5394_s14  ;;  %v3399_v49 = vsel %vm5533_vm7, %v3394_v38, %v3398_v21  ;;  %v2382_v38 = vrot.slane %v2380_v24, 4  ;;  %v2215_v40 = vld [vmem:[#allocation2 + $0x50] sm:$0x1]  ;;  %v3306_v28 = vld [vmem:[#allocation2 + $0x58] sm:$0xf] }
 0x153   : > { %v1909_v52 = vpop.permute.xlu0 %1908  ;;  %v3409_v59 = vsel %vm5533_vm7, %v3404_v43, %v3408_v44  ;;  %v3433_v15 = vsel %vm5533_vm7, %v3428_v60, %v3432_v54  ;;  %v2771_v60 = vld [vmem:[#allocation2 + $0x3c] sm:$0xe] }
 0x154   : > { %1989 = vst.msk [vmem:[#allocation3 + $0x40] sm:$0xf] %vm1972_vm15, %v1909_v52  ;;  %v1911_v58 = vpop.permute.xlu1 %1910  ;;  %v2352_v52 = vshll.u32 %v2211_v4, 16  ;;  %v2386_v4 = vshll.u32 %v2215_v40, 16 }
 0x155   : > { %2975 = vrot.lane.b32.xlu0 %v2872_v0, %s5395_s15  ;;  %1990 = vst.msk [vmem:[#allocation3 + $0x44] sm:$0xf] %vm1972_vm15, %v1911_v58  ;;  %v3963_v0 = vrot.slane %v3858_v45, 5  ;;  %v2348_v58 = vrot.slane %v2346_v56, 5 }
 0x156   : > { %2977 = vrot.lane.b32.xlu1 %v2875_v53, %s5395_s15  ;;  %v2354_v21 = vrot.slane %v2352_v52, 5  ;;  %v2775_v52 = vld [vmem:[#allocation2 + $0x4c] sm:$0xf] }
 0x157   : > { %v1913_v17 = vpop.permute.xlu0 %1912  ;;  %v3965_v16 = vrot.slane %v3963_v0, 4  ;;  %v3964_v26 = vsel %vm5901_vm13, %v5049_v9, %v3963_v0  ;;  %v2892_v61 = vrot.slane %v2775_v52, 5 }
 0x158   : > { %1991 = vst.msk [vmem:[#allocation3 + $0x48] sm:$0xf] %vm1972_vm15, %v1913_v17  ;;  %v1915_v23 = vpop.permute.xlu1 %1914  ;;  %v3966_v17 = vrot.slane %v3859_v6, 5  ;;  %v2773_v6 = vld [vmem:[#allocation2 + $0x44] sm:$0x1] }
 0x159   : > { %2979 = vrot.lane.b32.xlu0 %v2879_v10, %s5395_s15  ;;  %1992 = vst.msk [vmem:[#allocation3 + $0x4c] sm:$0xf] %vm1972_vm15, %v1915_v23  ;;  %v2376_v23 = vshll.u32 %v2214_v11, 16  ;;  %v2888_v11 = vrot.slane %v2773_v6, 5  ;;  %v2894_v24 = vrot.slane %v2892_v61, 4 }
 0x15a   : > { %2981 = vrot.lane.b32.xlu1 %v2882_v20, %s5395_s15  ;;  %v3862_v20 = vld [vmem:[#allocation2 + $0x44] sm:$0x1]  ;;  %v3967_v34 = vsel %vm5901_vm13, %v3965_v16, %v3966_v17  ;;  %v3303_v16 = vld [vmem:[#allocation2 + $0x4c] sm:$0xf]  ;;  %v2216_v6 = vld [vmem:[#allocation2 + $0x54] sm:$0xf] }
 0x15b   : > { %v1917_v29 = vpop.permute.xlu0 %1916  ;;  %v3973_v36 = vrot.slane %v3862_v20, 5 }
 0x15c   : > { %1993 = vst.msk [vmem:[#allocation3 + $0x50] sm:$0xf] %vm1972_vm15, %v1917_v29  ;;  %v1919_v37 = vpop.permute.xlu1 %1918  ;;  %v2349_v29 = vor.u32 %v2348_v58, %v2345_v12  ;;  %v2774_v12 = vld [vmem:[#allocation2 + $0x48] sm:$0xe] }
 0x15d   : > { %3169 = vrot.lane.b32.xlu0 %v3101_v27, %s5396_s16  ;;  %1994 = vst.msk [vmem:[#allocation3 + $0x54] sm:$0xf] %vm1972_vm15, %v1919_v37  ;;  %v2212_v27 = vld [vmem:[#allocation2 + $0x44] sm:$0x1]  ;;  %v2359_v37 = vor.u32 %v2358_v22, %v2354_v21  ;;  %v3974_v44 = vsel %vm5901_vm13, %v3972_v35, %v3973_v36  ;;  %v3302_v58 = vld [vmem:[#allocation2 + $0x48] sm:$0xf] }
 0x15e   : > { %3171 = vrot.lane.b32.xlu1 %v3102_v32, %s5396_s16  ;;  %v2362_v2 = vshll.u32 %v2212_v27, 16  ;;  %v2350_v42 = vrot.slane %v2349_v29, 4  ;;  %v5036_v18 = vrot.slane %v2774_v12, 9  ;;  %v3435_v19 = vshrl.u32 %v3302_v58, 16 }
 0x15f   : > { %v1921_v39 = vpop.permute.xlu0 %1920  ;;  %v2360_v45 = vrot.slane %v2359_v37, 4  ;;  %v3438_v20 = vshll.u32 %v3302_v58, 16  ;;  %v3448_v27 = vshrl.u32 %v3303_v16, 16  ;;  %v3468_v37 = vshll.u32 %v3306_v28, 16  ;;  %v3863_v58 = vld [vmem:[#allocation2 + $0x48] sm:$0xe] }
 0x160   : > { %1995 = vst.msk [vmem:[#allocation3 + $0x58] sm:$0xf] %vm1972_vm15, %v1921_v39  ;;  %v1923_v46 = vpop.permute.xlu1 %1922  ;;  %v2355_v51 = vsel %vm5533_vm7, %v2350_v42, %v2354_v21  ;;  %v3305_v21 = vld [vmem:[#allocation2 + $0x54] sm:$0xf] }
 0x161   : > { %3173 = vrot.lane.b32.xlu0 %v3103_v47, %s5396_s16  ;;  %1996 = vst.msk [vmem:[#allocation3 + $0x5c] sm:$0xf] %vm1972_vm15, %v1923_v46  ;;  %v2378_v47 = vrot.slane %v2376_v23, 5  ;;  %v2364_v46 = vrot.slane %v2362_v2, 5  ;;  %v3440_v35 = vrot.slane %v3438_v20, 5  ;;  %v3472_v2 = vshrl.u32 %v3306_v28, 16 }
 0x162   : > { %3175 = vrot.lane.b32.xlu1 %v3104_v14, %s5396_s16  ;;  %v2373_v14 = vor.u32 %v2372_v31, %v2369_v30  ;;  %v3459_v30 = vshrl.u32 %v3305_v21, 16  ;;  %v3462_v31 = vshll.u32 %v3305_v21, 16  ;;  %v3865_v20 = vld [vmem:[#allocation2 + $0x50] sm:$0x1]  ;;  %v3867_v21 = vld [vmem:[#allocation2 + $0x58] sm:$0xf] }
 0x163   : > { %v1925_v57 = vpop.permute.xlu0 %1924  ;;  %v2383_v48 = vor.u32 %v2382_v38, %v2378_v47  ;;  %v2365_v0 = vsel %vm5533_vm7, %v2360_v45, %v2364_v46  ;;  %v6258_v46 = vrot.slane %v3468_v37, 5  ;;  %v3866_v37 = vld [vmem:[#allocation2 + $0x54] sm:$0xe] }
 0x164   : > { %1997 = vst.msk [vmem:[#allocation3 + $0x60] sm:$0xf] %vm1972_vm15, %v1925_v57  ;;  %v1927_v53 = vpop.permute.xlu1 %1926  ;;  %v2374_v56 = vrot.slane %v2373_v14, 4  ;;  %v3461_v42 = vrot.slane %v3459_v30, 4  ;;  %v3464_v14 = vrot.slane %v3462_v31, 5 }
 0x165   : > { %3730 = vrot.lane.b32.xlu0 %v3399_v49, %s5397_s19  ;;  %1998 = vst.msk [vmem:[#allocation3 + $0x64] sm:$0xf] %vm1972_vm15, %v1927_v53  ;;  %v2772_v49 = vld [vmem:[#allocation2 + $0x40] sm:$0xf]  ;;  %v2384_v1 = vrot.slane %v2383_v48, 4  ;;  %v5035_v53 = vrot.slane %v2771_v60, 9 }
 0x166   : > { %3732 = vrot.lane.b32.xlu1 %v3409_v59, %s5397_s19  ;;  %v2885_v54 = vrot.slane %v2772_v49, 5  ;;  %v2388_v59 = vrot.slane %v2386_v4, 5  ;;  %v2379_v5 = vsel %vm5533_vm7, %v2374_v56, %v2378_v47  ;;  %v3474_v48 = vrot.slane %v3472_v2, 4  ;;  %v3106_v4 = vld [vmem:[#allocation2 + $0x4c] sm:$0xf] }
 0x167   : > { %v1929_v10 = vpop.permute.xlu0 %1928  ;;  %v3107_v60 = vld [vmem:[#allocation2 + $0x54] sm:$0xf]  ;;  %v3984_v2 = vrot.slane %v3867_v21, 5 }
 0x168   : > { %1999 = vst.msk [vmem:[#allocation3 + $0x68] sm:$0xf] %vm1972_vm15, %v1929_v10  ;;  %v1931_v25 = vpop.permute.xlu1 %1930  ;;  %v2887_v9 = vrot.slane %v2885_v54, 4  ;;  %v2389_v13 = vsel %vm5533_vm7, %v2384_v1, %v2388_v59  ;;  %v2886_v17 = vsel %vm5901_vm13, %v5035_v53, %v2885_v54  ;;  %v3475_v1 = vor.u32 %v3474_v48, %v6258_v46  ;;  %v3864_v53 = vld [vmem:[#allocation2 + $0x4c] sm:$0xf] }
 0x169   : > { %3734 = vrot.lane.b32.xlu0 %v3423_v8, %s5397_s19  ;;  %2000 = vst.msk [vmem:[#allocation3 + $0x6c] sm:$0xf] %vm1972_vm15, %v1931_v25 }
 0x16a   : > { %3736 = vrot.lane.b32.xlu1 %v3433_v15, %s5397_s19  ;;  %v2776_v15 = vld [vmem:[#allocation2 + $0x50] sm:$0x1]  ;;  %v2889_v23 = vsel %vm5901_vm13, %v2887_v9, %v2888_v11  ;;  %v2217_v11 = vld [vmem:[#allocation2 + $0x58] sm:$0xf] }
 0x16b   : > { %v1933_v32 = vpop.permute.xlu0 %1932  ;;  %v2895_v25 = vrot.slane %v2776_v15, 5  ;;  %v3476_v15 = vrot.slane %v3475_v1, 4  ;;  %v2221_v1 = vld [vmem:[#allocation2 + $0x68] sm:$0x1] }
 0x16c   : > { %2001 = vst.msk [vmem:[#allocation3 + $0x70] sm:$0xf] %vm1972_vm15, %v1933_v32  ;;  %v1935_v39 = vpop.permute.xlu1 %1934  ;;  %v2893_v32 = vsel %vm5901_vm13, %v5036_v18, %v2892_v61  ;;  %v2394_v61 = vshll.u32 %v2216_v6, 16  ;;  %v2219_v18 = vld [vmem:[#allocation2 + $0x60] sm:$0xf] }
 0x16d   : > { %4067 = vrot.lane.b32.xlu0 %v3964_v26, %s5398_s28  ;;  %2002 = vst.msk [vmem:[#allocation3 + $0x74] sm:$0xf] %vm1972_vm15, %v1935_v39  ;;  %v3444_v26 = vshll.u32 %v3303_v16, 16  ;;  %v2896_v47 = vsel %vm5901_vm13, %v2894_v24, %v2895_v25  ;;  %v3450_v39 = vrot.slane %v3448_v27, 4  ;;  %v2220_v27 = vld [vmem:[#allocation2 + $0x64] sm:$0xf] }
 0x16e   : > { %4069 = vrot.lane.b32.xlu1 %v3967_v34, %s5398_s28  ;;  %v3437_v34 = vrot.slane %v3435_v19, 4  ;;  %v2415_v30 = vshrl.u32 %v2219_v18, 16  ;;  %v2418_v31 = vshll.u32 %v2219_v18, 16 }
 0x16f   : > { %v1937_v43 = vpop.permute.xlu0 %1936  ;;  %v3446_v38 = vrot.slane %v3444_v26, 5  ;;  %v5051_v26 = vrot.slane %v3863_v58, 9  ;;  %v2778_v58 = vld [vmem:[#allocation2 + $0x58] sm:$0xf] }
 0x170   : > { %2003 = vst.msk [vmem:[#allocation3 + $0x78] sm:$0xf] %vm1972_vm15, %v1937_v43  ;;  %v1939_v50 = vpop.permute.xlu1 %1938  ;;  %v3105_v43 = vld [vmem:[#allocation2 + $0x48] sm:$0xf]  ;;  %v2420_v48 = vrot.slane %v2418_v31, 5 }
 0x171   : > { %4071 = vrot.lane.b32.xlu0 %v3971_v41, %s5398_s28  ;;  %2004 = vst.msk [vmem:[#allocation3 + $0x7c] sm:$0xf] %vm1972_vm15, %v1939_v50  ;;  %v3304_v41 = vld [vmem:[#allocation2 + $0x50] sm:$0x1]  ;;  %v3451_v49 = vor.u32 %v3450_v39, %v3446_v38 }
 0x172   : > { %4073 = vrot.lane.b32.xlu1 %v3974_v44, %s5398_s28  ;;  %v3441_v44 = vor.u32 %v3440_v35, %v3437_v34  ;;  %v3454_v50 = vshll.u32 %v3304_v41, 16  ;;  %v2428_v41 = vshrl.u32 %v2220_v27, 16 }
 0x173   : > { %v2070_v57 = vpop.permute.xlu0 %2069  ;;  %v3452_v52 = vrot.slane %v3451_v49, 4 }
 0x174   : > { %2166 = vst.msk [vmem:[#allocation3] sm:$0xf] %vm2165_vm3, %v2070_v57  ;;  %v2072_v7 = vpop.permute.xlu1 %2071  ;;  %v3465_v57 = vor.u32 %v3464_v14, %v3461_v42  ;;  %v3442_v54 = vrot.slane %v3441_v44, 4  ;;  %v5052_v44 = vrot.slane %v3866_v37, 9 }
 0x175   : > { %2646 = vrot.lane.b32.xlu0 %v2355_v51, %s5394_s14  ;;  %2167 = vst.msk [vmem:[#allocation3 + $0x4] sm:$0xf] %vm2165_vm3, %v2072_v7  ;;  %v3307_v51 = vld [vmem:[#allocation2 + $0x5c] sm:$0x1]  ;;  %v3108_v7 = vld [vmem:[#allocation2 + $0x58] sm:$0xf] }
 0x176   : > { %2648 = vrot.lane.b32.xlu1 %v2365_v0, %s5394_s14  ;;  %v3478_v59 = vshll.u32 %v3307_v51, 16  ;;  %v3466_v9 = vrot.slane %v3465_v57, 4  ;;  %v3447_v12 = vsel %vm5533_vm7, %v3442_v54, %v3446_v38  ;;  %v2430_v54 = vrot.slane %v2428_v41, 4  ;;  %v3311_v41 = vld [vmem:[#allocation2 + $0x6c] sm:$0xf] }
 0x177   : > { %v2074_v8 = vpop.permute.xlu0 %2073 }
 0x178   : > { %2168 = vst.msk [vmem:[#allocation3 + $0x8] sm:$0xf] %vm2165_vm3, %v2074_v8  ;;  %v2076_v10 = vpop.permute.xlu1 %2075  ;;  %v3480_v16 = vrot.slane %v3478_v59, 5  ;;  %v3471_v25 = vsel %vm5533_vm7, %v3466_v9, %v6258_v46  ;;  %v2417_v46 = vrot.slane %v2415_v30, 4  ;;  %v3985_v59 = vsel %vm5901_vm13, %v5052_v44, %v3984_v2 }
 0x179   : > { %2650 = vrot.lane.b32.xlu0 %v2379_v5, %s5394_s14  ;;  %2169 = vst.msk [vmem:[#allocation3 + $0xc] sm:$0xf] %vm2165_vm3, %v2076_v10  ;;  %v3456_v5 = vrot.slane %v3454_v50, 5  ;;  %v3986_v50 = vrot.slane %v3984_v2, 4 }
 0x17a   : > { %2652 = vrot.lane.b32.xlu1 %v2389_v13, %s5394_s14  ;;  %v2391_v13 = vshrl.u32 %v2216_v6, 16  ;;  %v3481_v34 = vsel %vm5533_vm7, %v3476_v15, %v3480_v16  ;;  %v2777_v15 = vld [vmem:[#allocation2 + $0x54] sm:$0xe] }
 0x17b   : > { %v2078_v22 = vpop.permute.xlu0 %2077  ;;  %v3457_v19 = vsel %vm5533_vm7, %v3452_v52, %v3456_v5 }
 0x17c   : > { %2170 = vst.msk [vmem:[#allocation3 + $0x10] sm:$0xf] %vm2165_vm3, %v2078_v22  ;;  %v2080_v29 = vpop.permute.xlu1 %2079  ;;  %v2400_v22 = vshll.u32 %v2217_v11, 16  ;;  %v2393_v28 = vrot.slane %v2391_v13, 4 }
 0x17d   : > { %2983 = vrot.lane.b32.xlu0 %v2886_v17, %s5395_s15  ;;  %2171 = vst.msk [vmem:[#allocation3 + $0x14] sm:$0xf] %vm2165_vm3, %v2080_v29  ;;  %v3977_v17 = vrot.slane %v3864_v53, 5  ;;  %v2396_v29 = vrot.slane %v2394_v61, 5 }
 0x17e   : > { %2985 = vrot.lane.b32.xlu1 %v2889_v23, %s5395_s15  ;;  %v2404_v23 = vshrl.u32 %v2217_v11, 16  ;;  %v2402_v38 = vrot.slane %v2400_v22, 5  ;;  %v2434_v11 = vshll.u32 %v2221_v1, 16  ;;  %v2779_v22 = vld [vmem:[#allocation2 + $0x5c] sm:$0x1] }
 0x17f   : > { %v2082_v36 = vpop.permute.xlu0 %2081  ;;  %v3979_v35 = vrot.slane %v3977_v17, 4  ;;  %v3978_v14 = vsel %vm5901_vm13, %v5051_v26, %v3977_v17  ;;  %v2902_v31 = vrot.slane %v2779_v22, 5 }
 0x180   : > { %2172 = vst.msk [vmem:[#allocation3 + $0x18] sm:$0xf] %vm2165_vm3, %v2082_v36  ;;  %v2084_v40 = vpop.permute.xlu1 %2083  ;;  %v3980_v36 = vrot.slane %v3865_v20, 5  ;;  %v2406_v39 = vrot.slane %v2404_v23, 4  ;;  %v2436_v18 = vrot.slane %v2434_v11, 5 }
 0x181   : > { %2987 = vrot.lane.b32.xlu0 %v2893_v32, %s5395_s15  ;;  %2173 = vst.msk [vmem:[#allocation3 + $0x1c] sm:$0xf] %vm2165_vm3, %v2084_v40  ;;  %v2424_v40 = vshll.u32 %v2220_v27, 16  ;;  %v2781_v20 = vld [vmem:[#allocation2 + $0x64] sm:$0xf] }
 0x182   : > { %2989 = vrot.lane.b32.xlu1 %v2896_v47, %s5395_s15  ;;  %v3868_v47 = vld [vmem:[#allocation2 + $0x5c] sm:$0x1]  ;;  %v3981_v49 = vsel %vm5901_vm13, %v3979_v35, %v3980_v36  ;;  %v2906_v27 = vrot.slane %v2781_v20, 5  ;;  %v3309_v36 = vld [vmem:[#allocation2 + $0x64] sm:$0xf] }
 0x183   : > { %v2086_v45 = vpop.permute.xlu0 %2085  ;;  %v3987_v51 = vrot.slane %v3868_v47, 5 }
 0x184   : > { %2174 = vst.msk [vmem:[#allocation3 + $0x20] sm:$0xf] %vm2165_vm3, %v2086_v45  ;;  %v2088_v56 = vpop.permute.xlu1 %2087  ;;  %v2397_v45 = vor.u32 %v2396_v29, %v2393_v28  ;;  %v3308_v28 = vld [vmem:[#allocation2 + $0x60] sm:$0xf] }
 0x185   : > { %3177 = vrot.lane.b32.xlu0 %v3105_v43, %s5396_s16  ;;  %2175 = vst.msk [vmem:[#allocation3 + $0x24] sm:$0xf] %vm2165_vm3, %v2088_v56  ;;  %v2218_v43 = vld [vmem:[#allocation2 + $0x5c] sm:$0x1]  ;;  %v2407_v56 = vor.u32 %v2406_v39, %v2402_v38  ;;  %v3988_v5 = vsel %vm5901_vm13, %v3986_v50, %v3987_v51  ;;  %v3483_v2 = vshrl.u32 %v3308_v28, 16  ;;  %v3486_v47 = vshll.u32 %v3308_v28, 16 }
 0x186   : > { %3179 = vrot.lane.b32.xlu1 %v3106_v4, %s5396_s16  ;;  %v2410_v57 = vshll.u32 %v2218_v43, 16  ;;  %v2398_v6 = vrot.slane %v2397_v45, 4  ;;  %v2908_v39 = vrot.slane %v2906_v27, 4  ;;  %v3496_v43 = vshrl.u32 %v3309_v36, 16 }
 0x187   : > { %v2090_v0 = vpop.permute.xlu0 %2089  ;;  %v2408_v53 = vrot.slane %v2407_v56, 4  ;;  %v3510_v50 = vshll.u32 %v3311_v41, 16 }
 0x188   : > { %2176 = vst.msk [vmem:[#allocation3 + $0x28] sm:$0xf] %vm2165_vm3, %v2090_v0  ;;  %v2092_v8 = vpop.permute.xlu1 %2091  ;;  %v2403_v13 = vsel %vm5533_vm7, %v2398_v6, %v2402_v38  ;;  %v3109_v6 = vld [vmem:[#allocation2 + $0x60] sm:$0xf] }
 0x189   : > { %3181 = vrot.lane.b32.xlu0 %v3107_v60, %s5396_s16  ;;  %2177 = vst.msk [vmem:[#allocation3 + $0x2c] sm:$0xf] %vm2165_vm3, %v2092_v8  ;;  %v2426_v60 = vrot.slane %v2424_v40, 5  ;;  %v2412_v8 = vrot.slane %v2410_v57, 5 }
 0x18a   : > { %3183 = vrot.lane.b32.xlu1 %v3108_v7, %s5396_s16  ;;  %v2421_v7 = vor.u32 %v2420_v48, %v2417_v46  ;;  %v3312_v46 = vld [vmem:[#allocation2 + $0x70] sm:$0xf]  ;;  %v3485_v48 = vrot.slane %v3483_v2, 4 }
 0x18b   : > { %v2094_v10 = vpop.permute.xlu0 %2093  ;;  %v2431_v9 = vor.u32 %v2430_v54, %v2426_v60  ;;  %v2413_v16 = vsel %vm5533_vm7, %v2408_v53, %v2412_v8  ;;  %v3516_v54 = vshll.u32 %v3312_v46, 16  ;;  %v3110_v8 = vld [vmem:[#allocation2 + $0x64] sm:$0xf] }
 0x18c   : > { %2178 = vst.msk [vmem:[#allocation3 + $0x30] sm:$0xf] %vm2165_vm3, %v2094_v10  ;;  %v2096_v24 = vpop.permute.xlu1 %2095  ;;  %v2422_v61 = vrot.slane %v2421_v7, 4 }
 0x18d   : > { %3738 = vrot.lane.b32.xlu0 %v3447_v12, %s5397_s19  ;;  %2179 = vst.msk [vmem:[#allocation3 + $0x34] sm:$0xf] %vm2165_vm3, %v2096_v24  ;;  %v2432_v17 = vrot.slane %v2431_v9, 4  ;;  %v5037_v24 = vrot.slane %v2777_v15, 9 }
 0x18e   : > { %3740 = vrot.lane.b32.xlu1 %v3457_v19, %s5397_s19  ;;  %v2899_v19 = vrot.slane %v2778_v58, 5  ;;  %v2427_v23 = vsel %vm5533_vm7, %v2422_v61, %v2426_v60  ;;  %v3498_v60 = vrot.slane %v3496_v43, 4  ;;  %v3313_v58 = vld [vmem:[#allocation2 + $0x74] sm:$0x1] }
 0x18f   : > { %v2098_v32 = vpop.permute.xlu0 %2097  ;;  %v2437_v29 = vsel %vm5533_vm7, %v2432_v17, %v2436_v18  ;;  %v3526_v18 = vshll.u32 %v3313_v58, 16 }
 0x190   : > { %2180 = vst.msk [vmem:[#allocation3 + $0x38] sm:$0xf] %vm2165_vm3, %v2098_v32  ;;  %v2100_v42 = vpop.permute.xlu1 %2099  ;;  %v2901_v30 = vrot.slane %v2899_v19, 4  ;;  %v2782_v32 = vld [vmem:[#allocation2 + $0x68] sm:$0x1]  ;;  %v2900_v37 = vsel %vm5901_vm13, %v5037_v24, %v2899_v19 }
 0x191   : > { %3742 = vrot.lane.b32.xlu0 %v3471_v25, %s5397_s19  ;;  %2181 = vst.msk [vmem:[#allocation3 + $0x3c] sm:$0xf] %vm2165_vm3, %v2100_v42  ;;  %v2780_v25 = vld [vmem:[#allocation2 + $0x60] sm:$0xe]  ;;  %v2909_v40 = vrot.slane %v2782_v32, 5 }
 0x192   : > { %3744 = vrot.lane.b32.xlu1 %v3481_v34, %s5397_s19  ;;  %v5038_v35 = vrot.slane %v2780_v25, 9  ;;  %v2903_v42 = vsel %vm5901_vm13, %v2901_v30, %v2902_v31  ;;  %v3112_v19 = vld [vmem:[#allocation2 + $0x70] sm:$0xf]  ;;  %v3870_v24 = vld [vmem:[#allocation2 + $0x64] sm:$0xf] }
 0x193   : > { %v2102_v4 = vpop.permute.xlu0 %2101  ;;  %v2910_v56 = vsel %vm5901_vm13, %v2908_v39, %v2909_v40  ;;  %v2222_v30 = vld [vmem:[#allocation2 + $0x6c] sm:$0xf] }
 0x194   : > { %2182 = vst.msk [vmem:[#allocation3 + $0x40] sm:$0xf] %vm2165_vm3, %v2102_v4  ;;  %v2104_v0 = vpop.permute.xlu1 %2103  ;;  %v2907_v45 = vsel %vm5901_vm13, %v5038_v35, %v2906_v27  ;;  %v3488_v4 = vrot.slane %v3486_v47, 5  ;;  %v3869_v27 = vld [vmem:[#allocation2 + $0x60] sm:$0xe]  ;;  %v2439_v40 = vshrl.u32 %v2222_v30, 16 }
 0x195   : > { %4075 = vrot.lane.b32.xlu0 %v3978_v14, %s5398_s28  ;;  %2183 = vst.msk [vmem:[#allocation3 + $0x44] sm:$0xf] %vm2165_vm3, %v2104_v0  ;;  %v3492_v14 = vshll.u32 %v3309_v36, 16  ;;  %v3520_v0 = vshrl.u32 %v3312_v46, 16  ;;  %v3873_v35 = vld [vmem:[#allocation2 + $0x70] sm:$0xf] }
 0x196   : > { %4077 = vrot.lane.b32.xlu1 %v3981_v49, %s5398_s28  ;;  %v3507_v49 = vshrl.u32 %v3311_v41, 16  ;;  %v3489_v7 = vor.u32 %v3488_v4, %v3485_v48  ;;  %v2223_v36 = vld [vmem:[#allocation2 + $0x70] sm:$0xf]  ;;  %v5053_v2 = vrot.slane %v3869_v27, 9  ;;  %v3871_v47 = vld [vmem:[#allocation2 + $0x68] sm:$0x1] }
 0x197   : > { %v2631_v52 = vpop.permute.xlu0 %2630  ;;  %v3494_v57 = vrot.slane %v3492_v14, 5  ;;  %v3872_v39 = vld [vmem:[#allocation2 + $0x6c] sm:$0xe]  ;;  %v2442_v41 = vshll.u32 %v2222_v30, 16  ;;  %v3998_v14 = vrot.slane %v3873_v35, 5  ;;  %v2448_v43 = vshll.u32 %v2223_v36, 16 }
 0x198   : > { %2727 = vst.msk [vmem:[#allocation3] sm:$0xf] %vm2726_vm4, %v2631_v52  ;;  %v2633_v12 = vpop.permute.xlu1 %2632  ;;  %v3509_v52 = vrot.slane %v3507_v49, 4  ;;  %v3490_v15 = vrot.slane %v3489_v7, 4  ;;  %v3994_v4 = vrot.slane %v3871_v47, 5 }
 0x199   : > { %4079 = vrot.lane.b32.xlu0 %v3985_v59, %s5398_s28  ;;  %2728 = vst.msk [vmem:[#allocation3 + $0x4] sm:$0xf] %vm2726_vm4, %v2633_v12  ;;  %v3310_v59 = vld [vmem:[#allocation2 + $0x68] sm:$0x1]  ;;  %v3499_v9 = vor.u32 %v3498_v60, %v3494_v57  ;;  %v3518_v12 = vrot.slane %v3516_v54, 5  ;;  %v2441_v60 = vrot.slane %v2439_v40, 4 }
 0x19a   : > { %4081 = vrot.lane.b32.xlu1 %v3988_v5, %s5398_s28  ;;  %v3512_v5 = vrot.slane %v3510_v50, 5  ;;  %v3502_v11 = vshll.u32 %v3310_v59, 16  ;;  %v3495_v25 = vsel %vm5533_vm7, %v3490_v15, %v3494_v57  ;;  %v2226_v57 = vld [vmem:[#allocation2 + $0x7c] sm:$0xf]  ;;  %v2444_v54 = vrot.slane %v2442_v41, 5 }
 0x19b   : > { %v2635_v10 = vpop.permute.xlu0 %2634  ;;  %v3500_v20 = vrot.slane %v3499_v9, 4  ;;  %v6360_v7 = vrot.slane %v2448_v43, 5  ;;  %v2472_v9 = vshll.u32 %v2226_v57, 16  ;;  %v5381_v30 = vld [vmem:[%s6936_s2] ss:$0 sm:$0xff] }
 0x19c   : > { %2729 = vst.msk [vmem:[#allocation3 + $0x8] sm:$0xf] %vm2726_vm4, %v2635_v10  ;;  %v2637_v21 = vpop.permute.xlu1 %2636  ;;  %v3111_v10 = vld [vmem:[#allocation2 + $0x6c] sm:$0xf]  ;;  %v2445_v15 = vor.u32 %v2444_v54, %v2441_v60  ;;  %v2787_v54 = vld [vmem:[#allocation2 + $0x7c] sm:$0xf] }
 0x19d   : > { %2654 = vrot.lane.b32.xlu0 %v2403_v13, %s5394_s14  ;;  %2730 = vst.msk [vmem:[#allocation3 + $0xc] sm:$0xf] %vm2726_vm4, %v2637_v21  ;;  %v3522_v13 = vrot.slane %v3520_v0, 4  ;;  %v3504_v21 = vrot.slane %v3502_v11, 5  ;;  %v2476_v11 = vshrl.u32 %v2226_v57, 16 }
 0x19e   : > { %2656 = vrot.lane.b32.xlu1 %v2413_v16, %s5394_s14  ;;  %v3513_v16 = vor.u32 %v3512_v5, %v3509_v52 }
 0x19f   : > { %v2968_v26 = vpop.permute.xlu0 %2967  ;;  %v3523_v22 = vor.u32 %v3522_v13, %v3518_v12  ;;  %v3505_v31 = vsel %vm5533_vm7, %v3500_v20, %v3504_v21  ;;  %v5380_v21 = vld [vmem:[%s6935_s1] ss:$0 sm:$0xff]  ;;  %v2478_v27 = vrot.slane %v2476_v11, 4 }
 0x1a0   : > { %3064 = vst.msk [vmem:[#allocation3] sm:$0xf] %vm3063_vm5, %v2968_v26  ;;  %v2970_v34 = vpop.permute.xlu1 %2969  ;;  %v3514_v26 = vrot.slane %v3513_v16, 4 }
 0x1a1   : > { %2658 = vrot.lane.b32.xlu0 %v2427_v23, %s5394_s14  ;;  %3065 = vst.msk [vmem:[#allocation3 + $0x4] sm:$0xf] %vm3063_vm5, %v2970_v34  ;;  %v3524_v32 = vrot.slane %v3523_v22, 4  ;;  %v3991_v34 = vrot.slane %v3870_v24, 5 }
 0x1a2   : > { %2660 = vrot.lane.b32.xlu1 %v2437_v29, %s5394_s14  ;;  %v3528_v29 = vrot.slane %v3526_v18, 5 }
 0x1a3   : > { %v2972_v38 = vpop.permute.xlu0 %2971  ;;  %v3993_v48 = vrot.slane %v3991_v34, 4  ;;  %v3992_v50 = vsel %vm5901_vm13, %v5053_v2, %v3991_v34  ;;  %v2446_v34 = vrot.slane %v2445_v15, 4 }
 0x1a4   : > { %3066 = vst.msk [vmem:[#allocation3 + $0x8] sm:$0xf] %vm3063_vm5, %v2972_v38  ;;  %v2974_v44 = vpop.permute.xlu1 %2973  ;;  %v3519_v38 = vsel %vm5533_vm7, %v3514_v26, %v3518_v12  ;;  %v3529_v46 = vsel %vm5533_vm7, %v3524_v32, %v3528_v29  ;;  %v5276_v12 = vld [vmem:[%s5508_s26 + $0x78] sm:$0xff]   ;;  %v2227_v26 = vld [vmem:[#allocation2 + $0x80] sm:$0x1] }
 0x1a5   : > { %2991 = vrot.lane.b32.xlu0 %v2900_v37, %s5395_s15  ;;  %3067 = vst.msk [vmem:[#allocation3 + $0xc] sm:$0xf] %vm3063_vm5, %v2974_v44  ;;  %v2452_v44 = vshrl.u32 %v2223_v36, 16  ;;  %v3995_v5 = vsel %vm5901_vm13, %v3993_v48, %v3994_v4  ;;  %v5260_v13 = vunpack.c.l.bf16 %v5276_v12  ;;  %v2023_v32 = vld [vmem:[#allocation2 + $0x78] sm:$0xf] }
 0x1a6   : > { %2993 = vrot.lane.b32.xlu1 %v2903_v42, %s5395_s15 }
 0x1a7   : > { %v3162_v51 = vpop.permute.xlu0 %3161  ;;  %v2454_v52 = vrot.slane %v2452_v44, 4  ;;  %v371_v22 = vmul.f32 %v5380_v21, %v5260_v13  ;;  %v2784_v44 = vld [vmem:[#allocation2 + $0x70] sm:$0xf]  ;;  %v3314_v13 = vld [vmem:[#allocation2 + $0x78] sm:$0xf] }
 0x1a8   : > { %3258 = vst.msk [vmem:[#allocation3] sm:$0xf] %vm3257_vm6, %v3162_v51  ;;  %v3164_v1 = vpop.permute.xlu1 %3163  ;;  %v5054_v51 = vrot.slane %v3872_v39, 9  ;;  %v2024_v39 = vld [vmem:[#allocation2 + $0x7c] sm:$0xf]  ;;  %v2913_v60 = vrot.slane %v2784_v44, 5 }
 0x1a9   : > { %2995 = vrot.lane.b32.xlu0 %v2907_v45, %s5395_s15  ;;  %3259 = vst.msk [vmem:[#allocation3 + $0x4] sm:$0xf] %vm3257_vm6, %v3164_v1  ;;  %v2225_v45 = vld [vmem:[#allocation2 + $0x78] sm:$0xf] }
 0x1aa   : > { %2997 = vrot.lane.b32.xlu1 %v2910_v56, %s5395_s15  ;;  %v3874_v56 = vld [vmem:[#allocation2 + $0x74] sm:$0x1]  ;;  %v2463_v0 = vshrl.u32 %v2225_v45, 16  ;;  %v2466_v1 = vshll.u32 %v2225_v45, 16  ;;  %v2451_v45 = vsel %vm5533_vm7, %v2446_v34, %v6360_v7 }
 0x1ab   : > { %v3166_v53 = vpop.permute.xlu0 %3165 }
 0x1ac   : > { %3260 = vst.msk [vmem:[#allocation3 + $0x8] sm:$0xf] %vm3257_vm6, %v3166_v53  ;;  %v3168_v61 = vpop.permute.xlu1 %3167  ;;  %v4001_v53 = vrot.slane %v3874_v56, 5  ;;  %v2465_v16 = vrot.slane %v2463_v0, 4  ;;  %v2783_v56 = vld [vmem:[#allocation2 + $0x6c] sm:$0xe] }
 0x1ad   : > { %3185 = vrot.lane.b32.xlu0 %v3109_v6, %s5396_s16  ;;  %3261 = vst.msk [vmem:[#allocation3 + $0xc] sm:$0xf] %vm3257_vm6, %v3168_v61  ;;  %v4000_v6 = vrot.slane %v3998_v14, 4  ;;  %v5261_v61 = vunpack.c.h.bf16 %v5276_v12 }
 0x1ae   : > { %3187 = vrot.lane.b32.xlu1 %v3110_v8, %s5396_s16  ;;  %v2224_v8 = vld [vmem:[#allocation2 + $0x74] sm:$0x1] }
 0x1af   : > { %v3723_v17 = vpop.permute.xlu0 %3722  ;;  %v2458_v20 = vshll.u32 %v2224_v8, 16  ;;  %v4002_v24 = vsel %vm5901_vm13, %v4000_v6, %v4001_v53  ;;  %v2785_v6 = vld [vmem:[#allocation2 + $0x74] sm:$0x1]  ;;  %v5039_v53 = vrot.slane %v2783_v56, 9  ;;  %v2786_v8 = vld [vmem:[#allocation2 + $0x78] sm:$0xe] }
 0x1b0   : > { %3819 = vst.msk [vmem:[#allocation3] sm:$0xf] %vm3818_vm11, %v3723_v17  ;;  %v3725_v23 = vpop.permute.xlu1 %3724  ;;  %v2468_v17 = vrot.slane %v2466_v1, 5  ;;  %v2916_v15 = vrot.slane %v2785_v6, 5 }
 0x1b1   : > { %3189 = vrot.lane.b32.xlu0 %v3111_v10, %s5396_s16  ;;  %3820 = vst.msk [vmem:[#allocation3 + $0x4] sm:$0xf] %vm3818_vm11, %v3725_v23  ;;  %v3999_v10 = vsel %vm5901_vm13, %v5054_v51, %v3998_v14  ;;  %v372_v23 = vmul.f32 %v5380_v21, %v5261_v61  ;;  %v2460_v47 = vrot.slane %v2458_v20, 5  ;;  %v5040_v20 = vrot.slane %v2786_v8, 9  ;;  %v3315_v21 = vld [vmem:[#allocation2 + $0x7c] sm:$0xf] }
 0x1b2   : > { %3191 = vrot.lane.b32.xlu1 %v3112_v19, %s5396_s16  ;;  %v2455_v19 = vor.u32 %v2454_v52, %v6360_v7  ;;  %v2469_v35 = vor.u32 %v2468_v17, %v2465_v16  ;;  %v2788_v16 = vld [vmem:[#allocation2 + $0x80] sm:$0x1] }
 0x1b3   : > { %v3727_v28 = vpop.permute.xlu0 %3726  ;;  %v411_v36 = vadd.f32 %v5381_v30, %v372_v23 }
 0x1b4   : > { %3821 = vst.msk [vmem:[#allocation3 + $0x8] sm:$0xf] %vm3818_vm11, %v3727_v28  ;;  %v3729_v37 = vpop.permute.xlu1 %3728  ;;  %v2456_v2 = vrot.slane %v2455_v19, 4 }
 0x1b5   : > { %3746 = vrot.lane.b32.xlu0 %v3495_v25, %s5397_s19  ;;  %3822 = vst.msk [vmem:[#allocation3 + $0xc] sm:$0xf] %vm3818_vm11, %v3729_v37  ;;  %v6378_v25 = vrot.slane %v2472_v9, 5 }
 0x1b6   : > { %3748 = vrot.lane.b32.xlu1 %v3505_v31, %s5397_s19  ;;  %v410_v31 = vadd.f32 %v5381_v30, %v371_v22  ;;  %v2923_v30 = vrot.slane %v2788_v16, 5 }
 0x1b7   : > { %v4060_v42 = vpop.permute.xlu0 %4059  ;;  %v2479_v40 = vor.u32 %v2478_v27, %v6378_v25 }
 0x1b8   : > { %4156 = vst.msk [vmem:[#allocation3] sm:$0xf] %vm4155_vm12, %v4060_v42  ;;  %v4062_v49 = vpop.permute.xlu1 %4061  ;;  %v442_v41 = vmax.f32 %v410_v31, 0.0  ;;  %v443_v42 = vmax.f32 %v411_v36, 0.0  ;;  %v3317_v31 = vld [vmem:[#allocation2 + $0x84] sm:$0xf] }
 0x1b9   : > { %3750 = vrot.lane.b32.xlu0 %v3519_v38, %s5397_s19  ;;  %4157 = vst.msk [vmem:[#allocation3 + $0x4] sm:$0xf] %vm4155_vm12, %v4062_v49  ;;  %v2482_v38 = vshll.u32 %v2227_v26, 16  ;;  %v2480_v57 = vrot.slane %v2479_v40, 4  ;;  %v3534_v26 = vshll.u32 %v3314_v13, 16  ;;  %v3540_v36 = vshll.u32 %v3315_v21, 16 }
 0x1ba   : > { %3752 = vrot.lane.b32.xlu1 %v3529_v46, %s5397_s19  ;;  %v2470_v46 = vrot.slane %v2469_v35, 4  ;;  %v5164_v48 = vpack.c.bf16 %v442_v41, %v442_v41  ;;  %v5165_v4 = vpack.c.bf16 %v443_v42, %v443_v42  ;;  %v3555_v41 = vshrl.u32 %v3317_v31, 16 }
 0x1bb   : > { %v4064_v59 = vpop.permute.xlu0 %4063  ;;  %v2484_v51 = vrot.slane %v2482_v38, 5  ;;  %v3318_v38 = vld [vmem:[#allocation2 + $0x88] sm:$0xf]  ;;  %v3536_v40 = vrot.slane %v3534_v26, 5  ;;  %v3558_v42 = vshll.u32 %v3317_v31, 16  ;;  %v3542_v44 = vrot.slane %v3540_v36, 5 }
 0x1bc   : > { %4158 = vst.msk [vmem:[#allocation3 + $0x8] sm:$0xf] %vm4155_vm12, %v4064_v59  ;;  %v4066_v58 = vpop.permute.xlu1 %4065  ;;  %v855_v0 = vshrl.u32 %v5164_v48, 16  ;;  %v863_v1 = vshrl.u32 %v5165_v4, 16  ;;  %v858_v7 = vshll.u32 %v5164_v48, 16  ;;  %v866_v52 = vshll.u32 %v5165_v4, 16 }
 0x1bd   : > { %4083 = vrot.lane.b32.xlu0 %v3992_v50, %s5398_s28  ;;  %4159 = vst.msk [vmem:[#allocation3 + $0xc] sm:$0xf] %vm4155_vm12, %v4066_v58  ;;  %v2461_v50 = vsel %vm5533_vm7, %v2456_v2, %v2460_v47  ;;  %v2920_v58 = vrot.slane %v2787_v54, 5  ;;  %v2485_v61 = vsel %vm5533_vm7, %v2480_v57, %v2484_v51  ;;  %v3568_v3 = vshrl.u32 %v3318_v38, 16  ;;  %v3316_v4 = vld [vmem:[#allocation2 + $0x80] sm:$0x1] }
 0x1be   : > { %4085 = vrot.lane.b32.xlu1 %v3995_v5, %s5398_s28  ;;  %v2475_v5 = vsel %vm5533_vm7, %v2470_v46, %v6378_v25  ;;  %v857_v9 = vrot.slane %v855_v0, 7  ;;  %v865_v11 = vrot.slane %v863_v1, 7  ;;  %v3531_v25 = vshrl.u32 %v3314_v13, 16  ;;  %v2228_v31 = vld [vmem:[#allocation2 + $0x84] sm:$0xf] }
 0x1bf   : > { %v2639_v18 = vpop.permute.xlu0 %2638  ;;  %v2921_v47 = vsel %vm5901_vm13, %v5040_v20, %v2920_v58  ;;  %v3564_v46 = vshll.u32 %v3318_v38, 16  ;;  %v3557_v51 = vrot.slane %v3555_v41, 4  ;;  %v3560_v56 = vrot.slane %v3558_v42, 5  ;;  %v3880_v36 = vld [vmem:[#allocation2 + $0x8c] sm:$0x1] }
 0x1c0   : > { %2731 = vst.msk [vmem:[#allocation3 + $0x10] sm:$0xf] %vm2726_vm4, %v2639_v18  ;;  %v2641_v28 = vpop.permute.xlu1 %2640  ;;  %v5362_v29 = vld [vmem:[#allocation3] sm:$0xff]   ;;  %v860_v17 = vor.u32 %v858_v7, %v857_v9  ;;  %v1030_v18 = vld [vmem:[#allocation2 + $0xc0] sm:$0xf]  ;;  %v861_v22 = vrot.slane %v857_v9, 4  ;;  %v868_v23 = vor.u32 %v866_v52, %v865_v11 }
 0x1c1   : > { %4087 = vrot.lane.b32.xlu0 %v3999_v10, %s5398_s28  ;;  %2732 = vst.msk [vmem:[#allocation3 + $0x14] sm:$0xf] %vm2726_vm4, %v2641_v28  ;;  %5302 = vmatprep.mubr.msk.bf16.mxu0 %vm4320_vm14, %v5362_v29  ;;  %v2915_v10 = vrot.slane %v2913_v60, 4  ;;  %v2922_v29 = vrot.slane %v2920_v58, 4  ;;  %v870_v34 = vrot.slane %v865_v11, 4  ;;  %v3550_v0 = vshll.u32 %v3316_v4, 16 }
 0x1c2   : > { %4089 = vrot.lane.b32.xlu1 %v4002_v24, %s5398_s28  ;;  %v2914_v24 = vsel %vm5901_vm13, %v5039_v53, %v2913_v60  ;;  %v1031_v27 = vsel %vm5553_vm9, %v860_v17, %v1030_v18  ;;  %v3114_v60 = vld [vmem:[#allocation2 + $0x7c] sm:$0xf]  ;;  %v3566_v1 = vrot.slane %v3564_v46, 5  ;;  %v3319_v7 = vld [vmem:[#allocation2 + $0x8c] sm:$0x1]  ;;  %v3561_v53 = vor.u32 %v3560_v56, %v3557_v51 }
 0x1c3   : > { %v2643_v37 = vpop.permute.xlu0 %2642  ;;  %1032 = vst [vmem:[#allocation2 + $0xc0] sm:$0xf] %v1031_v27  ;;  %v2917_v35 = vsel %vm5901_vm13, %v2915_v10, %v2916_v15  ;;  %v1035_v55 = vsel %vm5561_vm10, %v870_v34, %v1034_v62  ;;  %v3115_v52 = vld [vmem:[#allocation2 + $0x84] sm:$0xf]  ;;  %v3116_v9 = vld [vmem:[#allocation2 + $0x88] sm:$0xf] }
 0x1c4   : > { %2733 = vst.msk [vmem:[#allocation3 + $0x18] sm:$0xf] %vm2726_vm4, %v2643_v37  ;;  %v2645_v14 = vpop.permute.xlu1 %2644  ;;  %v5363_v43 = vld [vmem:[#allocation3 + $0x8] sm:$0xff]   ;;  %v3544_v37 = vshrl.u32 %v3315_v21, 16  ;;  %1036 = vst [vmem:[#allocation2 + $0xc8] sm:$0x1] %v1035_v55 }
 0x1c5   : > { %2105 = vrot.lane.b32.xlu0 %v2023_v32, %s5393_s13  ;;  %2734 = vst.msk [vmem:[#allocation3 + $0x1c] sm:$0xf] %vm2726_vm4, %v2645_v14  ;;  %5303 = vmatmul.mubr.msk.bf16.vlgmr.msra.gmra.mxu0 %vm4320_vm14, %v5363_v43  ;;  %v869_v32 = vsel %vm5547_vm8, %v861_v22, %v868_v23  ;;  %v2924_v43 = vsel %vm5901_vm13, %v2922_v29, %v2923_v30  ;;  %v3574_v13 = vshll.u32 %v3319_v7, 16  ;;  %v3876_v10 = vld [vmem:[#allocation2 + $0x7c] sm:$0xf]  ;;  %v3562_v16 = vrot.slane %v3561_v53, 4 }
 0x1c6   : > { %2107 = vrot.lane.b32.xlu1 %v2024_v39, %s5393_s13  ;;  %1033 = vst.msk [vmem:[#allocation2 + $0xc4] sm:$0xf] %vm444_vm0, %v869_v32  ;;  %v3533_v39 = vrot.slane %v3531_v25, 4  ;;  %v3875_v18 = vld [vmem:[#allocation2 + $0x78] sm:$0xe]  ;;  %v4005_v22 = vrot.slane %v3876_v10, 5 }
 0x1c7   : > { %v2976_v49 = vpop.permute.xlu0 %2975  ;;  %v3576_v21 = vrot.slane %v3574_v13, 5  ;;  %v3879_v23 = vld [vmem:[#allocation2 + $0x88] sm:$0xf]  ;;  %v3877_v25 = vld [vmem:[#allocation2 + $0x80] sm:$0x1]  ;;  %v3567_v26 = vsel %vm5533_vm7, %v3562_v16, %v3566_v1  ;;  %v5055_v27 = vrot.slane %v3875_v18, 9 }
 0x1c8   : > { %3068 = vst.msk [vmem:[#allocation3 + $0x10] sm:$0xf] %vm3063_vm5, %v2976_v49  ;;  %v2978_v59 = vpop.permute.xlu1 %2977  ;;  %v3113_v49 = vld [vmem:[#allocation2 + $0x78] sm:$0xf]  ;;  %v4012_v30 = vrot.slane %v3879_v23, 5  ;;  %v4007_v34 = vrot.slane %v4005_v22, 4 }
 0x1c9   : > { %2662 = vrot.lane.b32.xlu0 %v2451_v45, %s5394_s14  ;;  %3069 = vst.msk [vmem:[#allocation3 + $0x14] sm:$0xf] %vm3063_vm5, %v2978_v59  ;;  %v3546_v45 = vrot.slane %v3544_v37, 4  ;;  %v3570_v59 = vrot.slane %v3568_v3, 4  ;;  %v2487_v38 = vshrl.u32 %v2228_v31, 16  ;;  %v2490_v55 = vshll.u32 %v2228_v31, 16 }
 0x1ca   : > { %2664 = vrot.lane.b32.xlu1 %v2461_v50, %s5394_s14  ;;  %v3537_v50 = vor.u32 %v3536_v40, %v3533_v39  ;;  %v4014_v40 = vrot.slane %v4012_v30, 4  ;;  %v4015_v41 = vrot.slane %v3880_v36, 5  ;;  %v2231_v42 = vld [vmem:[#allocation2 + $0x90] sm:$0xf]  ;;  %v2230_v7 = vld [vmem:[#allocation2 + $0x8c] sm:$0x1] }
 0x1cb   : > { %v2980_v12 = vpop.permute.xlu0 %2979  ;;  %v3547_v54 = vor.u32 %v3546_v45, %v3542_v44  ;;  %v3571_v58 = vor.u32 %v3570_v59, %v3566_v1  ;;  %v2489_v4 = vrot.slane %v2487_v38, 4  ;;  %v2514_v51 = vshll.u32 %v2231_v42, 16  ;;  %v2027_v16 = vld [vmem:[#allocation2 + $0x90] sm:$0xf]  ;;  %v2793_v36 = vld [vmem:[#allocation2 + $0x94] sm:$0xf] }
 0x1cc   : > { %3070 = vst.msk [vmem:[#allocation3 + $0x18] sm:$0xf] %vm3063_vm5, %v2980_v12  ;;  %v2982_v19 = vpop.permute.xlu1 %2981  ;;  %v3552_v12 = vrot.slane %v3550_v0, 5  ;;  %v2792_v38 = vld [vmem:[#allocation2 + $0x90] sm:$0xe] }
 0x1cd   : > { %2666 = vrot.lane.b32.xlu0 %v2475_v5, %s5394_s14  ;;  %3071 = vst.msk [vmem:[#allocation3 + $0x1c] sm:$0xf] %vm3063_vm5, %v2982_v19  ;;  %v3538_v5 = vrot.slane %v3537_v50, 4  ;;  %v3548_v11 = vrot.slane %v3547_v54, 4  ;;  %v3572_v20 = vrot.slane %v3571_v58, 4  ;;  %v2511_v50 = vshrl.u32 %v2231_v42, 16 }
 0x1ce   : > { %2668 = vrot.lane.b32.xlu1 %v2485_v61, %s5394_s14  ;;  %v2506_v58 = vshll.u32 %v2230_v7, 16 }
 0x1cf   : > { %v3170_v28 = vpop.permute.xlu0 %3169  ;;  %v3543_v15 = vsel %vm5533_vm7, %v3538_v5, %v3542_v44  ;;  %v3553_v19 = vsel %vm5533_vm7, %v3548_v11, %v3552_v12  ;;  %v3577_v32 = vsel %vm5533_vm7, %v3572_v20, %v3576_v21  ;;  %v2513_v53 = vrot.slane %v2511_v50, 4  ;;  %v2026_v11 = vld [vmem:[#allocation2 + $0x88] sm:$0xf]  ;;  %v2028_v20 = vld [vmem:[#allocation2 + $0x94] sm:$0xf] }
 0x1d0   : > { %3262 = vst.msk [vmem:[#allocation3 + $0x10] sm:$0xf] %vm3257_vm6, %v3170_v28  ;;  %v3172_v2 = vpop.permute.xlu1 %3171  ;;  %v3878_v28 = vld [vmem:[#allocation2 + $0x84] sm:$0xe] }
 0x1d1   : > { %2999 = vrot.lane.b32.xlu0 %v2914_v24, %s5395_s15  ;;  %3263 = vst.msk [vmem:[#allocation3 + $0x14] sm:$0xf] %vm3257_vm6, %v3172_v2  ;;  %v5056_v62 = vrot.slane %v3878_v28, 9  ;;  %v2229_v2 = vld [vmem:[#allocation2 + $0x88] sm:$0xf] }
 0x1d2   : > { %3001 = vrot.lane.b32.xlu1 %v2917_v35, %s5395_s15  ;;  %v4008_v35 = vrot.slane %v3877_v25, 5  ;;  %v2500_v44 = vshrl.u32 %v2229_v2, 16 }
 0x1d3   : > { %v3174_v14 = vpop.permute.xlu0 %3173  ;;  %v4013_v3 = vsel %vm5901_vm13, %v5056_v62, %v4012_v30  ;;  %v2789_v30 = vld [vmem:[#allocation2 + $0x84] sm:$0xe]  ;;  %v2791_v62 = vld [vmem:[#allocation2 + $0x8c] sm:$0x1] }
 0x1d4   : > { %3264 = vst.msk [vmem:[#allocation3 + $0x18] sm:$0xf] %vm3257_vm6, %v3174_v14  ;;  %v3176_v48 = vpop.permute.xlu1 %3175  ;;  %v4009_v14 = vsel %vm5901_vm13, %v4007_v34, %v4008_v35  ;;  %v2502_v54 = vrot.slane %v2500_v44, 4 }
 0x1d5   : > { %3003 = vrot.lane.b32.xlu0 %v2921_v47, %s5395_s15  ;;  %3265 = vst.msk [vmem:[#allocation3 + $0x1c] sm:$0xf] %vm3257_vm6, %v3176_v48  ;;  %v4006_v47 = vsel %vm5901_vm13, %v5055_v27, %v4005_v22  ;;  %v2232_v48 = vld [vmem:[#allocation2 + $0x94] sm:$0xf]  ;;  %v2508_v22 = vrot.slane %v2506_v58, 5 }
 0x1d6   : > { %3005 = vrot.lane.b32.xlu1 %v2924_v43, %s5395_s15  ;;  %v2496_v43 = vshll.u32 %v2229_v2, 16  ;;  %v2520_v0 = vshll.u32 %v2232_v48, 16  ;;  %v2524_v1 = vshrl.u32 %v2232_v48, 16 }
 0x1d7   : > { %v3731_v57 = vpop.permute.xlu0 %3730 }
 0x1d8   : > { %3823 = vst.msk [vmem:[#allocation3 + $0x10] sm:$0xf] %vm3818_vm11, %v3731_v57  ;;  %v3733_v6 = vpop.permute.xlu1 %3732  ;;  %v4016_v57 = vsel %vm5901_vm13, %v4014_v40, %v4015_v41  ;;  %v2522_v13 = vrot.slane %v2520_v0, 5  ;;  %v3320_v40 = vld [vmem:[#allocation2 + $0x90] sm:$0xf] }
 0x1d9   : > { %3193 = vrot.lane.b32.xlu0 %v3113_v49, %s5396_s16  ;;  %3824 = vst.msk [vmem:[#allocation3 + $0x14] sm:$0xf] %vm3818_vm11, %v3733_v6  ;;  %v2492_v49 = vrot.slane %v2490_v55, 5  ;;  %v3579_v48 = vshrl.u32 %v3320_v40, 16 }
 0x1da   : > { %3195 = vrot.lane.b32.xlu1 %v3114_v60, %s5396_s16  ;;  %v2498_v60 = vrot.slane %v2496_v43, 5  ;;  %v2794_v43 = vld [vmem:[#allocation2 + $0x98] sm:$0x1] }
 0x1db   : > { %v3735_v8 = vpop.permute.xlu0 %3734  ;;  %v2493_v5 = vor.u32 %v2492_v49, %v2489_v4  ;;  %v3582_v4 = vshll.u32 %v3320_v40, 16 }
 0x1dc   : > { %3825 = vst.msk [vmem:[#allocation3 + $0x18] sm:$0xf] %vm3818_vm11, %v3735_v8  ;;  %v3737_v61 = vpop.permute.xlu1 %3736  ;;  %v2516_v8 = vrot.slane %v2514_v51, 5  ;;  %v2503_v12 = vor.u32 %v2502_v54, %v2498_v60  ;;  %v2937_v51 = vrot.slane %v2794_v43, 5 }
 0x1dd   : > { %3197 = vrot.lane.b32.xlu0 %v3115_v52, %s5396_s16  ;;  %3826 = vst.msk [vmem:[#allocation3 + $0x1c] sm:$0xf] %vm3818_vm11, %v3737_v61  ;;  %v2025_v52 = vld [vmem:[#allocation2 + $0x84] sm:$0xf]  ;;  %v2526_v61 = vrot.slane %v2524_v1, 4  ;;  %v3584_v7 = vrot.slane %v3582_v4, 5 }
 0x1de   : > { %3199 = vrot.lane.b32.xlu1 %v3116_v9, %s5396_s16  ;;  %v2517_v18 = vor.u32 %v2516_v8, %v2513_v53  ;;  %v2504_v21 = vrot.slane %v2503_v12, 4 }
 0x1df   : > { %v4068_v17 = vpop.permute.xlu0 %4067  ;;  %v2527_v23 = vor.u32 %v2526_v61, %v2522_v13  ;;  %v3322_v61 = vld [vmem:[#allocation2 + $0x98] sm:$0x1] }
 0x1e0   : > { %4160 = vst.msk [vmem:[#allocation3 + $0x10] sm:$0xf] %vm4155_vm12, %v4068_v17  ;;  %v4070_v24 = vpop.permute.xlu1 %4069  ;;  %v2494_v17 = vrot.slane %v2493_v5, 4  ;;  %v2518_v28 = vrot.slane %v2517_v18, 4  ;;  %v2509_v31 = vsel %vm5533_vm7, %v2504_v21, %v2508_v22  ;;  %v3598_v21 = vshll.u32 %v3322_v61, 16 }
 0x1e1   : > { %3754 = vrot.lane.b32.xlu0 %v3543_v15, %s5397_s19  ;;  %4161 = vst.msk [vmem:[#allocation3 + $0x14] sm:$0xf] %vm4155_vm12, %v4070_v24  ;;  %v2233_v15 = vld [vmem:[#allocation2 + $0x98] sm:$0x1]  ;;  %v2238_v61 = vld [vmem:[#allocation2 + $0xac] sm:$0xf] }
 0x1e2   : > { %3756 = vrot.lane.b32.xlu1 %v3553_v19, %s5397_s19  ;;  %v2530_v24 = vshll.u32 %v2233_v15, 16  ;;  %v2499_v27 = vsel %vm5533_vm7, %v2494_v17, %v2498_v60  ;;  %v2523_v2 = vsel %vm5533_vm7, %v2518_v28, %v2522_v13 }
 0x1e3   : > { %v4072_v29 = vpop.permute.xlu0 %4071 }
 0x1e4   : > { %4162 = vst.msk [vmem:[#allocation3 + $0x18] sm:$0xf] %vm4155_vm12, %v4072_v29  ;;  %v4074_v37 = vpop.permute.xlu1 %4073  ;;  %v2532_v34 = vrot.slane %v2530_v24, 5 }
 0x1e5   : > { %3758 = vrot.lane.b32.xlu0 %v3567_v26, %s5397_s19  ;;  %4163 = vst.msk [vmem:[#allocation3 + $0x1c] sm:$0xf] %vm4155_vm12, %v4074_v37  ;;  %v2790_v26 = vld [vmem:[#allocation2 + $0x88] sm:$0xf] }
 0x1e6   : > { %3760 = vrot.lane.b32.xlu1 %v3577_v32, %s5397_s19  ;;  %v2528_v32 = vrot.slane %v2527_v23, 4  ;;  %v2927_v35 = vrot.slane %v2790_v26, 5  ;;  %v3119_v26 = vld [vmem:[#allocation2 + $0x9c] sm:$0xf] }
 0x1e7   : > { %v2647_v39 = vpop.permute.xlu0 %2646 }
 0x1e8   : > { %2735 = vst.msk [vmem:[#allocation3 + $0x20] sm:$0xf] %vm2726_vm4, %v2647_v39  ;;  %v2649_v45 = vpop.permute.xlu1 %2648  ;;  %v5364_v46 = vld [vmem:[#allocation3 + $0x10] sm:$0xff]   ;;  %v2934_v39 = vrot.slane %v2793_v36, 5  ;;  %v2533_v41 = vsel %vm5533_vm7, %v2528_v32, %v2532_v34  ;;  %v2929_v42 = vrot.slane %v2927_v35, 4  ;;  %v3600_v32 = vrot.slane %v3598_v21, 5 }
 0x1e9   : > { %4091 = vrot.lane.b32.xlu0 %v4006_v47, %s5398_s28  ;;  %2736 = vst.msk [vmem:[#allocation3 + $0x24] sm:$0xf] %vm2726_vm4, %v2649_v45  ;;  %5306 = vmatprep.mubr.msk.bf16.mxu0 %vm4320_vm14, %v5364_v46  ;;  %v5041_v47 = vrot.slane %v2789_v30, 9  ;;  %v5042_v45 = vrot.slane %v2792_v38, 9  ;;  %v3321_v46 = vld [vmem:[#allocation2 + $0x94] sm:$0xf] }
 0x1ea   : > { %4093 = vrot.lane.b32.xlu1 %v4009_v14, %s5398_s28  ;;  %v2930_v14 = vrot.slane %v2791_v62, 5  ;;  %v2936_v50 = vrot.slane %v2934_v39, 4  ;;  %v3588_v60 = vshll.u32 %v3321_v46, 16  ;;  %v3592_v54 = vshrl.u32 %v3321_v46, 16  ;;  %v3120_v30 = vld [vmem:[#allocation2 + $0xa0] sm:$0xf] }
 0x1eb   : > { %v2651_v56 = vpop.permute.xlu0 %2650  ;;  %v2935_v1 = vsel %vm5901_vm13, %v5042_v45, %v2934_v39  ;;  %v3881_v38 = vld [vmem:[#allocation2 + $0x90] sm:$0xe] }
 0x1ec   : > { %2737 = vst.msk [vmem:[#allocation3 + $0x28] sm:$0xf] %vm2726_vm4, %v2651_v56  ;;  %v2653_v59 = vpop.permute.xlu1 %2652  ;;  %v5365_v6 = vld [vmem:[#allocation3 + $0x18] sm:$0xff]   ;;  %v3323_v56 = vld [vmem:[#allocation2 + $0x9c] sm:$0xf]  ;;  %v2938_v8 = vsel %vm5901_vm13, %v2936_v50, %v2937_v51  ;;  %v5057_v46 = vrot.slane %v3881_v38, 9 }
 0x1ed   : > { %4095 = vrot.lane.b32.xlu0 %v4013_v3, %s5398_s28  ;;  %2738 = vst.msk [vmem:[#allocation3 + $0x2c] sm:$0xf] %vm2726_vm4, %v2653_v59  ;;  %5307 = vmatmul.mubr.msk.bf16.gmra.mxu0 %vm4320_vm14, %v5365_v6  ;;  %v2928_v3 = vsel %vm5901_vm13, %v5041_v47, %v2927_v35  ;;  %v3324_v59 = vld [vmem:[#allocation2 + $0xa0] sm:$0xf]  ;;  %v3581_v6 = vrot.slane %v3579_v48, 4  ;;  %v3606_v5 = vshll.u32 %v3323_v56, 16 }
 0x1ee   : > { %4097 = vrot.lane.b32.xlu1 %v4016_v57, %s5398_s28  ;;  %v2931_v57 = vsel %vm5901_vm13, %v2929_v42, %v2930_v14  ;;  %v3612_v12 = vshll.u32 %v3324_v59, 16  ;;  %v3616_v58 = vshrl.u32 %v3324_v59, 16  ;;  %v3885_v42 = vld [vmem:[#allocation2 + $0xa0] sm:$0xf] }
 0x1ef   : > { %v2984_v9 = vpop.permute.xlu0 %2983  ;;  %v3585_v15 = vor.u32 %v3584_v7, %v3581_v6  ;;  %v3608_v17 = vrot.slane %v3606_v5, 5  ;;  %v4026_v4 = vrot.slane %v3885_v42, 5 }
 0x1f0   : > { %3072 = vst.msk [vmem:[#allocation3 + $0x20] sm:$0xf] %vm3063_vm5, %v2984_v9  ;;  %v2986_v10 = vpop.permute.xlu1 %2985  ;;  %v3590_v9 = vrot.slane %v3588_v60, 5  ;;  %v3614_v22 = vrot.slane %v3612_v12, 5  ;;  %v3618_v23 = vrot.slane %v3616_v58, 4 }
 0x1f1   : > { %2109 = vrot.lane.b32.xlu0 %v2025_v52, %s5393_s13  ;;  %3073 = vst.msk [vmem:[#allocation3 + $0x24] sm:$0xf] %vm3063_vm5, %v2986_v10  ;;  %v3603_v52 = vshrl.u32 %v3323_v56, 16  ;;  %v3117_v10 = vld [vmem:[#allocation2 + $0x90] sm:$0xf]  ;;  %v4028_v5 = vrot.slane %v4026_v4, 4 }
 0x1f2   : > { %2111 = vrot.lane.b32.xlu1 %v2026_v11, %s5393_s13  ;;  %v3594_v11 = vrot.slane %v3592_v54, 4  ;;  %v3619_v34 = vor.u32 %v3618_v23, %v3614_v22  ;;  %v2572_v23 = vshrl.u32 %v2238_v61, 16 }
 0x1f3   : > { %v2988_v19 = vpop.permute.xlu0 %2987 }
 0x1f4   : > { %3074 = vst.msk [vmem:[#allocation3 + $0x28] sm:$0xf] %vm3063_vm5, %v2988_v19  ;;  %v2990_v25 = vpop.permute.xlu1 %2989  ;;  %v3118_v19 = vld [vmem:[#allocation2 + $0x94] sm:$0xf]  ;;  %v3620_v39 = vrot.slane %v3619_v34, 4 }
 0x1f5   : > { %2113 = vrot.lane.b32.xlu0 %v2027_v16, %s5393_s13  ;;  %3075 = vst.msk [vmem:[#allocation3 + $0x2c] sm:$0xf] %vm3063_vm5, %v2990_v25  ;;  %v3605_v16 = vrot.slane %v3603_v52, 4  ;;  %v3325_v25 = vld [vmem:[#allocation2 + $0xa4] sm:$0x1] }
 0x1f6   : > { %2115 = vrot.lane.b32.xlu1 %v2028_v20, %s5393_s13  ;;  %v3595_v20 = vor.u32 %v3594_v11, %v3590_v9  ;;  %v3622_v35 = vshll.u32 %v3325_v25, 16  ;;  %v2236_v25 = vld [vmem:[#allocation2 + $0xa4] sm:$0x1] }
 0x1f7   : > { %v3178_v29 = vpop.permute.xlu0 %3177  ;;  %v3609_v28 = vor.u32 %v3608_v17, %v3605_v16  ;;  %v2554_v34 = vshll.u32 %v2236_v25, 16 }
 0x1f8   : > { %3266 = vst.msk [vmem:[#allocation3 + $0x20] sm:$0xf] %vm3257_vm6, %v3178_v29  ;;  %v3180_v37 = vpop.permute.xlu1 %3179  ;;  %v3624_v40 = vrot.slane %v3622_v35, 5 }
 0x1f9   : > { %2670 = vrot.lane.b32.xlu0 %v2499_v27, %s5394_s14  ;;  %3267 = vst.msk [vmem:[#allocation3 + $0x24] sm:$0xf] %vm3257_vm6, %v3180_v37  ;;  %v3586_v27 = vrot.slane %v3585_v15, 4  ;;  %v3882_v37 = vld [vmem:[#allocation2 + $0x94] sm:$0xf] }
 0x1fa   : > { %2672 = vrot.lane.b32.xlu1 %v2509_v31, %s5394_s14  ;;  %v3596_v31 = vrot.slane %v3595_v20, 4  ;;  %v3625_v50 = vsel %vm5533_vm7, %v3620_v39, %v3624_v40  ;;  %v2032_v39 = vld [vmem:[#allocation2 + $0xac] sm:$0xf] }
 0x1fb   : > { %v3182_v55 = vpop.permute.xlu0 %3181  ;;  %v3591_v62 = vsel %vm5533_vm7, %v3586_v27, %v3590_v9 }
 0x1fc   : > { %3268 = vst.msk [vmem:[#allocation3 + $0x28] sm:$0xf] %vm3257_vm6, %v3182_v55  ;;  %v3184_v44 = vpop.permute.xlu1 %3183  ;;  %v3601_v55 = vsel %vm5533_vm7, %v3596_v31, %v3600_v32  ;;  %v2030_v31 = vld [vmem:[#allocation2 + $0xa0] sm:$0xf] }
 0x1fd   : > { %2674 = vrot.lane.b32.xlu0 %v2523_v2, %s5394_s14  ;;  %3269 = vst.msk [vmem:[#allocation3 + $0x2c] sm:$0xf] %vm3257_vm6, %v3184_v44  ;;  %v3610_v2 = vrot.slane %v3609_v28, 4  ;;  %v3883_v44 = vld [vmem:[#allocation2 + $0x98] sm:$0x1] }
 0x1fe   : > { %2676 = vrot.lane.b32.xlu1 %v2533_v41, %s5394_s14  ;;  %v4019_v41 = vrot.slane %v3882_v37, 5  ;;  %v4022_v56 = vrot.slane %v3883_v44, 5  ;;  %v2796_v44 = vld [vmem:[#allocation2 + $0xa0] sm:$0xf] }
 0x1ff   : > { %v3739_v49 = vpop.permute.xlu0 %3738  ;;  %v3615_v45 = vsel %vm5533_vm7, %v3610_v2, %v3614_v22  ;;  %v2568_v22 = vshll.u32 %v2238_v61, 16  ;;  %v2031_v2 = vld [vmem:[#allocation2 + $0xa8] sm:$0xf] }
 0x200   : > { %3827 = vst.msk [vmem:[#allocation3 + $0x20] sm:$0xf] %vm3818_vm11, %v3739_v49  ;;  %v3741_v0 = vpop.permute.xlu1 %3740  ;;  %v2234_v49 = vld [vmem:[#allocation2 + $0x9c] sm:$0xf]  ;;  %v4021_v51 = vrot.slane %v4019_v41, 4  ;;  %v4020_v59 = vsel %vm5901_vm13, %v5057_v46, %v4019_v41  ;;  %v2556_v41 = vrot.slane %v2554_v34, 5 }
 0x201   : > { %3007 = vrot.lane.b32.xlu0 %v2928_v3, %s5395_s15  ;;  %3828 = vst.msk [vmem:[#allocation3 + $0x24] sm:$0xf] %vm3818_vm11, %v3741_v0  ;;  %v3884_v3 = vld [vmem:[#allocation2 + $0x9c] sm:$0xe]  ;;  %v2535_v6 = vshrl.u32 %v2234_v49, 16  ;;  %v2538_v7 = vshll.u32 %v2234_v49, 16 }
 0x202   : > { %3009 = vrot.lane.b32.xlu1 %v2931_v57, %s5395_s15  ;;  %v3886_v57 = vld [vmem:[#allocation2 + $0xa4] sm:$0x1]  ;;  %v5058_v0 = vrot.slane %v3884_v3, 9  ;;  %v4023_v9 = vsel %vm5901_vm13, %v4021_v51, %v4022_v56  ;;  %v2570_v35 = vrot.slane %v2568_v22, 5  ;;  %v2941_v51 = vrot.slane %v2796_v44, 5 }
 0x203   : > { %v3743_v53 = vpop.permute.xlu0 %3742  ;;  %v2540_v15 = vrot.slane %v2538_v7, 5  ;;  %v2799_v56 = vld [vmem:[#allocation2 + $0xac] sm:$0xf]  ;;  %v3326_v7 = vld [vmem:[#allocation2 + $0xa8] sm:$0xf] }
 0x204   : > { %3829 = vst.msk [vmem:[#allocation3 + $0x28] sm:$0xf] %vm3818_vm11, %v3743_v53  ;;  %v3745_v13 = vpop.permute.xlu1 %3744  ;;  %v4029_v53 = vrot.slane %v3886_v57, 5  ;;  %v3630_v61 = vshll.u32 %v3326_v7, 16  ;;  %v3331_v44 = vld [vmem:[#allocation2 + $0xbc] sm:$0x1] }
 0x205   : > { %3011 = vrot.lane.b32.xlu0 %v2935_v1, %s5395_s15  ;;  %3830 = vst.msk [vmem:[#allocation3 + $0x2c] sm:$0xf] %vm3818_vm11, %v3745_v13  ;;  %v2235_v1 = vld [vmem:[#allocation2 + $0xa0] sm:$0xf]  ;;  %v4027_v13 = vsel %vm5901_vm13, %v5058_v0, %v4026_v4 }
 0x206   : > { %3013 = vrot.lane.b32.xlu1 %v2938_v8, %s5395_s15  ;;  %v2237_v8 = vld [vmem:[#allocation2 + $0xa8] sm:$0xf]  ;;  %v2544_v11 = vshll.u32 %v2235_v1, 16  ;;  %v2548_v12 = vshrl.u32 %v2235_v1, 16  ;;  %v3632_v25 = vrot.slane %v3630_v61, 5 }
 0x207   : > { %v4076_v18 = vpop.permute.xlu0 %4075  ;;  %v2559_v16 = vshrl.u32 %v2237_v8, 16  ;;  %v2562_v17 = vshll.u32 %v2237_v8, 16  ;;  %v2798_v1 = vld [vmem:[#allocation2 + $0xa8] sm:$0xe]  ;;  %v2800_v8 = vld [vmem:[#allocation2 + $0xb0] sm:$0x1] }
 0x208   : > { %4164 = vst.msk [vmem:[#allocation3 + $0x20] sm:$0xf] %vm4155_vm12, %v4076_v18  ;;  %v4078_v24 = vpop.permute.xlu1 %4077  ;;  %v2546_v20 = vrot.slane %v2544_v11, 5  ;;  %v2550_v21 = vrot.slane %v2548_v12, 4  ;;  %v5044_v11 = vrot.slane %v2798_v1, 9 }
 0x209   : > { %3201 = vrot.lane.b32.xlu0 %v3117_v10, %s5396_s16  ;;  %4165 = vst.msk [vmem:[#allocation3 + $0x24] sm:$0xf] %vm4155_vm12, %v4078_v24  ;;  %v2537_v10 = vrot.slane %v2535_v6, 4  ;;  %v2561_v28 = vrot.slane %v2559_v16, 4  ;;  %v2948_v6 = vrot.slane %v2799_v56, 5  ;;  %v2951_v16 = vrot.slane %v2800_v8, 5 }
 0x20a   : > { %3203 = vrot.lane.b32.xlu1 %v3118_v19, %s5396_s16  ;;  %v4030_v19 = vsel %vm5901_vm13, %v4028_v5, %v4029_v53  ;;  %v2551_v32 = vor.u32 %v2550_v21, %v2546_v20  ;;  %v2943_v5 = vrot.slane %v2941_v51, 4  ;;  %v3327_v12 = vld [vmem:[#allocation2 + $0xac] sm:$0xf]  ;;  %v3670_v56 = vshll.u32 %v3331_v44, 16  ;;  %v3891_v8 = vld [vmem:[#allocation2 + $0xb8] sm:$0xf] }
 0x20b   : > { %v4080_v29 = vpop.permute.xlu0 %4079  ;;  %v2541_v27 = vor.u32 %v2540_v15, %v2537_v10  ;;  %v2950_v15 = vrot.slane %v2948_v6, 4  ;;  %v2949_v22 = vsel %vm5901_vm13, %v5044_v11, %v2948_v6  ;;  %v3887_v6 = vld [vmem:[#allocation2 + $0xa8] sm:$0xe]  ;;  %v3889_v11 = vld [vmem:[#allocation2 + $0xb0] sm:$0x1] }
 0x20c   : > { %4166 = vst.msk [vmem:[#allocation3 + $0x28] sm:$0xf] %vm4155_vm12, %v4080_v29  ;;  %v4082_v36 = vpop.permute.xlu1 %4081  ;;  %v2564_v29 = vrot.slane %v2562_v17, 5  ;;  %v2552_v40 = vrot.slane %v2551_v32, 4  ;;  %v3329_v17 = vld [vmem:[#allocation2 + $0xb4] sm:$0xf] }
 0x20d   : > { %3205 = vrot.lane.b32.xlu0 %v3119_v26, %s5396_s16  ;;  %4167 = vst.msk [vmem:[#allocation3 + $0x2c] sm:$0xf] %vm4155_vm12, %v4082_v36  ;;  %v2029_v26 = vld [vmem:[#allocation2 + $0x9c] sm:$0xf]  ;;  %v2574_v36 = vrot.slane %v2572_v23, 4 }
 0x20e   : > { %3207 = vrot.lane.b32.xlu1 %v3120_v30, %s5396_s16  ;;  %v2565_v38 = vor.u32 %v2564_v29, %v2561_v28  ;;  %v2557_v4 = vsel %vm5533_vm7, %v2552_v40, %v2556_v41  ;;  %v3330_v23 = vld [vmem:[#allocation2 + $0xb8] sm:$0xf]  ;;  %v2952_v29 = vsel %vm5901_vm13, %v2950_v15, %v2951_v16  ;;  %v2240_v15 = vld [vmem:[#allocation2 + $0xb4] sm:$0xf] }
 0x20f   : > { %v2655_v47 = vpop.permute.xlu0 %2654  ;;  %v2575_v42 = vor.u32 %v2574_v36, %v2570_v35  ;;  %v3660_v32 = vshll.u32 %v3330_v23, 16  ;;  %v3664_v34 = vshrl.u32 %v3330_v23, 16  ;;  %v3328_v36 = vld [vmem:[#allocation2 + $0xb0] sm:$0x1]  ;;  %v2033_v44 = vld [vmem:[#allocation2 + $0xb4] sm:$0xf] }
 0x210   : > { %2739 = vst.msk [vmem:[#allocation3 + $0x30] sm:$0xf] %vm2726_vm4, %v2655_v47  ;;  %v2657_v14 = vpop.permute.xlu1 %2656  ;;  %v5366_v43 = vld [vmem:[#allocation3 + $0x20] sm:$0xff]   ;;  %v2542_v47 = vrot.slane %v2541_v27, 4  ;;  %v2566_v46 = vrot.slane %v2565_v38, 4  ;;  %v3654_v27 = vshll.u32 %v3329_v17, 16 }
 0x211   : > { %3762 = vrot.lane.b32.xlu0 %v3591_v62, %s5397_s19  ;;  %2740 = vst.msk [vmem:[#allocation3 + $0x34] sm:$0xf] %vm2726_vm4, %v2657_v14  ;;  %5310 = vmatprep.mubr.msk.bf16.mxu0 %vm4320_vm14, %v5366_v43  ;;  %v2239_v62 = vld [vmem:[#allocation2 + $0xb0] sm:$0x1]  ;;  %v2576_v49 = vrot.slane %v2575_v42, 4  ;;  %v3646_v40 = vshll.u32 %v3328_v36, 16 }
 0x212   : > { %3764 = vrot.lane.b32.xlu1 %v3601_v55, %s5397_s19  ;;  %v2578_v14 = vshll.u32 %v2239_v62, 16  ;;  %v3662_v41 = vrot.slane %v3660_v32, 5  ;;  %v3666_v42 = vrot.slane %v3664_v34, 4  ;;  %v2244_v36 = vld [vmem:[#allocation2 + $0xc4] sm:$0xf] }
 0x213   : > { %v2659_v48 = vpop.permute.xlu0 %2658 }
 0x214   : > { %2741 = vst.msk [vmem:[#allocation3 + $0x38] sm:$0xf] %vm2726_vm4, %v2659_v48  ;;  %v2661_v60 = vpop.permute.xlu1 %2660  ;;  %v5367_v54 = vld [vmem:[#allocation3 + $0x28] sm:$0xff]   ;;  %v2795_v48 = vld [vmem:[#allocation2 + $0x9c] sm:$0xe] }
 0x215   : > { %3766 = vrot.lane.b32.xlu0 %v3615_v45, %s5397_s19  ;;  %2742 = vst.msk [vmem:[#allocation3 + $0x3c] sm:$0xf] %vm2726_vm4, %v2661_v60  ;;  %5311 = vmatmul.mubr.msk.bf16.gmra.mxu0 %vm4320_vm14, %v5367_v54  ;;  %v2547_v45 = vsel %vm5533_vm7, %v2542_v47, %v2546_v20  ;;  %v2797_v60 = vld [vmem:[#allocation2 + $0xa4] sm:$0x1]  ;;  %v2571_v54 = vsel %vm5533_vm7, %v2566_v46, %v2570_v35  ;;  %v5043_v0 = vrot.slane %v2795_v48, 9  ;;  %v3640_v20 = vshrl.u32 %v3327_v12, 16 }
 0x216   : > { %3768 = vrot.lane.b32.xlu1 %v3625_v50, %s5397_s19  ;;  %v2580_v50 = vrot.slane %v2578_v14, 5  ;;  %v2944_v53 = vrot.slane %v2797_v60, 5  ;;  %v3656_v47 = vrot.slane %v3654_v27, 5 }
 0x217   : > { %v2992_v52 = vpop.permute.xlu0 %2991 }
 0x218   : > { %3076 = vst.msk [vmem:[#allocation3 + $0x30] sm:$0xf] %vm3063_vm5, %v2992_v52  ;;  %v2994_v58 = vpop.permute.xlu1 %2993  ;;  %v2581_v52 = vsel %vm5533_vm7, %v2576_v49, %v2580_v50  ;;  %v3648_v50 = vrot.slane %v3646_v40, 5 }
 0x219   : > { %4099 = vrot.lane.b32.xlu0 %v4020_v59, %s5398_s28  ;;  %3077 = vst.msk [vmem:[#allocation3 + $0x34] sm:$0xf] %vm3063_vm5, %v2994_v58  ;;  %v2942_v58 = vsel %vm5901_vm13, %v5043_v0, %v2941_v51  ;;  %v3667_v51 = vor.u32 %v3666_v42, %v3662_v41  ;;  %v2620_v42 = vshrl.u32 %v2244_v36, 16 }
 0x21a   : > { %4101 = vrot.lane.b32.xlu1 %v4023_v9, %s5398_s28 }
 0x21b   : > { %v2996_v18 = vpop.permute.xlu0 %2995 }
 0x21c   : > { %3078 = vst.msk [vmem:[#allocation3 + $0x38] sm:$0xf] %vm3063_vm5, %v2996_v18  ;;  %v2998_v24 = vpop.permute.xlu1 %2997  ;;  %v2945_v18 = vsel %vm5901_vm13, %v2943_v5, %v2944_v53  ;;  %v3672_v5 = vrot.slane %v3670_v56, 5  ;;  %v2622_v56 = vrot.slane %v2620_v42, 4  ;;  %v3336_v42 = vld [vmem:[#allocation2 + $0xd0] sm:$0xf] }
 0x21d   : > { %4103 = vrot.lane.b32.xlu0 %v4027_v13, %s5398_s28  ;;  %3079 = vst.msk [vmem:[#allocation3 + $0x3c] sm:$0xf] %vm3063_vm5, %v2998_v24  ;;  %v3627_v13 = vshrl.u32 %v3326_v7, 16 }
 0x21e   : > { %4105 = vrot.lane.b32.xlu1 %v4030_v19, %s5398_s28  ;;  %v3636_v19 = vshll.u32 %v3327_v12, 16 }
 0x21f   : > { %v3186_v30 = vpop.permute.xlu0 %3185  ;;  %v3629_v24 = vrot.slane %v3627_v13, 4  ;;  %v3890_v13 = vld [vmem:[#allocation2 + $0xb4] sm:$0xe] }
 0x220   : > { %3270 = vst.msk [vmem:[#allocation3 + $0x30] sm:$0xf] %vm3257_vm6, %v3186_v30  ;;  %v3188_v37 = vpop.permute.xlu1 %3187  ;;  %v3638_v30 = vrot.slane %v3636_v19, 5  ;;  %v3892_v19 = vld [vmem:[#allocation2 + $0xbc] sm:$0x1] }
 0x221   : > { %2117 = vrot.lane.b32.xlu0 %v2029_v26, %s5393_s13  ;;  %3271 = vst.msk [vmem:[#allocation3 + $0x34] sm:$0xf] %vm3257_vm6, %v3188_v37  ;;  %v3651_v26 = vshrl.u32 %v3329_v17, 16  ;;  %v3121_v37 = vld [vmem:[#allocation2 + $0xa8] sm:$0xf]  ;;  %v3633_v62 = vor.u32 %v3632_v25, %v3629_v24  ;;  %v2583_v24 = vshrl.u32 %v2240_v15, 16 }
 0x222   : > { %2119 = vrot.lane.b32.xlu1 %v2030_v31, %s5393_s13  ;;  %v3642_v31 = vrot.slane %v3640_v20, 4  ;;  %v2586_v25 = vshll.u32 %v2240_v15, 16 }
 0x223   : > { %v3190_v55 = vpop.permute.xlu0 %3189  ;;  %v3634_v46 = vrot.slane %v3633_v62, 4 }
 0x224   : > { %3272 = vst.msk [vmem:[#allocation3 + $0x38] sm:$0xf] %vm3257_vm6, %v3190_v55  ;;  %v3192_v43 = vpop.permute.xlu1 %3191  ;;  %v3122_v55 = vld [vmem:[#allocation2 + $0xac] sm:$0xf]  ;;  %v2588_v62 = vrot.slane %v2586_v25, 5 }
 0x225   : > { %2121 = vrot.lane.b32.xlu0 %v2031_v2, %s5393_s13  ;;  %3273 = vst.msk [vmem:[#allocation3 + $0x3c] sm:$0xf] %vm3257_vm6, %v3192_v43  ;;  %v3653_v2 = vrot.slane %v3651_v26, 4  ;;  %v3639_v0 = vsel %vm5533_vm7, %v3634_v46, %v3638_v30  ;;  %v3332_v25 = vld [vmem:[#allocation2 + $0xc0] sm:$0xf] }
 0x226   : > { %2123 = vrot.lane.b32.xlu1 %v2032_v39, %s5393_s13  ;;  %v3643_v39 = vor.u32 %v3642_v31, %v3638_v30 }
 0x227   : > { %v3747_v3 = vpop.permute.xlu0 %3746 }
 0x228   : > { %3831 = vst.msk [vmem:[#allocation3 + $0x30] sm:$0xf] %vm3818_vm11, %v3747_v3  ;;  %v3749_v57 = vpop.permute.xlu1 %3748  ;;  %v3657_v3 = vor.u32 %v3656_v47, %v3653_v2  ;;  %v3644_v49 = vrot.slane %v3643_v39, 4 }
 0x229   : > { %2678 = vrot.lane.b32.xlu0 %v2547_v45, %s5394_s14  ;;  %3832 = vst.msk [vmem:[#allocation3 + $0x34] sm:$0xf] %vm3818_vm11, %v3749_v57  ;;  %v3123_v45 = vld [vmem:[#allocation2 + $0xb4] sm:$0xf] }
 0x22a   : > { %2680 = vrot.lane.b32.xlu1 %v2557_v4, %s5394_s14  ;;  %v3124_v4 = vld [vmem:[#allocation2 + $0xb8] sm:$0xf]  ;;  %v3658_v1 = vrot.slane %v3657_v3, 4  ;;  %v3649_v7 = vsel %vm5533_vm7, %v3644_v49, %v3648_v50 }
 0x22b   : > { %v3751_v59 = vpop.permute.xlu0 %3750 }
 0x22c   : > { %3833 = vst.msk [vmem:[#allocation3 + $0x38] sm:$0xf] %vm3818_vm11, %v3751_v59  ;;  %v3753_v9 = vpop.permute.xlu1 %3752  ;;  %v3663_v12 = vsel %vm5533_vm7, %v3658_v1, %v3662_v41  ;;  %v2616_v41 = vshll.u32 %v2244_v36, 16  ;;  %v3678_v36 = vshll.u32 %v3332_v25, 16 }
 0x22d   : > { %2682 = vrot.lane.b32.xlu0 %v2571_v54, %s5394_s14  ;;  %3834 = vst.msk [vmem:[#allocation3 + $0x3c] sm:$0xf] %vm3818_vm11, %v3753_v9  ;;  %v3888_v54 = vld [vmem:[#allocation2 + $0xac] sm:$0xf] }
 0x22e   : > { %2684 = vrot.lane.b32.xlu1 %v2581_v52, %s5394_s14  ;;  %v3668_v52 = vrot.slane %v3667_v51, 4  ;;  %v4033_v53 = vrot.slane %v3888_v54, 5  ;;  %v2618_v51 = vrot.slane %v2616_v41, 5  ;;  %v2035_v54 = vld [vmem:[#allocation2 + $0xc0] sm:$0xf] }
 0x22f   : > { %v4084_v10 = vpop.permute.xlu0 %4083 }
 0x230   : > { %4168 = vst.msk [vmem:[#allocation3 + $0x30] sm:$0xf] %vm4155_vm12, %v4084_v10  ;;  %v4086_v21 = vpop.permute.xlu1 %4085  ;;  %v4040_v10 = vrot.slane %v3891_v8, 5  ;;  %v3673_v16 = vsel %vm5533_vm7, %v3668_v52, %v3672_v5  ;;  %v4035_v17 = vrot.slane %v4033_v53, 4  ;;  %v2623_v5 = vor.u32 %v2622_v56, %v2618_v51 }
 0x231   : > { %3015 = vrot.lane.b32.xlu0 %v2942_v58, %s5395_s15  ;;  %4169 = vst.msk [vmem:[#allocation3 + $0x34] sm:$0xf] %vm4155_vm12, %v4086_v21  ;;  %v5059_v58 = vrot.slane %v3887_v6, 9  ;;  %v5060_v21 = vrot.slane %v3890_v13, 9  ;;  %v2036_v6 = vld [vmem:[#allocation2 + $0xc4] sm:$0xf] }
 0x232   : > { %3017 = vrot.lane.b32.xlu1 %v2945_v18, %s5395_s15  ;;  %v4036_v18 = vrot.slane %v3889_v11, 5  ;;  %v4042_v27 = vrot.slane %v4040_v10, 4  ;;  %v2801_v13 = vld [vmem:[#allocation2 + $0xb4] sm:$0xe] }
 0x233   : > { %v4088_v28 = vpop.permute.xlu0 %4087  ;;  %v4034_v23 = vsel %vm5901_vm13, %v5059_v58, %v4033_v53 }
 0x234   : > { %4170 = vst.msk [vmem:[#allocation3 + $0x38] sm:$0xf] %vm4155_vm12, %v4088_v28  ;;  %v4090_v35 = vpop.permute.xlu1 %4089  ;;  %v4043_v28 = vrot.slane %v3892_v19, 5  ;;  %v4037_v30 = vsel %vm5901_vm13, %v4035_v17, %v4036_v18  ;;  %v2805_v17 = vld [vmem:[#allocation2 + $0xc4] sm:$0xf] }
 0x235   : > { %3019 = vrot.lane.b32.xlu0 %v2949_v22, %s5395_s15  ;;  %4171 = vst.msk [vmem:[#allocation3 + $0x3c] sm:$0xf] %vm4155_vm12, %v4090_v35  ;;  %v2241_v22 = vld [vmem:[#allocation2 + $0xb8] sm:$0xf]  ;;  %v4041_v35 = vsel %vm5901_vm13, %v5060_v21, %v4040_v10  ;;  %v2624_v10 = vrot.slane %v2623_v5, 4  ;;  %v5045_v21 = vrot.slane %v2801_v13, 9 }
 0x236   : > { %3021 = vrot.lane.b32.xlu1 %v2952_v29, %s5395_s15  ;;  %v2243_v29 = vld [vmem:[#allocation2 + $0xc0] sm:$0xf]  ;;  %v2592_v31 = vshll.u32 %v2241_v22, 16  ;;  %v2596_v32 = vshrl.u32 %v2241_v22, 16  ;;  %v2803_v19 = vld [vmem:[#allocation2 + $0xbc] sm:$0x1] }
 0x237   : > { %v2106_v38 = vpop.permute.xlu0 %2105  ;;  %v2607_v2 = vshrl.u32 %v2243_v29, 16  ;;  %v2610_v47 = vshll.u32 %v2243_v29, 16  ;;  %v2804_v22 = vld [vmem:[#allocation2 + $0xc0] sm:$0xe]  ;;  %v2806_v29 = vld [vmem:[#allocation2 + $0xc8] sm:$0x1] }
 0x238   : > { %2184 = vst.msk [vmem:[#allocation3 + $0x48] sm:$0xf] %vm2165_vm3, %v2106_v38  ;;  %v2108_v14 = vpop.permute.xlu1 %2107  ;;  %v5368_v43 = vld [vmem:[#allocation3 + $0x30] sm:$0xff]   ;;  %v2594_v39 = vrot.slane %v2592_v31, 5  ;;  %v2598_v40 = vrot.slane %v2596_v32, 4  ;;  %v5046_v31 = vrot.slane %v2804_v22, 9 }
 0x239   : > { %3209 = vrot.lane.b32.xlu0 %v3121_v37, %s5396_s16  ;;  %2185 = vst.msk [vmem:[#allocation3 + $0x4c] sm:$0xf] %vm2165_vm3, %v2108_v14  ;;  %5314 = vmatprep.mubr.msk.bf16.mxu0 %vm4320_vm14, %v5368_v43  ;;  %v2585_v37 = vrot.slane %v2583_v24, 4  ;;  %v2242_v43 = vld [vmem:[#allocation2 + $0xbc] sm:$0x1]  ;;  %v2609_v46 = vrot.slane %v2607_v2, 4 }
 0x23a   : > { %3211 = vrot.lane.b32.xlu1 %v3122_v55, %s5396_s16  ;;  %v4044_v55 = vsel %vm5901_vm13, %v4042_v27, %v4043_v28  ;;  %v2612_v3 = vrot.slane %v2610_v47, 5  ;;  %v2599_v49 = vor.u32 %v2598_v40, %v2594_v39  ;;  %v2602_v50 = vshll.u32 %v2242_v43, 16  ;;  %v3333_v32 = vld [vmem:[#allocation2 + $0xc4] sm:$0xf]  ;;  %v3335_v47 = vld [vmem:[#allocation2 + $0xcc] sm:$0xf] }
 0x23b   : > { %v2663_v48 = vpop.permute.xlu0 %2662  ;;  %v2962_v24 = vrot.slane %v2805_v17, 5  ;;  %v2958_v28 = vrot.slane %v2803_v19, 5  ;;  %v2965_v2 = vrot.slane %v2806_v29, 5  ;;  %v3680_v43 = vrot.slane %v3678_v36, 5  ;;  %v3896_v36 = vld [vmem:[#allocation2 + $0xcc] sm:$0xe] }
 0x23c   : > { %2743 = vst.msk [vmem:[#allocation3 + $0x40] sm:$0xf] %vm2726_vm4, %v2663_v48  ;;  %v2665_v57 = vpop.permute.xlu1 %2664  ;;  %v5369_v60 = vld [vmem:[#allocation3 + $0x38] sm:$0xff]   ;;  %v2613_v1 = vor.u32 %v2612_v3, %v2609_v46  ;;  %v2604_v52 = vrot.slane %v2602_v50, 5  ;;  %v3712_v50 = vshrl.u32 %v3336_v42, 16 }
 0x23d   : > { %3213 = vrot.lane.b32.xlu0 %v3123_v45, %s5396_s16  ;;  %2744 = vst.msk [vmem:[#allocation3 + $0x44] sm:$0xf] %vm2726_vm4, %v2665_v57  ;;  %5315 = vmatmul.mubr.msk.bf16.gmra.mxu0 %vm4320_vm14, %v5369_v60  ;;  %v2589_v45 = vor.u32 %v2588_v62, %v2585_v37  ;;  %v2245_v60 = vld [vmem:[#allocation2 + $0xc8] sm:$0x1]  ;;  %v2964_v62 = vrot.slane %v2962_v24, 4  ;;  %v2963_v41 = vsel %vm5901_vm13, %v5046_v31, %v2962_v24 }
 0x23e   : > { %3215 = vrot.lane.b32.xlu1 %v3124_v4, %s5396_s16  ;;  %v2034_v4 = vld [vmem:[#allocation2 + $0xb8] sm:$0xf]  ;;  %v2626_v53 = vshll.u32 %v2245_v60, 16  ;;  %v3125_v60 = vld [vmem:[#allocation2 + $0xc0] sm:$0xf] }
 0x23f   : > { %v2667_v59 = vpop.permute.xlu0 %2666  ;;  %v2966_v3 = vsel %vm5901_vm13, %v2964_v62, %v2965_v2  ;;  %v3893_v24 = vld [vmem:[#allocation2 + $0xc0] sm:$0xe]  ;;  %v3897_v31 = vld [vmem:[#allocation2 + $0xd0] sm:$0xf] }
 0x240   : > { %2745 = vst.msk [vmem:[#allocation3 + $0x48] sm:$0xf] %vm2726_vm4, %v2667_v59  ;;  %v2669_v9 = vpop.permute.xlu1 %2668  ;;  %v2628_v15 = vrot.slane %v2626_v53, 5  ;;  %v3714_v53 = vrot.slane %v3712_v50, 4 }
 0x241   : > { %3770 = vrot.lane.b32.xlu0 %v3639_v0, %s5397_s19  ;;  %2746 = vst.msk [vmem:[#allocation3 + $0x4c] sm:$0xf] %vm2726_vm4, %v2669_v9  ;;  %v2590_v0 = vrot.slane %v2589_v45, 4  ;;  %v2802_v9 = vld [vmem:[#allocation2 + $0xb8] sm:$0xf]  ;;  %v3702_v45 = vshll.u32 %v3335_v47, 16 }
 0x242   : > { %3772 = vrot.lane.b32.xlu1 %v3649_v7, %s5397_s19  ;;  %v2600_v7 = vrot.slane %v2599_v49, 4  ;;  %v3708_v49 = vshll.u32 %v3336_v42, 16 }
 0x243   : > { %v3000_v61 = vpop.permute.xlu0 %2999  ;;  %v2595_v11 = vsel %vm5533_vm7, %v2590_v0, %v2594_v39  ;;  %v3688_v39 = vshrl.u32 %v3333_v32, 16 }
 0x244   : > { %3080 = vst.msk [vmem:[#allocation3 + $0x40] sm:$0xf] %vm3063_vm5, %v3000_v61  ;;  %v3002_v20 = vpop.permute.xlu1 %3001  ;;  %v2605_v61 = vsel %vm5533_vm7, %v2600_v7, %v2604_v52  ;;  %v3710_v5 = vrot.slane %v3708_v49, 5 }
 0x245   : > { %3774 = vrot.lane.b32.xlu0 %v3663_v12, %s5397_s19  ;;  %3081 = vst.msk [vmem:[#allocation3 + $0x44] sm:$0xf] %vm3063_vm5, %v3002_v20  ;;  %v2614_v12 = vrot.slane %v2613_v1, 4  ;;  %v3704_v1 = vrot.slane %v3702_v45, 5 }
 0x246   : > { %3776 = vrot.lane.b32.xlu1 %v3673_v16, %s5397_s19  ;;  %v2955_v16 = vrot.slane %v2802_v9, 5  ;;  %v3715_v17 = vor.u32 %v3714_v53, %v3710_v5 }
 0x247   : > { %v3004_v26 = vpop.permute.xlu0 %3003  ;;  %v2619_v20 = vsel %vm5533_vm7, %v2614_v12, %v2618_v51  ;;  %v3127_v12 = vld [vmem:[#allocation2 + $0xcc] sm:$0xf] }
 0x248   : > { %3082 = vst.msk [vmem:[#allocation3 + $0x48] sm:$0xf] %vm3063_vm5, %v3004_v26  ;;  %v3006_v34 = vpop.permute.xlu1 %3005  ;;  %v2629_v26 = vsel %vm5533_vm7, %v2624_v10, %v2628_v15  ;;  %v2957_v27 = vrot.slane %v2955_v16, 4  ;;  %v3128_v10 = vld [vmem:[#allocation2 + $0xd0] sm:$0xf] }
 0x249   : > { %4107 = vrot.lane.b32.xlu0 %v4034_v23, %s5398_s28  ;;  %3083 = vst.msk [vmem:[#allocation3 + $0x4c] sm:$0xf] %vm3063_vm5, %v3006_v34  ;;  %v2956_v34 = vsel %vm5901_vm13, %v5045_v21, %v2955_v16 }
 0x24a   : > { %4109 = vrot.lane.b32.xlu1 %v4037_v30, %s5398_s28 }
 0x24b   : > { %v3194_v38 = vpop.permute.xlu0 %3193 }
 0x24c   : > { %3274 = vst.msk [vmem:[#allocation3 + $0x40] sm:$0xf] %vm3257_vm6, %v3194_v38  ;;  %v3196_v14 = vpop.permute.xlu1 %3195  ;;  %v2959_v38 = vsel %vm5901_vm13, %v2957_v27, %v2958_v28 }
 0x24d   : > { %4111 = vrot.lane.b32.xlu0 %v4041_v35, %s5398_s28  ;;  %3275 = vst.msk [vmem:[#allocation3 + $0x44] sm:$0xf] %vm3257_vm6, %v3196_v14  ;;  %v3675_v35 = vshrl.u32 %v3332_v25, 16 }
 0x24e   : > { %4113 = vrot.lane.b32.xlu1 %v4044_v55, %s5398_s28  ;;  %v3684_v55 = vshll.u32 %v3333_v32, 16 }
 0x24f   : > { %v3198_v48 = vpop.permute.xlu0 %3197  ;;  %v3677_v14 = vrot.slane %v3675_v35, 4 }
 0x250   : > { %3276 = vst.msk [vmem:[#allocation3 + $0x48] sm:$0xf] %vm3257_vm6, %v3198_v48  ;;  %v3200_v57 = vpop.permute.xlu1 %3199  ;;  %v3686_v48 = vrot.slane %v3684_v55, 5  ;;  %v3898_v55 = vld [vmem:[#allocation2 + $0xd4] sm:$0x1] }
 0x251   : > { %2125 = vrot.lane.b32.xlu0 %v2033_v44, %s5393_s13  ;;  %3277 = vst.msk [vmem:[#allocation3 + $0x4c] sm:$0xf] %vm3257_vm6, %v3200_v57  ;;  %v3699_v44 = vshrl.u32 %v3335_v47, 16  ;;  %v3334_v57 = vld [vmem:[#allocation2 + $0xc8] sm:$0x1]  ;;  %v4054_v47 = vrot.slane %v3897_v31, 5 }
 0x252   : > { %2127 = vrot.lane.b32.xlu1 %v2034_v4, %s5393_s13  ;;  %v3690_v4 = vrot.slane %v3688_v39, 4  ;;  %v3694_v52 = vshll.u32 %v3334_v57, 16 }
 0x253   : > { %v3755_v59 = vpop.permute.xlu0 %3754  ;;  %v3701_v0 = vrot.slane %v3699_v44, 4  ;;  %v4056_v42 = vrot.slane %v4054_v47, 4 }
 0x254   : > { %3835 = vst.msk [vmem:[#allocation3 + $0x40] sm:$0xf] %vm3818_vm11, %v3755_v59  ;;  %v3757_v8 = vpop.permute.xlu1 %3756  ;;  %v3691_v7 = vor.u32 %v3690_v4, %v3686_v48  ;;  %v3696_v16 = vrot.slane %v3694_v52, 5 }
 0x255   : > { %2129 = vrot.lane.b32.xlu0 %v2035_v54, %s5393_s13  ;;  %3836 = vst.msk [vmem:[#allocation3 + $0x44] sm:$0xf] %vm3818_vm11, %v3757_v8  ;;  %v3681_v54 = vor.u32 %v3680_v43, %v3677_v14  ;;  %v3705_v13 = vor.u32 %v3704_v1, %v3701_v0  ;;  %v4057_v14 = vrot.slane %v3898_v55, 5 }
 0x256   : > { %2131 = vrot.lane.b32.xlu1 %v2036_v6, %s5393_s13  ;;  %v3126_v6 = vld [vmem:[#allocation2 + $0xc4] sm:$0xf]  ;;  %v3692_v15 = vrot.slane %v3691_v7, 4 }
 0x257   : > { %v3759_v58 = vpop.permute.xlu0 %3758  ;;  %v3706_v22 = vrot.slane %v3705_v13, 4 }
 0x258   : > { %3837 = vst.msk [vmem:[#allocation3 + $0x48] sm:$0xf] %vm3818_vm11, %v3759_v58  ;;  %v3761_v18 = vpop.permute.xlu1 %3760  ;;  %v3682_v58 = vrot.slane %v3681_v54, 4  ;;  %v3697_v25 = vsel %vm5533_vm7, %v3692_v15, %v3696_v16 }
 0x259   : > { %2686 = vrot.lane.b32.xlu0 %v2595_v11, %s5394_s14  ;;  %3838 = vst.msk [vmem:[#allocation3 + $0x4c] sm:$0xf] %vm3818_vm11, %v3761_v18  ;;  %v3337_v11 = vld [vmem:[#allocation2 + $0xd4] sm:$0x1]  ;;  %v3711_v32 = vsel %vm5533_vm7, %v3706_v22, %v3710_v5 }
 0x25a   : > { %2688 = vrot.lane.b32.xlu1 %v2605_v61, %s5394_s14  ;;  %v3718_v18 = vshll.u32 %v3337_v11, 16  ;;  %v3687_v21 = vsel %vm5533_vm7, %v3682_v58, %v3686_v48 }
 0x25b   : > { %v4092_v23 = vpop.permute.xlu0 %4091 }
 0x25c   : > { %4172 = vst.msk [vmem:[#allocation3 + $0x40] sm:$0xf] %vm4155_vm12, %v4092_v23  ;;  %v4094_v30 = vpop.permute.xlu1 %4093  ;;  %v3720_v27 = vrot.slane %v3718_v18, 5 }
 0x25d   : > { %2690 = vrot.lane.b32.xlu0 %v2619_v20, %s5394_s14  ;;  %4173 = vst.msk [vmem:[#allocation3 + $0x44] sm:$0xf] %vm4155_vm12, %v4094_v30  ;;  %v3894_v20 = vld [vmem:[#allocation2 + $0xc4] sm:$0xf]  ;;  %v3895_v30 = vld [vmem:[#allocation2 + $0xc8] sm:$0x1] }
 0x25e   : > { %2692 = vrot.lane.b32.xlu1 %v2629_v26, %s5394_s14  ;;  %v3716_v26 = vrot.slane %v3715_v17, 4  ;;  %v4047_v28 = vrot.slane %v3894_v20, 5  ;;  %v4050_v2 = vrot.slane %v3895_v30, 5 }
 0x25f   : > { %v4096_v37 = vpop.permute.xlu0 %4095 }
 0x260   : > { %4174 = vst.msk [vmem:[#allocation3 + $0x48] sm:$0xf] %vm4155_vm12, %v4096_v37  ;;  %v4098_v40 = vpop.permute.xlu1 %4097  ;;  %v3721_v37 = vsel %vm5533_vm7, %v3716_v26, %v3720_v27  ;;  %v4049_v62 = vrot.slane %v4047_v28, 4  ;;  %vm4694_vm7 = vcmask 31744  }
 0x261   : > { %3023 = vrot.lane.b32.xlu0 %v2956_v34, %s5395_s15  ;;  %4175 = vst.msk [vmem:[#allocation3 + $0x4c] sm:$0xf] %vm4155_vm12, %v4098_v40  ;;  %v5061_v34 = vrot.slane %v3893_v24, 9  ;;  %v5062_v40 = vrot.slane %v3896_v36, 9 }
 0x262   : > { %3025 = vrot.lane.b32.xlu1 %v2959_v38, %s5395_s15  ;;  %v4051_v33 = vsel %vm5901_vm13, %v4049_v62, %v4050_v2 }
 0x263   : > { %v2110_v46 = vpop.permute.xlu0 %2109  ;;  %v4048_v39 = vsel %vm5901_vm13, %v5061_v34, %v4047_v28  ;;  %v4055_v44 = vsel %vm5901_vm13, %v5062_v40, %v4054_v47 }
 0x264   : > { %2186 = vst.msk [vmem:[#allocation3 + $0x50] sm:$0xf] %vm2165_vm3, %v2110_v46  ;;  %v2112_v51 = vpop.permute.xlu1 %2111  ;;  %v5370_v56 = vld [vmem:[#allocation3 + $0x40] sm:$0xff]   ;;  %v4058_v46 = vsel %vm5901_vm13, %v4056_v42, %v4057_v14 }
 0x265   : > { %3027 = vrot.lane.b32.xlu0 %v2963_v41, %s5395_s15  ;;  %2187 = vst.msk [vmem:[#allocation3 + $0x54] sm:$0xf] %vm2165_vm3, %v2112_v51  ;;  %5318 = vmatprep.mubr.msk.bf16.mxu1 %vm4320_vm14, %v5370_v56 }
 0x266   : > { %3029 = vrot.lane.b32.xlu1 %v2966_v3, %s5395_s15  ;;  %s268_s15 = scalar_lea.vmem %s6940_s6, %s6952_s22 }
 0x267   : > { %v2114_v59 = vpop.permute.xlu0 %2113 }
 0x268   : > { %2188 = vst.msk [vmem:[#allocation3 + $0x58] sm:$0xf] %vm2165_vm3, %v2114_v59  ;;  %v2116_v8 = vpop.permute.xlu1 %2115  ;;  %v5371_v9 = vld [vmem:[#allocation3 + $0x48] sm:$0xff]  }
 0x269   : > { %3217 = vrot.lane.b32.xlu0 %v3125_v60, %s5396_s16  ;;  %2189 = vst.msk [vmem:[#allocation3 + $0x5c] sm:$0xf] %vm2165_vm3, %v2116_v8  ;;  %5319 = vmatmul.mubr.msk.bf16.vlgmr.msra.gmra.mxu1 %vm4320_vm14, %v5371_v9 }
 0x26a   : > { %3219 = vrot.lane.b32.xlu1 %v3126_v6, %s5396_s16 }
 0x26b   : > { %v2671_v61 = vpop.permute.xlu0 %2670 }
 0x26c   : > { %2747 = vst.msk [vmem:[#allocation3 + $0x50] sm:$0xf] %vm2726_vm4, %v2671_v61  ;;  %v2673_v19 = vpop.permute.xlu1 %2672 }
 0x26d   : > { %3221 = vrot.lane.b32.xlu0 %v3127_v12, %s5396_s16  ;;  %2748 = vst.msk [vmem:[#allocation3 + $0x54] sm:$0xf] %vm2726_vm4, %v2673_v19 }
 0x26e   : > { %3223 = vrot.lane.b32.xlu1 %v3128_v10, %s5396_s16 }
 0x26f   : > { %v2675_v23 = vpop.permute.xlu0 %2674 }
 0x270   : > { %2749 = vst.msk [vmem:[#allocation3 + $0x58] sm:$0xf] %vm2726_vm4, %v2675_v23  ;;  %v2677_v29 = vpop.permute.xlu1 %2676 }
 0x271   : > { %3778 = vrot.lane.b32.xlu0 %v3687_v21, %s5397_s19  ;;  %2750 = vst.msk [vmem:[#allocation3 + $0x5c] sm:$0xf] %vm2726_vm4, %v2677_v29 }
 0x272   : > { %3780 = vrot.lane.b32.xlu1 %v3697_v25, %s5397_s19 }
 0x273   : > { %v3008_v35 = vpop.permute.xlu0 %3007 }
 0x274   : > { %3084 = vst.msk [vmem:[#allocation3 + $0x50] sm:$0xf] %vm3063_vm5, %v3008_v35  ;;  %v3010_v38 = vpop.permute.xlu1 %3009 }
 0x275   : > { %3782 = vrot.lane.b32.xlu0 %v3711_v32, %s5397_s19  ;;  %3085 = vst.msk [vmem:[#allocation3 + $0x54] sm:$0xf] %vm3063_vm5, %v3010_v38 }
 0x276   : > { %3784 = vrot.lane.b32.xlu1 %v3721_v37, %s5397_s19 }
 0x277   : > { %v3012_v41 = vpop.permute.xlu0 %3011 }
 0x278   : > { %3086 = vst.msk [vmem:[#allocation3 + $0x58] sm:$0xf] %vm3063_vm5, %v3012_v41  ;;  %v3014_v43 = vpop.permute.xlu1 %3013 }
 0x279   : > { %4115 = vrot.lane.b32.xlu0 %v4048_v39, %s5398_s28  ;;  %3087 = vst.msk [vmem:[#allocation3 + $0x5c] sm:$0xf] %vm3063_vm5, %v3014_v43 }
 0x27a   : > { %4117 = vrot.lane.b32.xlu1 %v4051_v33, %s5398_s28 }
 0x27b   : > { %v3202_v45 = vpop.permute.xlu0 %3201 }
 0x27c   : > { %3278 = vst.msk [vmem:[#allocation3 + $0x50] sm:$0xf] %vm3257_vm6, %v3202_v45  ;;  %v3204_v3 = vpop.permute.xlu1 %3203 }
 0x27d   : > { %4119 = vrot.lane.b32.xlu0 %v4055_v44, %s5398_s28  ;;  %3279 = vst.msk [vmem:[#allocation3 + $0x54] sm:$0xf] %vm3257_vm6, %v3204_v3 }
 0x27e   : > { %4121 = vrot.lane.b32.xlu1 %v4058_v46, %s5398_s28 }
 0x27f   : > { %v3206_v48 = vpop.permute.xlu0 %3205 }
 0x280   : > { %3280 = vst.msk [vmem:[#allocation3 + $0x58] sm:$0xf] %vm3257_vm6, %v3206_v48  ;;  %v3208_v4 = vpop.permute.xlu1 %3207 }
 0x281   : > { %3281 = vst.msk [vmem:[#allocation3 + $0x5c] sm:$0xf] %vm3257_vm6, %v3208_v4 }
 0x283   : > { %v3763_v49 = vpop.permute.xlu0 %3762 }
 0x284   : > { %3839 = vst.msk [vmem:[#allocation3 + $0x50] sm:$0xf] %vm3818_vm11, %v3763_v49  ;;  %v3765_v50 = vpop.permute.xlu1 %3764 }
 0x285   : > { %3840 = vst.msk [vmem:[#allocation3 + $0x54] sm:$0xf] %vm3818_vm11, %v3765_v50  ;;  %v5304_v63 = vpop.f32.mrf.mxu0 }
 0x286   : > { %v5168_v56 = vpack.c.bf16 %v5304_v63, %v5304_v63  ;;  %v4767_v7 = vmul.f32 %v5304_v63, %v5304_v63  ;;  %v4698_v13 = vsel %vm4694_vm7, %v5304_v63, 0.0 }
 0x287   : > { %v3767_v51 = vpop.permute.xlu0 %3766  ;;  %v4407_v60 = vpop.f32.mrf.mxu0 }
 0x288   : > { %3841 = vst.msk [vmem:[#allocation3 + $0x58] sm:$0xf] %vm3818_vm11, %v3767_v51  ;;  %v3769_v57 = vpop.permute.xlu1 %3768  ;;  %v5166_v54 = vpack.c.bf16 %v4407_v60, %v4407_v60  ;;  %v4765_v59 = vmul.f32 %v4407_v60, %v4407_v60  ;;  %v4695_v53 = vsel %vm4694_vm7, %v4407_v60, 0.0  ;;  %v4800_v19 = vsel %vm4694_vm7, %v4767_v7, 0.0 }
 0x289   : > { %4664 = vst.msk [vmem:[%s6731_s10 + $0x8] sm:$0xf] %vm444_vm0, %v5168_v56  ;;  %v5305_v0 = vpop.f32.mrf.mxu0 }
 0x28a   : > { %3842 = vst.msk [vmem:[#allocation3 + $0x5c] sm:$0xf] %vm3818_vm11, %v3769_v57  ;;  %v5169_v6 = vpack.c.bf16 %v5305_v0, %v5305_v0  ;;  %v4797_v61 = vsel %vm4694_vm7, %v4765_v59, 0.0  ;;  %v4768_v10 = vmul.f32 %v5305_v0, %v5305_v0  ;;  %v4700_v20 = vsel %vm4694_vm7, %v5305_v0, 0.0 }
 0x28b   : > { %v4100_v1 = vpop.permute.xlu0 %4099  ;;  %4662 = vst.msk [vmem:[%s6731_s10] sm:$0xf] %vm444_vm0, %v5166_v54  ;;  %v4410_v5 = vpop.f32.mrf.mxu0 }
 0x28c   : > { %4176 = vst.msk [vmem:[#allocation3 + $0x50] sm:$0xf] %vm4155_vm12, %v4100_v1  ;;  %v4102_v52 = vpop.permute.xlu1 %4101  ;;  %v5167_v8 = vpack.c.bf16 %v4410_v5, %v4410_v5  ;;  %v4696_v9 = vsel %vm4694_vm7, %v4410_v5, 0.0  ;;  %v4766_v11 = vmul.f32 %v4410_v5, %v4410_v5  ;;  %v4802_v24 = vsel %vm4694_vm7, %v4768_v10, 0.0 }
 0x28d   : > { %4665 = vst.msk [vmem:[%s6731_s10 + $0xc] sm:$0xf] %vm444_vm0, %v5169_v6  ;;  %v4697_v12 = vadd.f32 %v4696_v9, %v4695_v53 }
 0x28e   : > { %4177 = vst.msk [vmem:[#allocation3 + $0x54] sm:$0xf] %vm4155_vm12, %v4102_v52  ;;  %v4798_v15 = vsel %vm4694_vm7, %v4766_v11, 0.0 }
 0x28f   : > { %v4104_v58 = vpop.permute.xlu0 %4103  ;;  %4663 = vst.msk [vmem:[%s6731_s10 + $0x4] sm:$0xf] %vm444_vm0, %v5167_v8  ;;  %v4699_v16 = vadd.f32 %v4698_v13, %v4697_v12  ;;  %v4799_v17 = vadd.f32 %v4798_v15, %v4797_v61 }
 0x290   : > { %4178 = vst.msk [vmem:[#allocation3 + $0x58] sm:$0xf] %vm4155_vm12, %v4104_v58  ;;  %v4106_v18 = vpop.permute.xlu1 %4105 }
 0x291   : > { %4179 = vst.msk [vmem:[#allocation3 + $0x5c] sm:$0xf] %vm4155_vm12, %v4106_v18  ;;  %v4801_v21 = vadd.f32 %v4800_v19, %v4799_v17  ;;  %v4701_v23 = vadd.f32 %v4700_v20, %v4699_v16 }
 0x293   : > { %v2118_v22 = vpop.permute.xlu0 %2117  ;;  %v4803_v27 = vadd.f32 %v4802_v24, %v4801_v21 }
 0x294   : > { %2190 = vst.msk [vmem:[#allocation3 + $0x60] sm:$0xf] %vm2165_vm3, %v2118_v22  ;;  %v2120_v25 = vpop.permute.xlu1 %2119 }
 0x295   : > { %v5372_v26 = vld [vmem:[#allocation3 + $0x50] sm:$0xff]   ;;  %2191 = vst.msk [vmem:[#allocation3 + $0x64] sm:$0xf] %vm2165_vm3, %v2120_v25 }
 0x296   : > { %5322 = vmatprep.mubr.msk.bf16.mxu1 %vm4320_vm14, %v5372_v26 }
 0x297   : > { %v2122_v28 = vpop.permute.xlu0 %2121 }
 0x298   : > { %2192 = vst.msk [vmem:[#allocation3 + $0x68] sm:$0xf] %vm2165_vm3, %v2122_v28  ;;  %v2124_v29 = vpop.permute.xlu1 %2123  ;;  %v5373_v30 = vld [vmem:[#allocation3 + $0x58] sm:$0xff]  }
 0x299   : > { %2193 = vst.msk [vmem:[#allocation3 + $0x6c] sm:$0xf] %vm2165_vm3, %v2124_v29  ;;  %5323 = vmatmul.mubr.msk.bf16.gmra.mxu1 %vm4320_vm14, %v5373_v30 }
 0x29b   : > { %v2679_v31 = vpop.permute.xlu0 %2678 }
 0x29c   : > { %2751 = vst.msk [vmem:[#allocation3 + $0x60] sm:$0xf] %vm2726_vm4, %v2679_v31  ;;  %v2681_v32 = vpop.permute.xlu1 %2680 }
 0x29d   : > { %2752 = vst.msk [vmem:[#allocation3 + $0x64] sm:$0xf] %vm2726_vm4, %v2681_v32 }
 0x29f   : > { %v2683_v34 = vpop.permute.xlu0 %2682 }
 0x2a0   : > { %2753 = vst.msk [vmem:[#allocation3 + $0x68] sm:$0xf] %vm2726_vm4, %v2683_v34  ;;  %v2685_v35 = vpop.permute.xlu1 %2684 }
 0x2a1   : > { %2754 = vst.msk [vmem:[#allocation3 + $0x6c] sm:$0xf] %vm2726_vm4, %v2685_v35 }
 0x2a3   : > { %v3016_v36 = vpop.permute.xlu0 %3015 }
 0x2a4   : > { %3088 = vst.msk [vmem:[#allocation3 + $0x60] sm:$0xf] %vm3063_vm5, %v3016_v36  ;;  %v3018_v37 = vpop.permute.xlu1 %3017 }
 0x2a5   : > { %3089 = vst.msk [vmem:[#allocation3 + $0x64] sm:$0xf] %vm3063_vm5, %v3018_v37 }
 0x2a7   : > { %v3020_v62 = vpop.permute.xlu0 %3019 }
 0x2a8   : > { %3090 = vst.msk [vmem:[#allocation3 + $0x68] sm:$0xf] %vm3063_vm5, %v3020_v62  ;;  %v3022_v2 = vpop.permute.xlu1 %3021 }
 0x2a9   : > { %3091 = vst.msk [vmem:[#allocation3 + $0x6c] sm:$0xf] %vm3063_vm5, %v3022_v2 }
 0x2ab   : > { %v3210_v47 = vpop.permute.xlu0 %3209 }
 0x2ac   : > { %3282 = vst.msk [vmem:[#allocation3 + $0x60] sm:$0xf] %vm3257_vm6, %v3210_v47  ;;  %v3212_v38 = vpop.permute.xlu1 %3211 }
 0x2ad   : > { %3283 = vst.msk [vmem:[#allocation3 + $0x64] sm:$0xf] %vm3257_vm6, %v3212_v38  ;;  %v5308_v55 = vpop.f32.mrf.mxu0 }
 0x2ae   : > { %v5172_v40 = vpack.c.bf16 %v5308_v55, %v5308_v55  ;;  %v4771_v63 = vmul.f32 %v5308_v55, %v5308_v55  ;;  %v4706_v0 = vsel %vm4694_vm7, %v5308_v55, 0.0 }
 0x2af   : > { %v3214_v39 = vpop.permute.xlu0 %3213  ;;  %v4423_v33 = vpop.f32.mrf.mxu0 }
 0x2b0   : > { %3284 = vst.msk [vmem:[#allocation3 + $0x68] sm:$0xf] %vm3257_vm6, %v3214_v39  ;;  %v3216_v41 = vpop.permute.xlu1 %3215  ;;  %v5170_v42 = vpack.c.bf16 %v4423_v33, %v4423_v33  ;;  %v4702_v14 = vsel %vm4694_vm7, %v4423_v33, 0.0  ;;  %v4769_v43 = vmul.f32 %v4423_v33, %v4423_v33  ;;  %v4808_v5 = vsel %vm4694_vm7, %v4771_v63, 0.0 }
 0x2b1   : > { %4668 = vst.msk [vmem:[%s6731_s10 + $0x18] sm:$0xf] %vm444_vm0, %v5172_v40  ;;  %v4703_v44 = vadd.f32 %v4702_v14, %v4701_v23  ;;  %v5309_v45 = vpop.f32.mrf.mxu0 }
 0x2b2   : > { %3285 = vst.msk [vmem:[#allocation3 + $0x6c] sm:$0xf] %vm3257_vm6, %v3216_v41  ;;  %v4804_v3 = vsel %vm4694_vm7, %v4769_v43, 0.0  ;;  %v5173_v48 = vpack.c.bf16 %v5309_v45, %v5309_v45  ;;  %v4772_v1 = vmul.f32 %v5309_v45, %v5309_v45  ;;  %v4708_v53 = vsel %vm4694_vm7, %v5309_v45, 0.0 }
 0x2b3   : > { %v3771_v46 = vpop.permute.xlu0 %3770  ;;  %4666 = vst.msk [vmem:[%s6731_s10 + $0x10] sm:$0xf] %vm444_vm0, %v5170_v42  ;;  %v4805_v4 = vadd.f32 %v4804_v3, %v4803_v27  ;;  %v4426_v50 = vpop.f32.mrf.mxu0 }
 0x2b4   : > { %3843 = vst.msk [vmem:[#allocation3 + $0x60] sm:$0xf] %vm3818_vm11, %v3771_v46  ;;  %v3773_v49 = vpop.permute.xlu1 %3772  ;;  %v5171_v51 = vpack.c.bf16 %v4426_v50, %v4426_v50  ;;  %v4704_v56 = vsel %vm4694_vm7, %v4426_v50, 0.0  ;;  %v4770_v57 = vmul.f32 %v4426_v50, %v4426_v50  ;;  %v4810_v12 = vsel %vm4694_vm7, %v4772_v1, 0.0 }
 0x2b5   : > { %4669 = vst.msk [vmem:[%s6731_s10 + $0x1c] sm:$0xf] %vm444_vm0, %v5173_v48  ;;  %v4705_v60 = vadd.f32 %v4704_v56, %v4703_v44 }
 0x2b6   : > { %3844 = vst.msk [vmem:[#allocation3 + $0x64] sm:$0xf] %vm3818_vm11, %v3773_v49  ;;  %v4806_v59 = vsel %vm4694_vm7, %v4770_v57, 0.0 }
 0x2b7   : > { %v3775_v54 = vpop.permute.xlu0 %3774  ;;  %4667 = vst.msk [vmem:[%s6731_s10 + $0x14] sm:$0xf] %vm444_vm0, %v5171_v51  ;;  %v4707_v6 = vadd.f32 %v4706_v0, %v4705_v60  ;;  %v4807_v7 = vadd.f32 %v4806_v59, %v4805_v4 }
 0x2b8   : > { %3845 = vst.msk [vmem:[#allocation3 + $0x68] sm:$0xf] %vm3818_vm11, %v3775_v54  ;;  %v3777_v52 = vpop.permute.xlu1 %3776 }
 0x2b9   : > { %3846 = vst.msk [vmem:[#allocation3 + $0x6c] sm:$0xf] %vm3818_vm11, %v3777_v52  ;;  %v4809_v8 = vadd.f32 %v4808_v5, %v4807_v7  ;;  %v4709_v11 = vadd.f32 %v4708_v53, %v4707_v6 }
 0x2bb   : > { %v4108_v9 = vpop.permute.xlu0 %4107  ;;  %v4811_v13 = vadd.f32 %v4810_v12, %v4809_v8 }
 0x2bc   : > { %4180 = vst.msk [vmem:[#allocation3 + $0x60] sm:$0xf] %vm4155_vm12, %v4108_v9  ;;  %v4110_v58 = vpop.permute.xlu1 %4109 }
 0x2bd   : > { %4181 = vst.msk [vmem:[#allocation3 + $0x64] sm:$0xf] %vm4155_vm12, %v4110_v58 }
 0x2bf   : > { %v4112_v61 = vpop.permute.xlu0 %4111 }
 0x2c0   : > { %4182 = vst.msk [vmem:[#allocation3 + $0x68] sm:$0xf] %vm4155_vm12, %v4112_v61  ;;  %v4114_v10 = vpop.permute.xlu1 %4113 }
 0x2c1   : > { %4183 = vst.msk [vmem:[#allocation3 + $0x6c] sm:$0xf] %vm4155_vm12, %v4114_v10 }
 0x2c3   : > { %v2126_v15 = vpop.permute.xlu0 %2125 }
 0x2c4   : > { %2194 = vst.msk [vmem:[#allocation3 + $0x70] sm:$0xf] %vm2165_vm3, %v2126_v15  ;;  %v2128_v16 = vpop.permute.xlu1 %2127  ;;  %v5374_v17 = vld [vmem:[#allocation3 + $0x60] sm:$0xff]  }
 0x2c5   : > { %2195 = vst.msk [vmem:[#allocation3 + $0x74] sm:$0xf] %vm2165_vm3, %v2128_v16  ;;  %5326 = vmatprep.mubr.msk.bf16.mxu1 %vm4320_vm14, %v5374_v17 }
 0x2c7   : > { %v2130_v18 = vpop.permute.xlu0 %2129 }
 0x2c8   : > { %2196 = vst.msk [vmem:[#allocation3 + $0x78] sm:$0xf] %vm2165_vm3, %v2130_v18  ;;  %v2132_v19 = vpop.permute.xlu1 %2131  ;;  %v5375_v20 = vld [vmem:[#allocation3 + $0x68] sm:$0xff]  }
 0x2c9   : > { %2197 = vst.msk [vmem:[#allocation3 + $0x7c] sm:$0xf] %vm2165_vm3, %v2132_v19  ;;  %5327 = vmatmul.mubr.msk.bf16.gmra.mxu1 %vm4320_vm14, %v5375_v20 }
 0x2cb   : > { %v2687_v21 = vpop.permute.xlu0 %2686 }
 0x2cc   : > { %2755 = vst.msk [vmem:[#allocation3 + $0x70] sm:$0xf] %vm2726_vm4, %v2687_v21  ;;  %v2689_v22 = vpop.permute.xlu1 %2688 }
 0x2cd   : > { %2756 = vst.msk [vmem:[#allocation3 + $0x74] sm:$0xf] %vm2726_vm4, %v2689_v22 }
 0x2cf   : > { %v2691_v23 = vpop.permute.xlu0 %2690 }
 0x2d0   : > { %2757 = vst.msk [vmem:[#allocation3 + $0x78] sm:$0xf] %vm2726_vm4, %v2691_v23  ;;  %v2693_v24 = vpop.permute.xlu1 %2692 }
 0x2d1   : > { %2758 = vst.msk [vmem:[#allocation3 + $0x7c] sm:$0xf] %vm2726_vm4, %v2693_v24 }
 0x2d3   : > { %v3024_v25 = vpop.permute.xlu0 %3023 }
 0x2d4   : > { %3092 = vst.msk [vmem:[#allocation3 + $0x70] sm:$0xf] %vm3063_vm5, %v3024_v25  ;;  %v3026_v26 = vpop.permute.xlu1 %3025 }
 0x2d5   : > { %3093 = vst.msk [vmem:[#allocation3 + $0x74] sm:$0xf] %vm3063_vm5, %v3026_v26  ;;  %v5312_v27 = vpop.f32.mrf.mxu0 }
 0x2d6   : > { %v5176_v29 = vpack.c.bf16 %v5312_v27, %v5312_v27  ;;  %v4775_v40 = vmul.f32 %v5312_v27, %v5312_v27  ;;  %v4714_v44 = vsel %vm4694_vm7, %v5312_v27, 0.0 }
 0x2d7   : > { %v3028_v28 = vpop.permute.xlu0 %3027  ;;  %v4439_v31 = vpop.f32.mrf.mxu0 }
 0x2d8   : > { %3094 = vst.msk [vmem:[#allocation3 + $0x78] sm:$0xf] %vm3063_vm5, %v3028_v28  ;;  %v3030_v30 = vpop.permute.xlu1 %3029  ;;  %v5174_v32 = vpack.c.bf16 %v4439_v31, %v4439_v31  ;;  %v4710_v34 = vsel %vm4694_vm7, %v4439_v31, 0.0  ;;  %v4773_v35 = vmul.f32 %v4439_v31, %v4439_v31  ;;  %v4816_v49 = vsel %vm4694_vm7, %v4775_v40, 0.0 }
 0x2d9   : > { %4672 = vst.msk [vmem:[%s6731_s10 + $0x28] sm:$0xf] %vm444_vm0, %v5176_v29  ;;  %v4711_v36 = vadd.f32 %v4710_v34, %v4709_v11  ;;  %v5313_v37 = vpop.f32.mrf.mxu0 }
 0x2da   : > { %3095 = vst.msk [vmem:[#allocation3 + $0x7c] sm:$0xf] %vm3063_vm5, %v3030_v30  ;;  %v4812_v2 = vsel %vm4694_vm7, %v4773_v35, 0.0  ;;  %v5177_v47 = vpack.c.bf16 %v5313_v37, %v5313_v37  ;;  %v4776_v45 = vmul.f32 %v5313_v37, %v5313_v37  ;;  %v4716_v50 = vsel %vm4694_vm7, %v5313_v37, 0.0 }
 0x2db   : > { %v3218_v62 = vpop.permute.xlu0 %3217  ;;  %4670 = vst.msk [vmem:[%s6731_s10 + $0x20] sm:$0xf] %vm444_vm0, %v5174_v32  ;;  %v4813_v38 = vadd.f32 %v4812_v2, %v4811_v13  ;;  %v4442_v39 = vpop.f32.mrf.mxu0 }
 0x2dc   : > { %3286 = vst.msk [vmem:[#allocation3 + $0x70] sm:$0xf] %vm3257_vm6, %v3218_v62  ;;  %v3220_v55 = vpop.permute.xlu1 %3219  ;;  %v5175_v41 = vpack.c.bf16 %v4442_v39, %v4442_v39  ;;  %v4712_v33 = vsel %vm4694_vm7, %v4442_v39, 0.0  ;;  %v4774_v42 = vmul.f32 %v4442_v39, %v4442_v39  ;;  %v4818_v57 = vsel %vm4694_vm7, %v4776_v45, 0.0 }
 0x2dd   : > { %4673 = vst.msk [vmem:[%s6731_s10 + $0x2c] sm:$0xf] %vm444_vm0, %v5177_v47  ;;  %v4713_v14 = vadd.f32 %v4712_v33, %v4711_v36 }
 0x2de   : > { %3287 = vst.msk [vmem:[#allocation3 + $0x74] sm:$0xf] %vm3257_vm6, %v3220_v55  ;;  %v4814_v46 = vsel %vm4694_vm7, %v4774_v42, 0.0 }
 0x2df   : > { %v3222_v43 = vpop.permute.xlu0 %3221  ;;  %4671 = vst.msk [vmem:[%s6731_s10 + $0x24] sm:$0xf] %vm444_vm0, %v5175_v41  ;;  %v4715_v3 = vadd.f32 %v4714_v44, %v4713_v14  ;;  %v4815_v48 = vadd.f32 %v4814_v46, %v4813_v38 }
 0x2e0   : > { %3288 = vst.msk [vmem:[#allocation3 + $0x78] sm:$0xf] %vm3257_vm6, %v3222_v43  ;;  %v3224_v4 = vpop.permute.xlu1 %3223 }
 0x2e1   : > { %3289 = vst.msk [vmem:[#allocation3 + $0x7c] sm:$0xf] %vm3257_vm6, %v3224_v4  ;;  %v4817_v63 = vadd.f32 %v4816_v49, %v4815_v48  ;;  %v4717_v56 = vadd.f32 %v4716_v50, %v4715_v3 }
 0x2e3   : > { %v3779_v51 = vpop.permute.xlu0 %3778  ;;  %v4819_v54 = vadd.f32 %v4818_v57, %v4817_v63 }
 0x2e4   : > { %3847 = vst.msk [vmem:[#allocation3 + $0x70] sm:$0xf] %vm3818_vm11, %v3779_v51  ;;  %v3781_v60 = vpop.permute.xlu1 %3780 }
 0x2e5   : > { %3848 = vst.msk [vmem:[#allocation3 + $0x74] sm:$0xf] %vm3818_vm11, %v3781_v60 }
 0x2e7   : > { %v3783_v0 = vpop.permute.xlu0 %3782 }
 0x2e8   : > { %3849 = vst.msk [vmem:[#allocation3 + $0x78] sm:$0xf] %vm3818_vm11, %v3783_v0  ;;  %v3785_v1 = vpop.permute.xlu1 %3784 }
 0x2e9   : > { %3850 = vst.msk [vmem:[#allocation3 + $0x7c] sm:$0xf] %vm3818_vm11, %v3785_v1 }
 0x2eb   : > { %v4116_v59 = vpop.permute.xlu0 %4115 }
 0x2ec   : > { %4184 = vst.msk [vmem:[#allocation3 + $0x70] sm:$0xf] %vm4155_vm12, %v4116_v59  ;;  %v4118_v6 = vpop.permute.xlu1 %4117 }
 0x2ed   : > { %4185 = vst.msk [vmem:[#allocation3 + $0x74] sm:$0xf] %vm4155_vm12, %v4118_v6 }
 0x2ef   : > { %v4120_v7 = vpop.permute.xlu0 %4119 }
 0x2f0   : > { %4186 = vst.msk [vmem:[#allocation3 + $0x78] sm:$0xf] %vm4155_vm12, %v4120_v7  ;;  %v4122_v52 = vpop.permute.xlu1 %4121 }
 0x2f1   : > { %4187 = vst.msk [vmem:[#allocation3 + $0x7c] sm:$0xf] %vm4155_vm12, %v4122_v52 }
 0x2f4   : > { %v5376_v5 = vld [vmem:[#allocation3 + $0x70] sm:$0xff]  }
 0x2f5   : > { %5330 = vmatprep.mubr.msk.bf16.mxu1 %vm4320_vm14, %v5376_v5 }
 0x2f8   : > { %v5377_v53 = vld [vmem:[#allocation3 + $0x78] sm:$0xff]  }
 0x2f9   : > { %5331 = vmatmul.mubr.msk.bf16.gmra.mxu1 %vm4320_vm14, %v5377_v53 }
 0x2fd   : > { %v5316_v8 = vpop.f32.mrf.mxu0 }
 0x2fe   : > { %v5180_v9 = vpack.c.bf16 %v5316_v8, %v5316_v8  ;;  %v4779_v19 = vmul.f32 %v5316_v8, %v5316_v8  ;;  %v4722_v24 = vsel %vm4694_vm7, %v5316_v8, 0.0 }
 0x2ff   : > { %v4455_v11 = vpop.f32.mrf.mxu0 }
 0x300   : > { %4676 = vst.msk [vmem:[%s6731_s10 + $0x38] sm:$0xf] %vm444_vm0, %v5180_v9  ;;  %v5178_v12 = vpack.c.bf16 %v4455_v11, %v4455_v11  ;;  %v4718_v58 = vsel %vm4694_vm7, %v4455_v11, 0.0  ;;  %v4777_v13 = vmul.f32 %v4455_v11, %v4455_v11  ;;  %v4824_v29 = vsel %vm4694_vm7, %v4779_v19, 0.0 }
 0x301   : > { %v4719_v61 = vadd.f32 %v4718_v58, %v4717_v56  ;;  %v5317_v10 = vpop.f32.mrf.mxu0 }
 0x302   : > { %4674 = vst.msk [vmem:[%s6731_s10 + $0x30] sm:$0xf] %vm444_vm0, %v5178_v12  ;;  %v4820_v15 = vsel %vm4694_vm7, %v4777_v13, 0.0  ;;  %v5181_v16 = vpack.c.bf16 %v5317_v10, %v5317_v10  ;;  %v4780_v25 = vmul.f32 %v5317_v10, %v5317_v10  ;;  %v4724_v30 = vsel %vm4694_vm7, %v5317_v10, 0.0 }
 0x303   : > { %v4821_v17 = vadd.f32 %v4820_v15, %v4819_v54  ;;  %v4458_v18 = vpop.f32.mrf.mxu0 }
 0x304   : > { %4677 = vst.msk [vmem:[%s6731_s10 + $0x3c] sm:$0xf] %vm444_vm0, %v5181_v16  ;;  %v5179_v20 = vpack.c.bf16 %v4458_v18, %v4458_v18  ;;  %v4720_v21 = vsel %vm4694_vm7, %v4458_v18, 0.0  ;;  %v4778_v22 = vmul.f32 %v4458_v18, %v4458_v18  ;;  %v4826_v34 = vsel %vm4694_vm7, %v4780_v25, 0.0 }
 0x305   : > { %v4721_v23 = vadd.f32 %v4720_v21, %v4719_v61 }
 0x306   : > { %4675 = vst.msk [vmem:[%s6731_s10 + $0x34] sm:$0xf] %vm444_vm0, %v5179_v20  ;;  %v4822_v26 = vsel %vm4694_vm7, %v4778_v22, 0.0 }
 0x307   : > { %v4723_v27 = vadd.f32 %v4722_v24, %v4721_v23  ;;  %v4823_v28 = vadd.f32 %v4822_v26, %v4821_v17 }
 0x309   : > { %v4825_v31 = vadd.f32 %v4824_v29, %v4823_v28  ;;  %v4725_v32 = vadd.f32 %v4724_v30, %v4723_v27 }
 0x30b   : > { %v4827_v35 = vadd.f32 %v4826_v34, %v4825_v31 }
 0x329   : > { %v5320_v36 = vpop.f32.mrf.mxu1 }
 0x32a   : > { %v5184_v37 = vpack.c.bf16 %v5320_v36, %v5320_v36  ;;  %v4783_v14 = vmul.f32 %v5320_v36, %v5320_v36  ;;  %v4730_v3 = vsel %vm4694_vm7, %v5320_v36, 0.0 }
 0x32b   : > { %v4471_v62 = vpop.f32.mrf.mxu1 }
 0x32c   : > { %4680 = vst.msk [vmem:[%s6731_s10 + $0x48] sm:$0xf] %vm444_vm0, %v5184_v37  ;;  %v5182_v2 = vpack.c.bf16 %v4471_v62, %v4471_v62  ;;  %v4726_v47 = vsel %vm4694_vm7, %v4471_v62, 0.0  ;;  %v4781_v38 = vmul.f32 %v4471_v62, %v4471_v62  ;;  %v4832_v63 = vsel %vm4694_vm7, %v4783_v14, 0.0 }
 0x32d   : > { %v4727_v55 = vadd.f32 %v4726_v47, %v4725_v32  ;;  %v5321_v39 = vpop.f32.mrf.mxu1 }
 0x32e   : > { %4678 = vst.msk [vmem:[%s6731_s10 + $0x40] sm:$0xf] %vm444_vm0, %v5182_v2  ;;  %v4828_v40 = vsel %vm4694_vm7, %v4781_v38, 0.0  ;;  %v5185_v41 = vpack.c.bf16 %v5321_v39, %v5321_v39  ;;  %v4784_v48 = vmul.f32 %v5321_v39, %v5321_v39  ;;  %v4732_v51 = vsel %vm4694_vm7, %v5321_v39, 0.0 }
 0x32f   : > { %v4829_v33 = vadd.f32 %v4828_v40, %v4827_v35  ;;  %v4474_v42 = vpop.f32.mrf.mxu1 }
 0x330   : > { %4681 = vst.msk [vmem:[%s6731_s10 + $0x4c] sm:$0xf] %vm444_vm0, %v5185_v41  ;;  %v5183_v43 = vpack.c.bf16 %v4474_v42, %v4474_v42  ;;  %v4728_v44 = vsel %vm4694_vm7, %v4474_v42, 0.0  ;;  %v4782_v45 = vmul.f32 %v4474_v42, %v4474_v42  ;;  %v4834_v60 = vsel %vm4694_vm7, %v4784_v48, 0.0 }
 0x331   : > { %v4729_v46 = vadd.f32 %v4728_v44, %v4727_v55 }
 0x332   : > { %4679 = vst.msk [vmem:[%s6731_s10 + $0x44] sm:$0xf] %vm444_vm0, %v5183_v43  ;;  %v4830_v4 = vsel %vm4694_vm7, %v4782_v45, 0.0 }
 0x333   : > { %v4731_v49 = vadd.f32 %v4730_v3, %v4729_v46  ;;  %v4831_v50 = vadd.f32 %v4830_v4, %v4829_v33 }
 0x335   : > { %v4833_v56 = vadd.f32 %v4832_v63, %v4831_v50  ;;  %v4733_v57 = vadd.f32 %v4732_v51, %v4731_v49 }
 0x337   : > { %v4835_v54 = vadd.f32 %v4834_v60, %v4833_v56 }
 0x359   : > { %v5324_v0 = vpop.f32.mrf.mxu1 }
 0x35a   : > { %v5188_v1 = vpack.c.bf16 %v5324_v0, %v5324_v0  ;;  %v4787_v58 = vmul.f32 %v5324_v0, %v5324_v0  ;;  %v4738_v16 = vsel %vm4694_vm7, %v5324_v0, 0.0 }
 0x35b   : > { %v4487_v59 = vpop.f32.mrf.mxu1 }
 0x35c   : > { %4684 = vst.msk [vmem:[%s6731_s10 + $0x58] sm:$0xf] %vm444_vm0, %v5188_v1  ;;  %v5186_v6 = vpack.c.bf16 %v4487_v59, %v4487_v59  ;;  %v4734_v7 = vsel %vm4694_vm7, %v4487_v59, 0.0  ;;  %v4785_v52 = vmul.f32 %v4487_v59, %v4487_v59  ;;  %v4840_v21 = vsel %vm4694_vm7, %v4787_v58, 0.0 }
 0x35d   : > { %v4735_v5 = vadd.f32 %v4734_v7, %v4733_v57  ;;  %v5325_v53 = vpop.f32.mrf.mxu1 }
 0x35e   : > { %4682 = vst.msk [vmem:[%s6731_s10 + $0x50] sm:$0xf] %vm444_vm0, %v5186_v6  ;;  %v4836_v8 = vsel %vm4694_vm7, %v4785_v52, 0.0  ;;  %v5189_v9 = vpack.c.bf16 %v5325_v53, %v5325_v53  ;;  %v4788_v17 = vmul.f32 %v5325_v53, %v5325_v53  ;;  %v4740_v22 = vsel %vm4694_vm7, %v5325_v53, 0.0 }
 0x35f   : > { %v4837_v11 = vadd.f32 %v4836_v8, %v4835_v54  ;;  %v4490_v12 = vpop.f32.mrf.mxu1 }
 0x360   : > { %4685 = vst.msk [vmem:[%s6731_s10 + $0x5c] sm:$0xf] %vm444_vm0, %v5189_v9  ;;  %v5187_v13 = vpack.c.bf16 %v4490_v12, %v4490_v12  ;;  %v4736_v61 = vsel %vm4694_vm7, %v4490_v12, 0.0  ;;  %v4786_v10 = vmul.f32 %v4490_v12, %v4490_v12  ;;  %v4842_v25 = vsel %vm4694_vm7, %v4788_v17, 0.0 }
 0x361   : > { %v4737_v15 = vadd.f32 %v4736_v61, %v4735_v5 }
 0x362   : > { %4683 = vst.msk [vmem:[%s6731_s10 + $0x54] sm:$0xf] %vm444_vm0, %v5187_v13  ;;  %v4838_v18 = vsel %vm4694_vm7, %v4786_v10, 0.0 }
 0x363   : > { %v4739_v19 = vadd.f32 %v4738_v16, %v4737_v15  ;;  %v4839_v20 = vadd.f32 %v4838_v18, %v4837_v11 }
 0x365   : > { %v4841_v23 = vadd.f32 %v4840_v21, %v4839_v20  ;;  %v4741_v24 = vadd.f32 %v4740_v22, %v4739_v19 }
 0x367   : > { %v4843_v26 = vadd.f32 %v4842_v25, %v4841_v23 }
 0x389   : > { %v5328_v27 = vpop.f32.mrf.mxu1 }
 0x38a   : > { %v5192_v28 = vpack.c.bf16 %v5328_v27, %v5328_v27  ;;  %v4791_v41 = vmul.f32 %v5328_v27, %v5328_v27  ;;  %v4746_v42 = vsel %vm4694_vm7, %v5328_v27, 0.0 }
 0x38b   : > { %v4503_v29 = vpop.f32.mrf.mxu1 }
 0x38c   : > { %4688 = vst.msk [vmem:[%s6731_s10 + $0x68] sm:$0xf] %vm444_vm0, %v5192_v28  ;;  %v5190_v30 = vpack.c.bf16 %v4503_v29, %v4503_v29  ;;  %v4789_v36 = vmul.f32 %v4503_v29, %v4503_v29  ;;  %v4742_v37 = vsel %vm4694_vm7, %v4503_v29, 0.0  ;;  %v4848_v44 = vsel %vm4694_vm7, %v4791_v41, 0.0 }
 0x38d   : > { %v5329_v31 = vpop.f32.mrf.mxu1  ;;  %v4743_v38 = vadd.f32 %v4742_v37, %v4741_v24 }
 0x38e   : > { %4686 = vst.msk [vmem:[%s6731_s10 + $0x60] sm:$0xf] %vm444_vm0, %v5190_v30  ;;  %v5193_v32 = vpack.c.bf16 %v5329_v31, %v5329_v31  ;;  %v4844_v2 = vsel %vm4694_vm7, %v4789_v36, 0.0  ;;  %v4792_v45 = vmul.f32 %v5329_v31, %v5329_v31  ;;  %v4748_v4 = vsel %vm4694_vm7, %v5329_v31, 0.0 }
 0x38f   : > { %v4506_v34 = vpop.f32.mrf.mxu1  ;;  %v4845_v39 = vadd.f32 %v4844_v2, %v4843_v26 }
 0x390   : > { %4689 = vst.msk [vmem:[%s6731_s10 + $0x6c] sm:$0xf] %vm444_vm0, %v5193_v32  ;;  %v5191_v35 = vpack.c.bf16 %v4506_v34, %v4506_v34  ;;  %v4790_v62 = vmul.f32 %v4506_v34, %v4506_v34  ;;  %v4744_v47 = vsel %vm4694_vm7, %v4506_v34, 0.0  ;;  %v4850_v57 = vsel %vm4694_vm7, %v4792_v45, 0.0 }
 0x391   : > { %v4745_v40 = vadd.f32 %v4744_v47, %v4743_v38 }
 0x392   : > { %4687 = vst.msk [vmem:[%s6731_s10 + $0x64] sm:$0xf] %vm444_vm0, %v5191_v35  ;;  %v4846_v55 = vsel %vm4694_vm7, %v4790_v62, 0.0 }
 0x393   : > { %v4847_v33 = vadd.f32 %v4846_v55, %v4845_v39  ;;  %v4747_v14 = vadd.f32 %v4746_v42, %v4745_v40 }
 0x395   : > { %v4849_v3 = vadd.f32 %v4848_v44, %v4847_v33  ;;  %v4749_v51 = vadd.f32 %v4748_v4, %v4747_v14 }
 0x397   : > { %v4851_v1 = vadd.f32 %v4850_v57, %v4849_v3 }
 0x3b9   : > { %v5332_v43 = vpop.f32.mrf.mxu1 }
 0x3ba   : > { %v5196_v46 = vpack.c.bf16 %v5332_v43, %v5332_v43  ;;  %v4795_v6 = vmul.f32 %v5332_v43, %v5332_v43  ;;  %v4754_v9 = vsel %vm4694_vm7, %v5332_v43, 0.0 }
 0x3bb   : > { %v4519_v48 = vpop.f32.mrf.mxu1 }
 0x3bc   : > { %4692 = vst.msk [vmem:[%s6731_s10 + $0x78] sm:$0xf] %vm444_vm0, %v5196_v46  ;;  %v5194_v49 = vpack.c.bf16 %v4519_v48, %v4519_v48  ;;  %v4750_v50 = vsel %vm4694_vm7, %v4519_v48, 0.0  ;;  %v4793_v63 = vmul.f32 %v4519_v48, %v4519_v48  ;;  %v4856_v61 = vsel %vm4694_vm7, %v4795_v6, 0.0 }
 0x3bd   : > { %v5333_v56 = vpop.f32.mrf.mxu1  ;;  %v4751_v0 = vadd.f32 %v4750_v50, %v4749_v51 }
 0x3be   : > { %4690 = vst.msk [vmem:[%s6731_s10 + $0x70] sm:$0xf] %vm444_vm0, %v5194_v49  ;;  %v4852_v60 = vsel %vm4694_vm7, %v4793_v63, 0.0  ;;  %v5197_v54 = vpack.c.bf16 %v5333_v56, %v5333_v56  ;;  %v4796_v11 = vmul.f32 %v5333_v56, %v5333_v56  ;;  %v4756_v10 = vsel %vm4694_vm7, %v5333_v56, 0.0 }
 0x3bf   : > { %v4522_v59 = vpop.f32.mrf.mxu1  ;;  %v4853_v53 = vadd.f32 %v4852_v60, %v4851_v1 }
 0x3c0   : > { %4693 = vst.msk [vmem:[%s6731_s10 + $0x7c] sm:$0xf] %vm444_vm0, %v5197_v54  ;;  %v5195_v7 = vpack.c.bf16 %v4522_v59, %v4522_v59  ;;  %v4752_v52 = vsel %vm4694_vm7, %v4522_v59, 0.0  ;;  %v4794_v5 = vmul.f32 %v4522_v59, %v4522_v59  ;;  %v4858_v17 = vsel %vm4694_vm7, %v4796_v11, 0.0 }
 0x3c1   : > { %v4753_v8 = vadd.f32 %v4752_v52, %v4751_v0 }
 0x3c2   : > { %4691 = vst.msk [vmem:[%s6731_s10 + $0x74] sm:$0xf] %vm444_vm0, %v5195_v7  ;;  %v4854_v12 = vsel %vm4694_vm7, %v4794_v5, 0.0 }
 0x3c3   : > { %v4755_v58 = vadd.f32 %v4754_v9, %v4753_v8  ;;  %v4855_v13 = vadd.f32 %v4854_v12, %v4853_v53 }
 0x3c5   : > { %v4757_v15 = vadd.f32 %v4756_v10, %v4755_v58  ;;  %v4857_v16 = vadd.f32 %v4856_v61, %v4855_v13 }
 0x3c7   : > { %v4758_v18 = vrot.slane %v4757_v15, 4  ;;  %v4859_v19 = vadd.f32 %v4858_v17, %v4857_v16 }
 0x3c9   : > { %v4759_v20 = vadd.f32 %v4758_v18, %v4757_v15  ;;  %v4860_v21 = vrot.slane %v4859_v19, 4 }
 0x3cb   : > { %v4760_v22 = vrot.slane %v4759_v20, 2  ;;  %v4861_v23 = vadd.f32 %v4860_v21, %v4859_v19 }
 0x3cd   : > { %v4761_v24 = vadd.f32 %v4760_v22, %v4759_v20  ;;  %v4862_v25 = vrot.slane %v4861_v23, 2 }
 0x3cf   : > { %v4762_v26 = vrot.slane %v4761_v24, 1  ;;  %v4863_v27 = vadd.f32 %v4862_v25, %v4861_v23 }
 0x3d1   : > { %v4763_v28 = vadd.f32 %v4762_v26, %v4761_v24  ;;  %v4864_v29 = vrot.slane %v4863_v27, 1 }
 0x3d3   : > { %4764 = vst.msk [vmem:[%s265_s12] sm:$0x1] %vm447_vm1, %v4763_v28  ;;  %v4865_v30 = vadd.f32 %v4864_v29, %v4863_v27 }
 0x3d5   : > { %4866 = vst.msk [vmem:[%s268_s15] sm:$0x1] %vm447_vm1, %v4865_v30 }
 0x3d6 PF: > { %s17_s21 = sadd.s32 1, %s5388_s21  }
 0x3d7   : > { %p14_p4 = scmp.ge.s32.totalorder %s17_s21, 4  }
 0x3d9   :  { %16 = sbr.rel (!%p14_p4) target bundleno = 1 (0x1), region = 92 }

</bundles_post_ra>
